<compile_context>
chip_gen: v6e
topology: v6e:2x2x1
jax: 0.10.0
libtpu: 0.0.40
codegen_flags: <defaults>
</compile_context>

<pallas_src>
import functools
import inspect

import jax
import jax.numpy as jnp
from jax import lax
from jax.experimental import pallas as pl
from jax.experimental.pallas import tpu as pltpu

KSIZE = 5
PAD = 2
EPS = 1e-5

# Feature-detect BlockSpec(pipeline_mode=pl.Buffered(1)) once at import.
try:
    _HAS_SINGLE_BUFFER = (
        hasattr(pl, "Buffered")
        and "pipeline_mode" in inspect.signature(pl.BlockSpec).parameters)
except (TypeError, ValueError):
    _HAS_SINGLE_BUFFER = False


# --------------------------------- kernel -----------------------------------
def _cnn_kernel(L, Bblk,
                x_ref,                      # (L, Bblk, 5*Cin)       bf16
                w1_ref, s1_ref, b1_ref,     # (5*Cin, 64) bf16, (1,64) f32 x2
                w2_ref, s2_ref, b2_ref,     # (5*64, 128) bf16, (1,128) f32 x2
                w3_ref, s3_ref, b3_ref,     # (5*128,256) bf16, (1,256) f32 x2
                wfc_ref, bfc_ref,           # (L*256, 512) bf16, (1,512) f32
                out_ref,                    # (Bblk, 512) f32
                p1_ref, p2_ref):            # VMEM (Lp, Bblk, 64/128) bf16
    Lp = L + 2 * PAD
    M = L * Bblk
    f32 = jnp.float32

    # Keep the 2*PAD edge rows of the conv scratch zeroed every step (cheap,
    # and stays correct when the "parallel" batch axis is core-sharded).
    zero1 = jnp.zeros((PAD, Bblk, 64), p1_ref.dtype)
    p1_ref[0:PAD, :, :] = zero1
    p1_ref[PAD + L:Lp, :, :] = zero1
    zero2 = jnp.zeros((PAD, Bblk, 128), p2_ref.dtype)
    p2_ref[0:PAD, :, :] = zero2
    p2_ref[PAD + L:Lp, :, :] = zero2

    # ---- conv1: im2col prepared in the wrapper -> one matmul, K = 5*Cin ----
    x = x_ref[...].reshape(M, x_ref.shape[-1])                     # (M, 5*Cin)
    h1 = jnp.dot(x, w1_ref[...], preferred_element_type=f32)       # (M, 64)
    h1 = jnp.maximum(h1 * s1_ref[...] + b1_ref[...], 0.0)
    p1_ref[PAD:PAD + L, :, :] = h1.astype(p1_ref.dtype).reshape(L, Bblk, 64)

    # ---- conv2: in-VMEM im2col -> ONE matmul, K = 5*64 = 320 ----
    x2 = jnp.concatenate(
        [p1_ref[k:k + L, :, :].reshape(M, 64) for k in range(KSIZE)], axis=-1)
    h2 = jnp.dot(x2, w2_ref[...], preferred_element_type=f32)      # (M, 128)
    h2 = jnp.maximum(h2 * s2_ref[...] + b2_ref[...], 0.0)
    p2_ref[PAD:PAD + L, :, :] = h2.astype(p2_ref.dtype).reshape(L, Bblk, 128)

    # ---- conv3: in-VMEM im2col -> ONE matmul, K = 5*128 = 640 ----
    x3 = jnp.concatenate(
        [p2_ref[k:k + L, :, :].reshape(M, 128) for k in range(KSIZE)], axis=-1)
    h3 = jnp.dot(x3, w3_ref[...], preferred_element_type=f32)      # (M, 256)
    h3 = jnp.maximum(h3 * s3_ref[...] + b3_ref[...], 0.0)
    h3 = h3.astype(jnp.bfloat16).reshape(L, Bblk, 256)

    # ---- flatten + fc + ReLU: ONE matmul (Bblk, L*256) @ (L*256, 512) ----
    h3t = jnp.transpose(h3, (1, 0, 2)).reshape(Bblk, L * 256)
    acc = jnp.dot(h3t, wfc_ref[...], preferred_element_type=f32)   # (Bblk,512)
    out_ref[...] = jnp.maximum(acc + bfc_ref[...], 0.0).astype(out_ref.dtype)


# ------------------------------ pallas_call ----------------------------------
@functools.lru_cache(maxsize=None)
def _build_call(B_pad, Bblk, L, KC):
    Lp = L + 2 * PAD

    def wspec(shape):
        idx = lambda b: (0,) * len(shape)
        if _HAS_SINGLE_BUFFER:
            # Constant block index across the grid -> single-buffer (halves
            # weight VMEM; wfc is the big one).
            return pl.BlockSpec(shape, idx, pipeline_mode=pl.Buffered(1))
        return pl.BlockSpec(shape, idx)

    kernel = functools.partial(_cnn_kernel, L, Bblk)

    flops = 2 * B_pad * L * (KC * 64 + KSIZE * 64 * 128
                             + KSIZE * 128 * 256 + 256 * 512)
    weight_bytes = 2 * (KC * 64 + KSIZE * 64 * 128 + KSIZE * 128 * 256
                        + L * 256 * 512)
    bytes_accessed = (2 * B_pad * L * KC + weight_bytes
                      + 4 * 2 * (64 + 128 + 256) + 4 * 2 * 512
                      + 4 * B_pad * 512)

    # VMEM budget: resident weights + x/out double buffers + conv scratch +
    # in-kernel temporaries, clamped to what every generation provides
    # (v7x: 64 MiB physical).
    wbufs = 1 if _HAS_SINGLE_BUFFER else 2
    est = (wbufs * weight_bytes
           + 2 * 2 * L * Bblk * KC                        # x double buffer
           + 2 * 4 * Bblk * 512                           # out double buffer
           + 2 * Lp * Bblk * (64 + 128)                   # p1/p2 scratch
           + 2 * L * Bblk * KSIZE * (64 + 128)            # im2col temporaries
           + 4 * L * Bblk * (128 + 256) + 4 * Bblk * 512) # f32 matmul results
    vmem_limit = int(min(64 * 1024 * 1024, max(32 * 1024 * 1024, 2 * est)))

    return pl.pallas_call(
        kernel,
        out_shape=jax.ShapeDtypeStruct((B_pad, 512), jnp.float32),
        grid_spec=pltpu.PrefetchScalarGridSpec(
            num_scalar_prefetch=0,
            grid=(B_pad // Bblk,),
            in_specs=[
                pl.BlockSpec((L, Bblk, KC), lambda b: (0, b, 0)),
                wspec((KC, 64)), wspec((1, 64)), wspec((1, 64)),
                wspec((KSIZE * 64, 128)), wspec((1, 128)), wspec((1, 128)),
                wspec((KSIZE * 128, 256)), wspec((1, 256)), wspec((1, 256)),
                wspec((L * 256, 512)), wspec((1, 512)),
            ],
            out_specs=pl.BlockSpec((Bblk, 512), lambda b: (b, 0)),
            scratch_shapes=[
                pltpu.VMEM((Lp, Bblk, 64), jnp.bfloat16),
                pltpu.VMEM((Lp, Bblk, 128), jnp.bfloat16),
            ],
        ),
        compiler_params=pltpu.CompilerParams(
            dimension_semantics=("parallel",),   # batch axis; v7x has 2 TCs
            vmem_limit_bytes=vmem_limit,
        ),
        cost_estimate=pl.CostEstimate(flops=flops, transcendentals=0,
                                      bytes_accessed=bytes_accessed),
    )


# --------------------------------- wrapper -----------------------------------
@functools.partial(jax.jit, static_argnames=("bblk",))
def _forward(x_ncw, kparams, *, bblk):
    B, Cin, L = x_ncw.shape
    KC = KSIZE * Cin
    B_pad = -(-B // bblk) * bblk

    # Layout plumbing (inside the same jit as the kernel -> one dispatch):
    # NCW -> length-major NLC, conv1 im2col, batch pad, (L, B_pad, KC) bf16.
    x_nlc = jnp.transpose(x_ncw, (0, 2, 1))                     # (B, L, Cin)
    x_padL = jnp.pad(x_nlc, ((0, 0), (PAD, PAD), (0, 0)))       # (B, Lp, Cin)
    x_im2col = jnp.concatenate(
        [x_padL[:, k:k + L, :] for k in range(KSIZE)], axis=-1)  # (B, L, 5Cin)
    if B_pad != B:
        x_im2col = jnp.pad(x_im2col, ((0, B_pad - B), (0, 0), (0, 0)))
    x_lbc = jnp.transpose(x_im2col, (1, 0, 2)).astype(jnp.bfloat16)

    out = _build_call(B_pad, bblk, L, KC)(x_lbc, *kparams)
    return out[:B]


def _pick_bblk(B):
    """Batch tile: multiple of 8, capped at 128.  Fills MXU rows in the FC for
    large batches without padding tiny batches up to a huge tile.  (On v7x,
    batches >= 2*Bblk give >=2 grid steps so both TensorCores are used.)"""
    return min(128, max(8, -(-B // 8) * 8))


def cnn_feature_extractor(x_ncw, kparams, Bblk=None):
    """x_ncw: (B, Cin, L) float32 (PyTorch NCW). Returns (B, 512) float32."""
    if Bblk is None:
        Bblk = _pick_bblk(int(x_ncw.shape[0]))
    return _forward(x_ncw, kparams, bblk=Bblk)


# ----------------------- deterministic parameter init -----------------------
def init_raw_params(key, Cin, L):
    """PyTorch-layout params (conv weights OIK, fc weight (512, 256*L))."""
    ks = jax.random.split(key, 8)

    def conv_init(k, cin, cout):
        bound = 1.0 / jnp.sqrt(cin * KSIZE)
        w = jax.random.uniform(k, (cout, cin, KSIZE), jnp.float32, -bound, bound)
        b = jax.random.uniform(jax.random.fold_in(k, 1), (cout,),
                               jnp.float32, -bound, bound)
        return w, b

    def bn_init(k, c):
        k1, k2, k3, k4 = jax.random.split(k, 4)
        gamma = jax.random.uniform(k1, (c,), jnp.float32, 0.8, 1.2)
        beta = jax.random.uniform(k2, (c,), jnp.float32, -0.1, 0.1)
        mu = jax.random.uniform(k3, (c,), jnp.float32, -0.1, 0.1)
        var = jax.random.uniform(k4, (c,), jnp.float32, 0.5, 1.5)
        return gamma, beta, mu, var

    w1, cb1 = conv_init(ks[0], Cin, 64)
    g1, be1, m1, v1 = bn_init(ks[1], 64)
    w2, cb2 = conv_init(ks[2], 64, 128)
    g2, be2, m2, v2 = bn_init(ks[3], 128)
    w3, cb3 = conv_init(ks[4], 128, 256)
    g3, be3, m3, v3 = bn_init(ks[5], 256)

    bound = 1.0 / jnp.sqrt(256 * L)
    wfc = jax.random.uniform(ks[6], (512, 256 * L), jnp.float32, -bound, bound)
    bfc = jax.random.uniform(ks[7], (512,), jnp.float32, -bound, bound)

    return (w1, cb1, g1, be1, m1, v1,
            w2, cb2, g2, be2, m2, v2,
            w3, cb3, g3, be3, m3, v3,
            wfc, bfc)


def to_kernel_params(raw, L):
    (w1, cb1, g1, be1, m1, v1,
     w2, cb2, g2, be2, m2, v2,
     w3, cb3, g3, be3, m3, v3,
     wfc, bfc) = raw

    def fold_bn(cb, g, be, m, v):
        scale = g / jnp.sqrt(v + EPS)
        bias = scale * (cb - m) + be
        return (scale[None, :].astype(jnp.float32),
                bias[None, :].astype(jnp.float32))

    # conv1 weight: (O, I, K) -> (K, I, O) -> (K*I, O)  (im2col order), bf16.
    Cin = w1.shape[1]
    w1k = jnp.transpose(w1, (2, 1, 0)).reshape(KSIZE * Cin, 64).astype(jnp.bfloat16)
    s1, b1 = fold_bn(cb1, g1, be1, m1, v1)
    # conv2/conv3: (O, I, K) -> (K, I, O) -> (K*I, O) for the fused-K matmul.
    w2k = jnp.transpose(w2, (2, 1, 0)).reshape(KSIZE * 64, 128).astype(jnp.bfloat16)
    s2, b2 = fold_bn(cb2, g2, be2, m2, v2)
    w3k = jnp.transpose(w3, (2, 1, 0)).reshape(KSIZE * 128, 256).astype(jnp.bfloat16)
    s3, b3 = fold_bn(cb3, g3, be3, m3, v3)

    # PyTorch flatten is (C, L) channel-major; kernel LHS is l-major then c:
    # wfck[l*256 + c, o] = wfc[o, c*L + l]
    wfck = (jnp.transpose(wfc.reshape(512, 256, L), (2, 1, 0))
            .reshape(L * 256, 512).astype(jnp.bfloat16))
    bfck = bfc[None, :].astype(jnp.float32)
    return (w1k, s1, b1, w2k, s2, b2, w3k, s3, b3, wfck, bfck)


# ----------------------------- pure-JAX reference ----------------------------
def reference(x_ncw, raw):
    (w1, cb1, g1, be1, m1, v1,
     w2, cb2, g2, be2, m2, v2,
     w3, cb3, g3, be3, m3, v3,
     wfc, bfc) = raw

    def conv_bn_relu(x, w, cb, g, be, m, v):
        y = lax.conv_general_dilated(
            x, w, window_strides=(1,), padding=((PAD, PAD),),
            dimension_numbers=('NCH', 'OIH', 'NCH'),
            precision=lax.Precision.HIGHEST)
        y = y + cb[None, :, None]
        y = (g[None, :, None] * (y - m[None, :, None])
             / jnp.sqrt(v[None, :, None] + EPS) + be[None, :, None])
        return jnp.maximum(y, 0.0)

    h = conv_bn_relu(x_ncw, w1, cb1, g1, be1, m1, v1)
    h = conv_bn_relu(h, w2, cb2, g2, be2, m2, v2)
    h = conv_bn_relu(h, w3, cb3, g3, be3, m3, v3)
    flat = h.reshape(h.shape[0], -1)                 # (B, 256*L), channel-major
    out = flat @ wfc.T + bfc[None, :]
    return jnp.maximum(out, 0.0)


if __name__ == "__main__":
    B, Cin, L = 2, 4, 16
    key = jax.random.PRNGKey(0)
    kx, kp = jax.random.split(key)

    x = jax.random.normal(kx, (B, Cin, L), jnp.float32)
    raw = init_raw_params(kp, Cin, L)
    kparams = to_kernel_params(raw, L)

    out = jax.block_until_ready(cnn_feature_extractor(x, kparams))
    ref = jax.block_until_ready(reference(x, raw))

    assert out.shape == (B, 512), out.shape
    # bf16 MXU operands with f32 accumulation -> slightly looser tolerance.
    assert jnp.allclose(out, ref, rtol=3e-2, atol=3e-2), (
        float(jnp.max(jnp.abs(out - ref))))

    print("KERNEL_OK")
</pallas_src>

<mosaic_0001>
module attributes {stable_mosaic.version = 11 : i64} {
  func.func @_cnn_kernel(%arg0: i32, %arg1: memref<16x8x20xbf16, #tpu.memory_space<vmem>>, %arg2: memref<20x64xbf16, #tpu.memory_space<vmem>>, %arg3: memref<1x64xf32, #tpu.memory_space<vmem>>, %arg4: memref<1x64xf32, #tpu.memory_space<vmem>>, %arg5: memref<320x128xbf16, #tpu.memory_space<vmem>>, %arg6: memref<1x128xf32, #tpu.memory_space<vmem>>, %arg7: memref<1x128xf32, #tpu.memory_space<vmem>>, %arg8: memref<640x256xbf16, #tpu.memory_space<vmem>>, %arg9: memref<1x256xf32, #tpu.memory_space<vmem>>, %arg10: memref<1x256xf32, #tpu.memory_space<vmem>>, %arg11: memref<4096x512xbf16, #tpu.memory_space<vmem>>, %arg12: memref<1x512xf32, #tpu.memory_space<vmem>>, %arg13: memref<8x512xf32, #tpu.memory_space<vmem>>, %arg14: memref<20x8x64xbf16, #tpu.memory_space<vmem>>, %arg15: memref<20x8x128xbf16, #tpu.memory_space<vmem>>) attributes {dimension_semantics = [#tpu.dimension_semantics<parallel>], iteration_bounds = array<i64: 1>, scalar_prefetch = 0 : i64, scratch_operands = 2 : i64, tpu.core_type = #tpu.core_type<tc>, window_params = [{transform_indices = @transform_0, window_bounds = array<i64: 16, 8, 20>}, {pipeline_mode = #tpu.pipeline_mode<synchronous>, transform_indices = @transform_1, window_bounds = array<i64: 20, 64>}, {pipeline_mode = #tpu.pipeline_mode<synchronous>, transform_indices = @transform_2, window_bounds = array<i64: 1, 64>}, {pipeline_mode = #tpu.pipeline_mode<synchronous>, transform_indices = @transform_3, window_bounds = array<i64: 1, 64>}, {pipeline_mode = #tpu.pipeline_mode<synchronous>, transform_indices = @transform_4, window_bounds = array<i64: 320, 128>}, {pipeline_mode = #tpu.pipeline_mode<synchronous>, transform_indices = @transform_5, window_bounds = array<i64: 1, 128>}, {pipeline_mode = #tpu.pipeline_mode<synchronous>, transform_indices = @transform_6, window_bounds = array<i64: 1, 128>}, {pipeline_mode = #tpu.pipeline_mode<synchronous>, transform_indices = @transform_7, window_bounds = array<i64: 640, 256>}, {pipeline_mode = #tpu.pipeline_mode<synchronous>, transform_indices = @transform_8, window_bounds = array<i64: 1, 256>}, {pipeline_mode = #tpu.pipeline_mode<synchronous>, transform_indices = @transform_9, window_bounds = array<i64: 1, 256>}, {pipeline_mode = #tpu.pipeline_mode<synchronous>, transform_indices = @transform_10, window_bounds = array<i64: 4096, 512>}, {pipeline_mode = #tpu.pipeline_mode<synchronous>, transform_indices = @transform_11, window_bounds = array<i64: 1, 512>}, {transform_indices = @transform_12, window_bounds = array<i64: 8, 512>}]} {
    %cst = arith.constant 0.000000e+00 : bf16
    %0 = vector.broadcast %cst : bf16 to vector<2x8x64xbf16>
    %c0 = arith.constant 0 : index
    %c0_0 = arith.constant 0 : index
    %c0_1 = arith.constant 0 : index
    %1 = vector.load %arg14[%c0, %c0_0, %c0_1] : memref<20x8x64xbf16, #tpu.memory_space<vmem>>, vector<2x8x64xbf16>
    tpu.vector_store %arg14[%c0, %c0_0, %c0_1], %0 {strides = array<i32>} : memref<20x8x64xbf16, #tpu.memory_space<vmem>>, vector<2x8x64xbf16>,
    %c18 = arith.constant 18 : index
    %c0_2 = arith.constant 0 : index
    %c0_3 = arith.constant 0 : index
    %2 = vector.load %arg14[%c18, %c0_2, %c0_3] : memref<20x8x64xbf16, #tpu.memory_space<vmem>>, vector<2x8x64xbf16>
    tpu.vector_store %arg14[%c18, %c0_2, %c0_3], %0 {strides = array<i32>} : memref<20x8x64xbf16, #tpu.memory_space<vmem>>, vector<2x8x64xbf16>,
    %cst_4 = arith.constant 0.000000e+00 : bf16
    %3 = vector.broadcast %cst_4 : bf16 to vector<2x8x128xbf16>
    %c0_5 = arith.constant 0 : index
    %c0_6 = arith.constant 0 : index
    %c0_7 = arith.constant 0 : index
    %4 = vector.load %arg15[%c0_5, %c0_6, %c0_7] : memref<20x8x128xbf16, #tpu.memory_space<vmem>>, vector<2x8x128xbf16>
    tpu.vector_store %arg15[%c0_5, %c0_6, %c0_7], %3 {strides = array<i32>} : memref<20x8x128xbf16, #tpu.memory_space<vmem>>, vector<2x8x128xbf16>,
    %c18_8 = arith.constant 18 : index
    %c0_9 = arith.constant 0 : index
    %c0_10 = arith.constant 0 : index
    %5 = vector.load %arg15[%c18_8, %c0_9, %c0_10] : memref<20x8x128xbf16, #tpu.memory_space<vmem>>, vector<2x8x128xbf16>
    tpu.vector_store %arg15[%c18_8, %c0_9, %c0_10], %3 {strides = array<i32>} : memref<20x8x128xbf16, #tpu.memory_space<vmem>>, vector<2x8x128xbf16>,
    %c0_11 = arith.constant 0 : index
    %c0_12 = arith.constant 0 : index
    %c0_13 = arith.constant 0 : index
    %6 = vector.load %arg1[%c0_11, %c0_12, %c0_13] : memref<16x8x20xbf16, #tpu.memory_space<vmem>>, vector<16x8x20xbf16>
    %7 = vector.shape_cast %6 : vector<16x8x20xbf16> to vector<128x20xbf16>
    %c0_14 = arith.constant 0 : index
    %c0_15 = arith.constant 0 : index
    %8 = vector.load %arg2[%c0_14, %c0_15] : memref<20x64xbf16, #tpu.memory_space<vmem>>, vector<20x64xbf16>
    %cst_16 = arith.constant dense<0.000000e+00> : vector<128x64xf32>
    %9 = tpu.matmul %7, %8, %cst_16 {dimension_numbers = #tpu.dot_dimension_numbers<[1], [0], [0], [1], [0, 0, 1, 1], [], []>} : vector<128x20xbf16>, vector<20x64xbf16>, vector<128x64xf32> -> vector<128x64xf32>
    %c0_17 = arith.constant 0 : index
    %c0_18 = arith.constant 0 : index
    %10 = vector.load %arg3[%c0_17, %c0_18] : memref<1x64xf32, #tpu.memory_space<vmem>>, vector<1x64xf32>
    %11 = vector.broadcast %10 : vector<1x64xf32> to vector<128x64xf32>
    %12 = arith.mulf %9, %11 : vector<128x64xf32>
    %c0_19 = arith.constant 0 : index
    %c0_20 = arith.constant 0 : index
    %13 = vector.load %arg4[%c0_19, %c0_20] : memref<1x64xf32, #tpu.memory_space<vmem>>, vector<1x64xf32>
    %14 = vector.broadcast %13 : vector<1x64xf32> to vector<128x64xf32>
    %15 = arith.addf %12, %14 : vector<128x64xf32>
    %cst_21 = arith.constant 0.000000e+00 : f32
    %16 = vector.broadcast %cst_21 : f32 to vector<128x64xf32>
    %17 = arith.maximumf %15, %16 : vector<128x64xf32>
    %18 = arith.truncf %17 : vector<128x64xf32> to vector<128x64xbf16>
    %19 = vector.shape_cast %18 : vector<128x64xbf16> to vector<16x8x64xbf16>
    %c2 = arith.constant 2 : index
    %c0_22 = arith.constant 0 : index
    %c0_23 = arith.constant 0 : index
    %20 = vector.load %arg14[%c2, %c0_22, %c0_23] : memref<20x8x64xbf16, #tpu.memory_space<vmem>>, vector<16x8x64xbf16>
    tpu.vector_store %arg14[%c2, %c0_22, %c0_23], %19 {strides = array<i32>} : memref<20x8x64xbf16, #tpu.memory_space<vmem>>, vector<16x8x64xbf16>,
    %c0_24 = arith.constant 0 : index
    %c0_25 = arith.constant 0 : index
    %c0_26 = arith.constant 0 : index
    %21 = vector.load %arg14[%c0_24, %c0_25, %c0_26] : memref<20x8x64xbf16, #tpu.memory_space<vmem>>, vector<16x8x64xbf16>
    %22 = vector.shape_cast %21 : vector<16x8x64xbf16> to vector<128x64xbf16>
    %c1 = arith.constant 1 : index
    %c0_27 = arith.constant 0 : index
    %c0_28 = arith.constant 0 : index
    %23 = vector.load %arg14[%c1, %c0_27, %c0_28] : memref<20x8x64xbf16, #tpu.memory_space<vmem>>, vector<16x8x64xbf16>
    %24 = vector.shape_cast %23 : vector<16x8x64xbf16> to vector<128x64xbf16>
    %c2_29 = arith.constant 2 : index
    %c0_30 = arith.constant 0 : index
    %c0_31 = arith.constant 0 : index
    %25 = vector.load %arg14[%c2_29, %c0_30, %c0_31] : memref<20x8x64xbf16, #tpu.memory_space<vmem>>, vector<16x8x64xbf16>
    %26 = vector.shape_cast %25 : vector<16x8x64xbf16> to vector<128x64xbf16>
    %c3 = arith.constant 3 : index
    %c0_32 = arith.constant 0 : index
    %c0_33 = arith.constant 0 : index
    %27 = vector.load %arg14[%c3, %c0_32, %c0_33] : memref<20x8x64xbf16, #tpu.memory_space<vmem>>, vector<16x8x64xbf16>
    %28 = vector.shape_cast %27 : vector<16x8x64xbf16> to vector<128x64xbf16>
    %c4 = arith.constant 4 : index
    %c0_34 = arith.constant 0 : index
    %c0_35 = arith.constant 0 : index
    %29 = vector.load %arg14[%c4, %c0_34, %c0_35] : memref<20x8x64xbf16, #tpu.memory_space<vmem>>, vector<16x8x64xbf16>
    %30 = vector.shape_cast %29 : vector<16x8x64xbf16> to vector<128x64xbf16>
    %31 = tpu.concatenate %22, %24, %26, %28, %30 in 1 : vector<128x64xbf16>, vector<128x64xbf16>, vector<128x64xbf16>, vector<128x64xbf16>, vector<128x64xbf16> -> vector<128x320xbf16>
    %c0_36 = arith.constant 0 : index
    %c0_37 = arith.constant 0 : index
    %32 = vector.load %arg5[%c0_36, %c0_37] : memref<320x128xbf16, #tpu.memory_space<vmem>>, vector<320x128xbf16>
    %cst_38 = arith.constant dense<0.000000e+00> : vector<128x128xf32>
    %33 = tpu.matmul %31, %32, %cst_38 {dimension_numbers = #tpu.dot_dimension_numbers<[1], [0], [0], [1], [0, 0, 1, 1], [], []>} : vector<128x320xbf16>, vector<320x128xbf16>, vector<128x128xf32> -> vector<128x128xf32>
    %c0_39 = arith.constant 0 : index
    %c0_40 = arith.constant 0 : index
    %34 = vector.load %arg6[%c0_39, %c0_40] : memref<1x128xf32, #tpu.memory_space<vmem>>, vector<1x128xf32>
    %35 = vector.broadcast %34 : vector<1x128xf32> to vector<128x128xf32>
    %36 = arith.mulf %33, %35 : vector<128x128xf32>
    %c0_41 = arith.constant 0 : index
    %c0_42 = arith.constant 0 : index
    %37 = vector.load %arg7[%c0_41, %c0_42] : memref<1x128xf32, #tpu.memory_space<vmem>>, vector<1x128xf32>
    %38 = vector.broadcast %37 : vector<1x128xf32> to vector<128x128xf32>
    %39 = arith.addf %36, %38 : vector<128x128xf32>
    %cst_43 = arith.constant 0.000000e+00 : f32
    %40 = vector.broadcast %cst_43 : f32 to vector<128x128xf32>
    %41 = arith.maximumf %39, %40 : vector<128x128xf32>
    %42 = arith.truncf %41 : vector<128x128xf32> to vector<128x128xbf16>
    %43 = vector.shape_cast %42 : vector<128x128xbf16> to vector<16x8x128xbf16>
    %c2_44 = arith.constant 2 : index
    %c0_45 = arith.constant 0 : index
    %c0_46 = arith.constant 0 : index
    %44 = vector.load %arg15[%c2_44, %c0_45, %c0_46] : memref<20x8x128xbf16, #tpu.memory_space<vmem>>, vector<16x8x128xbf16>
    tpu.vector_store %arg15[%c2_44, %c0_45, %c0_46], %43 {strides = array<i32>} : memref<20x8x128xbf16, #tpu.memory_space<vmem>>, vector<16x8x128xbf16>,
    %c0_47 = arith.constant 0 : index
    %c0_48 = arith.constant 0 : index
    %c0_49 = arith.constant 0 : index
    %45 = vector.load %arg15[%c0_47, %c0_48, %c0_49] : memref<20x8x128xbf16, #tpu.memory_space<vmem>>, vector<16x8x128xbf16>
    %46 = vector.shape_cast %45 : vector<16x8x128xbf16> to vector<128x128xbf16>
    %c1_50 = arith.constant 1 : index
    %c0_51 = arith.constant 0 : index
    %c0_52 = arith.constant 0 : index
    %47 = vector.load %arg15[%c1_50, %c0_51, %c0_52] : memref<20x8x128xbf16, #tpu.memory_space<vmem>>, vector<16x8x128xbf16>
    %48 = vector.shape_cast %47 : vector<16x8x128xbf16> to vector<128x128xbf16>
    %c2_53 = arith.constant 2 : index
    %c0_54 = arith.constant 0 : index
    %c0_55 = arith.constant 0 : index
    %49 = vector.load %arg15[%c2_53, %c0_54, %c0_55] : memref<20x8x128xbf16, #tpu.memory_space<vmem>>, vector<16x8x128xbf16>
    %50 = vector.shape_cast %49 : vector<16x8x128xbf16> to vector<128x128xbf16>
    %c3_56 = arith.constant 3 : index
    %c0_57 = arith.constant 0 : index
    %c0_58 = arith.constant 0 : index
    %51 = vector.load %arg15[%c3_56, %c0_57, %c0_58] : memref<20x8x128xbf16, #tpu.memory_space<vmem>>, vector<16x8x128xbf16>
    %52 = vector.shape_cast %51 : vector<16x8x128xbf16> to vector<128x128xbf16>
    %c4_59 = arith.constant 4 : index
    %c0_60 = arith.constant 0 : index
    %c0_61 = arith.constant 0 : index
    %53 = vector.load %arg15[%c4_59, %c0_60, %c0_61] : memref<20x8x128xbf16, #tpu.memory_space<vmem>>, vector<16x8x128xbf16>
    %54 = vector.shape_cast %53 : vector<16x8x128xbf16> to vector<128x128xbf16>
    %55 = tpu.concatenate %46, %48, %50, %52, %54 in 1 : vector<128x128xbf16>, vector<128x128xbf16>, vector<128x128xbf16>, vector<128x128xbf16>, vector<128x128xbf16> -> vector<128x640xbf16>
    %c0_62 = arith.constant 0 : index
    %c0_63 = arith.constant 0 : index
    %56 = vector.load %arg8[%c0_62, %c0_63] : memref<640x256xbf16, #tpu.memory_space<vmem>>, vector<640x256xbf16>
    %cst_64 = arith.constant dense<0.000000e+00> : vector<128x256xf32>
    %57 = tpu.matmul %55, %56, %cst_64 {dimension_numbers = #tpu.dot_dimension_numbers<[1], [0], [0], [1], [0, 0, 1, 1], [], []>} : vector<128x640xbf16>, vector<640x256xbf16>, vector<128x256xf32> -> vector<128x256xf32>
    %c0_65 = arith.constant 0 : index
    %c0_66 = arith.constant 0 : index
    %58 = vector.load %arg9[%c0_65, %c0_66] : memref<1x256xf32, #tpu.memory_space<vmem>>, vector<1x256xf32>
    %59 = vector.broadcast %58 : vector<1x256xf32> to vector<128x256xf32>
    %60 = arith.mulf %57, %59 : vector<128x256xf32>
    %c0_67 = arith.constant 0 : index
    %c0_68 = arith.constant 0 : index
    %61 = vector.load %arg10[%c0_67, %c0_68] : memref<1x256xf32, #tpu.memory_space<vmem>>, vector<1x256xf32>
    %62 = vector.broadcast %61 : vector<1x256xf32> to vector<128x256xf32>
    %63 = arith.addf %60, %62 : vector<128x256xf32>
    %cst_69 = arith.constant 0.000000e+00 : f32
    %64 = vector.broadcast %cst_69 : f32 to vector<128x256xf32>
    %65 = arith.maximumf %63, %64 : vector<128x256xf32>
    %66 = arith.truncf %65 : vector<128x256xf32> to vector<128x256xbf16>
    %67 = vector.shape_cast %66 : vector<128x256xbf16> to vector<16x8x256xbf16>
    %68 = tpu.transpose %67, [1, 0, 2] : vector<16x8x256xbf16> -> vector<8x16x256xbf16>
    %69 = vector.shape_cast %68 : vector<8x16x256xbf16> to vector<8x4096xbf16>
    %c0_70 = arith.constant 0 : index
    %c0_71 = arith.constant 0 : index
    %70 = vector.load %arg11[%c0_70, %c0_71] : memref<4096x512xbf16, #tpu.memory_space<vmem>>, vector<4096x512xbf16>
    %cst_72 = arith.constant dense<0.000000e+00> : vector<8x512xf32>
    %71 = tpu.matmul %69, %70, %cst_72 {dimension_numbers = #tpu.dot_dimension_numbers<[1], [0], [0], [1], [0, 0, 1, 1], [], []>} : vector<8x4096xbf16>, vector<4096x512xbf16>, vector<8x512xf32> -> vector<8x512xf32>
    %c0_73 = arith.constant 0 : index
    %c0_74 = arith.constant 0 : index
    %72 = vector.load %arg12[%c0_73, %c0_74] : memref<1x512xf32, #tpu.memory_space<vmem>>, vector<1x512xf32>
    %73 = vector.broadcast %72 : vector<1x512xf32> to vector<8x512xf32>
    %74 = arith.addf %71, %73 : vector<8x512xf32>
    %cst_75 = arith.constant 0.000000e+00 : f32
    %75 = vector.broadcast %cst_75 : f32 to vector<8x512xf32>
    %76 = arith.maximumf %74, %75 : vector<8x512xf32>
    %c0_76 = arith.constant 0 : index
    %c0_77 = arith.constant 0 : index
    %77 = vector.load %arg13[%c0_76, %c0_77] : memref<8x512xf32, #tpu.memory_space<vmem>>, vector<8x512xf32>
    tpu.vector_store %arg13[%c0_76, %c0_77], %76 {strides = array<i32>} : memref<8x512xf32, #tpu.memory_space<vmem>>, vector<8x512xf32>,
    return
  }
  func.func @transform_0(%arg0: i32) -> (i32, i32, i32) {
    %c0_i32 = arith.constant 0 : i32
    %c0_i32_0 = arith.constant 0 : i32
    %c0_i32_1 = arith.constant 0 : i32
    return %c0_i32, %arg0, %c0_i32_0 : i32, i32, i32
  }
  func.func @transform_1(%arg0: i32) -> (i32, i32) {
    %c0_i32 = arith.constant 0 : i32
    %c0_i32_0 = arith.constant 0 : i32
    %c0_i32_1 = arith.constant 0 : i32
    return %c0_i32, %c0_i32_0 : i32, i32
  }
  func.func @transform_2(%arg0: i32) -> (i32, i32) {
    %c0_i32 = arith.constant 0 : i32
    %c0_i32_0 = arith.constant 0 : i32
    %c0_i32_1 = arith.constant 0 : i32
    return %c0_i32, %c0_i32_0 : i32, i32
  }
  func.func @transform_3(%arg0: i32) -> (i32, i32) {
    %c0_i32 = arith.constant 0 : i32
    %c0_i32_0 = arith.constant 0 : i32
    %c0_i32_1 = arith.constant 0 : i32
    return %c0_i32, %c0_i32_0 : i32, i32
  }
  func.func @transform_4(%arg0: i32) -> (i32, i32) {
    %c0_i32 = arith.constant 0 : i32
    %c0_i32_0 = arith.constant 0 : i32
    %c0_i32_1 = arith.constant 0 : i32
    return %c0_i32, %c0_i32_0 : i32, i32
  }
  func.func @transform_5(%arg0: i32) -> (i32, i32) {
    %c0_i32 = arith.constant 0 : i32
    %c0_i32_0 = arith.constant 0 : i32
    %c0_i32_1 = arith.constant 0 : i32
    return %c0_i32, %c0_i32_0 : i32, i32
  }
  func.func @transform_6(%arg0: i32) -> (i32, i32) {
    %c0_i32 = arith.constant 0 : i32
    %c0_i32_0 = arith.constant 0 : i32
    %c0_i32_1 = arith.constant 0 : i32
    return %c0_i32, %c0_i32_0 : i32, i32
  }
  func.func @transform_7(%arg0: i32) -> (i32, i32) {
    %c0_i32 = arith.constant 0 : i32
    %c0_i32_0 = arith.constant 0 : i32
    %c0_i32_1 = arith.constant 0 : i32
    return %c0_i32, %c0_i32_0 : i32, i32
  }
  func.func @transform_8(%arg0: i32) -> (i32, i32) {
    %c0_i32 = arith.constant 0 : i32
    %c0_i32_0 = arith.constant 0 : i32
    %c0_i32_1 = arith.constant 0 : i32
    return %c0_i32, %c0_i32_0 : i32, i32
  }
  func.func @transform_9(%arg0: i32) -> (i32, i32) {
    %c0_i32 = arith.constant 0 : i32
    %c0_i32_0 = arith.constant 0 : i32
    %c0_i32_1 = arith.constant 0 : i32
    return %c0_i32, %c0_i32_0 : i32, i32
  }
  func.func @transform_10(%arg0: i32) -> (i32, i32) {
    %c0_i32 = arith.constant 0 : i32
    %c0_i32_0 = arith.constant 0 : i32
    %c0_i32_1 = arith.constant 0 : i32
    return %c0_i32, %c0_i32_0 : i32, i32
  }
  func.func @transform_11(%arg0: i32) -> (i32, i32) {
    %c0_i32 = arith.constant 0 : i32
    %c0_i32_0 = arith.constant 0 : i32
    %c0_i32_1 = arith.constant 0 : i32
    return %c0_i32, %c0_i32_0 : i32, i32
  }
  func.func @transform_12(%arg0: i32) -> (i32, i32) {
    %c0_i32 = arith.constant 0 : i32
    %c0_i32_0 = arith.constant 0 : i32
    return %arg0, %c0_i32 : i32, i32
  }
}

</mosaic_0001>

<bundles_post_ra>
// kernel: _forward.1
= control target key start
LH: loop header
LB: loop body
LE: loop exit
PB: predicated region body
PF: predicated region fallthrough
CT: control target
= control target key end

     0   :  { %17 = vsyncpa [#allocation5], 0  ;;  %s15701_s0 = inlined_call_operand.vmem [shape: bf16[16,8,20], index: 0, kind: input, shape index: {}]   ;;  %s15702_s1 = inlined_call_operand.hbm [shape: bf16[20,64], index: 1, kind: input, shape index: {}]   ;;  %s15703_s2 = inlined_call_operand.hbm [shape: f32[1,64], index: 2, kind: input, shape index: {}]   ;;  %s15704_s3 = inlined_call_operand.hbm [shape: f32[1,64], index: 3, kind: input, shape index: {}]   ;;  %s15705_s4 = inlined_call_operand.hbm [shape: bf16[320,128], index: 4, kind: input, shape index: {}]   ;;  %s15706_s5 = inlined_call_operand.hbm [shape: f32[1,128], index: 5, kind: input, shape index: {}]   ;;  %s15707_s6 = inlined_call_operand.hbm [shape: f32[1,128], index: 6, kind: input, shape index: {}]   ;;  %s15708_s7 = inlined_call_operand.hbm [shape: bf16[640,256], index: 7, kind: input, shape index: {}]   ;;  %s15709_s8 = inlined_call_operand.hbm [shape: f32[1,256], index: 8, kind: input, shape index: {}]   ;;  %s15710_s9 = inlined_call_operand.hbm [shape: f32[1,256], index: 9, kind: input, shape index: {}]   ;;  %s15711_s10 = inlined_call_operand.hbm [shape: bf16[4096,512], index: 10, kind: input, shape index: {}]   ;;  %s15712_s11 = inlined_call_operand.hbm [shape: f32[1,512], index: 11, kind: input, shape index: {}]   ;;  %s15713_s12 = inlined_call_operand.vmem [shape: f32[8,512], index: 12, kind: output, shape index: {}]  }
   0x1   :  { %18 = vsyncpa [#allocation7], 0 }
   0x2   :  { %19 = vsyncpa [#allocation10], 0 }
   0x3   :  { %20 = vsyncpa [#allocation13], 0 }
   0x4   :  { %21 = vsyncpa [#allocation16], 0 }
   0x5   :  { %22 = vsyncpa [#allocation19], 0  ;;  %s14607_s21 = smov [#allocation6]  }
   0x6   :  { %s43_s22 = sshll.u32 %s14607_s21, 4  ;;  %s44_s22 = int_to_ptr.vmem [resolvable:$true] %s43_s22 }
   0x7   :  { %s14383_s23 = scalar_lea.vmem %s44_s22, 16  ;;  %s14387_s24 = scalar_lea.vmem %s44_s22, 32 }
   0x8   :  { %p14384_p0 = scmp.ne.s32.totalorder %s44_s22, %s14383_s23  ;;  %p14388_p1 = scmp.lt.s32.totalorder %s44_s22, %s44_s22 }
   0x9   :  { %p14389_p2 = scmp.lt.s32.totalorder %s14387_s24, %s14383_s23 }
   0xb   :  { %p14390_p3 = por %p14389_p2, %p14388_p1 }
   0xd   :  { %p14391_p4 = pnand %p14390_p3, %p14384_p0 }
   0xf   :  { %14394 = shalt.err (!%p14391_p4)
}
  0x10   :  { %46 = dma.hbm_to_vmem [thread:$0]  %s15703_s2, 16, %s44_s22, [#allocation7]  }
  0x11   :  { %s14608_s27 = smov [#allocation9]   ;;  %s14609_s29 = smov [#allocation12]  }
  0x12   :  { %s62_s28 = sshll.u32 %s14608_s27, 4  ;;  %s85_s30 = sshll.u32 %s14609_s29, 4  ;;  %s63_s28 = int_to_ptr.vmem [resolvable:$true] %s62_s28  ;;  %s86_s30 = int_to_ptr.vmem [resolvable:$true] %s85_s30 }
  0x13   :  { %s14403_s13 = scalar_lea.vmem %s63_s28, 2560  ;;  %p14408_p6 = scmp.lt.s32.totalorder %s63_s28, %s63_s28 }
  0x14   :  { %p14404_p5 = scmp.ne.s32.totalorder %s63_s28, %s14403_s13  ;;  %p14409_p7 = scmp.lt.s32.totalorder %s14403_s13, %s14403_s13 }
  0x16   :  { %p14410_p8 = por %p14409_p7, %p14408_p6 }
  0x18   :  { %p14411_p9 = pnand %p14410_p8, %p14404_p5 }
  0x1a   :  { %14414 = shalt.err (!%p14411_p9)
}
  0x1b   :  { %s14610_s14 = smov 64   ;;  %s14611_s15 = smov 4  }
  0x1c   :  { %68 = dma.hbm_to_vmem [thread:$0]  %s15705_s4, 2560, %s63_s28, [#allocation10], %s14610_s14, %s14610_s14, %s14611_s15  }
  0x1d   :  { %s14423_s2 = scalar_lea.vmem %s86_s30, 16  ;;  %s14427_s18 = scalar_lea.vmem %s86_s30, 32 }
  0x1e   :  { %p14424_p10 = scmp.ne.s32.totalorder %s86_s30, %s14423_s2  ;;  %p14428_p11 = scmp.lt.s32.totalorder %s86_s30, %s86_s30 }
  0x1f   :  { %p14429_p12 = scmp.lt.s32.totalorder %s14427_s18, %s14423_s2 }
  0x21   :  { %p14430_p13 = por %p14429_p12, %p14428_p11 }
  0x23   :  { %p14431_p0 = pnand %p14430_p13, %p14424_p10 }
  0x25   :  { %14434 = shalt.err (!%p14431_p0)
}
  0x26   :  { %88 = dma.hbm_to_vmem [thread:$0]  %s15707_s6, 16, %s86_s30, [#allocation13]  }
  0x27   :  { %s14612_s21 = smov [#allocation15]   ;;  %s14613_s23 = smov [#allocation18]  }
  0x28   :  { %s107_s22 = sshll.u32 %s14612_s21, 4  ;;  %s126_s24 = sshll.u32 %s14613_s23, 4  ;;  %s108_s22 = int_to_ptr.vmem [resolvable:$true] %s107_s22  ;;  %s127_s24 = int_to_ptr.vmem [resolvable:$true] %s126_s24 }
  0x29   :  { %s14443_s25 = scalar_lea.vmem %s108_s22, 32  ;;  %p14448_p2 = scmp.lt.s32.totalorder %s108_s22, %s108_s22 }
  0x2a   :  { %p14444_p1 = scmp.ne.s32.totalorder %s108_s22, %s14443_s25  ;;  %p14449_p3 = scmp.lt.s32.totalorder %s14443_s25, %s14443_s25 }
  0x2c   :  { %p14450_p4 = por %p14449_p3, %p14448_p2 }
  0x2e   :  { %p14451_p5 = pnand %p14450_p4, %p14444_p1 }
  0x30   :  { %14454 = shalt.err (!%p14451_p5)
}
  0x31   :  { %110 = dma.hbm_to_vmem [thread:$0]  %s15709_s8, 32, %s108_s22, [#allocation16]  }
  0x32   :  { %s14463_s27 = scalar_lea.vmem %s127_s24, 131072  ;;  %p14468_p7 = scmp.lt.s32.totalorder %s127_s24, %s127_s24 }
  0x33   :  { %p14464_p6 = scmp.ne.s32.totalorder %s127_s24, %s14463_s27  ;;  %p14469_p8 = scmp.lt.s32.totalorder %s14463_s27, %s14463_s27 }
  0x35   :  { %p14470_p9 = por %p14469_p8, %p14468_p7 }
  0x37   :  { %p14471_p10 = pnand %p14470_p9, %p14464_p6 }
  0x39   :  { %14474 = shalt.err (!%p14471_p10)
}
  0x3a   :  { %s14614_s6 = smov 256   ;;  %s14615_s28 = smov 16  }
  0x3b   :  { %132 = dma.hbm_to_vmem [thread:$0]  %s15711_s10, 131072, %s127_s24, [#allocation19], %s14614_s6, %s14614_s6, %s14615_s28  }
  0x3c   :  { %s14616_s13 = smov [#allocation4]   ;;  %s14617_s17 = smov [#allocation8]  }
  0x3d   :  { %s30_s16 = sshll.u32 %s14616_s13, 4  ;;  %s53_s2 = sshll.u32 %s14617_s17, 4  ;;  %s31_s16 = int_to_ptr.vmem [resolvable:$true] %s30_s16  ;;  %s54_s2 = int_to_ptr.vmem [resolvable:$true] %s53_s2 }
  0x3e   :  { %s14483_s8 = scalar_lea.vmem %s31_s16, 192  ;;  %p14488_p12 = scmp.lt.s32.totalorder %s31_s16, %s31_s16 }
  0x3f   :  { %p14484_p11 = scmp.ne.s32.totalorder %s31_s16, %s14483_s8  ;;  %p14489_p13 = scmp.lt.s32.totalorder %s14483_s8, %s14483_s8 }
  0x41   :  { %p14490_p0 = por %p14489_p13, %p14488_p12 }
  0x43   :  { %p14491_p1 = pnand %p14490_p0, %p14484_p11 }
  0x45   :  { %14494 = shalt.err (!%p14491_p1)
}
  0x46   :  { %36 = dma.hbm_to_vmem [thread:$0]  %s15702_s1, 192, %s31_s16, [#allocation5], %s14610_s14, %s14610_s14, %s14611_s15  }
  0x47   :  { %s14503_s10 = scalar_lea.vmem %s54_s2, 16  ;;  %s14507_s20 = scalar_lea.vmem %s54_s2, 32 }
  0x48   :  { %p14504_p2 = scmp.ne.s32.totalorder %s54_s2, %s14503_s10  ;;  %p14508_p3 = scmp.lt.s32.totalorder %s54_s2, %s54_s2 }
  0x49   :  { %p14509_p4 = scmp.lt.s32.totalorder %s14507_s20, %s14503_s10 }
  0x4b   :  { %p14510_p5 = por %p14509_p4, %p14508_p3 }
  0x4d   :  { %p14511_p6 = pnand %p14510_p5, %p14504_p2 }
  0x4f   :  { %14514 = shalt.err (!%p14511_p6)
}
  0x50   :  { %56 = dma.hbm_to_vmem [thread:$0]  %s15704_s3, 16, %s54_s2, [#allocation7]  }
  0x51   :  { %s14618_s23 = smov [#allocation11]   ;;  %s14619_s25 = smov [#allocation14]  }
  0x52   :  { %s75_s24 = sshll.u32 %s14618_s23, 4  ;;  %s94_s4 = sshll.u32 %s14619_s25, 4  ;;  %s76_s24 = int_to_ptr.vmem [resolvable:$true] %s75_s24  ;;  %s95_s4 = int_to_ptr.vmem [resolvable:$true] %s94_s4 }
  0x53   :  { %s14523_s26 = scalar_lea.vmem %s76_s24, 16  ;;  %s14527_s1 = scalar_lea.vmem %s76_s24, 32 }
  0x54   :  { %p14524_p7 = scmp.ne.s32.totalorder %s76_s24, %s14523_s26  ;;  %p14528_p8 = scmp.lt.s32.totalorder %s76_s24, %s76_s24 }
  0x55   :  { %p14529_p9 = scmp.lt.s32.totalorder %s14527_s1, %s14523_s26 }
  0x57   :  { %p14530_p10 = por %p14529_p9, %p14528_p8 }
  0x59   :  { %p14531_p11 = pnand %p14530_p10, %p14524_p7 }
  0x5b   :  { %14534 = shalt.err (!%p14531_p11)
}
  0x5c   :  { %78 = dma.hbm_to_vmem [thread:$0]  %s15706_s5, 16, %s76_s24, [#allocation10]  }
  0x5d   :  { %s14543_s6 = scalar_lea.vmem %s95_s4, 10240  ;;  %p14548_p13 = scmp.lt.s32.totalorder %s95_s4, %s95_s4 }
  0x5e   :  { %p14544_p12 = scmp.ne.s32.totalorder %s95_s4, %s14543_s6  ;;  %p14549_p0 = scmp.lt.s32.totalorder %s14543_s6, %s14543_s6 }
  0x60   :  { %p14550_p1 = por %p14549_p0, %p14548_p13 }
  0x62   :  { %p14551_p2 = pnand %p14550_p1, %p14544_p12 }
  0x64   :  { %14554 = shalt.err (!%p14551_p2)
}
  0x65   :  { %s14620_s3 = smov 128   ;;  %s14621_s28 = smov 8  }
  0x66   :  { %100 = dma.hbm_to_vmem [thread:$0]  %s15708_s7, 10240, %s95_s4, [#allocation13], %s14620_s3, %s14620_s3, %s14621_s28  }
  0x67   :  { %s14622_s13 = smov [#allocation17]   ;;  %s14623_s17 = smov [#allocation20]  }
  0x68   :  { %s117_s16 = sshll.u32 %s14622_s13, 4  ;;  %s139_s2 = sshll.u32 %s14623_s17, 4  ;;  %s118_s16 = int_to_ptr.vmem [resolvable:$true] %s117_s16  ;;  %s140_s2 = int_to_ptr.vmem [resolvable:$true] %s139_s2 }
  0x69   :  { %s14563_s5 = scalar_lea.vmem %s118_s16, 32  ;;  %p14568_p4 = scmp.lt.s32.totalorder %s118_s16, %s118_s16 }
  0x6a   :  { %p14564_p3 = scmp.ne.s32.totalorder %s118_s16, %s14563_s5  ;;  %p14569_p5 = scmp.lt.s32.totalorder %s14563_s5, %s14563_s5 }
  0x6c   :  { %p14570_p6 = por %p14569_p5, %p14568_p4 }
  0x6e   :  { %p14571_p7 = pnand %p14570_p6, %p14564_p3 }
  0x70   :  { %14574 = shalt.err (!%p14571_p7)
}
  0x71   :  { %120 = dma.hbm_to_vmem [thread:$0]  %s15710_s9, 32, %s118_s16, [#allocation16]  }
  0x72   :  { %s14583_s19 = scalar_lea.vmem %s140_s2, 64  ;;  %p14588_p9 = scmp.lt.s32.totalorder %s140_s2, %s140_s2 }
  0x73   :  { %p14584_p8 = scmp.ne.s32.totalorder %s140_s2, %s14583_s19  ;;  %p14589_p10 = scmp.lt.s32.totalorder %s14583_s19, %s14583_s19 }
  0x75   :  { %p14590_p11 = por %p14589_p10, %p14588_p9 }
  0x77   :  { %p14591_p12 = pnand %p14590_p11, %p14584_p8 }
  0x79   :  { %14594 = shalt.err (!%p14591_p12)
}
  0x7a   :  { %142 = dma.hbm_to_vmem [thread:$0]  %s15712_s11, 64, %s140_s2, [#allocation19]  }
  0x7b   :  { %14595 = dma.done.wait [#allocation5], 192  }
  0x7c   :  { %14596 = vsyncadd [#allocation5], 4294967104 }
  0x7d   :  { %14597 = dma.done.wait [#allocation7], 32  }
  0x7e   :  { %14598 = vsyncadd [#allocation7], 4294967264 }
  0x7f   :  { %14599 = dma.done.wait [#allocation10], 2576  }
  0x80   :  { %14600 = vsyncadd [#allocation10], 4294964720 }
  0x81   :  { %14601 = dma.done.wait [#allocation13], 10256  }
  0x82   :  { %14602 = vsyncadd [#allocation13], 4294957040 }
  0x83   :  { %14603 = dma.done.wait [#allocation16], 64  }
  0x84   :  { %14604 = vsyncadd [#allocation16], 4294967232 }
  0x85   :  { %14605 = dma.done.wait [#allocation19], 131136  }
  0x86   :  { %14606 = vsyncadd [#allocation19], 4294836160  ;;  %vm281_vm0 = vcmask 1041408   ;;  %vm256_vm1 = vcmask 162816   ;;  %v12609_v1 = vld [vmem:[#allocation4] sm:$0xff]   ;;  %v12611_v4 = vld [vmem:[%s15701_s0 + $0x8] sm:$0xff]  }
  0x87   :  { %v12608_v0 = vld [vmem:[#allocation4 + $0x8] ss:$0 sps:$4 sm:$0x33]   ;;  %v12610_v3 = vld [vmem:[%s15701_s0] sm:$0xff]   ;;  %v12612_v5 = vld [vmem:[%s15701_s0 + $0x10] sm:$0xff]   ;;  %vm177_vm2 = vcmask 519168  }
  0x88   :  { %12587 = vmatprep.subr.msk.bf16.mxu0 %vm281_vm0, %v12608_v0  ;;  %v283_v2 = vsel %vm281_vm0, %v12608_v0, 0  ;;  %12547 = vmatprep.mubr.msk.bf16.mxu0 %vm256_vm1, %v12610_v3  ;;  %v12613_v6 = vld [vmem:[%s15701_s0 + $0x18] sm:$0xff]   ;;  %v12614_v7 = vld [vmem:[%s15701_s0 + $0x20] sm:$0xff]   ;;  %v12615_v8 = vld [vmem:[%s15701_s0 + $0x28] sm:$0xff]   ;;  %v14624_v11 = vmov 0   ;;  %vm840_vm3 = vcmask 523264  }
  0x89   :  { %12544 = vmatpush3.bf16.msra.mxu0 %v283_v2  ;;  %v12616_v9 = vld [vmem:[%s15701_s0 + $0x30] sm:$0xff]   ;;  %v12617_v10 = vld [vmem:[%s15701_s0 + $0x38] sm:$0xff]   ;;  %179 = vst.msk [vmem:[#allocation2 + $0x4] sm:$0xf] %vm177_vm2, %v14624_v11  ;;  %178 = vst.msk [vmem:[#allocation2] sm:$0xf] %vm177_vm2, %v14624_v11 }
  0x8a   :  { %12545 = vmatprep.subr.bf16.mxu0 %v12609_v1  ;;  %181 = vst.msk [vmem:[#allocation2 + $0x48] sm:$0xf] %vm177_vm2, %v14624_v11  ;;  %182 = vst.msk [vmem:[#allocation2 + $0x4c] sm:$0xf] %vm177_vm2, %v14624_v11  ;;  %v12618_v12 = vld [vmem:[#allocation9 + $0x98] sm:$0xff]   ;;  %v12619_v13 = vld [vmem:[#allocation9 + $0x90] sm:$0xff]  }
  0x8b   :  { %183 = vst [vmem:[#allocation3] sm:$0xf] %v14624_v11  ;;  %184 = vst [vmem:[#allocation3 + $0x4] sm:$0xf] %v14624_v11  ;;  %v12621_v14 = vld [vmem:[#allocation9 + $0x88] sm:$0xff]   ;;  %v12623_v15 = vld [vmem:[#allocation9 + $0x80] sm:$0xff]  }
  0x8c   :  { %186 = vst [vmem:[#allocation3 + $0x48] sm:$0xf] %v14624_v11  ;;  %187 = vst [vmem:[#allocation3 + $0x4c] sm:$0xf] %v14624_v11  ;;  %v12645_v16 = vld [vmem:[#allocation9 + $0x78] sm:$0xff]   ;;  %v12647_v18 = vld [vmem:[#allocation9 + $0x70] sm:$0xff]  }
  0x8d   :  { %12546 = vmatpush3.bf16.msra.mxu0 %v12609_v1  ;;  %v12646_v17 = vld [vmem:[#allocation9 + $0x38] sm:$0xff]   ;;  %12467 = vmatprep.subr.bf16.mxu1 %v12645_v16  ;;  %v12648_v19 = vld [vmem:[#allocation9 + $0x30] sm:$0xff]   ;;  %v12649_v20 = vld [vmem:[#allocation9 + $0x68] sm:$0xff]  }
  0x8e   :  { %12563 = vmatprep.subr.bf16.mxu0 %v12618_v12  ;;  %12468 = vmatpush3.bf16.msra.mxu1 %v12646_v17  ;;  %v12650_v21 = vld [vmem:[#allocation9 + $0x28] sm:$0xff]   ;;  %v12651_v22 = vld [vmem:[#allocation9 + $0x60] sm:$0xff]   ;;  %v12653_v24 = vld [vmem:[#allocation9 + $0x58] sm:$0xff]  }
  0x8f   :  { %12469 = vmatprep.subr.bf16.mxu1 %v12647_v18  ;;  %v12652_v23 = vld [vmem:[#allocation9 + $0x20] sm:$0xff]   ;;  %v12654_v25 = vld [vmem:[#allocation9 + $0x18] sm:$0xff]   ;;  %v12655_v26 = vld [vmem:[#allocation9 + $0x50] sm:$0xff]  }
  0x90   :  { %12548 = vmatmul.mubr.msk.bf16.vlgmr.msra.gmra.mxu0 %vm256_vm1, %v12611_v4  ;;  %v12656_v27 = vld [vmem:[#allocation9 + $0x10] sm:$0xff]   ;;  %v12657_v28 = vld [vmem:[#allocation9 + $0x48] sm:$0xff]   ;;  %v14775_v30 = vld [vmem:[#allocation6] ss:$0 sm:$0xff] }
  0x91   :  { %12551 = vmatprep.mubr.msk.bf16.mxu0 %vm256_vm1, %v12612_v5  ;;  %12564 = vmatpush3.bf16.msra.mxu0 %v12618_v12  ;;  %v12658_v29 = vld [vmem:[#allocation9 + $0x8] sm:$0xff]   ;;  %v14777_v31 = vld [vmem:[#allocation8] ss:$0 sm:$0xff]  ;;  %v12659_v52 = vld [vmem:[#allocation9 + $0x40] sm:$0xff]  }
  0x92   :  { %12565 = vmatprep.subr.bf16.mxu0 %v12619_v13  ;;  %12470 = vmatpush3.bf16.msra.mxu1 %v12648_v19  ;;  %v12661_v58 = vld [vmem:[#allocation9] sm:$0xff]  }
  0x93   :  { %12471 = vmatprep.subr.bf16.mxu1 %v12649_v20 }
  0x95   :  { %12566 = vmatpush3.bf16.msra.mxu0 %v12619_v13 }
  0x96   :  { %12567 = vmatprep.subr.bf16.mxu0 %v12621_v14  ;;  %12472 = vmatpush3.bf16.msra.mxu1 %v12650_v21 }
  0x97   :  { %12473 = vmatprep.subr.bf16.mxu1 %v12651_v22 }
  0x98   :  { %12552 = vmatmul.mubr.msk.bf16.gmra.mxu0 %vm256_vm1, %v12613_v6 }
  0x99   :  { %12555 = vmatprep.mubr.msk.bf16.mxu0 %vm256_vm1, %v12614_v7  ;;  %12568 = vmatpush3.bf16.msra.mxu0 %v12621_v14 }
  0x9a   :  { %12569 = vmatprep.subr.bf16.mxu0 %v12623_v15  ;;  %12474 = vmatpush3.bf16.msra.mxu1 %v12652_v23 }
  0x9b   :  { %12475 = vmatprep.subr.bf16.mxu1 %v12653_v24 }
  0x9d   :  { %12570 = vmatpush3.bf16.msra.mxu0 %v12623_v15 }
  0x9e   :  { %12476 = vmatpush3.bf16.msra.mxu1 %v12654_v25 }
  0x9f   :  { %12477 = vmatprep.subr.bf16.mxu1 %v12655_v26 }
  0xa0   :  { %12556 = vmatmul.mubr.msk.bf16.gmra.mxu0 %vm256_vm1, %v12615_v8 }
  0xa1   :  { %12559 = vmatprep.mubr.msk.bf16.mxu0 %vm256_vm1, %v12616_v9 }
  0xa2   :  { %12478 = vmatpush3.bf16.msra.mxu1 %v12656_v27 }
  0xa3   :  { %12479 = vmatprep.subr.bf16.mxu1 %v12657_v28 }
  0xa6   :  { %12480 = vmatpush3.bf16.msra.mxu1 %v12658_v29 }
  0xa7   :  { %12481 = vmatprep.subr.bf16.mxu1 %v12659_v52 }
  0xa8   :  { %12560 = vmatmul.mubr.msk.bf16.gmra.mxu0 %vm256_vm1, %v12617_v10 }
  0xaa   :  { %12482 = vmatpush3.bf16.msra.mxu1 %v12661_v58 }
 0x150   :  { %v12549_v32 = vpop.f32.mrf.mxu0 }
 0x151   :  { %v391_v33 = vmul.f32 %v12549_v32, %v14775_v30 }
 0x152   :  { %v319_v34 = vpop.f32.mrf.mxu0 }
 0x153   :  { %v414_v35 = vadd.f32 %v14777_v31, %v391_v33  ;;  %v389_v36 = vmul.f32 %v14775_v30, %v319_v34 }
 0x154   :  { %v12550_v37 = vpop.f32.mrf.mxu0 }
 0x155   :  { %v430_v38 = vmax.f32 %v414_v35, 0.0  ;;  %v412_v39 = vadd.f32 %v14777_v31, %v389_v36  ;;  %v392_v40 = vmul.f32 %v12550_v37, %v14775_v30 }
 0x156   :  { %v322_v41 = vpop.f32.mrf.mxu0 }
 0x157   :  { %v12364_v42 = vpack.c.bf16 %v430_v38, %v430_v38  ;;  %v428_v43 = vmax.f32 %v412_v39, 0.0  ;;  %v415_v44 = vadd.f32 %v14777_v31, %v392_v40  ;;  %v390_v45 = vmul.f32 %v14775_v30, %v322_v41 }
 0x158   :  { %v12553_v46 = vpop.f32.mrf.mxu0 }
 0x159   :  { %511 = vst.msk [vmem:[#allocation2 + $0x10] sm:$0xf] %vm177_vm2, %v12364_v42  ;;  %v12362_v47 = vpack.c.bf16 %v428_v43, %v428_v43  ;;  %v431_v48 = vmax.f32 %v415_v44, 0.0  ;;  %v413_v49 = vadd.f32 %v14777_v31, %v390_v45  ;;  %v395_v50 = vmul.f32 %v12553_v46, %v14775_v30 }
 0x15a   :  { %v335_v51 = vpop.f32.mrf.mxu0 }
 0x15b   :  { %509 = vst.msk [vmem:[#allocation2 + $0x8] sm:$0xf] %vm177_vm2, %v12362_v47  ;;  %v12365_v53 = vpack.c.bf16 %v431_v48, %v431_v48  ;;  %v429_v54 = vmax.f32 %v413_v49, 0.0  ;;  %v418_v55 = vadd.f32 %v14777_v31, %v395_v50  ;;  %v393_v56 = vmul.f32 %v14775_v30, %v335_v51 }
 0x15c   :  { %v12554_v57 = vpop.f32.mrf.mxu0 }
 0x15d   :  { %512 = vst.msk [vmem:[#allocation2 + $0x14] sm:$0xf] %vm177_vm2, %v12365_v53  ;;  %v12363_v59 = vpack.c.bf16 %v429_v54, %v429_v54  ;;  %v434_v60 = vmax.f32 %v418_v55, 0.0  ;;  %v416_v61 = vadd.f32 %v14777_v31, %v393_v56  ;;  %v396_v62 = vmul.f32 %v12554_v57, %v14775_v30 }
 0x15e   :  { %v338_v63 = vpop.f32.mrf.mxu0 }
 0x15f   :  { %510 = vst.msk [vmem:[#allocation2 + $0xc] sm:$0xf] %vm177_vm2, %v12363_v59  ;;  %v12368_v0 = vpack.c.bf16 %v434_v60, %v434_v60  ;;  %v432_v1 = vmax.f32 %v416_v61, 0.0  ;;  %v419_v2 = vadd.f32 %v14777_v31, %v396_v62  ;;  %v394_v3 = vmul.f32 %v14775_v30, %v338_v63 }
 0x160   :  { %v12557_v4 = vpop.f32.mrf.mxu0 }
 0x161   :  { %515 = vst.msk [vmem:[#allocation2 + $0x20] sm:$0xf] %vm177_vm2, %v12368_v0  ;;  %v12366_v5 = vpack.c.bf16 %v432_v1, %v432_v1  ;;  %v435_v6 = vmax.f32 %v419_v2, 0.0  ;;  %v417_v7 = vadd.f32 %v14777_v31, %v394_v3  ;;  %v399_v8 = vmul.f32 %v12557_v4, %v14775_v30 }
 0x162   :  { %v351_v9 = vpop.f32.mrf.mxu0  ;;  %v12625_v34 = vld [vmem:[#allocation2 + $0x4] sm:$0xff]  }
 0x163   :  { %513 = vst.msk [vmem:[#allocation2 + $0x18] sm:$0xf] %vm177_vm2, %v12366_v5  ;;  %v12369_v10 = vpack.c.bf16 %v435_v6, %v435_v6  ;;  %v433_v12 = vmax.f32 %v417_v7, 0.0  ;;  %v422_v13 = vadd.f32 %v14777_v31, %v399_v8  ;;  %v397_v14 = vmul.f32 %v14775_v30, %v351_v9 }
 0x164   :  { %v12558_v15 = vpop.f32.mrf.mxu0  ;;  %v12620_v16 = vld [vmem:[#allocation2 + $0x10] sm:$0xff]  }
 0x165   :  { %516 = vst.msk [vmem:[#allocation2 + $0x24] sm:$0xf] %vm177_vm2, %v12369_v10  ;;  %v12367_v17 = vpack.c.bf16 %v433_v12, %v433_v12  ;;  %v438_v18 = vmax.f32 %v422_v13, 0.0  ;;  %v420_v19 = vadd.f32 %v14777_v31, %v397_v14  ;;  %v400_v20 = vmul.f32 %v12558_v15, %v14775_v30  ;;  %12571 = vmatprep.mubr.msk.bf16.mxu0 %vm840_vm3, %v12620_v16  ;;  %v12674_v10 = vld [vmem:[#allocation2 + $0x48] sm:$0xff]   ;;  %v12695_v15 = vld [vmem:[#allocation14 + $0x164] ss:$8 sps:$4 sm:$0xff]  }
 0x166   :  { %v354_v21 = vpop.f32.mrf.mxu0  ;;  %v12622_v22 = vld [vmem:[#allocation2 + $0xc] sm:$0xff]   ;;  %v12693_v16 = vld [vmem:[#allocation14 + $0x160] ss:$8 sps:$4 sm:$0xff]  }
 0x167   :  { %514 = vst.msk [vmem:[#allocation2 + $0x1c] sm:$0xf] %vm177_vm2, %v12367_v17  ;;  %v12372_v23 = vpack.c.bf16 %v438_v18, %v438_v18  ;;  %v436_v24 = vmax.f32 %v420_v19, 0.0  ;;  %v423_v25 = vadd.f32 %v14777_v31, %v400_v20  ;;  %v398_v26 = vmul.f32 %v14775_v30, %v354_v21  ;;  %784 = vrot.lane.b32.xlu0 %v12622_v22, %s14610_s14  ;;  %v12626_v46 = vld [vmem:[#allocation2 + $0xc] sm:$0xff]   ;;  %v12707_v19 = vld [vmem:[#allocation14 + $0x144] ss:$8 sps:$4 sm:$0xff]  }
 0x168   :  { %v12561_v27 = vpop.f32.mrf.mxu0  ;;  %v12680_v12 = vld [vmem:[#allocation14 + $0x74] ss:$8 sps:$4 sm:$0xff]   ;;  %v12687_v13 = vld [vmem:[#allocation14 + $0x170] ss:$8 sps:$4 sm:$0xff]   ;;  %v12705_v20 = vld [vmem:[#allocation14 + $0x140] ss:$8 sps:$4 sm:$0xff]  }
 0x169   :  { %519 = vst.msk [vmem:[#allocation2 + $0x30] sm:$0xf] %vm177_vm2, %v12372_v23  ;;  %v12370_v28 = vpack.c.bf16 %v436_v24, %v436_v24  ;;  %v439_v29 = vmax.f32 %v423_v25, 0.0  ;;  %v421_v32 = vadd.f32 %v14777_v31, %v398_v26  ;;  %v403_v33 = vmul.f32 %v12561_v27, %v14775_v30  ;;  %2229 = vmatprep.subr.bf16.mxu1 %v12680_v12  ;;  %v12689_v14 = vld [vmem:[#allocation14 + $0x174] ss:$8 sps:$4 sm:$0xff]   ;;  %v12662_v25 = vld [vmem:[#allocation2] sm:$0xff]  }
 0x16a   :  { %v367_v35 = vpop.f32.mrf.mxu0  ;;  %v12624_v36 = vld [vmem:[#allocation2 + $0x14] sm:$0xff]   ;;  %2342 = vmatprep.subr.bf16.mxu0 %v12689_v14  ;;  %v12701_v17 = vld [vmem:[#allocation14 + $0x154] ss:$8 sps:$4 sm:$0xff]   ;;  %v12699_v18 = vld [vmem:[#allocation14 + $0x150] ss:$8 sps:$4 sm:$0xff]  }
 0x16b   :  { %517 = vst.msk [vmem:[#allocation2 + $0x28] sm:$0xf] %vm177_vm2, %v12370_v28  ;;  %v12373_v37 = vpack.c.bf16 %v439_v29, %v439_v29  ;;  %v437_v38 = vmax.f32 %v421_v32, 0.0  ;;  %v426_v39 = vadd.f32 %v14777_v31, %v403_v33  ;;  %v401_v40 = vmul.f32 %v14775_v30, %v367_v35  ;;  %786 = vrot.lane.b32.xlu1 %v12624_v36, %s14610_s14  ;;  %v12630_v58 = vld [vmem:[#allocation2 + $0x14] sm:$0xff]   ;;  %v12713_v21 = vld [vmem:[#allocation14 + $0x134] ss:$8 sps:$4 sm:$0xff]  }
 0x16c   :  { %v12562_v41 = vpop.f32.mrf.mxu0  ;;  %688 = vrot.lane.b32.xlu0 %v12625_v34, %s14610_s14  ;;  %v12629_v54 = vld [vmem:[#allocation2 + $0x20] sm:$0xff]   ;;  %v12660_v23 = vld [vmem:[#allocation2 + $0x8] sm:$0xff]   ;;  %v12717_v27 = vld [vmem:[#allocation14 + $0x120] ss:$8 sps:$4 sm:$0xff]  }
 0x16d   :  { %520 = vst.msk [vmem:[#allocation2 + $0x34] sm:$0xf] %vm177_vm2, %v12373_v37  ;;  %v12371_v42 = vpack.c.bf16 %v437_v38, %v437_v38  ;;  %v442_v43 = vmax.f32 %v426_v39, 0.0  ;;  %v424_v44 = vadd.f32 %v14777_v31, %v401_v40  ;;  %v404_v45 = vmul.f32 %v12562_v41, %v14775_v30  ;;  %v12711_v22 = vld [vmem:[#allocation14 + $0x130] ss:$8 sps:$4 sm:$0xff]   ;;  %v12663_v29 = vld [vmem:[#allocation2 + $0x10] sm:$0xff]  }
 0x16e   :  { %v370_v47 = vpop.f32.mrf.mxu0  ;;  %v12627_v48 = vld [vmem:[#allocation2 + $0x18] sm:$0xff]   ;;  %v12678_v32 = vld [vmem:[#allocation14 + $0x70] ss:$8 sps:$4 sm:$0xff]   ;;  %v12725_v34 = vld [vmem:[#allocation14 + $0x114] ss:$8 sps:$4 sm:$0xff]  }
 0x16f   :  { %518 = vst.msk [vmem:[#allocation2 + $0x2c] sm:$0xf] %vm177_vm2, %v12371_v42  ;;  %v12376_v49 = vpack.c.bf16 %v442_v43, %v442_v43  ;;  %v440_v50 = vmax.f32 %v424_v44, 0.0  ;;  %v427_v51 = vadd.f32 %v14777_v31, %v404_v45  ;;  %v402_v52 = vmul.f32 %v14775_v30, %v370_v47  ;;  %v12628_v53 = vld [vmem:[#allocation2 + $0x1c] sm:$0xff]   ;;  %690 = vrot.lane.b32.xlu1 %v12626_v46, %s14610_s14  ;;  %v12723_v37 = vld [vmem:[#allocation14 + $0x110] ss:$8 sps:$4 sm:$0xff]  }
 0x170   :  { %12572 = vmatmul.mubr.msk.bf16.vlgmr.msra.gmra.mxu0 %vm840_vm3, %v12627_v48  ;;  %788 = vrot.lane.b32.xlu0 %v12628_v53, %s14610_s14  ;;  %v12632_v61 = vld [vmem:[#allocation2 + $0x1c] sm:$0xff]   ;;  %v12686_v41 = vld [vmem:[#allocation14 + $0x54] ss:$8 sps:$4 sm:$0xff]   ;;  %v12684_v43 = vld [vmem:[#allocation14 + $0x50] ss:$8 sps:$4 sm:$0xff]  }
 0x171   :  { %523 = vst.msk [vmem:[#allocation2 + $0x40] sm:$0xf] %vm177_vm2, %v12376_v49  ;;  %v12374_v55 = vpack.c.bf16 %v440_v50, %v440_v50  ;;  %v443_v56 = vmax.f32 %v427_v51, 0.0  ;;  %v425_v57 = vadd.f32 %v14777_v31, %v402_v52  ;;  %12575 = vmatprep.mubr.msk.bf16.mxu0 %vm840_vm3, %v12629_v54  ;;  %2343 = vmatpush1.bf16.msra.mxu0 %v12687_v13  ;;  %v12719_v24 = vld [vmem:[#allocation14 + $0x124] ss:$8 sps:$4 sm:$0xff]   ;;  %v12664_v42 = vld [vmem:[#allocation2 + $0x8] sm:$0xff]  }
 0x172   :  { %v12631_v59 = vld [vmem:[#allocation2 + $0x24] sm:$0xff]   ;;  %2344 = vmatprep.subr.bf16.mxu0 %v12695_v15  ;;  %v12683_v33 = vld [vmem:[#allocation14 + $0x64] ss:$8 sps:$4 sm:$0xff]   ;;  %v12681_v40 = vld [vmem:[#allocation14 + $0x60] ss:$8 sps:$4 sm:$0xff]  }
 0x173   :  { %521 = vst.msk [vmem:[#allocation2 + $0x38] sm:$0xf] %vm177_vm2, %v12374_v55  ;;  %v12377_v30 = vpack.c.bf16 %v443_v56, %v443_v56  ;;  %v441_v60 = vmax.f32 %v425_v57, 0.0  ;;  %692 = vrot.lane.b32.xlu1 %v12630_v58, %s14610_s14  ;;  %v12635_v1 = vld [vmem:[#allocation2 + $0x24] sm:$0xff]   ;;  %v12665_v45 = vld [vmem:[#allocation2 + $0x18] sm:$0xff]   ;;  %v12666_v52 = vld [vmem:[#allocation2 + $0x10] sm:$0xff]  }
 0x174   :  { %v12639_v62 = vld [vmem:[#allocation2 + $0x30] sm:$0xff]   ;;  %790 = vrot.lane.b32.xlu0 %v12631_v59, %s14610_s14  ;;  %v12692_v46 = vld [vmem:[#allocation14 + $0x44] ss:$8 sps:$4 sm:$0xff]   ;;  %v12696_v53 = vld [vmem:[#allocation14 + $0x30] ss:$8 sps:$4 sm:$0xff]  }
 0x175   :  { %524 = vst.msk [vmem:[#allocation2 + $0x44] sm:$0xf] %vm177_vm2, %v12377_v30  ;;  %v12375_v63 = vpack.c.bf16 %v441_v60, %v441_v60  ;;  %2345 = vmatpush1.bf16.msra.mxu0 %v12693_v16  ;;  %v12690_v49 = vld [vmem:[#allocation14 + $0x40] ss:$8 sps:$4 sm:$0xff]   ;;  %v12698_v51 = vld [vmem:[#allocation14 + $0x34] ss:$8 sps:$4 sm:$0xff]  }
 0x176   :  { %v12633_v31 = vld [vmem:[#allocation2 + $0x2c] sm:$0xff]   ;;  %2346 = vmatprep.subr.bf16.mxu0 %v12701_v17  ;;  %v12667_v55 = vld [vmem:[#allocation2 + $0x20] sm:$0xff]   ;;  %v12702_v59 = vld [vmem:[#allocation14 + $0x20] ss:$8 sps:$4 sm:$0xff]  }
 0x177   :  { %522 = vst.msk [vmem:[#allocation2 + $0x3c] sm:$0xf] %vm177_vm2, %v12375_v63  ;;  %v12634_v0 = vld [vmem:[#allocation2 + $0x28] sm:$0xff]   ;;  %694 = vrot.lane.b32.xlu1 %v12632_v61, %s14610_s14  ;;  %v12704_v56 = vld [vmem:[#allocation14 + $0x24] ss:$8 sps:$4 sm:$0xff]  }
 0x178   :  { %792 = vrot.lane.b32.xlu0 %v12633_v31, %s14610_s14  ;;  %12576 = vmatmul.mubr.msk.bf16.gmra.mxu0 %vm840_vm3, %v12634_v0  ;;  %v12637_v3 = vld [vmem:[#allocation2 + $0x2c] sm:$0xff]   ;;  %v12668_v61 = vld [vmem:[#allocation2 + $0x18] sm:$0xff]  }
 0x179   :  { %12579 = vmatprep.mubr.msk.bf16.mxu0 %vm840_vm3, %v12639_v62  ;;  %2347 = vmatpush1.bf16.msra.mxu0 %v12699_v18  ;;  %v12710_v60 = vld [vmem:[#allocation14 + $0x14] ss:$8 sps:$4 sm:$0xff]   ;;  %v12708_v62 = vld [vmem:[#allocation14 + $0x10] ss:$8 sps:$4 sm:$0xff]   ;;  %v12716_v0 = vld [vmem:[#allocation14 + $0x4] ss:$8 sps:$4 sm:$0xff]  }
 0x17a   :  { %v12636_v2 = vld [vmem:[#allocation2 + $0x34] sm:$0xff]   ;;  %2348 = vmatprep.subr.bf16.mxu0 %v12707_v19  ;;  %v12669_v31 = vld [vmem:[#allocation2 + $0x28] sm:$0xff]  }
 0x17b   :  { %696 = vrot.lane.b32.xlu1 %v12635_v1, %s14610_s14  ;;  %v12640_v8 = vld [vmem:[#allocation2 + $0x34] sm:$0xff]   ;;  %v12672_v14 = vld [vmem:[#allocation2 + $0x28] sm:$0xff]  }
 0x17c   :  { %794 = vrot.lane.b32.xlu0 %v12636_v2, %s14610_s14  ;;  %v12644_v4 = vld [vmem:[#allocation2 + $0x40] sm:$0xff]  }
 0x17d   :  { %v12641_v7 = vld [vmem:[#allocation2 + $0x44] sm:$0xff]   ;;  %2349 = vmatpush1.bf16.msra.mxu0 %v12705_v20  ;;  %v12675_v20 = vld [vmem:[#allocation2 + $0x30] sm:$0xff]  }
 0x17e   :  { %v12638_v5 = vld [vmem:[#allocation2 + $0x3c] sm:$0xff]   ;;  %2350 = vmatprep.subr.bf16.mxu0 %v12713_v21 }
 0x17f   :  { %v12643_v6 = vld [vmem:[#allocation2 + $0x38] sm:$0xff]   ;;  %698 = vrot.lane.b32.xlu1 %v12637_v3, %s14610_s14 }
 0x180   :  { %796 = vrot.lane.b32.xlu0 %v12638_v5, %s14610_s14  ;;  %12580 = vmatmul.mubr.msk.bf16.gmra.mxu0 %vm840_vm3, %v12643_v6  ;;  %v12642_v9 = vld [vmem:[#allocation2 + $0x3c] sm:$0xff]   ;;  %v12722_v5 = vld [vmem:[#allocation14 + $0xf4] ss:$8 sps:$4 sm:$0xff]  }
 0x181   :  { %12583 = vmatprep.mubr.msk.bf16.mxu0 %vm840_vm3, %v12644_v4  ;;  %2351 = vmatpush1.bf16.msra.mxu0 %v12711_v22  ;;  %v12714_v3 = vld [vmem:[#allocation14] ss:$8 sps:$4 sm:$0xff]   ;;  %v12670_v6 = vld [vmem:[#allocation2 + $0x20] sm:$0xff]  }
 0x182   :  { %2352 = vmatprep.subr.bf16.mxu0 %v12719_v24  ;;  %v12673_v16 = vld [vmem:[#allocation2 + $0x38] sm:$0xff]   ;;  %v12676_v22 = vld [vmem:[#allocation2 + $0x40] sm:$0xff]  }
 0x183   :  { %700 = vrot.lane.b32.xlu1 %v12640_v8, %s14610_s14 }
 0x184   :  { %798 = vrot.lane.b32.xlu0 %v12641_v7, %s14610_s14  ;;  %v12720_v7 = vld [vmem:[#allocation14 + $0xf0] ss:$8 sps:$4 sm:$0xff]  }
 0x185   :  { %2353 = vmatpush1.bf16.msra.mxu0 %v12717_v27 }
 0x186   :  { %2354 = vmatprep.subr.bf16.mxu0 %v12725_v34  ;;  %v12731_v34 = vld [vmem:[#allocation14 + $0x104] ss:$8 sps:$4 sm:$0xff]  }
 0x187   :  { %702 = vrot.lane.b32.xlu1 %v12642_v9, %s14610_s14  ;;  %v12671_v9 = vld [vmem:[#allocation2 + $0x30] sm:$0xff]  }
 0x188   :  { %12584 = vmatmul.mubr.msk.bf16.gmra.mxu0 %vm840_vm3, %v12674_v10 }
 0x189   :  { %2355 = vmatpush1.bf16.msra.mxu0 %v12723_v37  ;;  %v12735_v37 = vld [vmem:[#allocation14 + $0x1f0] ss:$8 sps:$4 sm:$0xff]  }
 0x18a   :  { %2356 = vmatprep.subr.bf16.mxu0 %v12731_v34 }
 0x1d9   :  { %v785_v26 = vpop.permute.xlu0 %784 }
 0x1da   :  { %v875_v28 = vsel %vm840_vm3, %v12660_v23, %v785_v26  ;;  %v12677_v26 = vld [vmem:[#allocation2 + $0x38] sm:$0xff]  }
 0x1db   :  { %1121 = vmatprep.mubr.bf16.mxu1 %v875_v28 }
 0x1dd   :  { %v787_v35 = vpop.permute.xlu1 %786 }
 0x1de   :  { %v689_v36 = vpop.permute.xlu0 %688  ;;  %v879_v39 = vsel %vm840_vm3, %v12663_v29, %v787_v35  ;;  %v12726_v29 = vld [vmem:[#allocation14 + $0xe0] ss:$8 sps:$4 sm:$0xff]   ;;  %v12732_v35 = vld [vmem:[#allocation14 + $0xd0] ss:$8 sps:$4 sm:$0xff]  }
 0x1df   :  { %v843_v38 = vsel %vm840_vm3, %v12662_v25, %v689_v36  ;;  %v12734_v36 = vld [vmem:[#allocation14 + $0xd4] ss:$8 sps:$4 sm:$0xff]  }
 0x1e0   :  { %1122 = vmatmul.mubr.bf16.vlgmr.msra.gmra.mxu1 %v843_v38  ;;  %v12737_v38 = vld [vmem:[#allocation14 + $0x1f4] ss:$8 sps:$4 sm:$0xff]  }
 0x1e1   :  { %1129 = vmatprep.mubr.bf16.mxu1 %v879_v39  ;;  %2230 = vmatpush1.bf16.msra.mxu1 %v12678_v32  ;;  %v691_v44 = vpop.permute.xlu1 %690  ;;  %v12728_v32 = vld [vmem:[#allocation14 + $0xe4] ss:$8 sps:$4 sm:$0xff]   ;;  %v12738_v39 = vld [vmem:[#allocation14 + $0xc0] ss:$8 sps:$4 sm:$0xff]  }
 0x1e2   :  { %2231 = vmatprep.subr.bf16.mxu1 %v12683_v33  ;;  %v789_v47 = vpop.permute.xlu0 %788  ;;  %v847_v48 = vsel %vm840_vm3, %v12664_v42, %v691_v44  ;;  %v12729_v33 = vld [vmem:[#allocation14 + $0x100] ss:$8 sps:$4 sm:$0xff]   ;;  %v12743_v42 = vld [vmem:[#allocation14 + $0x1e4] ss:$8 sps:$4 sm:$0xff]   ;;  %v12746_v44 = vld [vmem:[#allocation14 + $0xb4] ss:$8 sps:$4 sm:$0xff]  }
 0x1e3   :  { %v883_v50 = vsel %vm840_vm3, %v12665_v45, %v789_v47  ;;  %2357 = vmatpush1.bf16.msra.mxu0 %v12729_v33  ;;  %v12747_v45 = vld [vmem:[#allocation14 + $0x1d0] ss:$8 sps:$4 sm:$0xff]   ;;  %v12750_v47 = vld [vmem:[#allocation14 + $0xa0] ss:$8 sps:$4 sm:$0xff]  }
 0x1e4   :  { %2358 = vmatprep.subr.bf16.mxu0 %v12737_v38 }
 0x1e5   :  { %2232 = vmatpush1.bf16.msra.mxu1 %v12681_v40  ;;  %v693_v54 = vpop.permute.xlu1 %692  ;;  %v12740_v40 = vld [vmem:[#allocation14 + $0xc4] ss:$8 sps:$4 sm:$0xff]  }
 0x1e6   :  { %2233 = vmatprep.subr.bf16.mxu1 %v12686_v41  ;;  %v791_v57 = vpop.permute.xlu0 %790  ;;  %v851_v58 = vsel %vm840_vm3, %v12666_v52, %v693_v54  ;;  %v12741_v41 = vld [vmem:[#allocation14 + $0x1e0] ss:$8 sps:$4 sm:$0xff]   ;;  %v12758_v52 = vld [vmem:[#allocation14 + $0x94] ss:$8 sps:$4 sm:$0xff]  }
 0x1e7   :  { %v887_v30 = vsel %vm840_vm3, %v12667_v55, %v791_v57  ;;  %2359 = vmatpush2.bf16.msra.mxu0 %v12735_v37  ;;  %v12761_v54 = vld [vmem:[#allocation14 + $0x1b4] ss:$8 sps:$4 sm:$0xff]   ;;  %v12762_v55 = vld [vmem:[#allocation14 + $0x80] ss:$8 sps:$4 sm:$0xff]   ;;  %v12767_v57 = vld [vmem:[#allocation14 + $0x1a4] ss:$8 sps:$4 sm:$0xff]  }
 0x1e8   :  { %1130 = vmatmul.mubr.bf16.gmra.mxu1 %v847_v48  ;;  %2360 = vmatprep.subr.bf16.mxu0 %v12743_v42  ;;  %v12752_v48 = vld [vmem:[#allocation14 + $0xa4] ss:$8 sps:$4 sm:$0xff]  }
 0x1e9   :  { %1137 = vmatprep.mubr.bf16.mxu1 %v883_v50  ;;  %2234 = vmatpush1.bf16.msra.mxu1 %v12684_v43  ;;  %v695_v63 = vpop.permute.xlu1 %694  ;;  %v12744_v43 = vld [vmem:[#allocation14 + $0xb0] ss:$8 sps:$4 sm:$0xff]   ;;  %v12755_v50 = vld [vmem:[#allocation14 + $0x1c4] ss:$8 sps:$4 sm:$0xff]  }
 0x1ea   :  { %2235 = vmatprep.subr.bf16.mxu1 %v12692_v46  ;;  %v793_v1 = vpop.permute.xlu0 %792  ;;  %v855_v2 = vsel %vm840_vm3, %v12668_v61, %v695_v63  ;;  %v12749_v46 = vld [vmem:[#allocation14 + $0x1d4] ss:$8 sps:$4 sm:$0xff]   ;;  %v12778_v61 = vld [vmem:[#allocation14 + $0x184] ss:$8 sps:$4 sm:$0xff]  }
 0x1eb   :  { %v891_v4 = vsel %vm840_vm3, %v12669_v31, %v793_v1  ;;  %2361 = vmatpush2.bf16.msra.mxu0 %v12741_v41 }
 0x1ec   :  { %2362 = vmatprep.subr.bf16.mxu0 %v12749_v46 }
 0x1ed   :  { %2236 = vmatpush1.bf16.msra.mxu1 %v12690_v49  ;;  %v697_v8 = vpop.permute.xlu1 %696  ;;  %v12753_v49 = vld [vmem:[#allocation14 + $0x1c0] ss:$8 sps:$4 sm:$0xff]  }
 0x1ee   :  { %2237 = vmatprep.subr.bf16.mxu1 %v12698_v51  ;;  %v795_v10 = vpop.permute.xlu0 %794  ;;  %v859_v12 = vsel %vm840_vm3, %v12670_v6, %v697_v8  ;;  %v12756_v51 = vld [vmem:[#allocation14 + $0x90] ss:$8 sps:$4 sm:$0xff]  }
 0x1ef   :  { %v895_v13 = vsel %vm840_vm3, %v12671_v9, %v795_v10  ;;  %2363 = vmatpush2.bf16.msra.mxu0 %v12747_v45 }
 0x1f0   :  { %1138 = vmatmul.mubr.bf16.gmra.mxu1 %v851_v58  ;;  %2364 = vmatprep.subr.bf16.mxu0 %v12755_v50  ;;  %v12765_v58 = vld [vmem:[#allocation14 + $0x1a0] ss:$8 sps:$4 sm:$0xff]  }
 0x1f1   :  { %1145 = vmatprep.mubr.bf16.mxu1 %v887_v30  ;;  %2238 = vmatpush1.bf16.msra.mxu1 %v12696_v53  ;;  %v699_v15 = vpop.permute.xlu1 %698  ;;  %v12759_v53 = vld [vmem:[#allocation14 + $0x1b0] ss:$8 sps:$4 sm:$0xff]  }
 0x1f2   :  { %2239 = vmatprep.subr.bf16.mxu1 %v12704_v56  ;;  %v797_v17 = vpop.permute.xlu0 %796  ;;  %v863_v18 = vsel %vm840_vm3, %v12672_v14, %v699_v15  ;;  %v12764_v56 = vld [vmem:[#allocation14 + $0x84] ss:$8 sps:$4 sm:$0xff]   ;;  %v12773_v30 = vld [vmem:[#allocation14 + $0x190] ss:$8 sps:$4 sm:$0xff]  }
 0x1f3   :  { %v899_v19 = vsel %vm840_vm3, %v12673_v16, %v797_v17  ;;  %2365 = vmatpush2.bf16.msra.mxu0 %v12753_v49 }
 0x1f4   :  { %2366 = vmatprep.subr.bf16.mxu0 %v12761_v54 }
 0x1f5   :  { %2240 = vmatpush1.bf16.msra.mxu1 %v12702_v59  ;;  %v701_v21 = vpop.permute.xlu1 %700  ;;  %v12771_v59 = vld [vmem:[#allocation14 + $0x274] ss:$8 sps:$4 sm:$0xff]  }
 0x1f6   :  { %2241 = vmatprep.subr.bf16.mxu1 %v12710_v60  ;;  %v799_v23 = vpop.permute.xlu0 %798  ;;  %v867_v24 = vsel %vm840_vm3, %v12675_v20, %v701_v21  ;;  %v12775_v60 = vld [vmem:[#allocation14 + $0x194] ss:$8 sps:$4 sm:$0xff]  }
 0x1f7   :  { %v903_v25 = vsel %vm840_vm3, %v12676_v22, %v799_v23  ;;  %2367 = vmatpush2.bf16.msra.mxu0 %v12759_v53 }
 0x1f8   :  { %1146 = vmatmul.mubr.bf16.gmra.mxu1 %v855_v2  ;;  %2368 = vmatprep.subr.bf16.mxu0 %v12767_v57 }
 0x1f9   :  { %1153 = vmatprep.mubr.bf16.mxu1 %v891_v4  ;;  %2242 = vmatpush1.bf16.msra.mxu1 %v12708_v62  ;;  %v703_v27 = vpop.permute.xlu1 %702  ;;  %v12776_v62 = vld [vmem:[#allocation14 + $0x180] ss:$8 sps:$4 sm:$0xff]   ;;  %v14867_v4 = vld [vmem:[#allocation11] ss:$0 sm:$0xff] }
 0x1fa   :  { %2243 = vmatprep.subr.bf16.mxu1 %v12716_v0  ;;  %v871_v28 = vsel %vm840_vm3, %v12677_v26, %v703_v27 }
 0x1fb   :  { %2369 = vmatpush2.bf16.msra.mxu0 %v12765_v58  ;;  %v12783_v58 = vld [vmem:[#allocation14 + $0x264] ss:$8 sps:$4 sm:$0xff]  }
 0x1fc   :  { %2370 = vmatprep.subr.bf16.mxu0 %v12775_v60 }
 0x1fd   :  { %2244 = vmatpush1.bf16.msra.mxu1 %v12714_v3 }
 0x1fe   :  { %2245 = vmatprep.subr.bf16.mxu1 %v12722_v5 }
 0x1ff   :  { %2371 = vmatpush2.bf16.msra.mxu0 %v12773_v30 }
 0x200   :  { %1154 = vmatmul.mubr.bf16.gmra.mxu1 %v859_v12  ;;  %2372 = vmatprep.subr.bf16.mxu0 %v12778_v61  ;;  %v14870_v12 = vld [vmem:[#allocation12] ss:$0 sm:$0xff] }
 0x201   :  { %1161 = vmatprep.mubr.bf16.mxu1 %v895_v13  ;;  %2246 = vmatpush2.bf16.msra.mxu1 %v12720_v7 }
 0x202   :  { %2247 = vmatprep.subr.bf16.mxu1 %v12728_v32 }
 0x203   :  { %2373 = vmatpush2.bf16.msra.mxu0 %v12776_v62 }
 0x205   :  { %2248 = vmatpush2.bf16.msra.mxu1 %v12726_v29 }
 0x206   :  { %2249 = vmatprep.subr.bf16.mxu1 %v12734_v36 }
 0x208   :  { %1162 = vmatmul.mubr.bf16.gmra.mxu1 %v863_v18 }
 0x209   :  { %1169 = vmatprep.mubr.bf16.mxu1 %v899_v19  ;;  %2250 = vmatpush2.bf16.msra.mxu1 %v12732_v35 }
 0x20a   :  { %2251 = vmatprep.subr.bf16.mxu1 %v12740_v40 }
 0x20d   :  { %2252 = vmatpush2.bf16.msra.mxu1 %v12738_v39 }
 0x20e   :  { %2253 = vmatprep.subr.bf16.mxu1 %v12746_v44 }
 0x210   :  { %1170 = vmatmul.mubr.bf16.gmra.mxu1 %v867_v24 }
 0x211   :  { %1177 = vmatprep.mubr.bf16.mxu1 %v903_v25  ;;  %2254 = vmatpush2.bf16.msra.mxu1 %v12744_v43 }
 0x212   :  { %2255 = vmatprep.subr.bf16.mxu1 %v12752_v48 }
 0x215   :  { %2256 = vmatpush2.bf16.msra.mxu1 %v12750_v47 }
 0x216   :  { %2257 = vmatprep.subr.bf16.mxu1 %v12758_v52  ;;  %v12772_v52 = vld [vmem:[#allocation3] sm:$0xff]  }
 0x218   :  { %1178 = vmatmul.mubr.bf16.gmra.mxu1 %v871_v28 }
 0x219   :  { %2258 = vmatpush2.bf16.msra.mxu1 %v12756_v51  ;;  %v12769_v51 = vld [vmem:[#allocation14 + $0x270] ss:$8 sps:$4 sm:$0xff]  }
 0x21a   :  { %2259 = vmatprep.subr.bf16.mxu1 %v12764_v56 }
 0x21d   :  { %2260 = vmatpush2.bf16.msra.mxu1 %v12762_v55 }
 0x21e   :  { %2455 = vmatprep.subr.bf16.mxu1 %v12771_v59 }
 0x230   :  { %v12573_v63 = vpop.f32.mrf.mxu0 }
 0x232   :  { %v1220_v31 = vpop.f32.mrf.mxu0 }
 0x234   :  { %v12574_v3 = vpop.f32.mrf.mxu0 }
 0x236   :  { %v1223_v10 = vpop.f32.mrf.mxu0 }
 0x238   :  { %v12577_v19 = vpop.f32.mrf.mxu0 }
 0x23a   :  { %v1236_v28 = vpop.f32.mrf.mxu0 }
 0x23c   :  { %v12578_v38 = vpop.f32.mrf.mxu0 }
 0x23e   :  { %v1239_v47 = vpop.f32.mrf.mxu0 }
 0x240   :  { %v14882_v59 = vpop.f32.mrf.mxu0 }
 0x2a0   :  { %v12483_v0 = vpop.f32.mrf.mxu1 }
 0x2a2   :  { %v12484_v1 = vpop.f32.mrf.mxu1 }
 0x2a3   :  { %v12485_v2 = vadd.f32 %v12484_v1, %v12483_v0 }
 0x2a4   :  { %v12486_v5 = vpop.f32.mrf.mxu1 }
 0x2a5   :  { %v1221_v6 = vadd.f32 %v12485_v2, %v1220_v31 }
 0x2a6   :  { %v12487_v7 = vpop.f32.mrf.mxu1 }
 0x2a7   :  { %v1290_v8 = vmul.f32 %v14867_v4, %v1221_v6  ;;  %v12488_v9 = vadd.f32 %v12487_v7, %v12486_v5  ;;  %v1252_v5 = vpop.f32.mrf.mxu0 }
 0x2a8   :  { %v12489_v13 = vpop.f32.mrf.mxu1 }
 0x2a9   :  { %v1224_v14 = vadd.f32 %v12488_v9, %v1223_v10  ;;  %v1313_v16 = vadd.f32 %v14870_v12, %v1290_v8  ;;  %v12788_v10 = vld [vmem:[#allocation14 + $0x250] ss:$8 sps:$4 sm:$0xff]  }
 0x2aa   :  { %v12490_v15 = vpop.f32.mrf.mxu1 }
 0x2ab   :  { %v1291_v17 = vmul.f32 %v14867_v4, %v1224_v14  ;;  %v12491_v18 = vadd.f32 %v12490_v15, %v12489_v13  ;;  %v1329_v24 = vmax.f32 %v1313_v16, 0.0  ;;  %v12797_v13 = vld [vmem:[#allocation14 + $0x244] ss:$8 sps:$4 sm:$0xff]  }
 0x2ac   :  { %v12492_v20 = vpop.f32.mrf.mxu1 }
 0x2ad   :  { %v1314_v21 = vadd.f32 %v14870_v12, %v1291_v17  ;;  %v1229_v22 = vadd.f32 %v12573_v63, %v12491_v18  ;;  %v12781_v63 = vld [vmem:[#allocation14 + $0x260] ss:$8 sps:$4 sm:$0xff]  }
 0x2ae   :  { %v12493_v23 = vpop.f32.mrf.mxu1 }
 0x2af   :  { %v1330_v25 = vmax.f32 %v1314_v21, 0.0  ;;  %v1292_v26 = vmul.f32 %v14867_v4, %v1229_v22  ;;  %v12494_v27 = vadd.f32 %v12493_v23, %v12492_v20  ;;  %v12582_v20 = vpop.f32.mrf.mxu0 }
 0x2b0   :  { %v12495_v29 = vpop.f32.mrf.mxu1 }
 0x2b1   :  { %v12413_v32 = vpack.c.bf16 %v1330_v25, %v1329_v24  ;;  %v1232_v33 = vadd.f32 %v12574_v3, %v12494_v27  ;;  %v1315_v35 = vadd.f32 %v14870_v12, %v1292_v26  ;;  %v12790_v3 = vld [vmem:[#allocation14 + $0x254] ss:$8 sps:$4 sm:$0xff]   ;;  %v12795_v26 = vld [vmem:[#allocation14 + $0x240] ss:$8 sps:$4 sm:$0xff]  }
 0x2b2   :  { %v12496_v34 = vpop.f32.mrf.mxu1 }
 0x2b3   :  { %12414 = vst [vmem:[#allocation3 + $0x8] sm:$0xff] %v12413_v32   ;;  %v1293_v36 = vmul.f32 %v14867_v4, %v1232_v33  ;;  %v12497_v37 = vadd.f32 %v12496_v34, %v12495_v29  ;;  %v1331_v43 = vmax.f32 %v1315_v35, 0.0  ;;  %v12804_v33 = vld [vmem:[#allocation14 + $0x234] ss:$8 sps:$4 sm:$0xff]   ;;  %v1255_v34 = vpop.f32.mrf.mxu0 }
 0x2b4   :  { %v12498_v39 = vpop.f32.mrf.mxu1 }
 0x2b5   :  { %v1316_v40 = vadd.f32 %v14870_v12, %v1293_v36  ;;  %v1237_v41 = vadd.f32 %v12497_v37, %v1236_v28 }
 0x2b6   :  { %v12499_v42 = vpop.f32.mrf.mxu1 }
 0x2b7   :  { %v1332_v44 = vmax.f32 %v1316_v40, 0.0  ;;  %v1294_v45 = vmul.f32 %v14867_v4, %v1237_v41  ;;  %v12500_v46 = vadd.f32 %v12499_v42, %v12498_v39  ;;  %v12802_v39 = vld [vmem:[#allocation14 + $0x230] ss:$8 sps:$4 sm:$0xff]   ;;  %v12811_v40 = vld [vmem:[#allocation14 + $0x224] ss:$8 sps:$4 sm:$0xff]  }
 0x2b8   :  { %v12501_v48 = vpop.f32.mrf.mxu1 }
 0x2b9   :  { %v12418_v49 = vpack.c.bf16 %v1332_v44, %v1331_v43  ;;  %v1240_v50 = vadd.f32 %v12500_v46, %v1239_v47  ;;  %v1317_v55 = vadd.f32 %v14870_v12, %v1294_v45 }
 0x2ba   :  { %v12502_v53 = vpop.f32.mrf.mxu1  ;;  %v12768_v54 = vld [vmem:[#allocation3 + $0x4] sm:$0xff]  }
 0x2bb   :  { %12450 = vst [vmem:[#allocation3 + $0x10] sm:$0xff] %v12418_v49   ;;  %v1295_v56 = vmul.f32 %v14867_v4, %v1240_v50  ;;  %v12503_v57 = vadd.f32 %v12502_v53, %v12501_v48  ;;  %2261 = vmatprep.mubr.bf16.mxu1 %v12768_v54  ;;  %v1333_v31 = vmax.f32 %v1317_v55, 0.0  ;;  %v12784_v9 = vld [vmem:[#allocation3 + $0x8] sm:$0xff]   ;;  %v14892_v48 = vpop.f32.mrf.mxu0 }
 0x2bc   :  { %v12504_v30 = vpop.f32.mrf.mxu1  ;;  %2262 = vmatmul.mubr.bf16.vlgmr.msra.gmra.mxu1 %v12772_v52  ;;  %v12785_v22 = vld [vmem:[#allocation3 + $0x8] sm:$0xff]  }
 0x2bd   :  { %v1318_v60 = vadd.f32 %v14870_v12, %v1295_v56  ;;  %v1245_v61 = vadd.f32 %v12577_v19, %v12503_v57  ;;  %2456 = vmatpush1.bf16.msra.mxu1 %v12769_v51  ;;  %v12809_v53 = vld [vmem:[#allocation14 + $0x220] ss:$8 sps:$4 sm:$0xff]  }
 0x2be   :  { %v12505_v62 = vpop.f32.mrf.mxu1  ;;  %2457 = vmatprep.subr.bf16.mxu1 %v12783_v58  ;;  %v12818_v58 = vld [vmem:[#allocation14 + $0x214] ss:$8 sps:$4 sm:$0xff]  }
 0x2bf   :  { %v1334_v0 = vmax.f32 %v1318_v60, 0.0  ;;  %v1296_v1 = vmul.f32 %v14867_v4, %v1245_v61  ;;  %v12506_v2 = vadd.f32 %v12505_v62, %v12504_v30  ;;  %v1268_v30 = vpop.f32.mrf.mxu0 }
 0x2c0   :  { %v12507_v6 = vpop.f32.mrf.mxu1 }
 0x2c1   :  { %v12423_v7 = vpack.c.bf16 %v1334_v0, %v1333_v31  ;;  %v1248_v8 = vadd.f32 %v12578_v38, %v12506_v2  ;;  %2458 = vmatpush1.bf16.msra.mxu1 %v12781_v63  ;;  %v1319_v16 = vadd.f32 %v14870_v12, %v1296_v1  ;;  %v12816_v31 = vld [vmem:[#allocation14 + $0x210] ss:$8 sps:$4 sm:$0xff]  }
 0x2c2   :  { %v12508_v14 = vpop.f32.mrf.mxu1  ;;  %v12779_v15 = vld [vmem:[#allocation3 + $0xc] sm:$0xff]   ;;  %2459 = vmatprep.subr.bf16.mxu1 %v12790_v3 }
 0x2c3   :  { %12451 = vst [vmem:[#allocation3 + $0x18] sm:$0xff] %v12423_v7   ;;  %v1297_v17 = vmul.f32 %v14867_v4, %v1248_v8  ;;  %v12509_v18 = vadd.f32 %v12508_v14, %v12507_v6  ;;  %v12780_v19 = vld [vmem:[#allocation3 + $0xc] sm:$0xff]   ;;  %2271 = vmatprep.mubr.bf16.mxu1 %v12779_v15  ;;  %v1335_v27 = vmax.f32 %v1319_v16, 0.0  ;;  %v12586_v7 = vpop.f32.mrf.mxu0 }
 0x2c4   :  { %v12510_v21 = vpop.f32.mrf.mxu1  ;;  %2374 = vmatprep.mubr.bf16.mxu0 %v12780_v19  ;;  %2272 = vmatmul.mubr.bf16.gmra.mxu1 %v12784_v9  ;;  %v12791_v38 = vld [vmem:[#allocation3 + $0x10] sm:$0xff]   ;;  %v12823_v15 = vld [vmem:[#allocation14 + $0x200] ss:$8 sps:$4 sm:$0xff]  }
 0x2c5   :  { %v1320_v23 = vadd.f32 %v14870_v12, %v1297_v17  ;;  %v1253_v24 = vadd.f32 %v12509_v18, %v1252_v5  ;;  %2375 = vmatmul.mubr.bf16.vlgmr.msra.gmra.mxu0 %v12785_v22  ;;  %2460 = vmatpush1.bf16.msra.mxu1 %v12788_v10  ;;  %v12792_v49 = vld [vmem:[#allocation3 + $0x10] sm:$0xff]  }
 0x2c6   :  { %v12511_v25 = vpop.f32.mrf.mxu1  ;;  %2461 = vmatprep.subr.bf16.mxu1 %v12797_v13 }
 0x2c7   :  { %v1336_v28 = vmax.f32 %v1320_v23, 0.0  ;;  %v1298_v29 = vmul.f32 %v14867_v4, %v1253_v24  ;;  %v12512_v32 = vadd.f32 %v12511_v25, %v12510_v21 }
 0x2c8   :  { %v12513_v35 = vpop.f32.mrf.mxu1 }
 0x2c9   :  { %v12428_v36 = vpack.c.bf16 %v1336_v28, %v1335_v27  ;;  %v1256_v37 = vadd.f32 %v12512_v32, %v1255_v34  ;;  %2462 = vmatpush1.bf16.msra.mxu1 %v12795_v26  ;;  %v1321_v43 = vadd.f32 %v14870_v12, %v1298_v29 }
 0x2ca   :  { %v12514_v41 = vpop.f32.mrf.mxu1  ;;  %v12786_v42 = vld [vmem:[#allocation3 + $0x14] sm:$0xff]   ;;  %2463 = vmatprep.subr.bf16.mxu1 %v12804_v33 }
 0x2cb   :  { %12452 = vst [vmem:[#allocation3 + $0x20] sm:$0xff] %v12428_v36   ;;  %v1299_v44 = vmul.f32 %v14867_v4, %v1256_v37  ;;  %v12515_v45 = vadd.f32 %v12514_v41, %v12513_v35  ;;  %v12787_v46 = vld [vmem:[#allocation3 + $0x14] sm:$0xff]   ;;  %2281 = vmatprep.mubr.bf16.mxu1 %v12786_v42  ;;  %v1337_v54 = vmax.f32 %v1321_v43, 0.0 }
 0x2cc   :  { %v12516_v47 = vpop.f32.mrf.mxu1  ;;  %2384 = vmatprep.mubr.bf16.mxu0 %v12787_v46  ;;  %2282 = vmatmul.mubr.bf16.gmra.mxu1 %v12791_v38  ;;  %v12798_v63 = vld [vmem:[#allocation3 + $0x18] sm:$0xff]  }
 0x2cd   :  { %v1322_v50 = vadd.f32 %v14870_v12, %v1299_v44  ;;  %v1261_v51 = vadd.f32 %v14882_v59, %v12515_v45  ;;  %2385 = vmatmul.mubr.bf16.gmra.mxu0 %v12792_v49  ;;  %2464 = vmatpush1.bf16.msra.mxu1 %v12802_v39  ;;  %v12825_v59 = vld [vmem:[#allocation14 + $0x204] ss:$8 sps:$4 sm:$0xff]   ;;  %v12799_v9 = vld [vmem:[#allocation3 + $0x18] sm:$0xff]  }
 0x2ce   :  { %v12517_v52 = vpop.f32.mrf.mxu1  ;;  %2465 = vmatprep.subr.bf16.mxu1 %v12811_v40 }
 0x2cf   :  { %v1338_v55 = vmax.f32 %v1322_v50, 0.0  ;;  %v1300_v56 = vmul.f32 %v14867_v4, %v1261_v51  ;;  %v12518_v57 = vadd.f32 %v12517_v52, %v12516_v47 }
 0x2d0   :  { %v12519_v60 = vpop.f32.mrf.mxu1 }
 0x2d1   :  { %v12433_v61 = vpack.c.bf16 %v1338_v55, %v1337_v54  ;;  %v1264_v62 = vadd.f32 %v12582_v20, %v12518_v57  ;;  %2466 = vmatpush1.bf16.msra.mxu1 %v12809_v53  ;;  %v1323_v2 = vadd.f32 %v14870_v12, %v1300_v56  ;;  %v1271_v20 = vpop.f32.mrf.mxu0 }
 0x2d2   :  { %v12520_v0 = vpop.f32.mrf.mxu1  ;;  %v12793_v1 = vld [vmem:[#allocation3 + $0x1c] sm:$0xff]   ;;  %2467 = vmatprep.subr.bf16.mxu1 %v12818_v58 }
 0x2d3   :  { %12453 = vst [vmem:[#allocation3 + $0x28] sm:$0xff] %v12433_v61   ;;  %v1301_v3 = vmul.f32 %v14867_v4, %v1264_v62  ;;  %v12521_v5 = vadd.f32 %v12520_v0, %v12519_v60  ;;  %v12794_v6 = vld [vmem:[#allocation3 + $0x1c] sm:$0xff]   ;;  %2291 = vmatprep.mubr.bf16.mxu1 %v12793_v1  ;;  %v1339_v16 = vmax.f32 %v1323_v2, 0.0  ;;  %v12830_v61 = vld [vmem:[#allocation3 + $0x10] sm:$0xff]  }
 0x2d4   :  { %v12522_v8 = vpop.f32.mrf.mxu1  ;;  %2394 = vmatprep.mubr.bf16.mxu0 %v12794_v6  ;;  %2292 = vmatmul.mubr.bf16.gmra.mxu1 %v12798_v63  ;;  %v12805_v24 = vld [vmem:[#allocation3 + $0x20] sm:$0xff]   ;;  %v12831_v63 = vld [vmem:[#allocation3 + $0x18] sm:$0xff]  }
 0x2d5   :  { %v1324_v10 = vadd.f32 %v14870_v12, %v1301_v3  ;;  %v1269_v13 = vadd.f32 %v12521_v5, %v1268_v30  ;;  %2395 = vmatmul.mubr.bf16.gmra.mxu0 %v12799_v9  ;;  %2468 = vmatpush1.bf16.msra.mxu1 %v12816_v31  ;;  %v12806_v34 = vld [vmem:[#allocation3 + $0x20] sm:$0xff]   ;;  %v12837_v3 = vld [vmem:[#allocation3 + $0x48] sm:$0xff]  }
 0x2d6   :  { %v12523_v14 = vpop.f32.mrf.mxu1  ;;  %2469 = vmatprep.subr.bf16.mxu1 %v12825_v59  ;;  %v12832_v31 = vld [vmem:[#allocation3 + $0x20] sm:$0xff]   ;;  %v12838_v5 = vld [vmem:[#allocation18 + $0xe0] ss:$16 sps:$4 sm:$0xff]   ;;  %v12840_v6 = vld [vmem:[#allocation18 + $0xe4] ss:$16 sps:$4 sm:$0xff]  }
 0x2d7   :  { %v1340_v17 = vmax.f32 %v1324_v10, 0.0  ;;  %v1302_v18 = vmul.f32 %v14867_v4, %v1269_v13  ;;  %v12524_v19 = vadd.f32 %v12523_v14, %v12522_v8  ;;  %9702 = vmatprep.subr.bf16.mxu0 %v12840_v6  ;;  %v12843_v8 = vld [vmem:[#allocation18 + $0x2e4] ss:$16 sps:$4 sm:$0xff]   ;;  %v12844_v9 = vld [vmem:[#allocation18 + $0xc0] ss:$16 sps:$4 sm:$0xff]  }
 0x2d8   :  { %v12525_v21 = vpop.f32.mrf.mxu1  ;;  %9703 = vmatpush1.bf16.msra.mxu0 %v12838_v5  ;;  %v12846_v10 = vld [vmem:[#allocation18 + $0xc4] ss:$16 sps:$4 sm:$0xff]   ;;  %v12847_v13 = vld [vmem:[#allocation18 + $0x2c0] ss:$16 sps:$4 sm:$0xff]  }
 0x2d9   :  { %v12438_v22 = vpack.c.bf16 %v1340_v17, %v1339_v16  ;;  %v1272_v23 = vadd.f32 %v12524_v19, %v1271_v20  ;;  %2470 = vmatpush1.bf16.msra.mxu1 %v12823_v15  ;;  %v1325_v27 = vadd.f32 %v14870_v12, %v1302_v18  ;;  %9704 = vmatprep.subr.bf16.mxu0 %v12846_v10  ;;  %v12849_v14 = vld [vmem:[#allocation18 + $0x2c4] ss:$16 sps:$4 sm:$0xff]   ;;  %v12850_v15 = vld [vmem:[#allocation18 + $0xa0] ss:$16 sps:$4 sm:$0xff]  }
 0x2da   :  { %v12526_v25 = vpop.f32.mrf.mxu1  ;;  %v12800_v26 = vld [vmem:[#allocation3 + $0x24] sm:$0xff]   ;;  %9743 = vmatprep.subr.bf16.mxu1 %v12843_v8  ;;  %v12852_v16 = vld [vmem:[#allocation18 + $0xa4] ss:$16 sps:$4 sm:$0xff]  }
 0x2db   :  { %12454 = vst [vmem:[#allocation3 + $0x30] sm:$0xff] %v12438_v22   ;;  %v1303_v28 = vmul.f32 %v14867_v4, %v1272_v23  ;;  %v12527_v29 = vadd.f32 %v12526_v25, %v12525_v21  ;;  %v12801_v32 = vld [vmem:[#allocation3 + $0x24] sm:$0xff]   ;;  %2301 = vmatprep.mubr.bf16.mxu1 %v12800_v26  ;;  %v1341_v38 = vmax.f32 %v1325_v27, 0.0  ;;  %v12855_v17 = vld [vmem:[#allocation18 + $0x2a4] ss:$16 sps:$4 sm:$0xff]  }
 0x2dc   :  { %v12528_v33 = vpop.f32.mrf.mxu1  ;;  %2404 = vmatprep.mubr.bf16.mxu0 %v12801_v32  ;;  %2302 = vmatmul.mubr.bf16.gmra.mxu1 %v12805_v24  ;;  %v12812_v44 = vld [vmem:[#allocation3 + $0x28] sm:$0xff]  }
 0x2dd   :  { %v1326_v35 = vadd.f32 %v14870_v12, %v1303_v28  ;;  %v1277_v36 = vadd.f32 %v14892_v48, %v12527_v29  ;;  %2405 = vmatmul.mubr.bf16.gmra.mxu0 %v12806_v34  ;;  %v12813_v48 = vld [vmem:[#allocation3 + $0x28] sm:$0xff]  }
 0x2de   :  { %v12529_v37 = vpop.f32.mrf.mxu1  ;;  %v12833_v59 = vld [vmem:[#allocation3 + $0x28] sm:$0xff]   ;;  %9705 = vmatpush1.bf16.msra.mxu0 %v12844_v9 }
 0x2df   :  { %v1342_v39 = vmax.f32 %v1326_v35, 0.0  ;;  %v1304_v40 = vmul.f32 %v14867_v4, %v1277_v36  ;;  %v12530_v41 = vadd.f32 %v12529_v37, %v12528_v33  ;;  %9706 = vmatprep.subr.bf16.mxu0 %v12852_v16  ;;  %v12856_v18 = vld [vmem:[#allocation18 + $0x80] ss:$16 sps:$4 sm:$0xff]   ;;  %v12858_v19 = vld [vmem:[#allocation18 + $0x84] ss:$16 sps:$4 sm:$0xff]  }
 0x2e0   :  { %v12859_v20 = vld [vmem:[#allocation18 + $0x280] ss:$16 sps:$4 sm:$0xff]   ;;  %v12861_v21 = vld [vmem:[#allocation18 + $0x284] ss:$16 sps:$4 sm:$0xff]  }
 0x2e1   :  { %v12443_v42 = vpack.c.bf16 %v1342_v39, %v1341_v38  ;;  %v1280_v43 = vadd.f32 %v12586_v7, %v12530_v41  ;;  %v1327_v46 = vadd.f32 %v14870_v12, %v1304_v40  ;;  %v12841_v7 = vld [vmem:[#allocation18 + $0x2e0] ss:$16 sps:$4 sm:$0xff]   ;;  %v12864_v23 = vld [vmem:[#allocation18 + $0x64] ss:$16 sps:$4 sm:$0xff]  }
 0x2e2   :  { %v12807_v45 = vld [vmem:[#allocation3 + $0x2c] sm:$0xff]   ;;  %9707 = vmatpush1.bf16.msra.mxu0 %v12850_v15  ;;  %v12862_v22 = vld [vmem:[#allocation18 + $0x60] ss:$16 sps:$4 sm:$0xff]  }
 0x2e3   :  { %12455 = vst [vmem:[#allocation3 + $0x38] sm:$0xff] %v12443_v42   ;;  %v1305_v47 = vmul.f32 %v14867_v4, %v1280_v43  ;;  %v12808_v49 = vld [vmem:[#allocation3 + $0x2c] sm:$0xff]   ;;  %2311 = vmatprep.mubr.bf16.mxu1 %v12807_v45  ;;  %v1343_v51 = vmax.f32 %v1327_v46, 0.0  ;;  %9708 = vmatprep.subr.bf16.mxu0 %v12858_v19  ;;  %v12865_v24 = vld [vmem:[#allocation18 + $0x260] ss:$16 sps:$4 sm:$0xff]  }
 0x2e4   :  { %2414 = vmatprep.mubr.bf16.mxu0 %v12808_v49  ;;  %2312 = vmatmul.mubr.bf16.gmra.mxu1 %v12812_v44  ;;  %v12819_v54 = vld [vmem:[#allocation3 + $0x30] sm:$0xff]   ;;  %v12867_v25 = vld [vmem:[#allocation18 + $0x264] ss:$16 sps:$4 sm:$0xff]   ;;  %v12868_v26 = vld [vmem:[#allocation18 + $0x40] ss:$16 sps:$4 sm:$0xff]  }
 0x2e5   :  { %v1328_v50 = vadd.f32 %v14870_v12, %v1305_v47  ;;  %2415 = vmatmul.mubr.bf16.gmra.mxu0 %v12813_v48  ;;  %v12820_v57 = vld [vmem:[#allocation3 + $0x30] sm:$0xff]   ;;  %v12870_v27 = vld [vmem:[#allocation18 + $0x44] ss:$16 sps:$4 sm:$0xff]   ;;  %v12871_v28 = vld [vmem:[#allocation18 + $0x240] ss:$16 sps:$4 sm:$0xff]  }
 0x2e6   :  { %v12834_v0 = vld [vmem:[#allocation3 + $0x30] sm:$0xff]   ;;  %9709 = vmatpush1.bf16.msra.mxu0 %v12856_v18  ;;  %v12873_v29 = vld [vmem:[#allocation18 + $0x244] ss:$16 sps:$4 sm:$0xff]   ;;  %v12874_v33 = vld [vmem:[#allocation18 + $0x20] ss:$16 sps:$4 sm:$0xff]  }
 0x2e7   :  { %v1344_v52 = vmax.f32 %v1328_v50, 0.0  ;;  %9710 = vmatprep.subr.bf16.mxu0 %v12864_v23  ;;  %v12876_v32 = vld [vmem:[#allocation18 + $0x24] ss:$16 sps:$4 sm:$0xff]   ;;  %v12877_v34 = vld [vmem:[#allocation18 + $0x220] ss:$16 sps:$4 sm:$0xff]  }
 0x2e8   :  { %v12879_v35 = vld [vmem:[#allocation18 + $0x224] ss:$16 sps:$4 sm:$0xff]   ;;  %v12880_v37 = vld [vmem:[#allocation18] ss:$16 sps:$4 sm:$0xff]  }
 0x2e9   :  { %v12448_v53 = vpack.c.bf16 %v1344_v52, %v1343_v51  ;;  %v12882_v36 = vld [vmem:[#allocation18 + $0x4] ss:$16 sps:$4 sm:$0xff]   ;;  %v12883_v38 = vld [vmem:[#allocation18 + $0x200] ss:$16 sps:$4 sm:$0xff]  }
 0x2ea   :  { %v12814_v55 = vld [vmem:[#allocation3 + $0x34] sm:$0xff]   ;;  %9711 = vmatpush1.bf16.msra.mxu0 %v12862_v22  ;;  %v12885_v39 = vld [vmem:[#allocation18 + $0x204] ss:$16 sps:$4 sm:$0xff]  }
 0x2eb   :  { %12456 = vst [vmem:[#allocation3 + $0x40] sm:$0xff] %v12448_v53   ;;  %v12815_v56 = vld [vmem:[#allocation3 + $0x34] sm:$0xff]   ;;  %2321 = vmatprep.mubr.bf16.mxu1 %v12814_v55  ;;  %9712 = vmatprep.subr.bf16.mxu0 %v12870_v27  ;;  %v12888_v40 = vld [vmem:[#allocation18 + $0x1e4] ss:$16 sps:$4 sm:$0xff]  }
 0x2ec   :  { %2424 = vmatprep.mubr.bf16.mxu0 %v12815_v56  ;;  %2322 = vmatmul.mubr.bf16.gmra.mxu1 %v12819_v54  ;;  %v12826_v30 = vld [vmem:[#allocation3 + $0x38] sm:$0xff]  }
 0x2ed   :  { %2425 = vmatmul.mubr.bf16.gmra.mxu0 %v12820_v57  ;;  %v12827_v12 = vld [vmem:[#allocation3 + $0x38] sm:$0xff]  }
 0x2ee   :  { %v12835_v1 = vld [vmem:[#allocation3 + $0x38] sm:$0xff]   ;;  %9713 = vmatpush1.bf16.msra.mxu0 %v12868_v26 }
 0x2ef   :  { %9714 = vmatprep.subr.bf16.mxu0 %v12876_v32  ;;  %v12886_v41 = vld [vmem:[#allocation18 + $0x1e0] ss:$16 sps:$4 sm:$0xff]   ;;  %v12891_v42 = vld [vmem:[#allocation18 + $0x3e4] ss:$16 sps:$4 sm:$0xff]  }
 0x2f0   :  { %v12889_v43 = vld [vmem:[#allocation18 + $0x3e0] ss:$16 sps:$4 sm:$0xff]   ;;  %v12894_v44 = vld [vmem:[#allocation18 + $0x1c4] ss:$16 sps:$4 sm:$0xff]  }
 0x2f1   :  { %v12897_v45 = vld [vmem:[#allocation18 + $0x3c4] ss:$16 sps:$4 sm:$0xff]   ;;  %v12892_v46 = vld [vmem:[#allocation18 + $0x1c0] ss:$16 sps:$4 sm:$0xff]  }
 0x2f2   :  { %v12821_v4 = vld [vmem:[#allocation3 + $0x3c] sm:$0xff]   ;;  %v12828_v60 = vld [vmem:[#allocation3 + $0x44] sm:$0xff]   ;;  %9715 = vmatpush1.bf16.msra.mxu0 %v12874_v33 }
 0x2f3   :  { %v12822_v58 = vld [vmem:[#allocation3 + $0x3c] sm:$0xff]   ;;  %2331 = vmatprep.mubr.bf16.mxu1 %v12821_v4  ;;  %9716 = vmatprep.subr.bf16.mxu0 %v12882_v36  ;;  %v12895_v47 = vld [vmem:[#allocation18 + $0x3c0] ss:$16 sps:$4 sm:$0xff]  }
 0x2f4   :  { %2434 = vmatprep.mubr.bf16.mxu0 %v12822_v58  ;;  %2332 = vmatmul.mubr.bf16.gmra.mxu1 %v12826_v30  ;;  %v12829_v62 = vld [vmem:[#allocation3 + $0x40] sm:$0xff]   ;;  %v12900_v49 = vld [vmem:[#allocation18 + $0x1a4] ss:$16 sps:$4 sm:$0xff]   ;;  %v12898_v50 = vld [vmem:[#allocation18 + $0x1a0] ss:$16 sps:$4 sm:$0xff]  }
 0x2f5   :  { %2435 = vmatmul.mubr.bf16.gmra.mxu0 %v12827_v12  ;;  %2487 = vmatprep.mubr.bf16.mxu1 %v14624_v11  ;;  %v12836_v2 = vld [vmem:[#allocation3 + $0x40] sm:$0xff]   ;;  %v12903_v48 = vld [vmem:[#allocation18 + $0x3a4] ss:$16 sps:$4 sm:$0xff]   ;;  %v12901_v51 = vld [vmem:[#allocation18 + $0x3a0] ss:$16 sps:$4 sm:$0xff]  }
 0x2f6   :  { %2444 = vmatprep.mubr.bf16.mxu0 %v12828_v60  ;;  %9717 = vmatpush1.bf16.msra.mxu0 %v12880_v37  ;;  %v12906_v52 = vld [vmem:[#allocation18 + $0x184] ss:$16 sps:$4 sm:$0xff]   ;;  %v12904_v55 = vld [vmem:[#allocation18 + $0x180] ss:$16 sps:$4 sm:$0xff]  }
 0x2f7   :  { %9718 = vmatprep.subr.bf16.mxu0 %v12888_v40  ;;  %v12909_v53 = vld [vmem:[#allocation18 + $0x384] ss:$16 sps:$4 sm:$0xff]   ;;  %v12907_v56 = vld [vmem:[#allocation18 + $0x380] ss:$16 sps:$4 sm:$0xff]  }
 0x2f8   :  { %v12912_v57 = vld [vmem:[#allocation18 + $0x164] ss:$16 sps:$4 sm:$0xff]   ;;  %v12910_v12 = vld [vmem:[#allocation18 + $0x160] ss:$16 sps:$4 sm:$0xff]  }
 0x2f9   :  { %v12915_v58 = vld [vmem:[#allocation18 + $0x364] ss:$16 sps:$4 sm:$0xff]   ;;  %v12913_v60 = vld [vmem:[#allocation18 + $0x360] ss:$16 sps:$4 sm:$0xff]  }
 0x2fa   :  { %9719 = vmatpush2.bf16.msra.mxu0 %v12886_v41  ;;  %v12924_v8 = vld [vmem:[#allocation18 + $0x124] ss:$16 sps:$4 sm:$0xff]   ;;  %v12925_v9 = vld [vmem:[#allocation18 + $0x320] ss:$16 sps:$4 sm:$0xff]  }
 0x2fb   :  { %9720 = vmatprep.subr.bf16.mxu0 %v12894_v44  ;;  %v12928_v18 = vld [vmem:[#allocation18 + $0x100] ss:$16 sps:$4 sm:$0xff]  }
 0x2fc   :  { %2488 = vmatmul.mubr.bf16.vlgmr.msra.gmra.mxu1 %v12830_v61  ;;  %v12918_v61 = vld [vmem:[#allocation18 + $0x144] ss:$16 sps:$4 sm:$0xff]  }
 0x2fd   :  { %2445 = vmatmul.mubr.bf16.gmra.mxu0 %v12829_v62  ;;  %2497 = vmatprep.mubr.bf16.mxu1 %v14624_v11 }
 0x2fe   :  { %9744 = vmatpush1.bf16.msra.mxu1 %v12841_v7  ;;  %9721 = vmatpush2.bf16.msra.mxu0 %v12892_v46  ;;  %v12922_v7 = vld [vmem:[#allocation18 + $0x120] ss:$16 sps:$4 sm:$0xff]  }
 0x2ff   :  { %9745 = vmatprep.subr.bf16.mxu1 %v12849_v14  ;;  %9722 = vmatprep.subr.bf16.mxu0 %v12900_v49 }
 0x302   :  { %9746 = vmatpush1.bf16.msra.mxu1 %v12847_v13  ;;  %9723 = vmatpush2.bf16.msra.mxu0 %v12898_v50  ;;  %v12927_v13 = vld [vmem:[#allocation18 + $0x324] ss:$16 sps:$4 sm:$0xff]  }
 0x303   :  { %9747 = vmatprep.subr.bf16.mxu1 %v12855_v17  ;;  %9724 = vmatprep.subr.bf16.mxu0 %v12906_v52 }
 0x304   :  { %2498 = vmatmul.mubr.bf16.gmra.mxu1 %v12831_v63  ;;  %v12921_v63 = vld [vmem:[#allocation18 + $0x344] ss:$16 sps:$4 sm:$0xff]  }
 0x305   :  { %2507 = vmatprep.mubr.bf16.mxu1 %v14624_v11 }
 0x306   :  { %9725 = vmatpush2.bf16.msra.mxu0 %v12904_v55 }
 0x307   :  { %9726 = vmatprep.subr.bf16.mxu0 %v12912_v57 }
 0x30a   :  { %9727 = vmatpush2.bf16.msra.mxu0 %v12910_v12 }
 0x30b   :  { %9728 = vmatprep.subr.bf16.mxu0 %v12918_v61 }
 0x30c   :  { %2508 = vmatmul.mubr.bf16.gmra.mxu1 %v12832_v31 }
 0x30d   :  { %2517 = vmatprep.mubr.bf16.mxu1 %v14624_v11 }
 0x314   :  { %2518 = vmatmul.mubr.bf16.gmra.mxu1 %v12833_v59  ;;  %v12916_v59 = vld [vmem:[#allocation18 + $0x140] ss:$16 sps:$4 sm:$0xff]  }
 0x315   :  { %2527 = vmatprep.mubr.bf16.mxu1 %v14624_v11  ;;  %9729 = vmatpush2.bf16.msra.mxu0 %v12916_v59 }
 0x316   :  { %9730 = vmatprep.subr.bf16.mxu0 %v12924_v8  ;;  %v2570_v8 = vlaneseq }
 0x319   :  { %9731 = vmatpush2.bf16.msra.mxu0 %v12922_v7 }
 0x31c   :  { %2528 = vmatmul.mubr.bf16.gmra.mxu1 %v12834_v0 }
 0x31d   :  { %2537 = vmatprep.mubr.bf16.mxu1 %v14624_v11 }
 0x324   :  { %2538 = vmatmul.mubr.bf16.gmra.mxu1 %v12835_v1  ;;  %v12919_v1 = vld [vmem:[#allocation18 + $0x340] ss:$16 sps:$4 sm:$0xff]  }
 0x325   :  { %2547 = vmatprep.mubr.bf16.mxu1 %v14624_v11 }
 0x32c   :  { %2548 = vmatmul.mubr.bf16.gmra.mxu1 %v12836_v2 }
 0x32d   :  { %2557 = vmatprep.mubr.bf16.mxu1 %v14624_v11  ;;  %v12853_v11 = vld [vmem:[#allocation18 + $0x2a0] ss:$16 sps:$4 sm:$0xff]  }
 0x32e   :  { %9748 = vmatpush1.bf16.msra.mxu1 %v12853_v11  ;;  %v12930_v11 = vld [vmem:[#allocation18 + $0x104] ss:$16 sps:$4 sm:$0xff]  }
 0x32f   :  { %9749 = vmatprep.subr.bf16.mxu1 %v12861_v21  ;;  %9732 = vmatprep.subr.bf16.mxu0 %v12930_v11  ;;  %v12933_v21 = vld [vmem:[#allocation18 + $0x304] ss:$16 sps:$4 sm:$0xff]  }
 0x330   :  { %9733 = vmatpush2.bf16.msra.mxu0 %v12928_v18  ;;  %v15029_v18 = vshrl.u32 %v2570_v8, 7 }
 0x332   :  { %9750 = vmatpush1.bf16.msra.mxu1 %v12859_v20  ;;  %v12931_v20 = vld [vmem:[#allocation18 + $0x300] ss:$16 sps:$4 sm:$0xff]  }
 0x333   :  { %9751 = vmatprep.subr.bf16.mxu1 %v12867_v25 }
 0x334   :  { %2558 = vmatmul.mubr.bf16.gmra.mxu1 %v12837_v3 }
 0x336   :  { %9752 = vmatpush1.bf16.msra.mxu1 %v12865_v24 }
 0x337   :  { %9753 = vmatprep.subr.bf16.mxu1 %v12873_v29  ;;  %v12936_v29 = vld [vmem:[#allocation18 + $0x4e4] ss:$16 sps:$4 sm:$0xff]  }
 0x338   :  { %9784 = vmatprep.subr.bf16.mxu0 %v12936_v29 }
 0x33a   :  { %9754 = vmatpush1.bf16.msra.mxu1 %v12871_v28 }
 0x33b   :  { %9755 = vmatprep.subr.bf16.mxu1 %v12879_v35  ;;  %v12939_v35 = vld [vmem:[#allocation18 + $0x6e4] ss:$16 sps:$4 sm:$0xff]  }
 0x33e   :  { %9756 = vmatpush1.bf16.msra.mxu1 %v12877_v34 }
 0x33f   :  { %9757 = vmatprep.subr.bf16.mxu1 %v12885_v39 }
 0x342   :  { %9758 = vmatpush1.bf16.msra.mxu1 %v12883_v38 }
 0x343   :  { %9759 = vmatprep.subr.bf16.mxu1 %v12891_v42 }
 0x346   :  { %9760 = vmatpush2.bf16.msra.mxu1 %v12889_v43 }
 0x347   :  { %9761 = vmatprep.subr.bf16.mxu1 %v12897_v45 }
 0x34a   :  { %9762 = vmatpush2.bf16.msra.mxu1 %v12895_v47 }
 0x34b   :  { %9763 = vmatprep.subr.bf16.mxu1 %v12903_v48 }
 0x34e   :  { %9764 = vmatpush2.bf16.msra.mxu1 %v12901_v51 }
 0x34f   :  { %9765 = vmatprep.subr.bf16.mxu1 %v12909_v53 }
 0x352   :  { %9766 = vmatpush2.bf16.msra.mxu1 %v12907_v56 }
 0x353   :  { %9767 = vmatprep.subr.bf16.mxu1 %v12915_v58 }
 0x356   :  { %9768 = vmatpush2.bf16.msra.mxu1 %v12913_v60 }
 0x357   :  { %9769 = vmatprep.subr.bf16.mxu1 %v12921_v63 }
 0x35a   :  { %9770 = vmatpush2.bf16.msra.mxu1 %v12919_v1 }
 0x35b   :  { %9771 = vmatprep.subr.bf16.mxu1 %v12927_v13 }
 0x35e   :  { %9772 = vmatpush2.bf16.msra.mxu1 %v12925_v9 }
 0x35f   :  { %9773 = vmatprep.subr.bf16.mxu1 %v12933_v21 }
 0x362   :  { %9774 = vmatpush2.bf16.msra.mxu1 %v12931_v20  ;;  %v14625_v20 = vmov 1983009808  }
 0x363   :  { %9825 = vmatprep.subr.bf16.mxu1 %v12939_v35  ;;  %v2787_v21 = vunpack.c.l.s4 %v14625_v20  ;;  %v14626_v35 = vmov 1934713408  }
 0x37c   :  { %v14917_v54 = vpop.f32.mrf.mxu1 }
 0x37e   :  { %v14919_v4 = vpop.f32.mrf.mxu1 }
 0x380   :  { %v14921_v30 = vpop.f32.mrf.mxu1 }
 0x382   :  { %v14923_v62 = vpop.f32.mrf.mxu1 }
 0x384   :  { %v14925_v31 = vpop.f32.mrf.mxu1 }
 0x385   :  { %v14927_v0 = vpop.f32.mrf.mxu0 }
 0x386   :  { %v14929_v2 = vpop.f32.mrf.mxu1  ;;  %v2377_v20 = vadd.f32 %v14927_v0, %v14917_v54 }
 0x387   :  { %v14931_v3 = vpop.f32.mrf.mxu0 }
 0x388   :  { %v14933_v5 = vpop.f32.mrf.mxu1 }
 0x389   :  { %v14935_v6 = vpop.f32.mrf.mxu0 }
 0x38a   :  { %v14937_v10 = vpop.f32.mrf.mxu1  ;;  %v2381_v54 = vadd.f32 %v14935_v6, %v14921_v30 }
 0x38b   :  { %v14939_v14 = vpop.f32.mrf.mxu0 }
 0x38c   :  { %v14941_v15 = vpop.f32.mrf.mxu1 }
 0x38d   :  { %v14943_v16 = vpop.f32.mrf.mxu0 }
 0x38e   :  { %v14945_v17 = vpop.f32.mrf.mxu1 }
 0x38f   :  { %v14947_v19 = vpop.f32.mrf.mxu0 }
 0x390   :  { %v14949_v22 = vpop.f32.mrf.mxu1 }
 0x391   :  { %v14951_v23 = vpop.f32.mrf.mxu0 }
 0x392   :  { %v14953_v24 = vpop.f32.mrf.mxu1 }
 0x393   :  { %v14955_v25 = vpop.f32.mrf.mxu0 }
 0x394   :  { %v14957_v26 = vpop.f32.mrf.mxu1  ;;  %v2393_v30 = vadd.f32 %v14955_v25, %v14937_v10 }
 0x395   :  { %v14959_v27 = vpop.f32.mrf.mxu0 }
 0x396   :  { %v14961_v28 = vpop.f32.mrf.mxu1  ;;  %v2397_v6 = vadd.f32 %v14959_v27, %v14941_v15 }
 0x397   :  { %v14963_v32 = vpop.f32.mrf.mxu0 }
 0x398   :  { %v14965_v33 = vpop.f32.mrf.mxu1 }
 0x399   :  { %v14967_v34 = vpop.f32.mrf.mxu0 }
 0x39a   :  { %v14969_v36 = vpop.f32.mrf.mxu1 }
 0x39b   :  { %v14971_v37 = vpop.f32.mrf.mxu0 }
 0x39c   :  { %v14973_v38 = vpop.f32.mrf.mxu1 }
 0x39d   :  { %v14975_v39 = vpop.f32.mrf.mxu0 }
 0x39e   :  { %v14977_v40 = vpop.f32.mrf.mxu1 }
 0x39f   :  { %v14979_v41 = vpop.f32.mrf.mxu0 }
 0x3a0   :  { %v14981_v42 = vpop.f32.mrf.mxu1  ;;  %v15083_v10 = vadd.f32 %v14979_v41, %v14961_v28 }
 0x3a1   :  { %v14983_v43 = vpop.f32.mrf.mxu0 }
 0x3a2   :  { %v14985_v44 = vpop.f32.mrf.mxu1  ;;  %v15087_v15 = vadd.f32 %v14983_v43, %v14965_v33 }
 0x3a3   :  { %v14987_v45 = vpop.f32.mrf.mxu0 }
 0x3a4   :  { %v14989_v46 = vpop.f32.mrf.mxu1 }
 0x3a5   :  { %v14991_v47 = vpop.f32.mrf.mxu0 }
 0x3a6   :  { %v14993_v49 = vpop.f32.mrf.mxu1 }
 0x3a7   :  { %15715 = vst [vmem:[#allocation27_spill] sm:$0xff] %v14993_v49  ;;  %v14995_v48 = vpop.f32.mrf.mxu0 }
 0x3a8   :  { %v14997_v50 = vpop.f32.mrf.mxu1 }
 0x3a9   :  { %15716 = vst [vmem:[#allocation28_spill] sm:$0xff] %v14997_v50  ;;  %v14999_v51 = vpop.f32.mrf.mxu0 }
 0x3aa   :  { %v15001_v52 = vpop.f32.mrf.mxu1  ;;  %v15104_v25 = vadd.f32 %v14999_v51, %v14981_v42 }
 0x3ab   :  { %15717 = vst [vmem:[#allocation29_spill] sm:$0xff] %v15001_v52  ;;  %v15003_v53 = vpop.f32.mrf.mxu0 }
 0x3ac   :  { %v15005_v55 = vpop.f32.mrf.mxu1 }
 0x3ad   :  { %15718 = vst [vmem:[#allocation30_spill] sm:$0xff] %v15005_v55  ;;  %v15007_v56 = vpop.f32.mrf.mxu0  ;;  %v2788_v55 = vunpack.c.0.s8 %v2787_v21 }
 0x3ae   :  { %15719 = vst [vmem:[#allocation31_spill] sm:$0xff] %v15007_v56  ;;  %v15009_v57 = vpop.f32.mrf.mxu1  ;;  %v15732_v33 = vld [vmem:[#allocation27_spill] sm:$0xff] }
 0x3af   :  { %15720 = vst [vmem:[#allocation32_spill] sm:$0xff] %v15009_v57  ;;  %v15011_v58 = vpop.f32.mrf.mxu0  ;;  %v2568_v57 = vld [vmem:[#allocation15] sm:$0x3]  ;;  %v15052_v21 = vsub.s32 %v2788_v55, %v15029_v18  ;;  %v2389_v55 = vadd.f32 %v14947_v19, %v14929_v2  ;;  %v2403_v2 = vadd.f32 %v14971_v37, %v14953_v24  ;;  %v15100_v24 = vadd.f32 %v14995_v48, %v14977_v40 }
 0x3b0   :  { %15721 = vst [vmem:[#allocation33_spill] sm:$0xff] %v15011_v58  ;;  %v15013_v12 = vpop.f32.mrf.mxu1  ;;  %v15734_v37 = vld [vmem:[#allocation28_spill] sm:$0xff] }
 0x3b1   :  { %15722 = vst [vmem:[#allocation34_spill] sm:$0xff] %v15013_v12  ;;  %v15017_v61 = vpop.f32.mrf.mxu0 }
 0x3b2   :  { %v15015_v60 = vpop.f32.mrf.mxu1  ;;  %15724 = vst [vmem:[#allocation36_spill] sm:$0xff] %v15017_v61  ;;  %v15736_v42 = vld [vmem:[#allocation29_spill] sm:$0xff] }
 0x3b3   :  { %15723 = vst [vmem:[#allocation35_spill] sm:$0xff] %v15015_v60  ;;  %v15023_v1 = vpop.f32.mrf.mxu0  ;;  %v2819_v60 = vunpack.c.l.s4 %v14626_v35 }
 0x3b4   :  { %v15019_v63 = vpop.f32.mrf.mxu1  ;;  %15727 = vst [vmem:[#allocation39_spill] sm:$0xff] %v15023_v1 }
 0x3b5   :  { %15725 = vst [vmem:[#allocation37_spill] sm:$0xff] %v15019_v63  ;;  %v2436_v13 = vpop.f32.mrf.mxu0  ;;  %v15032_v63 = vsub.s32 0, %v15029_v18  ;;  %v2820_v52 = vunpack.c.0.s8 %v2819_v60  ;;  %v2379_v60 = vadd.f32 %v14931_v3, %v14919_v4  ;;  %v2391_v4 = vadd.f32 %v14951_v23, %v14933_v5  ;;  %v15731_v28 = vld [vmem:[#allocation31_spill] sm:$0xff] }
 0x3b6   :  { %v15021_v59 = vpop.f32.mrf.mxu1  ;;  %v2407_v5 = vadd.f32 %v14975_v39, %v14957_v26  ;;  %v15096_v23 = vadd.f32 %v14991_v47, %v14973_v38  ;;  %v15108_v26 = vadd.f32 %v15003_v53, %v14985_v44 }
 0x3b7   :  { %15726 = vst [vmem:[#allocation38_spill] sm:$0xff] %v15021_v59  ;;  %v2438_v12 = vpop.f32.mrf.mxu0  ;;  %15730 = vst [vmem:[#allocation42_spill] sm:$0xff] %v15032_v63  ;;  %v15040_v61 = vrot.slane %v2568_v57, %v15032_v63 }
 0x3b8   :  { %v15025_v7 = vpop.f32.mrf.mxu1 }
 0x3b9   :  { %15728 = vst [vmem:[#allocation40_spill] sm:$0xff] %v15025_v7  ;;  %v15035_v7 = vsub.s32 1, %v15029_v18  ;;  %v2440_v8 = vpop.f32.mrf.mxu0  ;;  %v15735_v38 = vld [vmem:[#allocation36_spill] sm:$0xff] }
 0x3ba   :  { %v15027_v9 = vpop.f32.mrf.mxu1  ;;  %v15120_v39 = vadd.f32 %v15735_v38, %v15734_v37 }
 0x3bb   :  { %15729 = vst [vmem:[#allocation41_spill] sm:$0xff] %v15027_v9  ;;  %v2612_v9 = vld [vmem:[#allocation17] sm:$0x3]  ;;  %v15046_v58 = vrot.slane %v2568_v57, %v15035_v7  ;;  %v2383_v57 = vadd.f32 %v14939_v14, %v14923_v62  ;;  %v2442_v3 = vpop.f32.mrf.mxu0  ;;  %v15737_v43 = vld [vmem:[#allocation39_spill] sm:$0xff] }
 0x3bc   :  { %v2489_v11 = vpop.f32.mrf.mxu1  ;;  %v15043_v50 = vrot.slane %v2612_v9, %v15032_v63  ;;  %v15049_v49 = vrot.slane %v2612_v9, %v15035_v7  ;;  %v15059_v63 = vsub.s32 %v2820_v52, %v15029_v18  ;;  %v2387_v9 = vadd.f32 %v14943_v16, %v14925_v31 }
 0x3bd   :  { %v2490_v0 = vadd.f32 %v2489_v11, %v2377_v20  ;;  %v2399_v52 = vadd.f32 %v14963_v32, %v14945_v17  ;;  %v2401_v31 = vadd.f32 %v14967_v34, %v14949_v22  ;;  %v15091_v16 = vadd.f32 %v14987_v45, %v14969_v36  ;;  %v2446_v27 = vpop.f32.mrf.mxu0  ;;  %v15733_v34 = vld [vmem:[#allocation33_spill] sm:$0xff]  ;;  %v15738_v45 = vld [vmem:[#allocation30_spill] sm:$0xff] }
 0x3be   :  { %v2491_v29 = vpop.f32.mrf.mxu1  ;;  %v15112_v32 = vadd.f32 %v15731_v28, %v14989_v46  ;;  %v15116_v36 = vadd.f32 %v15733_v34, %v15732_v33  ;;  %v15125_v44 = vadd.f32 %v15737_v43, %v15736_v42  ;;  %v15128_v47 = vadd.f32 %v2436_v13, %v15738_v45  ;;  %v15739_v46 = vld [vmem:[#allocation32_spill] sm:$0xff] }
 0x3bf   :  { %v2492_v62 = vadd.f32 %v2491_v29, %v2379_v60  ;;  %v2580_v17 = vmul.f32 %v15040_v61, %v2490_v0  ;;  %v15131_v48 = vadd.f32 %v2438_v12, %v15739_v46  ;;  %v15740_v60 = vld [vmem:[#allocation34_spill] sm:$0xff]  ;;  %v15741_v0 = vld [vmem:[#allocation35_spill] sm:$0xff]  ;;  %v2448_v28 = vpop.f32.mrf.mxu0 }
 0x3c0   :  { %v2493_v59 = vpop.f32.mrf.mxu1 }
 0x3c1   :  { %v2494_v19 = vadd.f32 %v2493_v59, %v2381_v54  ;;  %v2581_v40 = vmul.f32 %v15046_v58, %v2492_v62  ;;  %v2624_v53 = vadd.f32 %v15043_v50, %v2580_v17  ;;  %v15136_v54 = vadd.f32 %v2440_v8, %v15740_v60 }
 0x3c2   :  { %v2495_v1 = vpop.f32.mrf.mxu1  ;;  %v15139_v62 = vadd.f32 %v2442_v3, %v15741_v0 }
 0x3c3   :  { %v2582_v59 = vmul.f32 %v15040_v61, %v2494_v19  ;;  %v2496_v11 = vadd.f32 %v2495_v1, %v2383_v57  ;;  %v2625_v12 = vadd.f32 %v15049_v49, %v2581_v40  ;;  %v15742_v19 = vld [vmem:[#allocation37_spill] sm:$0xff] }
 0x3c4   :  { %v2499_v35 = vpop.f32.mrf.mxu1  ;;  %v15144_v1 = vadd.f32 %v2446_v27, %v15742_v19  ;;  %v15744_v19 = vld [vmem:[#allocation40_spill] sm:$0xff] }
 0x3c5   :  { %v2500_v29 = vadd.f32 %v2499_v35, %v2387_v9  ;;  %v2656_v9 = vmax.f32 %v2624_v53, 0.0  ;;  %v2626_v3 = vadd.f32 %v15043_v50, %v2582_v59  ;;  %v2583_v38 = vmul.f32 %v15046_v58, %v2496_v11  ;;  %v15743_v53 = vld [vmem:[#allocation38_spill] sm:$0xff] }
 0x3c6   :  { %v2501_v56 = vpop.f32.mrf.mxu1  ;;  %v15159_v59 = vadd.f32 %v2448_v28, %v15743_v53 }
 0x3c7   :  { %v2658_v11 = vmax.f32 %v2626_v3, 0.0 }
 0x3c8   :  { %v2503_v14 = vpop.f32.mrf.mxu1 }
 0x3c9   :  { %v2504_v34 = vadd.f32 %v2503_v14, %v2391_v4 }
 0x3ca   :  { %v2505_v22 = vpop.f32.mrf.mxu1 }
 0x3cb   :  { %v2506_v17 = vadd.f32 %v2505_v22, %v2393_v30  ;;  %v2657_v22 = vmax.f32 %v2625_v12, 0.0 }
 0x3cc   :  { %v2509_v41 = vpop.f32.mrf.mxu1 }
 0x3cd   :  { %v2510_v51 = vadd.f32 %v2509_v41, %v2397_v6  ;;  %v2502_v6 = vadd.f32 %v2501_v56, %v2389_v55  ;;  %v2450_v56 = vpop.f32.mrf.mxu0  ;;  %v2587_v41 = vmul.f32 %v15046_v58, %v2506_v17 }
 0x3ce   :  { %v2511_v20 = vpop.f32.mrf.mxu1 }
 0x3cf   :  { %v2588_v13 = vmul.f32 %v15040_v61, %v2510_v51  ;;  %v2512_v33 = vadd.f32 %v2511_v20, %v2399_v52  ;;  %v2584_v52 = vmul.f32 %v15040_v61, %v2500_v29  ;;  %v2585_v27 = vmul.f32 %v15046_v58, %v2502_v6  ;;  %v2452_v60 = vpop.f32.mrf.mxu0 }
 0x3d0   :  { %v2513_v37 = vpop.f32.mrf.mxu1 }
 0x3d1   :  { %v2632_v35 = vadd.f32 %v15043_v50, %v2588_v13  ;;  %v2589_v8 = vmul.f32 %v15046_v58, %v2512_v33  ;;  %v2514_v57 = vadd.f32 %v2513_v37, %v2401_v31  ;;  %v2586_v31 = vmul.f32 %v15040_v61, %v2504_v34 }
 0x3d2   :  { %v2515_v40 = vpop.f32.mrf.mxu1  ;;  %v2628_v0 = vadd.f32 %v15043_v50, %v2584_v52  ;;  %v2629_v6 = vadd.f32 %v15049_v49, %v2585_v27 }
 0x3d3   :  { %v2664_v55 = vmax.f32 %v2632_v35, 0.0  ;;  %v2633_v4 = vadd.f32 %v15049_v49, %v2589_v8  ;;  %v2590_v30 = vmul.f32 %v15040_v61, %v2514_v57  ;;  %v2516_v14 = vadd.f32 %v2515_v40, %v2403_v2 }
 0x3d4   :  { %v2519_v42 = vpop.f32.mrf.mxu1  ;;  %v2627_v2 = vadd.f32 %v15049_v49, %v2583_v38  ;;  %v2630_v34 = vadd.f32 %v15043_v50, %v2586_v31  ;;  %v15169_v35 = vadd.f32 %v2450_v56, %v15744_v19 }
 0x3d5   :  { %v11290_v43 = vpack.c.bf16 %v2664_v55, %v2656_v9  ;;  %v2665_v45 = vmax.f32 %v2633_v4, 0.0  ;;  %v2634_v46 = vadd.f32 %v15043_v50, %v2590_v30  ;;  %v2591_v51 = vmul.f32 %v15046_v58, %v2516_v14  ;;  %v15745_v9 = vld [vmem:[#allocation41_spill] sm:$0xff] }
 0x3d6   :  { %v2520_v29 = vadd.f32 %v2519_v42, %v2407_v5  ;;  %v2521_v20 = vpop.f32.mrf.mxu1  ;;  %v2631_v5 = vadd.f32 %v15049_v49, %v2587_v41  ;;  %v15174_v3 = vadd.f32 %v2452_v60, %v15745_v9  ;;  %v2659_v4 = vmax.f32 %v2627_v2, 0.0 }
 0x3d7   :  { %v11291_v13 = vpack.c.bf16 %v2665_v45, %v2657_v22  ;;  %v2666_v33 = vmax.f32 %v2634_v46, 0.0  ;;  %v2635_v12 = vadd.f32 %v15049_v49, %v2591_v51  ;;  %v2522_v28 = vadd.f32 %v2521_v20, %v15083_v10 }
 0x3d8   :  { %v2592_v17 = vmul.f32 %v15040_v61, %v2520_v29  ;;  %v2523_v37 = vpop.f32.mrf.mxu1  ;;  %v2660_v10 = vmax.f32 %v2628_v0, 0.0  ;;  %v2661_v14 = vmax.f32 %v2629_v6, 0.0  ;;  %v2662_v22 = vmax.f32 %v2630_v34, 0.0 }
 0x3d9   :  { %v11294_v8 = vpack.c.bf16 %v2666_v33, %v2658_v11  ;;  %v2524_v57 = vadd.f32 %v2523_v37, %v15087_v15  ;;  %v2667_v38 = vmax.f32 %v2635_v12, 0.0  ;;  %v2593_v40 = vmul.f32 %v15046_v58, %v2522_v28 }
 0x3da   :  { %v2636_v52 = vadd.f32 %v15043_v50, %v2592_v17  ;;  %v2525_v55 = vpop.f32.mrf.mxu1  ;;  %v2663_v41 = vmax.f32 %v2631_v5, 0.0  ;;  %v2792_v51 = vrot.slane %v11290_v43, %v15052_v21  ;;  %v2799_v33 = vrot.slane %v11291_v13, %v15052_v21 }
 0x3db   :  { %v2594_v30 = vmul.f32 %v15040_v61, %v2524_v57  ;;  %v2526_v56 = vadd.f32 %v2525_v55, %v15091_v16  ;;  %v2637_v15 = vadd.f32 %v15049_v49, %v2593_v40  ;;  %v11295_v53 = vpack.c.bf16 %v2667_v38, %v2659_v4 }
 0x3dc   :  { %v2668_v27 = vmax.f32 %v2636_v52, 0.0  ;;  %v2529_v31 = vpop.f32.mrf.mxu1  ;;  %v2860_v12 = vrot.slane %v11294_v8, %v15052_v21 }
 0x3dd   :  { %v2638_v42 = vadd.f32 %v15043_v50, %v2594_v30  ;;  %v2595_v45 = vmul.f32 %v15046_v58, %v2526_v56  ;;  %v2530_v46 = vadd.f32 %v2529_v31, %v15096_v23  ;;  %v2669_v2 = vmax.f32 %v2637_v15, 0.0 }
 0x3de   :  { %v11292_v11 = vpack.c.bf16 %v2668_v27, %v2660_v10  ;;  %v2531_v29 = vpop.f32.mrf.mxu1  ;;  %v2867_v8 = vrot.slane %v11295_v53, %v15052_v21 }
 0x3df   :  { %v2670_v16 = vmax.f32 %v2638_v42, 0.0  ;;  %v2639_v20 = vadd.f32 %v15049_v49, %v2595_v45  ;;  %v2596_v60 = vmul.f32 %v15040_v61, %v2530_v46  ;;  %v2532_v0 = vadd.f32 %v2531_v29, %v15100_v24 }
 0x3e0   :  { %v2808_v6 = vrot.slane %v11292_v11, %v15052_v21  ;;  %v11293_v23 = vpack.c.bf16 %v2669_v2, %v2661_v14  ;;  %v2533_v34 = vpop.f32.mrf.mxu1 }
 0x3e1   :  { %v11296_v43 = vpack.c.bf16 %v2670_v16, %v2662_v22  ;;  %v2671_v17 = vmax.f32 %v2639_v20, 0.0  ;;  %v15192_v28 = vadd.f32 %v15043_v50, %v2596_v60  ;;  %v2597_v37 = vmul.f32 %v15046_v58, %v2532_v0 }
 0x3e2   :  { %v2816_v19 = vcombine.low %v2792_v51, %v2808_v6  ;;  %v2817_v5 = vcombine.high %v2792_v51, %v2808_v6  ;;  %v2815_v57 = vrot.slane %v11293_v23, %v15052_v21  ;;  %v2534_v24 = vadd.f32 %v2533_v34, %v15104_v25  ;;  %v2535_v13 = vpop.f32.mrf.mxu1 }
 0x3e3   :  { %v2876_v9 = vrot.slane %v11296_v43, %v15052_v21  ;;  %v11297_v38 = vpack.c.bf16 %v2671_v17, %v2663_v41  ;;  %v15200_v52 = vadd.f32 %v15049_v49, %v2597_v37  ;;  %v2672_v10 = vmax.f32 %v15192_v28, 0.0 }
 0x3e4   :  { %v2824_v40 = vrot.slane %v2816_v19, %v15059_v63  ;;  %v2832_v55 = vcombine.low %v2799_v33, %v2815_v57  ;;  %v2833_v4 = vcombine.high %v2799_v33, %v2815_v57  ;;  %v2539_v30 = vpop.f32.mrf.mxu1  ;;  %v2831_v56 = vrot.slane %v2817_v5, %v15059_v63 }
 0x3e5   :  { %v2884_v14 = vcombine.low %v2860_v12, %v2876_v9  ;;  %v2885_v25 = vcombine.high %v2860_v12, %v2876_v9  ;;  %v2883_v22 = vrot.slane %v11297_v38, %v15052_v21  ;;  %v2598_v31 = vmul.f32 %v15040_v61, %v2534_v24 }
 0x3e6   :  { %v2840_v27 = vrot.slane %v2832_v55, %v15059_v63  ;;  %v2847_v15 = vrot.slane %v2833_v4, %v15059_v63  ;;  %v2536_v41 = vadd.f32 %v2535_v13, %v15108_v26  ;;  %v2541_v42 = vpop.f32.mrf.mxu1  ;;  %v2673_v34 = vmax.f32 %v15200_v52, 0.0 }
 0x3e7   :  { %v2892_v45 = vrot.slane %v2884_v14, %v15059_v63  ;;  %v2899_v46 = vrot.slane %v2885_v25, %v15059_v63  ;;  %v2900_v51 = vcombine.low %v2867_v8, %v2883_v22  ;;  %v2901_v53 = vcombine.high %v2867_v8, %v2883_v22 }
 0x3e8   :  { %v2848_v11 = vcombine.low %v2824_v40, %v2840_v27  ;;  %v2849_v2 = vcombine.high %v2824_v40, %v2840_v27  ;;  %v2850_v29 = vcombine.low %v2831_v56, %v2847_v15  ;;  %v15212_v16 = vcombine.high %v2831_v56, %v2847_v15  ;;  %v2543_v20 = vpop.f32.mrf.mxu1 }
 0x3e9   :  { %v2908_v60 = vrot.slane %v2900_v51, %v15059_v63  ;;  %v2915_v0 = vrot.slane %v2901_v53, %v15059_v63  ;;  %v15217_v33 = vadd.f32 %v15043_v50, %v2598_v31  ;;  %v2599_v26 = vmul.f32 %v15046_v58, %v2536_v41 }
 0x3ea   :  { %v3060_v12 = vshrl.u32 %v2848_v11, 16  ;;  %v3068_v6 = vshrl.u32 %v2849_v2, 16  ;;  %v3076_v23 = vshrl.u32 %v2850_v29, 16  ;;  %v2545_v43 = vpop.f32.mrf.mxu1  ;;  %v3084_v57 = vshrl.u32 %v15212_v16, 16 }
 0x3eb   :  { %v2916_v17 = vcombine.low %v2892_v45, %v2908_v60  ;;  %v2917_v37 = vcombine.high %v2892_v45, %v2908_v60  ;;  %v2918_v19 = vcombine.low %v2899_v46, %v2915_v0  ;;  %v2919_v5 = vcombine.high %v2899_v46, %v2915_v0 }
 0x3ec   :  { %v15223_v24 = vadd.f32 %v15049_v49, %v2599_v26  ;;  %v2540_v13 = vadd.f32 %v2539_v30, %v15112_v32  ;;  %v2542_v8 = vadd.f32 %v2541_v42, %v15116_v36  ;;  %v2549_v9 = vpop.f32.mrf.mxu1  ;;  %v2674_v52 = vmax.f32 %v15217_v33, 0.0 }
 0x3ed   :  { %v15227_v38 = vpack.i.b16 %v2916_v17, %v2848_v11  ;;  %v3061_v40 = vshrl.u32 %v2916_v17, 16  ;;  %v15229_v55 = vpack.i.b16 %v2917_v37, %v2849_v2  ;;  %v3069_v4 = vshrl.u32 %v2917_v37, 16 }
 0x3ee   :  { %v15232_v56 = vpack.i.b16 %v2918_v19, %v2850_v29  ;;  %v3077_v14 = vshrl.u32 %v2918_v19, 16  ;;  %v15235_v25 = vpack.i.b16 %v2919_v5, %v15212_v16  ;;  %v2551_v22 = vpop.f32.mrf.mxu1  ;;  %v3085_v27 = vshrl.u32 %v2919_v5, 16 }
 0x3ef   :  { %v2600_v32 = vmul.f32 %v15040_v61, %v2540_v13  ;;  %v2601_v36 = vmul.f32 %v15046_v58, %v2542_v8  ;;  %v2544_v30 = vadd.f32 %v2543_v20, %v15120_v39  ;;  %v2546_v15 = vadd.f32 %v2545_v43, %v15125_v44 }
 0x3f0   :  { %v2550_v31 = vadd.f32 %v2549_v9, %v15128_v47  ;;  %v2552_v41 = vadd.f32 %v2551_v22, %v15131_v48  ;;  %v2553_v42 = vpop.f32.mrf.mxu1  ;;  %v15243_v45 = vpack.i.b16 %v3061_v40, %v3060_v12  ;;  %v15252_v29 = vpack.i.b16 %v3069_v4, %v3068_v6 }
 0x3f1   :  { %v2644_v46 = vadd.f32 %v15043_v50, %v2600_v32  ;;  %v2645_v51 = vadd.f32 %v15049_v49, %v2601_v36  ;;  %v2602_v53 = vmul.f32 %v15040_v61, %v2544_v30  ;;  %v2554_v11 = vadd.f32 %v2553_v42, %v15136_v54 }
 0x3f2   :  { %v2603_v2 = vmul.f32 %v15046_v58, %v2546_v15  ;;  %v2604_v39 = vmul.f32 %v15040_v61, %v2550_v31  ;;  %v2605_v44 = vmul.f32 %v15046_v58, %v2552_v41  ;;  %v2555_v47 = vpop.f32.mrf.mxu1  ;;  %v2675_v48 = vmax.f32 %v15223_v24, 0.0 }
 0x3f3   :  { %v2676_v16 = vmax.f32 %v2644_v46, 0.0  ;;  %v2646_v20 = vadd.f32 %v15043_v50, %v2602_v53  ;;  %v2606_v60 = vmul.f32 %v15040_v61, %v2554_v11  ;;  %v2556_v26 = vadd.f32 %v2555_v47, %v15139_v62 }
 0x3f4   :  { %v15258_v0 = vadd.f32 %v15049_v49, %v2603_v2  ;;  %v2648_v54 = vadd.f32 %v15043_v50, %v2604_v39  ;;  %v2649_v33 = vadd.f32 %v15049_v49, %v2605_v44  ;;  %v2559_v12 = vpop.f32.mrf.mxu1  ;;  %v2677_v43 = vmax.f32 %v2645_v51, 0.0 }
 0x3f5   :  { %v2650_v6 = vadd.f32 %v15043_v50, %v2606_v60  ;;  %v2560_v17 = vadd.f32 %v2559_v12, %v15144_v1  ;;  %v15265_v37 = vpack.i.b16 %v3077_v14, %v3076_v23  ;;  %v2678_v19 = vmax.f32 %v2646_v20, 0.0 }
 0x3f6   :  { %v2680_v5 = vmax.f32 %v2648_v54, 0.0  ;;  %v2681_v24 = vmax.f32 %v2649_v33, 0.0  ;;  %v2607_v13 = vmul.f32 %v15046_v58, %v2556_v26  ;;  %v2561_v8 = vpop.f32.mrf.mxu1  ;;  %v15270_v62 = vpack.i.b16 %v3085_v27, %v3084_v57 }
 0x3f7   :  { %v2682_v9 = vmax.f32 %v2650_v6, 0.0  ;;  %v2608_v40 = vmul.f32 %v15040_v61, %v2560_v17  ;;  %v2562_v4 = vadd.f32 %v2561_v8, %v15159_v59  ;;  %v3120_v14 = vcombine.low %v15227_v38, %v15232_v56 }
 0x3f8   :  { %v11298_v22 = vpack.c.bf16 %v2680_v5, %v2672_v10  ;;  %v11299_v32 = vpack.c.bf16 %v2681_v24, %v2673_v34  ;;  %v2651_v1 = vadd.f32 %v15049_v49, %v2607_v13  ;;  %v2563_v23 = vpop.f32.mrf.mxu1  ;;  %v2679_v59 = vmax.f32 %v15258_v0, 0.0 }
 0x3f9   :  { %v11302_v36 = vpack.c.bf16 %v2682_v9, %v2674_v52  ;;  %v2652_v30 = vadd.f32 %v15043_v50, %v2608_v40  ;;  %v2609_v15 = vmul.f32 %v15046_v58, %v2562_v4  ;;  %v2564_v31 = vadd.f32 %v2563_v23, %v15169_v35 }
 0x3fa   :  { %v2928_v57 = vrot.slane %v11298_v22, %v15052_v21  ;;  %v2683_v28 = vmax.f32 %v2651_v1, 0.0  ;;  %v2565_v10 = vpop.f32.mrf.mxu1  ;;  %v3121_v34 = vcombine.high %v15227_v38, %v15232_v56  ;;  %v2935_v27 = vrot.slane %v11299_v32, %v15052_v21 }
 0x3fb   :  { %v2684_v41 = vmax.f32 %v2652_v30, 0.0  ;;  %v2653_v52 = vadd.f32 %v15049_v49, %v2609_v15  ;;  %v2610_v42 = vmul.f32 %v15040_v61, %v2564_v31  ;;  %v2996_v46 = vrot.slane %v11302_v36, %v15052_v21 }
 0x3fc   :  { %v11303_v51 = vpack.c.bf16 %v2683_v28, %v2675_v48  ;;  %v2566_v35 = vadd.f32 %v2565_v10, %v15174_v3  ;;  %v15290_v53 = vrot.slane %v3120_v14, %v15052_v21  ;;  %v3136_v38 = vcombine.low %v15229_v55, %v15235_v25 }
 0x3fd   :  { %v11300_v11 = vpack.c.bf16 %v2684_v41, %v2676_v16  ;;  %v2685_v2 = vmax.f32 %v2653_v52, 0.0  ;;  %v2654_v39 = vadd.f32 %v15043_v50, %v2610_v42  ;;  %v15297_v44 = vrot.slane %v3121_v34, %v15052_v21 }
 0x3fe   :  { %v2611_v56 = vmul.f32 %v15046_v58, %v2566_v35  ;;  %v3137_v61 = vcombine.high %v15229_v55, %v15235_v25  ;;  %v3188_v3 = vcombine.low %v15243_v45, %v15265_v37  ;;  %v3144_v50 = vrot.slane %v3136_v38, %v15052_v21 }
 0x3ff   :  { %v2944_v47 = vrot.slane %v11300_v11, %v15052_v21  ;;  %v11301_v48 = vpack.c.bf16 %v2685_v2, %v2677_v43  ;;  %v2686_v16 = vmax.f32 %v2654_v39, 0.0  ;;  %v3003_v20 = vrot.slane %v11303_v51, %v15052_v21 }
 0x400   :  { %v2655_v60 = vadd.f32 %v15049_v49, %v2611_v56  ;;  %v15308_v58 = vrot.slane %v3137_v61, %v15052_v21  ;;  %v3189_v0 = vcombine.high %v15243_v45, %v15265_v37  ;;  %v3152_v12 = vcombine.low %v15290_v53, %v3144_v50 }
 0x401   :  { %v2952_v55 = vcombine.low %v2928_v57, %v2944_v47  ;;  %v2953_v25 = vcombine.high %v2928_v57, %v2944_v47  ;;  %v2951_v54 = vrot.slane %v11301_v48, %v15052_v21  ;;  %v11304_v33 = vpack.c.bf16 %v2686_v16, %v2678_v19 }
 0x402   :  { %v2687_v26 = vmax.f32 %v2655_v60, 0.0  ;;  %v3168_v43 = vcombine.low %v15297_v44, %v15308_v58  ;;  %v15317_v6 = vrot.slane %v3188_v3, %v15052_v21  ;;  %v3160_v19 = vrot.slane %v3152_v12, %v15059_v63 }
 0x403   :  { %v2960_v49 = vrot.slane %v2952_v55, %v15059_v63  ;;  %v2967_v17 = vrot.slane %v2953_v25, %v15059_v63  ;;  %v2968_v5 = vcombine.low %v2935_v27, %v2951_v54  ;;  %v2969_v45 = vcombine.high %v2935_v27, %v2951_v54 }
 0x404   :  { %v3012_v37 = vrot.slane %v11304_v33, %v15052_v21  ;;  %v11305_v24 = vpack.c.bf16 %v2687_v26, %v2679_v59  ;;  %v3176_v13 = vrot.slane %v3168_v43, %v15059_v63  ;;  %v3204_v40 = vcombine.low %v15252_v29, %v15270_v62 }
 0x405   :  { %v2976_v8 = vrot.slane %v2968_v5, %v15059_v63  ;;  %v2983_v9 = vrot.slane %v2969_v45, %v15059_v63  ;;  %v3205_v4 = vcombine.high %v15252_v29, %v15270_v62  ;;  %v3203_v29 = vrot.slane %v3189_v0, %v15052_v21 }
 0x406   :  { %v3020_v22 = vcombine.low %v2996_v46, %v3012_v37  ;;  %v3021_v32 = vcombine.high %v2996_v46, %v3012_v37  ;;  %v3019_v1 = vrot.slane %v11305_v24, %v15052_v21  ;;  %v15331_v23 = vcombine.low %v3160_v19, %v3176_v13 }
 0x407   :  { %v2984_v14 = vcombine.low %v2960_v49, %v2976_v8  ;;  %v2985_v36 = vcombine.high %v2960_v49, %v2976_v8  ;;  %v2986_v30 = vcombine.low %v2967_v17, %v2983_v9  ;;  %v2987_v15 = vcombine.high %v2967_v17, %v2983_v9 }
 0x408   :  { %v3028_v31 = vrot.slane %v3020_v22, %v15059_v63  ;;  %v3035_v59 = vrot.slane %v3021_v32, %v15059_v63  ;;  %v3036_v57 = vcombine.low %v3003_v20, %v3019_v1  ;;  %v3037_v28 = vcombine.high %v3003_v20, %v3019_v1 }
 0x409   :  { %v3092_v10 = vshrl.u32 %v2984_v14, 16  ;;  %v3100_v34 = vshrl.u32 %v2985_v36, 16  ;;  %v3108_v27 = vshrl.u32 %v2986_v30, 16  ;;  %v3212_v52 = vrot.slane %v3204_v40, %v15052_v21 }
 0x40a   :  { %v3044_v62 = vrot.slane %v3036_v57, %v15059_v63  ;;  %v3051_v41 = vrot.slane %v3037_v28, %v15059_v63  ;;  %v3219_v42 = vrot.slane %v3205_v4, %v15052_v21  ;;  %v3116_v46 = vshrl.u32 %v2987_v15, 16 }
 0x40b   :  { %v3185_v51 = vcombine.high %v3160_v19, %v3176_v13  ;;  %v3153_v35 = vcombine.high %v15290_v53, %v3144_v50  ;;  %v3169_v11 = vcombine.high %v15297_v44, %v15308_v58  ;;  %v3220_v61 = vcombine.low %v15317_v6, %v3212_v52 }
 0x40c   :  { %v3052_v2 = vcombine.low %v3028_v31, %v3044_v62  ;;  %v3053_v39 = vcombine.high %v3028_v31, %v3044_v62  ;;  %v3054_v38 = vcombine.low %v3035_v59, %v3051_v41  ;;  %v3055_v56 = vcombine.high %v3035_v59, %v3051_v41 }
 0x40d   :  { %v3236_v3 = vcombine.low %v3203_v29, %v3219_v42  ;;  %v3395_v47 = vshrl.u32 %v15331_v23, 16  ;;  %v3167_v48 = vrot.slane %v3153_v35, %v15059_v63  ;;  %v3228_v55 = vrot.slane %v3220_v61, %v15059_v63  ;;  %v12951_v61 = vld [vmem:[#allocation18 + $0x6a4] ss:$16 sps:$4 sm:$0xff]  }
 0x40e   :  { %v15346_v16 = vpack.i.b16 %v3052_v2, %v2984_v14  ;;  %v3093_v20 = vshrl.u32 %v3052_v2, 16  ;;  %v15348_v60 = vpack.i.b16 %v3053_v39, %v2985_v36  ;;  %v3101_v53 = vshrl.u32 %v3053_v39, 16  ;;  %v12948_v2 = vld [vmem:[#allocation18 + $0x4a4] ss:$16 sps:$4 sm:$0xff]   ;;  %v12943_v39 = vld [vmem:[#allocation18 + $0x6c0] ss:$16 sps:$4 sm:$0xff]  }
 0x40f   :  { %v15350_v50 = vpack.i.b16 %v3054_v38, %v2986_v30  ;;  %v3109_v44 = vshrl.u32 %v3054_v38, 16  ;;  %v15352_v58 = vpack.i.b16 %v3055_v56, %v2987_v15  ;;  %v3117_v0 = vshrl.u32 %v3055_v56, 16  ;;  %v12934_v30 = vld [vmem:[#allocation18 + $0x4e0] ss:$16 sps:$4 sm:$0xff]  }
 0x410   :  { %v3244_v25 = vrot.slane %v3236_v3, %v15059_v63  ;;  %v3183_v54 = vrot.slane %v3169_v11, %v15059_v63  ;;  %v3221_v33 = vcombine.high %v15317_v6, %v3212_v52  ;;  %v3237_v26 = vcombine.high %v3203_v29, %v3219_v42  ;;  %v12942_v29 = vld [vmem:[#allocation18 + $0x4c4] ss:$16 sps:$4 sm:$0xff]  }
 0x411   :  { %v15358_v12 = vpack.i.b16 %v3093_v20, %v3092_v10  ;;  %v15360_v43 = vpack.i.b16 %v3101_v53, %v3100_v34  ;;  %v15362_v49 = vpack.i.b16 %v3109_v44, %v3108_v27  ;;  %v15366_v13 = vpack.i.b16 %v3117_v0, %v3116_v46  ;;  %v12937_v27 = vld [vmem:[#allocation18 + $0x6e0] ss:$16 sps:$4 sm:$0xff]   ;;  %v12945_v42 = vld [vmem:[#allocation18 + $0x6c4] ss:$16 sps:$4 sm:$0xff]  }
 0x412   :  { %v3252_v17 = vcombine.low %v3228_v55, %v3244_v25  ;;  %v3253_v5 = vcombine.high %v3228_v55, %v3244_v25  ;;  %v3186_v45 = vcombine.low %v3167_v48, %v3183_v54  ;;  %v3235_v37 = vrot.slane %v3221_v33, %v15059_v63  ;;  %v12946_v20 = vld [vmem:[#allocation18 + $0x4a0] ss:$16 sps:$4 sm:$0xff]   ;;  %v12954_v0 = vld [vmem:[#allocation18 + $0x484] ss:$16 sps:$4 sm:$0xff]  }
 0x413   :  { %v3251_v24 = vrot.slane %v3237_v26, %v15059_v63  ;;  %v3187_v19 = vcombine.high %v3167_v48, %v3183_v54  ;;  %v3256_v6 = vcombine.low %v15346_v16, %v15350_v50  ;;  %v3401_v22 = vshrl.u32 %v3185_v51, 16  ;;  %v12949_v25 = vld [vmem:[#allocation18 + $0x6a0] ss:$16 sps:$4 sm:$0xff]  }
 0x414   :  { %v3394_v8 = vpack.i.b16 %v3252_v17, %v15331_v23  ;;  %v3396_v9 = vshrl.u32 %v3252_v17, 16  ;;  %v15371_v40 = vpack.i.b16 %v3253_v5, %v3185_v51  ;;  %v3402_v4 = vshrl.u32 %v3253_v5, 16  ;;  %v12940_v51 = vld [vmem:[#allocation18 + $0x4c0] ss:$16 sps:$4 sm:$0xff]  }
 0x415   :  { %v3254_v32 = vcombine.low %v3235_v37, %v3251_v24  ;;  %v3255_v1 = vcombine.high %v3235_v37, %v3251_v24  ;;  %v3407_v31 = vshrl.u32 %v3186_v45, 16  ;;  %v3413_v23 = vshrl.u32 %v3187_v19, 16 }
 0x416   :  { %v15373_v14 = vcombine.low %v3394_v8, %v3394_v8  ;;  %v15375_v36 = vcombine.high %v3394_v8, %v3394_v8  ;;  %v3397_v15 = vpack.i.b16 %v3396_v9, %v3395_v47  ;;  %v15377_v59 = vpack.i.b16 %v3402_v4, %v3401_v22  ;;  %v12955_v22 = vld [vmem:[#allocation18 + $0x680] ss:$16 sps:$4 sm:$0xff]  }
 0x417   :  { %v15379_v57 = vpack.i.b16 %v3254_v32, %v3186_v45  ;;  %v3408_v28 = vshrl.u32 %v3254_v32, 16  ;;  %v15386_v62 = vpack.i.b16 %v3255_v1, %v3187_v19  ;;  %v3414_v41 = vshrl.u32 %v3255_v1, 16  ;;  %v12952_v45 = vld [vmem:[#allocation18 + $0x480] ss:$16 sps:$4 sm:$0xff]  }
 0x418   :  { %9734 = vmatprep.mubr.bf16.mxu0 %v15375_v36  ;;  %v15382_v10 = vcombine.low %v3397_v15, %v3397_v15  ;;  %v15384_v34 = vcombine.high %v3397_v15, %v3397_v15  ;;  %v15391_v52 = vcombine.high %v15371_v40, %v15371_v40  ;;  %v15402_v11 = vcombine.high %v15377_v59, %v15377_v59 }
 0x419   :  { %9735 = vmatmul.mubr.bf16.vlgmr.msra.gmra.mxu0 %v15373_v14  ;;  %v15393_v46 = vpack.i.b16 %v3408_v28, %v3407_v31  ;;  %v15396_v35 = vpack.i.b16 %v3414_v41, %v3413_v23  ;;  %v3257_v38 = vcombine.high %v15346_v16, %v15350_v50  ;;  %v3264_v56 = vrot.slane %v3256_v6, %v15052_v21  ;;  %v12960_v6 = vld [vmem:[#allocation18 + $0x464] ss:$16 sps:$4 sm:$0xff]   ;;  %v12958_v41 = vld [vmem:[#allocation18 + $0x460] ss:$16 sps:$4 sm:$0xff]  }
 0x41a   :  { %9785 = vmatpush1.bf16.msra.mxu0 %v12934_v30  ;;  %9775 = vmatprep.mubr.bf16.mxu1 %v15384_v34  ;;  %v3272_v3 = vcombine.low %v15348_v60, %v15352_v58  ;;  %v3273_v47 = vcombine.high %v15348_v60, %v15352_v58  ;;  %v3324_v48 = vcombine.low %v15358_v12, %v15362_v49  ;;  %v12963_v31 = vld [vmem:[#allocation18 + $0x664] ss:$16 sps:$4 sm:$0xff]  }
 0x41b   :  { %9816 = vmatprep.mubr.bf16.mxu0 %v15391_v52  ;;  %9776 = vmatmul.mubr.bf16.vlgmr.msra.gmra.mxu1 %v15382_v10  ;;  %v3271_v53 = vrot.slane %v3257_v38, %v15052_v21  ;;  %v3325_v16 = vcombine.high %v15358_v12, %v15362_v49  ;;  %v3340_v50 = vcombine.low %v15360_v43, %v15366_v13  ;;  %v12957_v12 = vld [vmem:[#allocation18 + $0x684] ss:$16 sps:$4 sm:$0xff]  }
 0x41c   :  { %9826 = vmatpush1.bf16.msra.mxu1 %v12937_v27  ;;  %9786 = vmatprep.subr.bf16.mxu0 %v12942_v29  ;;  %v3341_v44 = vcombine.high %v15360_v43, %v15366_v13  ;;  %v3280_v60 = vrot.slane %v3272_v3, %v15052_v21  ;;  %v3287_v58 = vrot.slane %v3273_v47, %v15052_v21  ;;  %v12966_v38 = vld [vmem:[#allocation18 + $0x444] ss:$16 sps:$4 sm:$0xff]   ;;  %v12961_v3 = vld [vmem:[#allocation18 + $0x660] ss:$16 sps:$4 sm:$0xff]  }
 0x41d   :  { %9857 = vmatprep.mubr.bf16.mxu1 %v15402_v11  ;;  %9827 = vmatprep.subr.bf16.mxu1 %v12945_v42  ;;  %v3332_v55 = vrot.slane %v3324_v48, %v15052_v21  ;;  %v3339_v54 = vrot.slane %v3325_v16, %v15052_v21  ;;  %v3348_v33 = vrot.slane %v3340_v50, %v15052_v21 }
 0x41e   :  { %9787 = vmatpush1.bf16.msra.mxu0 %v12940_v51  ;;  %v3355_v26 = vrot.slane %v3341_v44, %v15052_v21  ;;  %v3288_v49 = vcombine.low %v3264_v56, %v3280_v60  ;;  %v3304_v43 = vcombine.low %v3271_v53, %v3287_v58  ;;  %v3289_v17 = vcombine.high %v3264_v56, %v3280_v60  ;;  %v12964_v60 = vld [vmem:[#allocation18 + $0x440] ss:$16 sps:$4 sm:$0xff]  }
 0x41f   :  { %9788 = vmatprep.subr.bf16.mxu0 %v12948_v2  ;;  %v3305_v5 = vcombine.high %v3271_v53, %v3287_v58  ;;  %v3356_v37 = vcombine.low %v3332_v55, %v3348_v33  ;;  %v3357_v19 = vcombine.high %v3332_v55, %v3348_v33  ;;  %v12969_v53 = vld [vmem:[#allocation18 + $0x644] ss:$16 sps:$4 sm:$0xff]  }
 0x420   :  { %9828 = vmatpush1.bf16.msra.mxu1 %v12943_v39  ;;  %v3372_v24 = vcombine.low %v3339_v54, %v3355_v26  ;;  %v3373_v13 = vcombine.high %v3339_v54, %v3355_v26  ;;  %v3296_v8 = vrot.slane %v3288_v49, %v15059_v63  ;;  %v3312_v9 = vrot.slane %v3304_v43, %v15059_v63  ;;  %v12967_v26 = vld [vmem:[#allocation18 + $0x640] ss:$16 sps:$4 sm:$0xff]   ;;  %v12975_v49 = vld [vmem:[#allocation18 + $0x624] ss:$16 sps:$4 sm:$0xff]  }
 0x421   :  { %9829 = vmatprep.subr.bf16.mxu1 %v12951_v61  ;;  %v3303_v21 = vrot.slane %v3289_v17, %v15059_v63  ;;  %v3319_v4 = vrot.slane %v3305_v5, %v15059_v63  ;;  %v3364_v32 = vrot.slane %v3356_v37, %v15059_v63  ;;  %v3371_v30 = vrot.slane %v3357_v19, %v15059_v63  ;;  %v12970_v43 = vld [vmem:[#allocation18 + $0x420] ss:$16 sps:$4 sm:$0xff]   ;;  %v12978_v5 = vld [vmem:[#allocation18 + $0x404] ss:$16 sps:$4 sm:$0xff]  }
 0x422   :  { %9789 = vmatpush1.bf16.msra.mxu0 %v12946_v20  ;;  %v3380_v1 = vrot.slane %v3372_v24, %v15059_v63  ;;  %v3387_v15 = vrot.slane %v3373_v13, %v15059_v63  ;;  %v3320_v28 = vcombine.low %v3296_v8, %v3312_v9  ;;  %v3321_v23 = vcombine.high %v3296_v8, %v3312_v9  ;;  %v12981_v37 = vld [vmem:[#allocation18 + $0x604] ss:$16 sps:$4 sm:$0xff]   ;;  %v12976_v24 = vld [vmem:[#allocation18 + $0x400] ss:$16 sps:$4 sm:$0xff]  }
 0x423   :  { %9790 = vmatprep.subr.bf16.mxu0 %v12954_v0  ;;  %v3322_v27 = vcombine.low %v3303_v21, %v3319_v4  ;;  %v3323_v29 = vcombine.high %v3303_v21, %v3319_v4  ;;  %v12984_v19 = vld [vmem:[#allocation18 + $0x5e4] ss:$16 sps:$4 sm:$0xff]   ;;  %v12979_v13 = vld [vmem:[#allocation18 + $0x600] ss:$16 sps:$4 sm:$0xff]  }
 0x424   :  { %9830 = vmatpush1.bf16.msra.mxu1 %v12949_v25  ;;  %v3388_v42 = vcombine.low %v3364_v32, %v3380_v1  ;;  %v3389_v51 = vcombine.high %v3364_v32, %v3380_v1  ;;  %v3390_v2 = vcombine.low %v3371_v30, %v3387_v15  ;;  %v3391_v39 = vcombine.high %v3371_v30, %v3387_v15  ;;  %v12972_v25 = vld [vmem:[#allocation18 + $0x424] ss:$16 sps:$4 sm:$0xff]   ;;  %v12982_v8 = vld [vmem:[#allocation18 + $0x5e0] ss:$16 sps:$4 sm:$0xff]  }
 0x425   :  { %9831 = vmatprep.subr.bf16.mxu1 %v12957_v12  ;;  %v3419_v56 = vshrl.u32 %v3320_v28, 16  ;;  %v3425_v61 = vshrl.u32 %v3321_v23, 16  ;;  %v3431_v50 = vshrl.u32 %v3322_v27, 16  ;;  %v3437_v12 = vshrl.u32 %v3323_v29, 16  ;;  %v12990_v9 = vld [vmem:[#allocation18 + $0x5c4] ss:$16 sps:$4 sm:$0xff]  }
 0x426   :  { %9791 = vmatpush1.bf16.msra.mxu0 %v12952_v45  ;;  %v15435_v47 = vpack.i.b16 %v3388_v42, %v3320_v28  ;;  %v3420_v63 = vshrl.u32 %v3388_v42, 16  ;;  %v15437_v48 = vpack.i.b16 %v3389_v51, %v3321_v23  ;;  %v3426_v20 = vshrl.u32 %v3389_v51, 16  ;;  %v12973_v45 = vld [vmem:[#allocation18 + $0x620] ss:$16 sps:$4 sm:$0xff]   ;;  %v12993_v4 = vld [vmem:[#allocation18 + $0x7c4] ss:$16 sps:$4 sm:$0xff]  }
 0x427   :  { %9792 = vmatprep.subr.bf16.mxu0 %v12960_v6  ;;  %v15439_v16 = vpack.i.b16 %v3390_v2, %v3322_v27  ;;  %v3432_v44 = vshrl.u32 %v3390_v2, 16  ;;  %v15441_v0 = vpack.i.b16 %v3391_v39, %v3323_v29  ;;  %v3438_v55 = vshrl.u32 %v3391_v39, 16  ;;  %v12987_v6 = vld [vmem:[#allocation18 + $0x7e4] ss:$16 sps:$4 sm:$0xff]   ;;  %v12985_v21 = vld [vmem:[#allocation18 + $0x7e0] ss:$16 sps:$4 sm:$0xff]  }
 0x428   :  { %9832 = vmatpush1.bf16.msra.mxu1 %v12955_v22  ;;  %v15443_v58 = vpack.i.b16 %v3420_v63, %v3419_v56  ;;  %v15445_v54 = vpack.i.b16 %v3426_v20, %v3425_v61  ;;  %v12988_v22 = vld [vmem:[#allocation18 + $0x5c0] ss:$16 sps:$4 sm:$0xff]   ;;  %v12996_v32 = vld [vmem:[#allocation18 + $0x5a4] ss:$16 sps:$4 sm:$0xff]  }
 0x429   :  { %9833 = vmatprep.subr.bf16.mxu1 %v12963_v31  ;;  %v15447_v33 = vpack.i.b16 %v3432_v44, %v3431_v50  ;;  %v15449_v17 = vpack.i.b16 %v3438_v55, %v3437_v12  ;;  %v12991_v1 = vld [vmem:[#allocation18 + $0x7c0] ss:$16 sps:$4 sm:$0xff]   ;;  %v12999_v30 = vld [vmem:[#allocation18 + $0x7a4] ss:$16 sps:$4 sm:$0xff]  }
 0x42a   :  { %9793 = vmatpush1.bf16.msra.mxu0 %v12958_v41  ;;  %v12994_v15 = vld [vmem:[#allocation18 + $0x5a0] ss:$16 sps:$4 sm:$0xff]   ;;  %v13002_v31 = vld [vmem:[#allocation18 + $0x584] ss:$16 sps:$4 sm:$0xff]  }
 0x42b   :  { %9794 = vmatprep.subr.bf16.mxu0 %v12966_v38  ;;  %v12997_v28 = vld [vmem:[#allocation18 + $0x7a0] ss:$16 sps:$4 sm:$0xff]   ;;  %v13005_v23 = vld [vmem:[#allocation18 + $0x784] ss:$16 sps:$4 sm:$0xff]  }
 0x42c   :  { %9834 = vmatpush1.bf16.msra.mxu1 %v12961_v3  ;;  %v13000_v27 = vld [vmem:[#allocation18 + $0x580] ss:$16 sps:$4 sm:$0xff]   ;;  %v13008_v29 = vld [vmem:[#allocation18 + $0x564] ss:$16 sps:$4 sm:$0xff]  }
 0x42d   :  { %9835 = vmatprep.subr.bf16.mxu1 %v12969_v53  ;;  %v13003_v41 = vld [vmem:[#allocation18 + $0x780] ss:$16 sps:$4 sm:$0xff]   ;;  %v13011_v42 = vld [vmem:[#allocation18 + $0x764] ss:$16 sps:$4 sm:$0xff]  }
 0x42e   :  { %9795 = vmatpush1.bf16.msra.mxu0 %v12964_v60  ;;  %v13006_v51 = vld [vmem:[#allocation18 + $0x560] ss:$16 sps:$4 sm:$0xff]   ;;  %v13014_v2 = vld [vmem:[#allocation18 + $0x544] ss:$16 sps:$4 sm:$0xff]  }
 0x42f   :  { %9796 = vmatprep.subr.bf16.mxu0 %v12972_v25  ;;  %v13009_v39 = vld [vmem:[#allocation18 + $0x760] ss:$16 sps:$4 sm:$0xff]   ;;  %v13017_v38 = vld [vmem:[#allocation18 + $0x744] ss:$16 sps:$4 sm:$0xff]  }
 0x430   :  { %9836 = vmatpush1.bf16.msra.mxu1 %v12967_v26  ;;  %v13012_v56 = vld [vmem:[#allocation18 + $0x540] ss:$16 sps:$4 sm:$0xff]   ;;  %v13020_v61 = vld [vmem:[#allocation18 + $0x524] ss:$16 sps:$4 sm:$0xff]  }
 0x431   :  { %9837 = vmatprep.subr.bf16.mxu1 %v12975_v49  ;;  %v13015_v3 = vld [vmem:[#allocation18 + $0x740] ss:$16 sps:$4 sm:$0xff]   ;;  %v13023_v63 = vld [vmem:[#allocation18 + $0x724] ss:$16 sps:$4 sm:$0xff]   ;;  %v15453_v49 = vcombine.low %v15371_v40, %v15371_v40  ;;  %v15467_v40 = vcombine.high %v15393_v46, %v15393_v46 }
 0x432   :  { %9797 = vmatpush1.bf16.msra.mxu0 %v12970_v43  ;;  %v13018_v20 = vld [vmem:[#allocation18 + $0x520] ss:$16 sps:$4 sm:$0xff]   ;;  %v13026_v53 = vld [vmem:[#allocation18 + $0x504] ss:$16 sps:$4 sm:$0xff]  }
 0x433   :  { %9798 = vmatprep.subr.bf16.mxu0 %v12978_v5  ;;  %v13021_v50 = vld [vmem:[#allocation18 + $0x720] ss:$16 sps:$4 sm:$0xff]   ;;  %v13029_v44 = vld [vmem:[#allocation18 + $0x704] ss:$16 sps:$4 sm:$0xff]   ;;  %v15457_v5 = vcombine.high %v15379_v57, %v15379_v57 }
 0x434   :  { %9838 = vmatpush1.bf16.msra.mxu1 %v12973_v45  ;;  %v13024_v60 = vld [vmem:[#allocation18 + $0x500] ss:$16 sps:$4 sm:$0xff]   ;;  %v13032_v55 = vld [vmem:[#allocation18 + $0x8e4] ss:$16 sps:$4 sm:$0xff]  }
 0x435   :  { %9839 = vmatprep.subr.bf16.mxu1 %v12981_v37  ;;  %v13027_v25 = vld [vmem:[#allocation18 + $0x700] ss:$16 sps:$4 sm:$0xff]   ;;  %v13035_v26 = vld [vmem:[#allocation18 + $0xae4] ss:$16 sps:$4 sm:$0xff]   ;;  %v15462_v37 = vcombine.low %v15377_v59, %v15377_v59 }
 0x436   :  { %9799 = vmatpush1.bf16.msra.mxu0 %v12976_v24  ;;  %v13030_v12 = vld [vmem:[#allocation18 + $0x8e0] ss:$16 sps:$4 sm:$0xff]   ;;  %v13038_v43 = vld [vmem:[#allocation18 + $0x8c4] ss:$16 sps:$4 sm:$0xff]  }
 0x437   :  { %9800 = vmatprep.subr.bf16.mxu0 %v12984_v19  ;;  %v13033_v45 = vld [vmem:[#allocation18 + $0xae0] ss:$16 sps:$4 sm:$0xff]   ;;  %v13041_v24 = vld [vmem:[#allocation18 + $0xac4] ss:$16 sps:$4 sm:$0xff]  }
 0x438   :  { %9840 = vmatpush1.bf16.msra.mxu1 %v12979_v13  ;;  %v13036_v19 = vld [vmem:[#allocation18 + $0x8c0] ss:$16 sps:$4 sm:$0xff]   ;;  %v13044_v13 = vld [vmem:[#allocation18 + $0x8a4] ss:$16 sps:$4 sm:$0xff]  }
 0x439   :  { %9841 = vmatprep.subr.bf16.mxu1 %v12987_v6  ;;  %v13039_v6 = vld [vmem:[#allocation18 + $0xac0] ss:$16 sps:$4 sm:$0xff]   ;;  %v13047_v59 = vld [vmem:[#allocation18 + $0xaa4] ss:$16 sps:$4 sm:$0xff]  }
 0x43a   :  { %9801 = vmatpush2.bf16.msra.mxu0 %v12982_v8  ;;  %v13042_v8 = vld [vmem:[#allocation18 + $0x8a0] ss:$16 sps:$4 sm:$0xff]  }
 0x43b   :  { %9802 = vmatprep.subr.bf16.mxu0 %v12990_v9  ;;  %v13050_v9 = vld [vmem:[#allocation18 + $0x884] ss:$16 sps:$4 sm:$0xff]  }
 0x43c   :  { %9842 = vmatpush2.bf16.msra.mxu1 %v12985_v21  ;;  %v13045_v21 = vld [vmem:[#allocation18 + $0xaa0] ss:$16 sps:$4 sm:$0xff]  }
 0x43d   :  { %9843 = vmatprep.subr.bf16.mxu1 %v12993_v4  ;;  %v13053_v4 = vld [vmem:[#allocation18 + $0xa84] ss:$16 sps:$4 sm:$0xff]  }
 0x43e   :  { %9803 = vmatpush2.bf16.msra.mxu0 %v12988_v22  ;;  %v13048_v22 = vld [vmem:[#allocation18 + $0x880] ss:$16 sps:$4 sm:$0xff]  }
 0x43f   :  { %9804 = vmatprep.subr.bf16.mxu0 %v12996_v32  ;;  %v13056_v32 = vld [vmem:[#allocation18 + $0x864] ss:$16 sps:$4 sm:$0xff]  }
 0x440   :  { %9844 = vmatpush2.bf16.msra.mxu1 %v12991_v1  ;;  %v13051_v1 = vld [vmem:[#allocation18 + $0xa80] ss:$16 sps:$4 sm:$0xff]  }
 0x441   :  { %9845 = vmatprep.subr.bf16.mxu1 %v12999_v30  ;;  %v13059_v30 = vld [vmem:[#allocation18 + $0xa64] ss:$16 sps:$4 sm:$0xff]  }
 0x442   :  { %9805 = vmatpush2.bf16.msra.mxu0 %v12994_v15  ;;  %v13054_v15 = vld [vmem:[#allocation18 + $0x860] ss:$16 sps:$4 sm:$0xff]  }
 0x443   :  { %9806 = vmatprep.subr.bf16.mxu0 %v13002_v31  ;;  %v13062_v31 = vld [vmem:[#allocation18 + $0x844] ss:$16 sps:$4 sm:$0xff]  }
 0x444   :  { %9846 = vmatpush2.bf16.msra.mxu1 %v12997_v28  ;;  %v13057_v28 = vld [vmem:[#allocation18 + $0xa60] ss:$16 sps:$4 sm:$0xff]  }
 0x445   :  { %9847 = vmatprep.subr.bf16.mxu1 %v13005_v23  ;;  %v13065_v23 = vld [vmem:[#allocation18 + $0xa44] ss:$16 sps:$4 sm:$0xff]  }
 0x446   :  { %9807 = vmatpush2.bf16.msra.mxu0 %v13000_v27  ;;  %v13060_v27 = vld [vmem:[#allocation18 + $0x840] ss:$16 sps:$4 sm:$0xff]  }
 0x447   :  { %9808 = vmatprep.subr.bf16.mxu0 %v13008_v29  ;;  %v13068_v29 = vld [vmem:[#allocation18 + $0x824] ss:$16 sps:$4 sm:$0xff]  }
 0x448   :  { %9848 = vmatpush2.bf16.msra.mxu1 %v13003_v41  ;;  %v13063_v41 = vld [vmem:[#allocation18 + $0xa40] ss:$16 sps:$4 sm:$0xff]  }
 0x449   :  { %9849 = vmatprep.subr.bf16.mxu1 %v13011_v42  ;;  %v13071_v42 = vld [vmem:[#allocation18 + $0xa24] ss:$16 sps:$4 sm:$0xff]  }
 0x44a   :  { %9809 = vmatpush2.bf16.msra.mxu0 %v13006_v51  ;;  %v13066_v51 = vld [vmem:[#allocation18 + $0x820] ss:$16 sps:$4 sm:$0xff]  }
 0x44b   :  { %9810 = vmatprep.subr.bf16.mxu0 %v13014_v2  ;;  %v13074_v2 = vld [vmem:[#allocation18 + $0x804] ss:$16 sps:$4 sm:$0xff]  }
 0x44c   :  { %9850 = vmatpush2.bf16.msra.mxu1 %v13009_v39  ;;  %v13069_v39 = vld [vmem:[#allocation18 + $0xa20] ss:$16 sps:$4 sm:$0xff]  }
 0x44d   :  { %9851 = vmatprep.subr.bf16.mxu1 %v13017_v38  ;;  %v13077_v38 = vld [vmem:[#allocation18 + $0xa04] ss:$16 sps:$4 sm:$0xff]  }
 0x44e   :  { %9811 = vmatpush2.bf16.msra.mxu0 %v13012_v56  ;;  %v13072_v56 = vld [vmem:[#allocation18 + $0x800] ss:$16 sps:$4 sm:$0xff]  }
 0x44f   :  { %9812 = vmatprep.subr.bf16.mxu0 %v13020_v61  ;;  %v13080_v61 = vld [vmem:[#allocation18 + $0x9e4] ss:$16 sps:$4 sm:$0xff]  }
 0x450   :  { %9852 = vmatpush2.bf16.msra.mxu1 %v13015_v3  ;;  %v13075_v3 = vld [vmem:[#allocation18 + $0xa00] ss:$16 sps:$4 sm:$0xff]  }
 0x451   :  { %9853 = vmatprep.subr.bf16.mxu1 %v13023_v63  ;;  %v13083_v63 = vld [vmem:[#allocation18 + $0xbe4] ss:$16 sps:$4 sm:$0xff]  }
 0x452   :  { %9813 = vmatpush2.bf16.msra.mxu0 %v13018_v20  ;;  %v13078_v20 = vld [vmem:[#allocation18 + $0x9e0] ss:$16 sps:$4 sm:$0xff]  }
 0x453   :  { %9814 = vmatprep.subr.bf16.mxu0 %v13026_v53  ;;  %v13086_v53 = vld [vmem:[#allocation18 + $0x9c4] ss:$16 sps:$4 sm:$0xff]  }
 0x454   :  { %9854 = vmatpush2.bf16.msra.mxu1 %v13021_v50  ;;  %v13081_v50 = vld [vmem:[#allocation18 + $0xbe0] ss:$16 sps:$4 sm:$0xff]  }
 0x455   :  { %9855 = vmatprep.subr.bf16.mxu1 %v13029_v44  ;;  %v13089_v44 = vld [vmem:[#allocation18 + $0xbc4] ss:$16 sps:$4 sm:$0xff]  }
 0x456   :  { %9815 = vmatpush2.bf16.msra.mxu0 %v13024_v60  ;;  %v13084_v60 = vld [vmem:[#allocation18 + $0x9c0] ss:$16 sps:$4 sm:$0xff]  }
 0x457   :  { %9866 = vmatprep.subr.bf16.mxu0 %v13032_v55  ;;  %v13092_v55 = vld [vmem:[#allocation18 + $0x9a4] ss:$16 sps:$4 sm:$0xff]  }
 0x458   :  { %9856 = vmatpush2.bf16.msra.mxu1 %v13027_v25  ;;  %v13087_v25 = vld [vmem:[#allocation18 + $0xbc0] ss:$16 sps:$4 sm:$0xff]  }
 0x459   :  { %9817 = vmatmul.mubr.bf16.vlgmr.msra.gmra.mxu0 %v15453_v49  ;;  %9907 = vmatprep.subr.bf16.mxu1 %v13035_v26  ;;  %v13095_v26 = vld [vmem:[#allocation18 + $0xba4] ss:$16 sps:$4 sm:$0xff]  }
 0x45a   :  { %9867 = vmatpush1.bf16.msra.mxu0 %v13030_v12  ;;  %9898 = vmatprep.mubr.bf16.mxu0 %v15457_v5  ;;  %v13090_v12 = vld [vmem:[#allocation18 + $0x9a0] ss:$16 sps:$4 sm:$0xff]  }
 0x45b   :  { %9858 = vmatmul.mubr.bf16.vlgmr.msra.gmra.mxu1 %v15462_v37  ;;  %9868 = vmatprep.subr.bf16.mxu0 %v13038_v43  ;;  %v13098_v43 = vld [vmem:[#allocation18 + $0x984] ss:$16 sps:$4 sm:$0xff]  }
 0x45c   :  { %9908 = vmatpush1.bf16.msra.mxu1 %v13033_v45  ;;  %9939 = vmatprep.mubr.bf16.mxu1 %v15467_v40  ;;  %v13093_v45 = vld [vmem:[#allocation18 + $0xba0] ss:$16 sps:$4 sm:$0xff]  }
 0x45d   :  { %9909 = vmatprep.subr.bf16.mxu1 %v13041_v24  ;;  %v13101_v24 = vld [vmem:[#allocation18 + $0xb84] ss:$16 sps:$4 sm:$0xff]  }
 0x45e   :  { %9869 = vmatpush1.bf16.msra.mxu0 %v13036_v19  ;;  %v13096_v19 = vld [vmem:[#allocation18 + $0x980] ss:$16 sps:$4 sm:$0xff]  }
 0x45f   :  { %9870 = vmatprep.subr.bf16.mxu0 %v13044_v13  ;;  %v13104_v13 = vld [vmem:[#allocation18 + $0x964] ss:$16 sps:$4 sm:$0xff]  }
 0x460   :  { %9910 = vmatpush1.bf16.msra.mxu1 %v13039_v6  ;;  %v13099_v6 = vld [vmem:[#allocation18 + $0xb80] ss:$16 sps:$4 sm:$0xff]  }
 0x461   :  { %9911 = vmatprep.subr.bf16.mxu1 %v13047_v59  ;;  %v13107_v59 = vld [vmem:[#allocation18 + $0xb64] ss:$16 sps:$4 sm:$0xff]  }
 0x462   :  { %9871 = vmatpush1.bf16.msra.mxu0 %v13042_v8  ;;  %v13102_v8 = vld [vmem:[#allocation18 + $0x960] ss:$16 sps:$4 sm:$0xff]  }
 0x463   :  { %9872 = vmatprep.subr.bf16.mxu0 %v13050_v9  ;;  %v13110_v9 = vld [vmem:[#allocation18 + $0x944] ss:$16 sps:$4 sm:$0xff]  }
 0x464   :  { %9912 = vmatpush1.bf16.msra.mxu1 %v13045_v21  ;;  %v13105_v21 = vld [vmem:[#allocation18 + $0xb60] ss:$16 sps:$4 sm:$0xff]  }
 0x465   :  { %9913 = vmatprep.subr.bf16.mxu1 %v13053_v4  ;;  %v13113_v4 = vld [vmem:[#allocation18 + $0xb44] ss:$16 sps:$4 sm:$0xff]  }
 0x466   :  { %9873 = vmatpush1.bf16.msra.mxu0 %v13048_v22  ;;  %v13108_v22 = vld [vmem:[#allocation18 + $0x940] ss:$16 sps:$4 sm:$0xff]  }
 0x467   :  { %9874 = vmatprep.subr.bf16.mxu0 %v13056_v32  ;;  %v13116_v32 = vld [vmem:[#allocation18 + $0x924] ss:$16 sps:$4 sm:$0xff]  }
 0x468   :  { %9914 = vmatpush1.bf16.msra.mxu1 %v13051_v1  ;;  %v13111_v1 = vld [vmem:[#allocation18 + $0xb40] ss:$16 sps:$4 sm:$0xff]  }
 0x469   :  { %9915 = vmatprep.subr.bf16.mxu1 %v13059_v30  ;;  %v13119_v30 = vld [vmem:[#allocation18 + $0xb24] ss:$16 sps:$4 sm:$0xff]  }
 0x46a   :  { %9875 = vmatpush1.bf16.msra.mxu0 %v13054_v15  ;;  %v13114_v15 = vld [vmem:[#allocation18 + $0x920] ss:$16 sps:$4 sm:$0xff]  }
 0x46b   :  { %9876 = vmatprep.subr.bf16.mxu0 %v13062_v31  ;;  %v13122_v31 = vld [vmem:[#allocation18 + $0x904] ss:$16 sps:$4 sm:$0xff]  }
 0x46c   :  { %9916 = vmatpush1.bf16.msra.mxu1 %v13057_v28  ;;  %v13117_v28 = vld [vmem:[#allocation18 + $0xb20] ss:$16 sps:$4 sm:$0xff]  }
 0x46d   :  { %9917 = vmatprep.subr.bf16.mxu1 %v13065_v23  ;;  %v13125_v23 = vld [vmem:[#allocation18 + $0xb04] ss:$16 sps:$4 sm:$0xff]  }
 0x46e   :  { %9877 = vmatpush1.bf16.msra.mxu0 %v13060_v27  ;;  %v13120_v27 = vld [vmem:[#allocation18 + $0x900] ss:$16 sps:$4 sm:$0xff]  }
 0x46f   :  { %9878 = vmatprep.subr.bf16.mxu0 %v13068_v29  ;;  %v13128_v29 = vld [vmem:[#allocation18 + $0xce4] ss:$16 sps:$4 sm:$0xff]  }
 0x470   :  { %9918 = vmatpush1.bf16.msra.mxu1 %v13063_v41  ;;  %v13123_v41 = vld [vmem:[#allocation18 + $0xb00] ss:$16 sps:$4 sm:$0xff]  }
 0x471   :  { %9919 = vmatprep.subr.bf16.mxu1 %v13071_v42  ;;  %v13131_v42 = vld [vmem:[#allocation18 + $0xee4] ss:$16 sps:$4 sm:$0xff]  }
 0x472   :  { %9879 = vmatpush1.bf16.msra.mxu0 %v13066_v51  ;;  %v13126_v51 = vld [vmem:[#allocation18 + $0xce0] ss:$16 sps:$4 sm:$0xff]  }
 0x473   :  { %9880 = vmatprep.subr.bf16.mxu0 %v13074_v2  ;;  %v15473_v2 = vcombine.low %v15379_v57, %v15379_v57  ;;  %v15487_v57 = vcombine.high %v15396_v35, %v15396_v35 }
 0x474   :  { %9920 = vmatpush1.bf16.msra.mxu1 %v13069_v39  ;;  %v13134_v39 = vld [vmem:[#allocation18 + $0xcc4] ss:$16 sps:$4 sm:$0xff]  }
 0x475   :  { %9921 = vmatprep.subr.bf16.mxu1 %v13077_v38  ;;  %v15477_v38 = vcombine.high %v15386_v62, %v15386_v62 }
 0x476   :  { %9881 = vmatpush1.bf16.msra.mxu0 %v13072_v56  ;;  %v13129_v56 = vld [vmem:[#allocation18 + $0xee0] ss:$16 sps:$4 sm:$0xff]  }
 0x477   :  { %9882 = vmatprep.subr.bf16.mxu0 %v13080_v61  ;;  %v15482_v61 = vcombine.low %v15393_v46, %v15393_v46  ;;  %v13143_v46 = vld [vmem:[#allocation18 + $0xea4] ss:$16 sps:$4 sm:$0xff]  }
 0x478   :  { %9922 = vmatpush1.bf16.msra.mxu1 %v13075_v3  ;;  %v13137_v3 = vld [vmem:[#allocation18 + $0xec4] ss:$16 sps:$4 sm:$0xff]  }
 0x479   :  { %9923 = vmatprep.subr.bf16.mxu1 %v13083_v63  ;;  %v13132_v63 = vld [vmem:[#allocation18 + $0xcc0] ss:$16 sps:$4 sm:$0xff]  }
 0x47a   :  { %9883 = vmatpush2.bf16.msra.mxu0 %v13078_v20  ;;  %v13140_v20 = vld [vmem:[#allocation18 + $0xca4] ss:$16 sps:$4 sm:$0xff]  }
 0x47b   :  { %9884 = vmatprep.subr.bf16.mxu0 %v13086_v53  ;;  %v13135_v53 = vld [vmem:[#allocation18 + $0xec0] ss:$16 sps:$4 sm:$0xff]  }
 0x47c   :  { %9924 = vmatpush2.bf16.msra.mxu1 %v13081_v50  ;;  %v13138_v50 = vld [vmem:[#allocation18 + $0xca0] ss:$16 sps:$4 sm:$0xff]  }
 0x47d   :  { %9925 = vmatprep.subr.bf16.mxu1 %v13089_v44  ;;  %v13146_v44 = vld [vmem:[#allocation18 + $0xc84] ss:$16 sps:$4 sm:$0xff]  }
 0x47e   :  { %9885 = vmatpush2.bf16.msra.mxu0 %v13084_v60  ;;  %v13141_v60 = vld [vmem:[#allocation18 + $0xea0] ss:$16 sps:$4 sm:$0xff]  }
 0x47f   :  { %9886 = vmatprep.subr.bf16.mxu0 %v13092_v55  ;;  %v13149_v55 = vld [vmem:[#allocation18 + $0xe84] ss:$16 sps:$4 sm:$0xff]  }
 0x480   :  { %9926 = vmatpush2.bf16.msra.mxu1 %v13087_v25  ;;  %v13144_v25 = vld [vmem:[#allocation18 + $0xc80] ss:$16 sps:$4 sm:$0xff]  }
 0x481   :  { %9927 = vmatprep.subr.bf16.mxu1 %v13095_v26  ;;  %v13152_v26 = vld [vmem:[#allocation18 + $0xc64] ss:$16 sps:$4 sm:$0xff]  }
 0x482   :  { %9887 = vmatpush2.bf16.msra.mxu0 %v13090_v12  ;;  %v13147_v12 = vld [vmem:[#allocation18 + $0xe80] ss:$16 sps:$4 sm:$0xff]  }
 0x483   :  { %9888 = vmatprep.subr.bf16.mxu0 %v13098_v43  ;;  %v13155_v43 = vld [vmem:[#allocation18 + $0xe64] ss:$16 sps:$4 sm:$0xff]  }
 0x484   :  { %9928 = vmatpush2.bf16.msra.mxu1 %v13093_v45  ;;  %v13150_v45 = vld [vmem:[#allocation18 + $0xc60] ss:$16 sps:$4 sm:$0xff]  }
 0x485   :  { %9929 = vmatprep.subr.bf16.mxu1 %v13101_v24  ;;  %v13158_v24 = vld [vmem:[#allocation18 + $0xc44] ss:$16 sps:$4 sm:$0xff]  }
 0x486   :  { %9889 = vmatpush2.bf16.msra.mxu0 %v13096_v19  ;;  %v13153_v19 = vld [vmem:[#allocation18 + $0xe60] ss:$16 sps:$4 sm:$0xff]  }
 0x487   :  { %9890 = vmatprep.subr.bf16.mxu0 %v13104_v13  ;;  %v13161_v13 = vld [vmem:[#allocation18 + $0xe44] ss:$16 sps:$4 sm:$0xff]  }
 0x488   :  { %9930 = vmatpush2.bf16.msra.mxu1 %v13099_v6  ;;  %v13156_v6 = vld [vmem:[#allocation18 + $0xc40] ss:$16 sps:$4 sm:$0xff]  }
 0x489   :  { %9931 = vmatprep.subr.bf16.mxu1 %v13107_v59  ;;  %v13164_v59 = vld [vmem:[#allocation18 + $0xc24] ss:$16 sps:$4 sm:$0xff]  }
 0x48a   :  { %9891 = vmatpush2.bf16.msra.mxu0 %v13102_v8  ;;  %v13159_v8 = vld [vmem:[#allocation18 + $0xe40] ss:$16 sps:$4 sm:$0xff]  }
 0x48b   :  { %9892 = vmatprep.subr.bf16.mxu0 %v13110_v9  ;;  %v13167_v9 = vld [vmem:[#allocation18 + $0xe24] ss:$16 sps:$4 sm:$0xff]  }
 0x48c   :  { %9932 = vmatpush2.bf16.msra.mxu1 %v13105_v21  ;;  %v13162_v21 = vld [vmem:[#allocation18 + $0xc20] ss:$16 sps:$4 sm:$0xff]  }
 0x48d   :  { %9933 = vmatprep.subr.bf16.mxu1 %v13113_v4  ;;  %v13170_v4 = vld [vmem:[#allocation18 + $0xc04] ss:$16 sps:$4 sm:$0xff]  }
 0x48e   :  { %9893 = vmatpush2.bf16.msra.mxu0 %v13108_v22  ;;  %v13165_v22 = vld [vmem:[#allocation18 + $0xe20] ss:$16 sps:$4 sm:$0xff]  }
 0x48f   :  { %9894 = vmatprep.subr.bf16.mxu0 %v13116_v32  ;;  %v13173_v32 = vld [vmem:[#allocation18 + $0xe04] ss:$16 sps:$4 sm:$0xff]  }
 0x490   :  { %9934 = vmatpush2.bf16.msra.mxu1 %v13111_v1  ;;  %v13168_v1 = vld [vmem:[#allocation18 + $0xc00] ss:$16 sps:$4 sm:$0xff]  }
 0x491   :  { %9935 = vmatprep.subr.bf16.mxu1 %v13119_v30  ;;  %v13176_v30 = vld [vmem:[#allocation18 + $0xde4] ss:$16 sps:$4 sm:$0xff]  }
 0x492   :  { %9895 = vmatpush2.bf16.msra.mxu0 %v13114_v15  ;;  %v13171_v15 = vld [vmem:[#allocation18 + $0xe00] ss:$16 sps:$4 sm:$0xff]  }
 0x493   :  { %9896 = vmatprep.subr.bf16.mxu0 %v13122_v31  ;;  %v13179_v31 = vld [vmem:[#allocation18 + $0xfe4] ss:$16 sps:$4 sm:$0xff]  }
 0x494   :  { %9936 = vmatpush2.bf16.msra.mxu1 %v13117_v28  ;;  %v13174_v28 = vld [vmem:[#allocation18 + $0xde0] ss:$16 sps:$4 sm:$0xff]  }
 0x495   :  { %9937 = vmatprep.subr.bf16.mxu1 %v13125_v23  ;;  %v13182_v23 = vld [vmem:[#allocation18 + $0xdc4] ss:$16 sps:$4 sm:$0xff]  }
 0x496   :  { %9897 = vmatpush2.bf16.msra.mxu0 %v13120_v27  ;;  %v13177_v27 = vld [vmem:[#allocation18 + $0xfe0] ss:$16 sps:$4 sm:$0xff]  }
 0x497   :  { %9948 = vmatprep.subr.bf16.mxu0 %v13128_v29  ;;  %v13185_v29 = vld [vmem:[#allocation18 + $0xfc4] ss:$16 sps:$4 sm:$0xff]  }
 0x498   :  { %9938 = vmatpush2.bf16.msra.mxu1 %v13123_v41  ;;  %v13180_v41 = vld [vmem:[#allocation18 + $0xdc0] ss:$16 sps:$4 sm:$0xff]  }
 0x499   :  { %9899 = vmatmul.mubr.bf16.vlgmr.msra.gmra.mxu0 %v15473_v2  ;;  %9989 = vmatprep.subr.bf16.mxu1 %v13131_v42  ;;  %v13188_v42 = vld [vmem:[#allocation18 + $0xda4] ss:$16 sps:$4 sm:$0xff]  }
 0x49a   :  { %9949 = vmatpush1.bf16.msra.mxu0 %v13126_v51  ;;  %9980 = vmatprep.mubr.bf16.mxu0 %v15477_v38  ;;  %v13183_v51 = vld [vmem:[#allocation18 + $0xfc0] ss:$16 sps:$4 sm:$0xff]  }
 0x49b   :  { %9940 = vmatmul.mubr.bf16.vlgmr.msra.gmra.mxu1 %v15482_v61  ;;  %9950 = vmatprep.subr.bf16.mxu0 %v13134_v39  ;;  %v13191_v39 = vld [vmem:[#allocation18 + $0xfa4] ss:$16 sps:$4 sm:$0xff]  }
 0x49c   :  { %9990 = vmatpush1.bf16.msra.mxu1 %v13129_v56  ;;  %10021 = vmatprep.mubr.bf16.mxu1 %v15487_v57  ;;  %v13186_v56 = vld [vmem:[#allocation18 + $0xda0] ss:$16 sps:$4 sm:$0xff]  }
 0x49d   :  { %9991 = vmatprep.subr.bf16.mxu1 %v13137_v3  ;;  %v13194_v3 = vld [vmem:[#allocation18 + $0xd84] ss:$16 sps:$4 sm:$0xff]  }
 0x49e   :  { %9951 = vmatpush1.bf16.msra.mxu0 %v13132_v63  ;;  %v13189_v63 = vld [vmem:[#allocation18 + $0xfa0] ss:$16 sps:$4 sm:$0xff]  }
 0x49f   :  { %9952 = vmatprep.subr.bf16.mxu0 %v13140_v20  ;;  %v13197_v20 = vld [vmem:[#allocation18 + $0xf84] ss:$16 sps:$4 sm:$0xff]  }
 0x4a0   :  { %9992 = vmatpush1.bf16.msra.mxu1 %v13135_v53  ;;  %v13192_v53 = vld [vmem:[#allocation18 + $0xd80] ss:$16 sps:$4 sm:$0xff]  }
 0x4a1   :  { %9993 = vmatprep.subr.bf16.mxu1 %v13143_v46  ;;  %v13200_v46 = vld [vmem:[#allocation18 + $0xd64] ss:$16 sps:$4 sm:$0xff]  }
 0x4a2   :  { %9953 = vmatpush1.bf16.msra.mxu0 %v13138_v50  ;;  %v13195_v50 = vld [vmem:[#allocation18 + $0xf80] ss:$16 sps:$4 sm:$0xff]  }
 0x4a3   :  { %9954 = vmatprep.subr.bf16.mxu0 %v13146_v44  ;;  %v13203_v44 = vld [vmem:[#allocation18 + $0xf64] ss:$16 sps:$4 sm:$0xff]  }
 0x4a4   :  { %9994 = vmatpush1.bf16.msra.mxu1 %v13141_v60  ;;  %v13198_v60 = vld [vmem:[#allocation18 + $0xd60] ss:$16 sps:$4 sm:$0xff]  }
 0x4a5   :  { %9995 = vmatprep.subr.bf16.mxu1 %v13149_v55  ;;  %v13206_v55 = vld [vmem:[#allocation18 + $0xd44] ss:$16 sps:$4 sm:$0xff]  }
 0x4a6   :  { %9955 = vmatpush1.bf16.msra.mxu0 %v13144_v25  ;;  %v13201_v25 = vld [vmem:[#allocation18 + $0xf60] ss:$16 sps:$4 sm:$0xff]  }
 0x4a7   :  { %9956 = vmatprep.subr.bf16.mxu0 %v13152_v26  ;;  %v13209_v26 = vld [vmem:[#allocation18 + $0xf44] ss:$16 sps:$4 sm:$0xff]  }
 0x4a8   :  { %9996 = vmatpush1.bf16.msra.mxu1 %v13147_v12  ;;  %v13204_v12 = vld [vmem:[#allocation18 + $0xd40] ss:$16 sps:$4 sm:$0xff]  }
 0x4a9   :  { %9997 = vmatprep.subr.bf16.mxu1 %v13155_v43  ;;  %v13212_v43 = vld [vmem:[#allocation18 + $0xd24] ss:$16 sps:$4 sm:$0xff]  }
 0x4aa   :  { %9957 = vmatpush1.bf16.msra.mxu0 %v13150_v45  ;;  %v13207_v45 = vld [vmem:[#allocation18 + $0xf40] ss:$16 sps:$4 sm:$0xff]  }
 0x4ab   :  { %9958 = vmatprep.subr.bf16.mxu0 %v13158_v24  ;;  %v13215_v24 = vld [vmem:[#allocation18 + $0xf24] ss:$16 sps:$4 sm:$0xff]  }
 0x4ac   :  { %9998 = vmatpush1.bf16.msra.mxu1 %v13153_v19  ;;  %v13210_v19 = vld [vmem:[#allocation18 + $0xd20] ss:$16 sps:$4 sm:$0xff]  }
 0x4ad   :  { %9999 = vmatprep.subr.bf16.mxu1 %v13161_v13  ;;  %v13218_v13 = vld [vmem:[#allocation18 + $0xd04] ss:$16 sps:$4 sm:$0xff]  }
 0x4ae   :  { %9959 = vmatpush1.bf16.msra.mxu0 %v13156_v6  ;;  %v13213_v6 = vld [vmem:[#allocation18 + $0xf20] ss:$16 sps:$4 sm:$0xff]  }
 0x4af   :  { %9960 = vmatprep.subr.bf16.mxu0 %v13164_v59  ;;  %v13221_v59 = vld [vmem:[#allocation18 + $0xf04] ss:$16 sps:$4 sm:$0xff]  }
 0x4b0   :  { %10000 = vmatpush1.bf16.msra.mxu1 %v13159_v8  ;;  %v13216_v8 = vld [vmem:[#allocation18 + $0xd00] ss:$16 sps:$4 sm:$0xff]  }
 0x4b1   :  { %10001 = vmatprep.subr.bf16.mxu1 %v13167_v9  ;;  %v13224_v9 = vld [vmem:[#allocation18 + $0x10e4] ss:$16 sps:$4 sm:$0xff]  }
 0x4b2   :  { %9961 = vmatpush1.bf16.msra.mxu0 %v13162_v21  ;;  %v4560_v21 = vld [vmem:[#allocation20] sm:$0xf] }
 0x4b3   :  { %9962 = vmatprep.subr.bf16.mxu0 %v13170_v4  ;;  %v13219_v4 = vld [vmem:[#allocation18 + $0xf00] ss:$16 sps:$4 sm:$0xff]  }
 0x4b4   :  { %10002 = vmatpush1.bf16.msra.mxu1 %v13165_v22  ;;  %v13227_v22 = vld [vmem:[#allocation18 + $0x12e4] ss:$16 sps:$4 sm:$0xff]  }
 0x4b5   :  { %10003 = vmatprep.subr.bf16.mxu1 %v13173_v32  ;;  %v13222_v32 = vld [vmem:[#allocation18 + $0x10e0] ss:$16 sps:$4 sm:$0xff]  }
 0x4b6   :  { %9963 = vmatpush1.bf16.msra.mxu0 %v13168_v1  ;;  %v15746_v1 = vld [vmem:[#allocation42_spill] sm:$0xff] }
 0x4b7   :  { %9964 = vmatprep.subr.bf16.mxu0 %v13176_v30  ;;  %v4565_v30 = vrot.slane %v4560_v21, %v15746_v1  ;;  %v13263_v1 = vld [vmem:[#allocation18 + $0x1224] ss:$16 sps:$4 sm:$0xff]  }
 0x4b8   :  { %10004 = vmatpush1.bf16.msra.mxu1 %v13171_v15  ;;  %v15494_v15 = vcombine.low %v15386_v62, %v15386_v62  ;;  %v13233_v62 = vld [vmem:[#allocation18 + $0x12c4] ss:$16 sps:$4 sm:$0xff]  }
 0x4b9   :  { %10005 = vmatprep.subr.bf16.mxu1 %v13179_v31  ;;  %v13230_v31 = vld [vmem:[#allocation18 + $0x10c4] ss:$16 sps:$4 sm:$0xff]  }
 0x4ba   :  { %9965 = vmatpush2.bf16.msra.mxu0 %v13174_v28  ;;  %v15498_v28 = vcombine.high %v15435_v47, %v15435_v47 }
 0x4bb   :  { %9966 = vmatprep.subr.bf16.mxu0 %v13182_v23  ;;  %v13225_v23 = vld [vmem:[#allocation18 + $0x12e0] ss:$16 sps:$4 sm:$0xff]  }
 0x4bc   :  { %10006 = vmatpush2.bf16.msra.mxu1 %v13177_v27  ;;  %v4569_v27 = vrot.slane %v4560_v21, %v15035_v7  ;;  %v13257_v21 = vld [vmem:[#allocation18 + $0x1244] ss:$16 sps:$4 sm:$0xff]  }
 0x4bd   :  { %10007 = vmatprep.subr.bf16.mxu1 %v13185_v29 }
 0x4be   :  { %9967 = vmatpush2.bf16.msra.mxu0 %v13180_v41  ;;  %v15504_v41 = vcombine.low %v15396_v35, %v15396_v35 }
 0x4bf   :  { %9968 = vmatprep.subr.bf16.mxu0 %v13188_v42 }
 0x4c0   :  { %10008 = vmatpush2.bf16.msra.mxu1 %v13183_v51  ;;  %v15509_v51 = vcombine.high %v15443_v58, %v15443_v58 }
 0x4c1   :  { %10009 = vmatprep.subr.bf16.mxu1 %v13191_v39  ;;  %v13228_v39 = vld [vmem:[#allocation18 + $0x10c0] ss:$16 sps:$4 sm:$0xff]  }
 0x4c2   :  { %9969 = vmatpush2.bf16.msra.mxu0 %v13186_v56 }
 0x4c3   :  { %9970 = vmatprep.subr.bf16.mxu0 %v13194_v3  ;;  %v13236_v3 = vld [vmem:[#allocation18 + $0x10a4] ss:$16 sps:$4 sm:$0xff]  }
 0x4c4   :  { %10010 = vmatpush2.bf16.msra.mxu1 %v13189_v63 }
 0x4c5   :  { %10011 = vmatprep.subr.bf16.mxu1 %v13197_v20  ;;  %v13231_v20 = vld [vmem:[#allocation18 + $0x12c0] ss:$16 sps:$4 sm:$0xff]  }
 0x4c6   :  { %9971 = vmatpush2.bf16.msra.mxu0 %v13192_v53 }
 0x4c7   :  { %9972 = vmatprep.subr.bf16.mxu0 %v13200_v46 }
 0x4c8   :  { %10012 = vmatpush2.bf16.msra.mxu1 %v13195_v50  ;;  %v13239_v50 = vld [vmem:[#allocation18 + $0x12a4] ss:$16 sps:$4 sm:$0xff]  }
 0x4c9   :  { %10013 = vmatprep.subr.bf16.mxu1 %v13203_v44 }
 0x4ca   :  { %9973 = vmatpush2.bf16.msra.mxu0 %v13198_v60  ;;  %v13234_v60 = vld [vmem:[#allocation18 + $0x10a0] ss:$16 sps:$4 sm:$0xff]  }
 0x4cb   :  { %9974 = vmatprep.subr.bf16.mxu0 %v13206_v55 }
 0x4cc   :  { %10014 = vmatpush2.bf16.msra.mxu1 %v13201_v25 }
 0x4cd   :  { %10015 = vmatprep.subr.bf16.mxu1 %v13209_v26  ;;  %v13242_v26 = vld [vmem:[#allocation18 + $0x1084] ss:$16 sps:$4 sm:$0xff]  }
 0x4ce   :  { %9975 = vmatpush2.bf16.msra.mxu0 %v13204_v12  ;;  %v13237_v12 = vld [vmem:[#allocation18 + $0x12a0] ss:$16 sps:$4 sm:$0xff]  }
 0x4cf   :  { %9976 = vmatprep.subr.bf16.mxu0 %v13212_v43 }
 0x4d0   :  { %10016 = vmatpush2.bf16.msra.mxu1 %v13207_v45  ;;  %v13245_v45 = vld [vmem:[#allocation18 + $0x1284] ss:$16 sps:$4 sm:$0xff]  }
 0x4d1   :  { %10017 = vmatprep.subr.bf16.mxu1 %v13215_v24  ;;  %v13240_v24 = vld [vmem:[#allocation18 + $0x1080] ss:$16 sps:$4 sm:$0xff]  }
 0x4d2   :  { %9977 = vmatpush2.bf16.msra.mxu0 %v13210_v19  ;;  %v13248_v19 = vld [vmem:[#allocation18 + $0x1064] ss:$16 sps:$4 sm:$0xff]  }
 0x4d3   :  { %9978 = vmatprep.subr.bf16.mxu0 %v13218_v13  ;;  %v13243_v13 = vld [vmem:[#allocation18 + $0x1280] ss:$16 sps:$4 sm:$0xff]  }
 0x4d4   :  { %10018 = vmatpush2.bf16.msra.mxu1 %v13213_v6  ;;  %v13251_v6 = vld [vmem:[#allocation18 + $0x1264] ss:$16 sps:$4 sm:$0xff]  }
 0x4d5   :  { %10019 = vmatprep.subr.bf16.mxu1 %v13221_v59  ;;  %v13246_v59 = vld [vmem:[#allocation18 + $0x1060] ss:$16 sps:$4 sm:$0xff]  }
 0x4d6   :  { %9979 = vmatpush2.bf16.msra.mxu0 %v13216_v8  ;;  %v13254_v8 = vld [vmem:[#allocation18 + $0x1044] ss:$16 sps:$4 sm:$0xff]  }
 0x4d7   :  { %10030 = vmatprep.subr.bf16.mxu0 %v13224_v9  ;;  %v13249_v9 = vld [vmem:[#allocation18 + $0x1260] ss:$16 sps:$4 sm:$0xff]  }
 0x4d8   :  { %10020 = vmatpush2.bf16.msra.mxu1 %v13219_v4  ;;  %v13252_v4 = vld [vmem:[#allocation18 + $0x1040] ss:$16 sps:$4 sm:$0xff]  }
 0x4d9   :  { %9981 = vmatmul.mubr.bf16.vlgmr.msra.gmra.mxu0 %v15494_v15  ;;  %v9736_v29 = vpop.f32.mrf.mxu0  ;;  %10071 = vmatprep.subr.bf16.mxu1 %v13227_v22  ;;  %v13260_v22 = vld [vmem:[#allocation18 + $0x1024] ss:$16 sps:$4 sm:$0xff]  }
 0x4da   :  { %v9737_v42 = vadd.f32 %v9736_v29, %v4565_v30  ;;  %10031 = vmatpush1.bf16.msra.mxu0 %v13222_v32  ;;  %10062 = vmatprep.mubr.bf16.mxu0 %v15498_v28  ;;  %v13255_v32 = vld [vmem:[#allocation18 + $0x1240] ss:$16 sps:$4 sm:$0xff]  }
 0x4db   :  { %10022 = vmatmul.mubr.bf16.vlgmr.msra.gmra.mxu1 %v15504_v41  ;;  %v9738_v7 = vpop.f32.mrf.mxu0  ;;  %v9777_v56 = vpop.f32.mrf.mxu1  ;;  %10032 = vmatprep.subr.bf16.mxu0 %v13230_v31  ;;  %v13258_v30 = vld [vmem:[#allocation18 + $0x1020] ss:$16 sps:$4 sm:$0xff]   ;;  %v13266_v31 = vld [vmem:[#allocation18 + $0x1004] ss:$16 sps:$4 sm:$0xff]  }
 0x4dc   :  { %v9739_v63 = vadd.f32 %v9738_v7, %v4569_v27  ;;  %v15512_v35 = vadd.f32 %v9777_v56, %v9737_v42  ;;  %10072 = vmatpush1.bf16.msra.mxu1 %v13225_v23  ;;  %10103 = vmatprep.mubr.bf16.mxu1 %v15509_v51  ;;  %v13261_v23 = vld [vmem:[#allocation18 + $0x1220] ss:$16 sps:$4 sm:$0xff]   ;;  %v13269_v27 = vld [vmem:[#allocation18 + $0x1204] ss:$16 sps:$4 sm:$0xff]  }
 0x4dd   :  { %v9740_v53 = vpop.f32.mrf.mxu0  ;;  %v9779_v46 = vpop.f32.mrf.mxu1  ;;  %10073 = vmatprep.subr.bf16.mxu1 %v13233_v62  ;;  %v13264_v29 = vld [vmem:[#allocation18 + $0x1000] ss:$16 sps:$4 sm:$0xff]   ;;  %v13272_v62 = vld [vmem:[#allocation18 + $0x11e4] ss:$16 sps:$4 sm:$0xff]  }
 0x4de   :  { %v15515_v44 = vadd.f32 %v9779_v46, %v9739_v63  ;;  %10033 = vmatpush1.bf16.msra.mxu0 %v13228_v39  ;;  %v13267_v42 = vld [vmem:[#allocation18 + $0x1200] ss:$16 sps:$4 sm:$0xff]   ;;  %v13275_v39 = vld [vmem:[#allocation18 + $0x13e4] ss:$16 sps:$4 sm:$0xff]  }
 0x4df   :  { %v9741_v55 = vpop.f32.mrf.mxu0  ;;  %v9781_v25 = vpop.f32.mrf.mxu1  ;;  %10034 = vmatprep.subr.bf16.mxu0 %v13236_v3  ;;  %v13270_v7 = vld [vmem:[#allocation18 + $0x11e0] ss:$16 sps:$4 sm:$0xff]   ;;  %v13278_v56 = vld [vmem:[#allocation18 + $0x11c4] ss:$16 sps:$4 sm:$0xff]  }
 0x4e0   :  { %10074 = vmatpush1.bf16.msra.mxu1 %v13231_v20  ;;  %v13273_v3 = vld [vmem:[#allocation18 + $0x13e0] ss:$16 sps:$4 sm:$0xff]   ;;  %v13281_v63 = vld [vmem:[#allocation18 + $0x13c4] ss:$16 sps:$4 sm:$0xff]  }
 0x4e1   :  { %v9782_v43 = vpop.f32.mrf.mxu1  ;;  %10075 = vmatprep.subr.bf16.mxu1 %v13239_v50  ;;  %v13276_v20 = vld [vmem:[#allocation18 + $0x11c0] ss:$16 sps:$4 sm:$0xff]   ;;  %v13284_v53 = vld [vmem:[#allocation18 + $0x11a4] ss:$16 sps:$4 sm:$0xff]  }
 0x4e2   :  { %10035 = vmatpush1.bf16.msra.mxu0 %v13234_v60  ;;  %v13279_v46 = vld [vmem:[#allocation18 + $0x13c0] ss:$16 sps:$4 sm:$0xff]   ;;  %v13287_v50 = vld [vmem:[#allocation18 + $0x13a4] ss:$16 sps:$4 sm:$0xff]  }
 0x4e3   :  { %10036 = vmatprep.subr.bf16.mxu0 %v13242_v26  ;;  %v13282_v60 = vld [vmem:[#allocation18 + $0x11a0] ss:$16 sps:$4 sm:$0xff]   ;;  %v13290_v55 = vld [vmem:[#allocation18 + $0x1184] ss:$16 sps:$4 sm:$0xff]  }
 0x4e4   :  { %10076 = vmatpush1.bf16.msra.mxu1 %v13237_v12  ;;  %v13285_v25 = vld [vmem:[#allocation18 + $0x13a0] ss:$16 sps:$4 sm:$0xff]   ;;  %v13293_v26 = vld [vmem:[#allocation18 + $0x1384] ss:$16 sps:$4 sm:$0xff]  }
 0x4e5   :  { %10077 = vmatprep.subr.bf16.mxu1 %v13245_v45  ;;  %v13288_v12 = vld [vmem:[#allocation18 + $0x1180] ss:$16 sps:$4 sm:$0xff]   ;;  %v13296_v43 = vld [vmem:[#allocation18 + $0x1164] ss:$16 sps:$4 sm:$0xff]  }
 0x4e6   :  { %10037 = vmatpush1.bf16.msra.mxu0 %v13240_v24  ;;  %v13291_v45 = vld [vmem:[#allocation18 + $0x1380] ss:$16 sps:$4 sm:$0xff]   ;;  %v13299_v24 = vld [vmem:[#allocation18 + $0x1364] ss:$16 sps:$4 sm:$0xff]  }
 0x4e7   :  { %10038 = vmatprep.subr.bf16.mxu0 %v13248_v19  ;;  %v13294_v19 = vld [vmem:[#allocation18 + $0x1160] ss:$16 sps:$4 sm:$0xff]  }
 0x4e8   :  { %10078 = vmatpush1.bf16.msra.mxu1 %v13243_v13  ;;  %v13302_v13 = vld [vmem:[#allocation18 + $0x1144] ss:$16 sps:$4 sm:$0xff]  }
 0x4e9   :  { %10079 = vmatprep.subr.bf16.mxu1 %v13251_v6  ;;  %v13297_v6 = vld [vmem:[#allocation18 + $0x1360] ss:$16 sps:$4 sm:$0xff]  }
 0x4ea   :  { %10039 = vmatpush1.bf16.msra.mxu0 %v13246_v59  ;;  %v13305_v59 = vld [vmem:[#allocation18 + $0x1344] ss:$16 sps:$4 sm:$0xff]  }
 0x4eb   :  { %10040 = vmatprep.subr.bf16.mxu0 %v13254_v8  ;;  %v13300_v8 = vld [vmem:[#allocation18 + $0x1140] ss:$16 sps:$4 sm:$0xff]  }
 0x4ec   :  { %10080 = vmatpush1.bf16.msra.mxu1 %v13249_v9  ;;  %v13308_v9 = vld [vmem:[#allocation18 + $0x1124] ss:$16 sps:$4 sm:$0xff]  }
 0x4ed   :  { %10081 = vmatprep.subr.bf16.mxu1 %v13257_v21  ;;  %v13303_v21 = vld [vmem:[#allocation18 + $0x1340] ss:$16 sps:$4 sm:$0xff]  }
 0x4ee   :  { %10041 = vmatpush1.bf16.msra.mxu0 %v13252_v4  ;;  %v13311_v4 = vld [vmem:[#allocation18 + $0x1324] ss:$16 sps:$4 sm:$0xff]  }
 0x4ef   :  { %10042 = vmatprep.subr.bf16.mxu0 %v13260_v22  ;;  %v13306_v22 = vld [vmem:[#allocation18 + $0x1120] ss:$16 sps:$4 sm:$0xff]  }
 0x4f0   :  { %10082 = vmatpush1.bf16.msra.mxu1 %v13255_v32  ;;  %v13314_v32 = vld [vmem:[#allocation18 + $0x1104] ss:$16 sps:$4 sm:$0xff]  }
 0x4f1   :  { %10083 = vmatprep.subr.bf16.mxu1 %v13263_v1  ;;  %v13309_v1 = vld [vmem:[#allocation18 + $0x1320] ss:$16 sps:$4 sm:$0xff]  }
 0x4f2   :  { %10043 = vmatpush1.bf16.msra.mxu0 %v13258_v30  ;;  %v13317_v30 = vld [vmem:[#allocation18 + $0x1304] ss:$16 sps:$4 sm:$0xff]  }
 0x4f3   :  { %10044 = vmatprep.subr.bf16.mxu0 %v13266_v31  ;;  %v13312_v31 = vld [vmem:[#allocation18 + $0x1100] ss:$16 sps:$4 sm:$0xff]  }
 0x4f4   :  { %10084 = vmatpush1.bf16.msra.mxu1 %v13261_v23  ;;  %v13320_v23 = vld [vmem:[#allocation18 + $0x14e4] ss:$16 sps:$4 sm:$0xff]  }
 0x4f5   :  { %10085 = vmatprep.subr.bf16.mxu1 %v13269_v27  ;;  %v13315_v27 = vld [vmem:[#allocation18 + $0x1300] ss:$16 sps:$4 sm:$0xff]  }
 0x4f6   :  { %10045 = vmatpush1.bf16.msra.mxu0 %v13264_v29  ;;  %v13323_v29 = vld [vmem:[#allocation18 + $0x16e4] ss:$16 sps:$4 sm:$0xff]  }
 0x4f7   :  { %10046 = vmatprep.subr.bf16.mxu0 %v13272_v62  ;;  %v13318_v62 = vld [vmem:[#allocation18 + $0x14e0] ss:$16 sps:$4 sm:$0xff]  }
 0x4f8   :  { %10086 = vmatpush1.bf16.msra.mxu1 %v13267_v42  ;;  %v15519_v42 = vcombine.low %v15435_v47, %v15435_v47 }
 0x4f9   :  { %10087 = vmatprep.subr.bf16.mxu1 %v13275_v39  ;;  %v13326_v39 = vld [vmem:[#allocation18 + $0x14c4] ss:$16 sps:$4 sm:$0xff]  }
 0x4fa   :  { %10047 = vmatpush2.bf16.msra.mxu0 %v13270_v7  ;;  %v15523_v7 = vcombine.high %v15437_v48, %v15437_v48 }
 0x4fb   :  { %10048 = vmatprep.subr.bf16.mxu0 %v13278_v56  ;;  %v13321_v56 = vld [vmem:[#allocation18 + $0x16e0] ss:$16 sps:$4 sm:$0xff]  }
 0x4fc   :  { %10088 = vmatpush2.bf16.msra.mxu1 %v13273_v3  ;;  %v15527_v3 = vcombine.low %v15443_v58, %v15443_v58  ;;  %v13332_v58 = vld [vmem:[#allocation18 + $0x14a4] ss:$16 sps:$4 sm:$0xff]  }
 0x4fd   :  { %10089 = vmatprep.subr.bf16.mxu1 %v13281_v63 }
 0x4fe   :  { %10049 = vmatpush2.bf16.msra.mxu0 %v13276_v20  ;;  %v13329_v20 = vld [vmem:[#allocation18 + $0x16c4] ss:$16 sps:$4 sm:$0xff]  }
 0x4ff   :  { %10050 = vmatprep.subr.bf16.mxu0 %v13284_v53  ;;  %v15534_v53 = vcombine.high %v15445_v54, %v15445_v54 }
 0x500   :  { %10090 = vmatpush2.bf16.msra.mxu1 %v13279_v46  ;;  %v13324_v46 = vld [vmem:[#allocation18 + $0x14c0] ss:$16 sps:$4 sm:$0xff]  }
 0x501   :  { %10091 = vmatprep.subr.bf16.mxu1 %v13287_v50 }
 0x502   :  { %10051 = vmatpush2.bf16.msra.mxu0 %v13282_v60 }
 0x503   :  { %10052 = vmatprep.subr.bf16.mxu0 %v13290_v55 }
 0x504   :  { %10092 = vmatpush2.bf16.msra.mxu1 %v13285_v25 }
 0x505   :  { %10093 = vmatprep.subr.bf16.mxu1 %v13293_v26 }
 0x506   :  { %10053 = vmatpush2.bf16.msra.mxu0 %v13288_v12 }
 0x507   :  { %10054 = vmatprep.subr.bf16.mxu0 %v13296_v43  ;;  %v13335_v43 = vld [vmem:[#allocation18 + $0x16a4] ss:$16 sps:$4 sm:$0xff]  }
 0x508   :  { %10094 = vmatpush2.bf16.msra.mxu1 %v13291_v45 }
 0x509   :  { %10095 = vmatprep.subr.bf16.mxu1 %v13299_v24  ;;  %v13330_v24 = vld [vmem:[#allocation18 + $0x14a0] ss:$16 sps:$4 sm:$0xff]  }
 0x50a   :  { %10055 = vmatpush2.bf16.msra.mxu0 %v13294_v19 }
 0x50b   :  { %10056 = vmatprep.subr.bf16.mxu0 %v13302_v13 }
 0x50c   :  { %10096 = vmatpush2.bf16.msra.mxu1 %v13297_v6  ;;  %v13338_v6 = vld [vmem:[#allocation18 + $0x1484] ss:$16 sps:$4 sm:$0xff]  }
 0x50d   :  { %10097 = vmatprep.subr.bf16.mxu1 %v13305_v59 }
 0x50e   :  { %10057 = vmatpush2.bf16.msra.mxu0 %v13300_v8  ;;  %v13341_v8 = vld [vmem:[#allocation18 + $0x1684] ss:$16 sps:$4 sm:$0xff]  }
 0x50f   :  { %10058 = vmatprep.subr.bf16.mxu0 %v13308_v9  ;;  %v13336_v9 = vld [vmem:[#allocation18 + $0x1480] ss:$16 sps:$4 sm:$0xff]  }
 0x510   :  { %10098 = vmatpush2.bf16.msra.mxu1 %v13303_v21  ;;  %v13344_v21 = vld [vmem:[#allocation18 + $0x1464] ss:$16 sps:$4 sm:$0xff]  }
 0x511   :  { %10099 = vmatprep.subr.bf16.mxu1 %v13311_v4  ;;  %v13339_v4 = vld [vmem:[#allocation18 + $0x1680] ss:$16 sps:$4 sm:$0xff]  }
 0x512   :  { %10059 = vmatpush2.bf16.msra.mxu0 %v13306_v22  ;;  %v13347_v22 = vld [vmem:[#allocation18 + $0x1664] ss:$16 sps:$4 sm:$0xff]  }
 0x513   :  { %10060 = vmatprep.subr.bf16.mxu0 %v13314_v32  ;;  %v13342_v32 = vld [vmem:[#allocation18 + $0x1460] ss:$16 sps:$4 sm:$0xff]  }
 0x514   :  { %10100 = vmatpush2.bf16.msra.mxu1 %v13309_v1  ;;  %v13350_v1 = vld [vmem:[#allocation18 + $0x1444] ss:$16 sps:$4 sm:$0xff]  }
 0x515   :  { %10101 = vmatprep.subr.bf16.mxu1 %v13317_v30  ;;  %v13345_v30 = vld [vmem:[#allocation18 + $0x1660] ss:$16 sps:$4 sm:$0xff]  }
 0x516   :  { %10061 = vmatpush2.bf16.msra.mxu0 %v13312_v31  ;;  %v13353_v31 = vld [vmem:[#allocation18 + $0x1644] ss:$16 sps:$4 sm:$0xff]  }
 0x517   :  { %10112 = vmatprep.subr.bf16.mxu0 %v13320_v23  ;;  %v13348_v23 = vld [vmem:[#allocation18 + $0x1440] ss:$16 sps:$4 sm:$0xff]  }
 0x518   :  { %10102 = vmatpush2.bf16.msra.mxu1 %v13315_v27  ;;  %v13356_v27 = vld [vmem:[#allocation18 + $0x1424] ss:$16 sps:$4 sm:$0xff]  }
 0x519   :  { %v9818_v63 = vpop.f32.mrf.mxu0  ;;  %10063 = vmatmul.mubr.bf16.vlgmr.msra.gmra.mxu0 %v15519_v42  ;;  %10153 = vmatprep.subr.bf16.mxu1 %v13323_v29  ;;  %v13351_v29 = vld [vmem:[#allocation18 + $0x1640] ss:$16 sps:$4 sm:$0xff]  }
 0x51a   :  { %v9819_v47 = vadd.f32 %v9818_v63, %v15512_v35  ;;  %10113 = vmatpush1.bf16.msra.mxu0 %v13318_v62  ;;  %10144 = vmatprep.mubr.bf16.mxu0 %v15523_v7  ;;  %v13327_v35 = vld [vmem:[#allocation18 + $0x16c0] ss:$16 sps:$4 sm:$0xff]   ;;  %v13359_v62 = vld [vmem:[#allocation18 + $0x1624] ss:$16 sps:$4 sm:$0xff]  }
 0x51b   :  { %v9820_v50 = vpop.f32.mrf.mxu0  ;;  %v9859_v60 = vpop.f32.mrf.mxu1  ;;  %10104 = vmatmul.mubr.bf16.vlgmr.msra.gmra.mxu1 %v15527_v3  ;;  %10114 = vmatprep.subr.bf16.mxu0 %v13326_v39  ;;  %v13354_v39 = vld [vmem:[#allocation18 + $0x1420] ss:$16 sps:$4 sm:$0xff]  }
 0x51c   :  { %v9821_v55 = vadd.f32 %v9820_v50, %v15515_v44  ;;  %v15538_v25 = vadd.f32 %v9859_v60, %v9819_v47  ;;  %10154 = vmatpush1.bf16.msra.mxu1 %v13321_v56  ;;  %10185 = vmatprep.mubr.bf16.mxu1 %v15534_v53  ;;  %v13333_v44 = vld [vmem:[#allocation18 + $0x16a0] ss:$16 sps:$4 sm:$0xff]   ;;  %v13362_v56 = vld [vmem:[#allocation18 + $0x1404] ss:$16 sps:$4 sm:$0xff]  }
 0x51d   :  { %v9822_v26 = vpop.f32.mrf.mxu0  ;;  %v9861_v12 = vpop.f32.mrf.mxu1  ;;  %10155 = vmatprep.subr.bf16.mxu1 %v13329_v20  ;;  %v13357_v63 = vld [vmem:[#allocation18 + $0x1620] ss:$16 sps:$4 sm:$0xff]   ;;  %v13365_v20 = vld [vmem:[#allocation18 + $0x1604] ss:$16 sps:$4 sm:$0xff]  }
 0x51e   :  { %v15541_v45 = vadd.f32 %v9861_v12, %v9821_v55  ;;  %10115 = vmatpush1.bf16.msra.mxu0 %v13324_v46  ;;  %v13360_v47 = vld [vmem:[#allocation18 + $0x1400] ss:$16 sps:$4 sm:$0xff]   ;;  %v13368_v46 = vld [vmem:[#allocation18 + $0x15e4] ss:$16 sps:$4 sm:$0xff]  }
 0x51f   :  { %v9823_v19 = vpop.f32.mrf.mxu0  ;;  %v9863_v13 = vpop.f32.mrf.mxu1  ;;  %10116 = vmatprep.subr.bf16.mxu0 %v13332_v58  ;;  %v13363_v50 = vld [vmem:[#allocation18 + $0x1600] ss:$16 sps:$4 sm:$0xff]   ;;  %v13371_v60 = vld [vmem:[#allocation18 + $0x17e4] ss:$16 sps:$4 sm:$0xff]  }
 0x520   :  { %10156 = vmatpush1.bf16.msra.mxu1 %v13327_v35  ;;  %v13366_v58 = vld [vmem:[#allocation18 + $0x15e0] ss:$16 sps:$4 sm:$0xff]   ;;  %v13374_v55 = vld [vmem:[#allocation18 + $0x15c4] ss:$16 sps:$4 sm:$0xff]  }
 0x521   :  { %v9864_v59 = vpop.f32.mrf.mxu1  ;;  %10157 = vmatprep.subr.bf16.mxu1 %v13335_v43  ;;  %v13369_v35 = vld [vmem:[#allocation18 + $0x17e0] ss:$16 sps:$4 sm:$0xff]   ;;  %v13377_v26 = vld [vmem:[#allocation18 + $0x17c4] ss:$16 sps:$4 sm:$0xff]  }
 0x522   :  { %10117 = vmatpush1.bf16.msra.mxu0 %v13330_v24  ;;  %v13372_v12 = vld [vmem:[#allocation18 + $0x15c0] ss:$16 sps:$4 sm:$0xff]   ;;  %v13380_v43 = vld [vmem:[#allocation18 + $0x15a4] ss:$16 sps:$4 sm:$0xff]  }
 0x523   :  { %10118 = vmatprep.subr.bf16.mxu0 %v13338_v6  ;;  %v13375_v24 = vld [vmem:[#allocation18 + $0x17c0] ss:$16 sps:$4 sm:$0xff]   ;;  %v13383_v19 = vld [vmem:[#allocation18 + $0x17a4] ss:$16 sps:$4 sm:$0xff]  }
 0x524   :  { %10158 = vmatpush1.bf16.msra.mxu1 %v13333_v44  ;;  %v13378_v13 = vld [vmem:[#allocation18 + $0x15a0] ss:$16 sps:$4 sm:$0xff]   ;;  %v13386_v6 = vld [vmem:[#allocation18 + $0x1584] ss:$16 sps:$4 sm:$0xff]  }
 0x525   :  { %10159 = vmatprep.subr.bf16.mxu1 %v13341_v8  ;;  %v13381_v44 = vld [vmem:[#allocation18 + $0x17a0] ss:$16 sps:$4 sm:$0xff]   ;;  %v13389_v59 = vld [vmem:[#allocation18 + $0x1784] ss:$16 sps:$4 sm:$0xff]  }
 0x526   :  { %10119 = vmatpush1.bf16.msra.mxu0 %v13336_v9  ;;  %v13384_v8 = vld [vmem:[#allocation18 + $0x1580] ss:$16 sps:$4 sm:$0xff]   ;;  %v13392_v9 = vld [vmem:[#allocation18 + $0x1564] ss:$16 sps:$4 sm:$0xff]  }
 0x527   :  { %10120 = vmatprep.subr.bf16.mxu0 %v13344_v21  ;;  %v13387_v21 = vld [vmem:[#allocation18 + $0x1780] ss:$16 sps:$4 sm:$0xff]  }
 0x528   :  { %10160 = vmatpush1.bf16.msra.mxu1 %v13339_v4  ;;  %v13395_v4 = vld [vmem:[#allocation18 + $0x1764] ss:$16 sps:$4 sm:$0xff]  }
 0x529   :  { %10161 = vmatprep.subr.bf16.mxu1 %v13347_v22  ;;  %v13390_v22 = vld [vmem:[#allocation18 + $0x1560] ss:$16 sps:$4 sm:$0xff]  }
 0x52a   :  { %10121 = vmatpush1.bf16.msra.mxu0 %v13342_v32  ;;  %v13398_v32 = vld [vmem:[#allocation18 + $0x1544] ss:$16 sps:$4 sm:$0xff]  }
 0x52b   :  { %10122 = vmatprep.subr.bf16.mxu0 %v13350_v1  ;;  %v13393_v1 = vld [vmem:[#allocation18 + $0x1760] ss:$16 sps:$4 sm:$0xff]  }
 0x52c   :  { %10162 = vmatpush1.bf16.msra.mxu1 %v13345_v30  ;;  %v13401_v30 = vld [vmem:[#allocation18 + $0x1744] ss:$16 sps:$4 sm:$0xff]  }
 0x52d   :  { %10163 = vmatprep.subr.bf16.mxu1 %v13353_v31  ;;  %v13396_v31 = vld [vmem:[#allocation18 + $0x1540] ss:$16 sps:$4 sm:$0xff]  }
 0x52e   :  { %10123 = vmatpush1.bf16.msra.mxu0 %v13348_v23  ;;  %v13404_v23 = vld [vmem:[#allocation18 + $0x1524] ss:$16 sps:$4 sm:$0xff]  }
 0x52f   :  { %10124 = vmatprep.subr.bf16.mxu0 %v13356_v27  ;;  %v13399_v27 = vld [vmem:[#allocation18 + $0x1740] ss:$16 sps:$4 sm:$0xff]  }
 0x530   :  { %10164 = vmatpush1.bf16.msra.mxu1 %v13351_v29  ;;  %v13407_v29 = vld [vmem:[#allocation18 + $0x1724] ss:$16 sps:$4 sm:$0xff]  }
 0x531   :  { %10165 = vmatprep.subr.bf16.mxu1 %v13359_v62  ;;  %v13402_v62 = vld [vmem:[#allocation18 + $0x1520] ss:$16 sps:$4 sm:$0xff]  }
 0x532   :  { %10125 = vmatpush1.bf16.msra.mxu0 %v13354_v39  ;;  %v13410_v39 = vld [vmem:[#allocation18 + $0x1504] ss:$16 sps:$4 sm:$0xff]  }
 0x533   :  { %10126 = vmatprep.subr.bf16.mxu0 %v13362_v56  ;;  %v13405_v56 = vld [vmem:[#allocation18 + $0x1720] ss:$16 sps:$4 sm:$0xff]  }
 0x534   :  { %10166 = vmatpush1.bf16.msra.mxu1 %v13357_v63  ;;  %v13413_v63 = vld [vmem:[#allocation18 + $0x1704] ss:$16 sps:$4 sm:$0xff]  }
 0x535   :  { %10167 = vmatprep.subr.bf16.mxu1 %v13365_v20  ;;  %v13408_v20 = vld [vmem:[#allocation18 + $0x1500] ss:$16 sps:$4 sm:$0xff]  }
 0x536   :  { %10127 = vmatpush1.bf16.msra.mxu0 %v13360_v47  ;;  %v13416_v47 = vld [vmem:[#allocation18 + $0x18e4] ss:$16 sps:$4 sm:$0xff]  }
 0x537   :  { %10128 = vmatprep.subr.bf16.mxu0 %v13368_v46  ;;  %v13411_v46 = vld [vmem:[#allocation18 + $0x1700] ss:$16 sps:$4 sm:$0xff]  }
 0x538   :  { %10168 = vmatpush1.bf16.msra.mxu1 %v13363_v50  ;;  %v13419_v50 = vld [vmem:[#allocation18 + $0x1ae4] ss:$16 sps:$4 sm:$0xff]  }
 0x539   :  { %10169 = vmatprep.subr.bf16.mxu1 %v13371_v60  ;;  %v13414_v60 = vld [vmem:[#allocation18 + $0x18e0] ss:$16 sps:$4 sm:$0xff]  }
 0x53a   :  { %10129 = vmatpush2.bf16.msra.mxu0 %v13366_v58  ;;  %v15545_v58 = vcombine.low %v15437_v48, %v15437_v48 }
 0x53b   :  { %10130 = vmatprep.subr.bf16.mxu0 %v13374_v55  ;;  %v13422_v55 = vld [vmem:[#allocation18 + $0x18c4] ss:$16 sps:$4 sm:$0xff]  }
 0x53c   :  { %10170 = vmatpush2.bf16.msra.mxu1 %v13369_v35  ;;  %v15549_v35 = vcombine.high %v15439_v16, %v15439_v16 }
 0x53d   :  { %10171 = vmatprep.subr.bf16.mxu1 %v13377_v26  ;;  %v13417_v26 = vld [vmem:[#allocation18 + $0x1ae0] ss:$16 sps:$4 sm:$0xff]  }
 0x53e   :  { %10131 = vmatpush2.bf16.msra.mxu0 %v13372_v12  ;;  %v15553_v12 = vcombine.low %v15445_v54, %v15445_v54  ;;  %v13428_v54 = vld [vmem:[#allocation18 + $0x18a4] ss:$16 sps:$4 sm:$0xff]  }
 0x53f   :  { %10132 = vmatprep.subr.bf16.mxu0 %v13380_v43 }
 0x540   :  { %10172 = vmatpush2.bf16.msra.mxu1 %v13375_v24  ;;  %v13425_v24 = vld [vmem:[#allocation18 + $0x1ac4] ss:$16 sps:$4 sm:$0xff]  }
 0x541   :  { %10173 = vmatprep.subr.bf16.mxu1 %v13383_v19  ;;  %v15560_v19 = vcombine.high %v15447_v33, %v15447_v33 }
 0x542   :  { %10133 = vmatpush2.bf16.msra.mxu0 %v13378_v13  ;;  %v13420_v13 = vld [vmem:[#allocation18 + $0x18c0] ss:$16 sps:$4 sm:$0xff]  }
 0x543   :  { %10134 = vmatprep.subr.bf16.mxu0 %v13386_v6 }
 0x544   :  { %10174 = vmatpush2.bf16.msra.mxu1 %v13381_v44 }
 0x545   :  { %10175 = vmatprep.subr.bf16.mxu1 %v13389_v59 }
 0x546   :  { %10135 = vmatpush2.bf16.msra.mxu0 %v13384_v8 }
 0x547   :  { %10136 = vmatprep.subr.bf16.mxu0 %v13392_v9 }
 0x548   :  { %10176 = vmatpush2.bf16.msra.mxu1 %v13387_v21 }
 0x549   :  { %10177 = vmatprep.subr.bf16.mxu1 %v13395_v4  ;;  %v13431_v4 = vld [vmem:[#allocation18 + $0x1aa4] ss:$16 sps:$4 sm:$0xff]  }
 0x54a   :  { %10137 = vmatpush2.bf16.msra.mxu0 %v13390_v22 }
 0x54b   :  { %10138 = vmatprep.subr.bf16.mxu0 %v13398_v32  ;;  %v13426_v32 = vld [vmem:[#allocation18 + $0x18a0] ss:$16 sps:$4 sm:$0xff]  }
 0x54c   :  { %10178 = vmatpush2.bf16.msra.mxu1 %v13393_v1 }
 0x54d   :  { %10179 = vmatprep.subr.bf16.mxu1 %v13401_v30 }
 0x54e   :  { %10139 = vmatpush2.bf16.msra.mxu0 %v13396_v31  ;;  %v13434_v31 = vld [vmem:[#allocation18 + $0x1884] ss:$16 sps:$4 sm:$0xff]  }
 0x54f   :  { %10140 = vmatprep.subr.bf16.mxu0 %v13404_v23 }
 0x550   :  { %10180 = vmatpush2.bf16.msra.mxu1 %v13399_v27  ;;  %v13437_v27 = vld [vmem:[#allocation18 + $0x1a84] ss:$16 sps:$4 sm:$0xff]  }
 0x551   :  { %10181 = vmatprep.subr.bf16.mxu1 %v13407_v29  ;;  %v13432_v29 = vld [vmem:[#allocation18 + $0x1880] ss:$16 sps:$4 sm:$0xff]  }
 0x552   :  { %10141 = vmatpush2.bf16.msra.mxu0 %v13402_v62  ;;  %v13440_v62 = vld [vmem:[#allocation18 + $0x1864] ss:$16 sps:$4 sm:$0xff]  }
 0x553   :  { %10142 = vmatprep.subr.bf16.mxu0 %v13410_v39  ;;  %v13435_v39 = vld [vmem:[#allocation18 + $0x1a80] ss:$16 sps:$4 sm:$0xff]  }
 0x554   :  { %10182 = vmatpush2.bf16.msra.mxu1 %v13405_v56  ;;  %v13443_v56 = vld [vmem:[#allocation18 + $0x1a64] ss:$16 sps:$4 sm:$0xff]  }
 0x555   :  { %10183 = vmatprep.subr.bf16.mxu1 %v13413_v63  ;;  %v13438_v63 = vld [vmem:[#allocation18 + $0x1860] ss:$16 sps:$4 sm:$0xff]  }
 0x556   :  { %10143 = vmatpush2.bf16.msra.mxu0 %v13408_v20  ;;  %v13446_v20 = vld [vmem:[#allocation18 + $0x1844] ss:$16 sps:$4 sm:$0xff]  }
 0x557   :  { %10194 = vmatprep.subr.bf16.mxu0 %v13416_v47  ;;  %v13441_v47 = vld [vmem:[#allocation18 + $0x1a60] ss:$16 sps:$4 sm:$0xff]  }
 0x558   :  { %10184 = vmatpush2.bf16.msra.mxu1 %v13411_v46  ;;  %v13449_v46 = vld [vmem:[#allocation18 + $0x1a44] ss:$16 sps:$4 sm:$0xff]  }
 0x559   :  { %v9900_v43 = vpop.f32.mrf.mxu0  ;;  %10145 = vmatmul.mubr.bf16.vlgmr.msra.gmra.mxu0 %v15545_v58  ;;  %10235 = vmatprep.subr.bf16.mxu1 %v13419_v50  ;;  %v13444_v50 = vld [vmem:[#allocation18 + $0x1840] ss:$16 sps:$4 sm:$0xff]  }
 0x55a   :  { %v9901_v48 = vadd.f32 %v9900_v43, %v15538_v25  ;;  %10195 = vmatpush1.bf16.msra.mxu0 %v13414_v60  ;;  %10226 = vmatprep.mubr.bf16.mxu0 %v15549_v35  ;;  %v13423_v25 = vld [vmem:[#allocation18 + $0x1ac0] ss:$16 sps:$4 sm:$0xff]   ;;  %v13452_v60 = vld [vmem:[#allocation18 + $0x1824] ss:$16 sps:$4 sm:$0xff]  }
 0x55b   :  { %v9902_v6 = vpop.f32.mrf.mxu0  ;;  %v9941_v44 = vpop.f32.mrf.mxu1  ;;  %10186 = vmatmul.mubr.bf16.vlgmr.msra.gmra.mxu1 %v15553_v12  ;;  %10196 = vmatprep.subr.bf16.mxu0 %v13422_v55  ;;  %v13447_v55 = vld [vmem:[#allocation18 + $0x1a40] ss:$16 sps:$4 sm:$0xff]  }
 0x55c   :  { %v9903_v59 = vadd.f32 %v9902_v6, %v15541_v45  ;;  %v15564_v8 = vadd.f32 %v9941_v44, %v9901_v48  ;;  %10236 = vmatpush1.bf16.msra.mxu1 %v13417_v26  ;;  %10267 = vmatprep.mubr.bf16.mxu1 %v15560_v19  ;;  %v13429_v45 = vld [vmem:[#allocation18 + $0x1aa0] ss:$16 sps:$4 sm:$0xff]   ;;  %v13455_v26 = vld [vmem:[#allocation18 + $0x1a24] ss:$16 sps:$4 sm:$0xff]  }
 0x55d   :  { %v9904_v9 = vpop.f32.mrf.mxu0  ;;  %v9943_v21 = vpop.f32.mrf.mxu1  ;;  %10237 = vmatprep.subr.bf16.mxu1 %v13425_v24  ;;  %v13450_v43 = vld [vmem:[#allocation18 + $0x1820] ss:$16 sps:$4 sm:$0xff]   ;;  %v13458_v24 = vld [vmem:[#allocation18 + $0x1804] ss:$16 sps:$4 sm:$0xff]  }
 0x55e   :  { %v15567_v22 = vadd.f32 %v9943_v21, %v9903_v59  ;;  %10197 = vmatpush1.bf16.msra.mxu0 %v13420_v13  ;;  %v13453_v48 = vld [vmem:[#allocation18 + $0x1a20] ss:$16 sps:$4 sm:$0xff]   ;;  %v13461_v13 = vld [vmem:[#allocation18 + $0x1a04] ss:$16 sps:$4 sm:$0xff]  }
 0x55f   :  { %v9905_v1 = vpop.f32.mrf.mxu0  ;;  %v9945_v30 = vpop.f32.mrf.mxu1  ;;  %10198 = vmatprep.subr.bf16.mxu0 %v13428_v54  ;;  %v13456_v6 = vld [vmem:[#allocation18 + $0x1800] ss:$16 sps:$4 sm:$0xff]   ;;  %v13464_v44 = vld [vmem:[#allocation18 + $0x19e4] ss:$16 sps:$4 sm:$0xff]  }
 0x560   :  { %10238 = vmatpush1.bf16.msra.mxu1 %v13423_v25  ;;  %v13459_v54 = vld [vmem:[#allocation18 + $0x1a00] ss:$16 sps:$4 sm:$0xff]   ;;  %v13467_v59 = vld [vmem:[#allocation18 + $0x1be4] ss:$16 sps:$4 sm:$0xff]  }
 0x561   :  { %v9946_v23 = vpop.f32.mrf.mxu1  ;;  %10239 = vmatprep.subr.bf16.mxu1 %v13431_v4  ;;  %v13462_v25 = vld [vmem:[#allocation18 + $0x19e0] ss:$16 sps:$4 sm:$0xff]   ;;  %v13470_v9 = vld [vmem:[#allocation18 + $0x19c4] ss:$16 sps:$4 sm:$0xff]  }
 0x562   :  { %10199 = vmatpush1.bf16.msra.mxu0 %v13426_v32  ;;  %v13465_v21 = vld [vmem:[#allocation18 + $0x1be0] ss:$16 sps:$4 sm:$0xff]   ;;  %v13473_v4 = vld [vmem:[#allocation18 + $0x1bc4] ss:$16 sps:$4 sm:$0xff]  }
 0x563   :  { %10200 = vmatprep.subr.bf16.mxu0 %v13434_v31  ;;  %v13468_v32 = vld [vmem:[#allocation18 + $0x19c0] ss:$16 sps:$4 sm:$0xff]   ;;  %v13476_v1 = vld [vmem:[#allocation18 + $0x19a4] ss:$16 sps:$4 sm:$0xff]  }
 0x564   :  { %10240 = vmatpush1.bf16.msra.mxu1 %v13429_v45  ;;  %v13471_v30 = vld [vmem:[#allocation18 + $0x1bc0] ss:$16 sps:$4 sm:$0xff]   ;;  %v13479_v31 = vld [vmem:[#allocation18 + $0x1ba4] ss:$16 sps:$4 sm:$0xff]  }
 0x565   :  { %10241 = vmatprep.subr.bf16.mxu1 %v13437_v27  ;;  %v13474_v45 = vld [vmem:[#allocation18 + $0x19a0] ss:$16 sps:$4 sm:$0xff]   ;;  %v13482_v23 = vld [vmem:[#allocation18 + $0x1984] ss:$16 sps:$4 sm:$0xff]  }
 0x566   :  { %10201 = vmatpush1.bf16.msra.mxu0 %v13432_v29  ;;  %v13477_v27 = vld [vmem:[#allocation18 + $0x1ba0] ss:$16 sps:$4 sm:$0xff]   ;;  %v13485_v29 = vld [vmem:[#allocation18 + $0x1b84] ss:$16 sps:$4 sm:$0xff]  }
 0x567   :  { %10202 = vmatprep.subr.bf16.mxu0 %v13440_v62  ;;  %v13480_v62 = vld [vmem:[#allocation18 + $0x1980] ss:$16 sps:$4 sm:$0xff]  }
 0x568   :  { %10242 = vmatpush1.bf16.msra.mxu1 %v13435_v39  ;;  %v13488_v39 = vld [vmem:[#allocation18 + $0x1964] ss:$16 sps:$4 sm:$0xff]  }
 0x569   :  { %10243 = vmatprep.subr.bf16.mxu1 %v13443_v56  ;;  %v13483_v56 = vld [vmem:[#allocation18 + $0x1b80] ss:$16 sps:$4 sm:$0xff]  }
 0x56a   :  { %10203 = vmatpush1.bf16.msra.mxu0 %v13438_v63  ;;  %v13491_v63 = vld [vmem:[#allocation18 + $0x1b64] ss:$16 sps:$4 sm:$0xff]  }
 0x56b   :  { %10204 = vmatprep.subr.bf16.mxu0 %v13446_v20  ;;  %v13486_v20 = vld [vmem:[#allocation18 + $0x1960] ss:$16 sps:$4 sm:$0xff]  }
 0x56c   :  { %10244 = vmatpush1.bf16.msra.mxu1 %v13441_v47  ;;  %v13494_v47 = vld [vmem:[#allocation18 + $0x1944] ss:$16 sps:$4 sm:$0xff]  }
 0x56d   :  { %10245 = vmatprep.subr.bf16.mxu1 %v13449_v46  ;;  %v13489_v46 = vld [vmem:[#allocation18 + $0x1b60] ss:$16 sps:$4 sm:$0xff]  }
 0x56e   :  { %10205 = vmatpush1.bf16.msra.mxu0 %v13444_v50  ;;  %v13497_v50 = vld [vmem:[#allocation18 + $0x1b44] ss:$16 sps:$4 sm:$0xff]  }
 0x56f   :  { %10206 = vmatprep.subr.bf16.mxu0 %v13452_v60  ;;  %v13492_v60 = vld [vmem:[#allocation18 + $0x1940] ss:$16 sps:$4 sm:$0xff]  }
 0x570   :  { %10246 = vmatpush1.bf16.msra.mxu1 %v13447_v55  ;;  %v13500_v55 = vld [vmem:[#allocation18 + $0x1924] ss:$16 sps:$4 sm:$0xff]  }
 0x571   :  { %10247 = vmatprep.subr.bf16.mxu1 %v13455_v26  ;;  %v13495_v26 = vld [vmem:[#allocation18 + $0x1b40] ss:$16 sps:$4 sm:$0xff]  }
 0x572   :  { %10207 = vmatpush1.bf16.msra.mxu0 %v13450_v43  ;;  %v13503_v43 = vld [vmem:[#allocation18 + $0x1b24] ss:$16 sps:$4 sm:$0xff]  }
 0x573   :  { %10208 = vmatprep.subr.bf16.mxu0 %v13458_v24  ;;  %v13498_v24 = vld [vmem:[#allocation18 + $0x1920] ss:$16 sps:$4 sm:$0xff]  }
 0x574   :  { %10248 = vmatpush1.bf16.msra.mxu1 %v13453_v48  ;;  %v13506_v48 = vld [vmem:[#allocation18 + $0x1904] ss:$16 sps:$4 sm:$0xff]  }
 0x575   :  { %10249 = vmatprep.subr.bf16.mxu1 %v13461_v13  ;;  %v13501_v13 = vld [vmem:[#allocation18 + $0x1b20] ss:$16 sps:$4 sm:$0xff]  }
 0x576   :  { %10209 = vmatpush1.bf16.msra.mxu0 %v13456_v6  ;;  %v13509_v6 = vld [vmem:[#allocation18 + $0x1b04] ss:$16 sps:$4 sm:$0xff]  }
 0x577   :  { %10210 = vmatprep.subr.bf16.mxu0 %v13464_v44  ;;  %v13504_v44 = vld [vmem:[#allocation18 + $0x1900] ss:$16 sps:$4 sm:$0xff]  }
 0x578   :  { %10250 = vmatpush1.bf16.msra.mxu1 %v13459_v54  ;;  %v13512_v54 = vld [vmem:[#allocation18 + $0x1ce4] ss:$16 sps:$4 sm:$0xff]  }
 0x579   :  { %10251 = vmatprep.subr.bf16.mxu1 %v13467_v59  ;;  %v13507_v59 = vld [vmem:[#allocation18 + $0x1b00] ss:$16 sps:$4 sm:$0xff]  }
 0x57a   :  { %10211 = vmatpush2.bf16.msra.mxu0 %v13462_v25  ;;  %v13515_v25 = vld [vmem:[#allocation18 + $0x1ee4] ss:$16 sps:$4 sm:$0xff]  }
 0x57b   :  { %10212 = vmatprep.subr.bf16.mxu0 %v13470_v9  ;;  %v13510_v9 = vld [vmem:[#allocation18 + $0x1ce0] ss:$16 sps:$4 sm:$0xff]  }
 0x57c   :  { %10252 = vmatpush2.bf16.msra.mxu1 %v13465_v21  ;;  %v15571_v21 = vcombine.low %v15439_v16, %v15439_v16 }
 0x57d   :  { %10253 = vmatprep.subr.bf16.mxu1 %v13473_v4  ;;  %v13518_v4 = vld [vmem:[#allocation18 + $0x1cc4] ss:$16 sps:$4 sm:$0xff]  }
 0x57e   :  { %10213 = vmatpush2.bf16.msra.mxu0 %v13468_v32  ;;  %v15575_v32 = vcombine.high %v15441_v0, %v15441_v0 }
 0x57f   :  { %10214 = vmatprep.subr.bf16.mxu0 %v13476_v1  ;;  %v13513_v1 = vld [vmem:[#allocation18 + $0x1ee0] ss:$16 sps:$4 sm:$0xff]  }
 0x580   :  { %10254 = vmatpush2.bf16.msra.mxu1 %v13471_v30  ;;  %v15579_v30 = vcombine.low %v15447_v33, %v15447_v33  ;;  %v13524_v33 = vld [vmem:[#allocation18 + $0x1ca4] ss:$16 sps:$4 sm:$0xff]  }
 0x581   :  { %10255 = vmatprep.subr.bf16.mxu1 %v13479_v31 }
 0x582   :  { %10215 = vmatpush2.bf16.msra.mxu0 %v13474_v45  ;;  %v13521_v45 = vld [vmem:[#allocation18 + $0x1ec4] ss:$16 sps:$4 sm:$0xff]  }
 0x583   :  { %10216 = vmatprep.subr.bf16.mxu0 %v13482_v23  ;;  %v15586_v23 = vcombine.high %v15449_v17, %v15449_v17 }
 0x584   :  { %10256 = vmatpush2.bf16.msra.mxu1 %v13477_v27  ;;  %v13516_v27 = vld [vmem:[#allocation18 + $0x1cc0] ss:$16 sps:$4 sm:$0xff]  }
 0x585   :  { %10257 = vmatprep.subr.bf16.mxu1 %v13485_v29 }
 0x586   :  { %10217 = vmatpush2.bf16.msra.mxu0 %v13480_v62 }
 0x587   :  { %10218 = vmatprep.subr.bf16.mxu0 %v13488_v39 }
 0x588   :  { %10258 = vmatpush2.bf16.msra.mxu1 %v13483_v56 }
 0x589   :  { %10259 = vmatprep.subr.bf16.mxu1 %v13491_v63 }
 0x58a   :  { %10219 = vmatpush2.bf16.msra.mxu0 %v13486_v20 }
 0x58b   :  { %10220 = vmatprep.subr.bf16.mxu0 %v13494_v47  ;;  %v13527_v47 = vld [vmem:[#allocation18 + $0x1ea4] ss:$16 sps:$4 sm:$0xff]  }
 0x58c   :  { %10260 = vmatpush2.bf16.msra.mxu1 %v13489_v46 }
 0x58d   :  { %10261 = vmatprep.subr.bf16.mxu1 %v13497_v50  ;;  %v13522_v50 = vld [vmem:[#allocation18 + $0x1ca0] ss:$16 sps:$4 sm:$0xff]  }
 0x58e   :  { %10221 = vmatpush2.bf16.msra.mxu0 %v13492_v60 }
 0x58f   :  { %10222 = vmatprep.subr.bf16.mxu0 %v13500_v55 }
 0x590   :  { %10262 = vmatpush2.bf16.msra.mxu1 %v13495_v26  ;;  %v13530_v26 = vld [vmem:[#allocation18 + $0x1c84] ss:$16 sps:$4 sm:$0xff]  }
 0x591   :  { %10263 = vmatprep.subr.bf16.mxu1 %v13503_v43 }
 0x592   :  { %10223 = vmatpush2.bf16.msra.mxu0 %v13498_v24  ;;  %v13533_v24 = vld [vmem:[#allocation18 + $0x1e84] ss:$16 sps:$4 sm:$0xff]  }
 0x593   :  { %10224 = vmatprep.subr.bf16.mxu0 %v13506_v48  ;;  %v13528_v48 = vld [vmem:[#allocation18 + $0x1c80] ss:$16 sps:$4 sm:$0xff]  }
 0x594   :  { %10264 = vmatpush2.bf16.msra.mxu1 %v13501_v13  ;;  %v13536_v13 = vld [vmem:[#allocation18 + $0x1c64] ss:$16 sps:$4 sm:$0xff]  }
 0x595   :  { %10265 = vmatprep.subr.bf16.mxu1 %v13509_v6  ;;  %v13531_v6 = vld [vmem:[#allocation18 + $0x1e80] ss:$16 sps:$4 sm:$0xff]  }
 0x596   :  { %10225 = vmatpush2.bf16.msra.mxu0 %v13504_v44  ;;  %v13539_v44 = vld [vmem:[#allocation18 + $0x1e64] ss:$16 sps:$4 sm:$0xff]  }
 0x597   :  { %10276 = vmatprep.subr.bf16.mxu0 %v13512_v54  ;;  %v13534_v54 = vld [vmem:[#allocation18 + $0x1c60] ss:$16 sps:$4 sm:$0xff]  }
 0x598   :  { %10266 = vmatpush2.bf16.msra.mxu1 %v13507_v59  ;;  %v13542_v59 = vld [vmem:[#allocation18 + $0x1c44] ss:$16 sps:$4 sm:$0xff]  }
 0x599   :  { %v9982_v31 = vpop.f32.mrf.mxu0  ;;  %10227 = vmatmul.mubr.bf16.vlgmr.msra.gmra.mxu0 %v15571_v21  ;;  %10317 = vmatprep.subr.bf16.mxu1 %v13515_v25  ;;  %v13537_v25 = vld [vmem:[#allocation18 + $0x1e60] ss:$16 sps:$4 sm:$0xff]  }
 0x59a   :  { %v9983_v16 = vadd.f32 %v9982_v31, %v15564_v8  ;;  %10277 = vmatpush1.bf16.msra.mxu0 %v13510_v9  ;;  %10308 = vmatprep.mubr.bf16.mxu0 %v15575_v32  ;;  %v13519_v8 = vld [vmem:[#allocation18 + $0x1ec0] ss:$16 sps:$4 sm:$0xff]   ;;  %v13545_v9 = vld [vmem:[#allocation18 + $0x1e44] ss:$16 sps:$4 sm:$0xff]  }
 0x59b   :  { %v9984_v29 = vpop.f32.mrf.mxu0  ;;  %v10023_v62 = vpop.f32.mrf.mxu1  ;;  %10268 = vmatmul.mubr.bf16.vlgmr.msra.gmra.mxu1 %v15579_v30  ;;  %10278 = vmatprep.subr.bf16.mxu0 %v13518_v4  ;;  %v13540_v4 = vld [vmem:[#allocation18 + $0x1c40] ss:$16 sps:$4 sm:$0xff]  }
 0x59c   :  { %v9985_v39 = vadd.f32 %v9984_v29, %v15567_v22  ;;  %v15590_v56 = vadd.f32 %v10023_v62, %v9983_v16  ;;  %10318 = vmatpush1.bf16.msra.mxu1 %v13513_v1  ;;  %10349 = vmatprep.mubr.bf16.mxu1 %v15586_v23  ;;  %v13525_v22 = vld [vmem:[#allocation18 + $0x1ea0] ss:$16 sps:$4 sm:$0xff]   ;;  %v13548_v1 = vld [vmem:[#allocation18 + $0x1c24] ss:$16 sps:$4 sm:$0xff]  }
 0x59d   :  { %v9986_v63 = vpop.f32.mrf.mxu0  ;;  %v10025_v20 = vpop.f32.mrf.mxu1  ;;  %10319 = vmatprep.subr.bf16.mxu1 %v13521_v45  ;;  %v13543_v31 = vld [vmem:[#allocation18 + $0x1e40] ss:$16 sps:$4 sm:$0xff]   ;;  %v13551_v45 = vld [vmem:[#allocation18 + $0x1e24] ss:$16 sps:$4 sm:$0xff]  }
 0x59e   :  { %v15593_v46 = vadd.f32 %v10025_v20, %v9985_v39  ;;  %10279 = vmatpush1.bf16.msra.mxu0 %v13516_v27  ;;  %v13546_v16 = vld [vmem:[#allocation18 + $0x1c20] ss:$16 sps:$4 sm:$0xff]   ;;  %v13554_v27 = vld [vmem:[#allocation18 + $0x1c04] ss:$16 sps:$4 sm:$0xff]  }
 0x59f   :  { %v9987_v60 = vpop.f32.mrf.mxu0  ;;  %v10027_v55 = vpop.f32.mrf.mxu1  ;;  %10280 = vmatprep.subr.bf16.mxu0 %v13524_v33  ;;  %v13549_v29 = vld [vmem:[#allocation18 + $0x1e20] ss:$16 sps:$4 sm:$0xff]   ;;  %v13557_v62 = vld [vmem:[#allocation18 + $0x1e04] ss:$16 sps:$4 sm:$0xff]  }
 0x5a0   :  { %10320 = vmatpush1.bf16.msra.mxu1 %v13519_v8  ;;  %v13552_v33 = vld [vmem:[#allocation18 + $0x1c00] ss:$16 sps:$4 sm:$0xff]   ;;  %v13560_v39 = vld [vmem:[#allocation18 + $0x1de4] ss:$16 sps:$4 sm:$0xff]  }
 0x5a1   :  { %v10028_v43 = vpop.f32.mrf.mxu1  ;;  %10321 = vmatprep.subr.bf16.mxu1 %v13527_v47  ;;  %v13555_v8 = vld [vmem:[#allocation18 + $0x1e00] ss:$16 sps:$4 sm:$0xff]   ;;  %v13563_v63 = vld [vmem:[#allocation18 + $0x1fe4] ss:$16 sps:$4 sm:$0xff]  }
 0x5a2   :  { %10281 = vmatpush1.bf16.msra.mxu0 %v13522_v50  ;;  %v13558_v20 = vld [vmem:[#allocation18 + $0x1de0] ss:$16 sps:$4 sm:$0xff]   ;;  %v13566_v47 = vld [vmem:[#allocation18 + $0x1dc4] ss:$16 sps:$4 sm:$0xff]  }
 0x5a3   :  { %10282 = vmatprep.subr.bf16.mxu0 %v13530_v26  ;;  %v13561_v50 = vld [vmem:[#allocation18 + $0x1fe0] ss:$16 sps:$4 sm:$0xff]   ;;  %v13569_v60 = vld [vmem:[#allocation18 + $0x1fc4] ss:$16 sps:$4 sm:$0xff]  }
 0x5a4   :  { %10322 = vmatpush1.bf16.msra.mxu1 %v13525_v22  ;;  %v13564_v55 = vld [vmem:[#allocation18 + $0x1dc0] ss:$16 sps:$4 sm:$0xff]   ;;  %v13572_v26 = vld [vmem:[#allocation18 + $0x1da4] ss:$16 sps:$4 sm:$0xff]  }
 0x5a5   :  { %10323 = vmatprep.subr.bf16.mxu1 %v13533_v24  ;;  %v13567_v22 = vld [vmem:[#allocation18 + $0x1fc0] ss:$16 sps:$4 sm:$0xff]   ;;  %v13575_v43 = vld [vmem:[#allocation18 + $0x1fa4] ss:$16 sps:$4 sm:$0xff]  }
 0x5a6   :  { %10283 = vmatpush1.bf16.msra.mxu0 %v13528_v48  ;;  %v13570_v24 = vld [vmem:[#allocation18 + $0x1da0] ss:$16 sps:$4 sm:$0xff]   ;;  %v13578_v48 = vld [vmem:[#allocation18 + $0x1d84] ss:$16 sps:$4 sm:$0xff]  }
 0x5a7   :  { %10284 = vmatprep.subr.bf16.mxu0 %v13536_v13  ;;  %v13573_v13 = vld [vmem:[#allocation18 + $0x1fa0] ss:$16 sps:$4 sm:$0xff]  }
 0x5a8   :  { %10324 = vmatpush1.bf16.msra.mxu1 %v13531_v6  ;;  %v13581_v6 = vld [vmem:[#allocation18 + $0x1f84] ss:$16 sps:$4 sm:$0xff]  }
 0x5a9   :  { %10325 = vmatprep.subr.bf16.mxu1 %v13539_v44  ;;  %v13576_v44 = vld [vmem:[#allocation18 + $0x1d80] ss:$16 sps:$4 sm:$0xff]  }
 0x5aa   :  { %10285 = vmatpush1.bf16.msra.mxu0 %v13534_v54  ;;  %v13584_v54 = vld [vmem:[#allocation18 + $0x1d64] ss:$16 sps:$4 sm:$0xff]  }
 0x5ab   :  { %10286 = vmatprep.subr.bf16.mxu0 %v13542_v59  ;;  %v13579_v59 = vld [vmem:[#allocation18 + $0x1f80] ss:$16 sps:$4 sm:$0xff]  }
 0x5ac   :  { %10326 = vmatpush1.bf16.msra.mxu1 %v13537_v25  ;;  %v13587_v25 = vld [vmem:[#allocation18 + $0x1f64] ss:$16 sps:$4 sm:$0xff]  }
 0x5ad   :  { %10327 = vmatprep.subr.bf16.mxu1 %v13545_v9  ;;  %v13582_v9 = vld [vmem:[#allocation18 + $0x1d60] ss:$16 sps:$4 sm:$0xff]  }
 0x5ae   :  { %10287 = vmatpush1.bf16.msra.mxu0 %v13540_v4  ;;  %v13590_v4 = vld [vmem:[#allocation18 + $0x1d44] ss:$16 sps:$4 sm:$0xff]  }
 0x5af   :  { %10288 = vmatprep.subr.bf16.mxu0 %v13548_v1  ;;  %v13585_v1 = vld [vmem:[#allocation18 + $0x1f60] ss:$16 sps:$4 sm:$0xff]  }
 0x5b0   :  { %10328 = vmatpush1.bf16.msra.mxu1 %v13543_v31  ;;  %v13593_v31 = vld [vmem:[#allocation18 + $0x1f44] ss:$16 sps:$4 sm:$0xff]  }
 0x5b1   :  { %10329 = vmatprep.subr.bf16.mxu1 %v13551_v45  ;;  %v13588_v45 = vld [vmem:[#allocation18 + $0x1d40] ss:$16 sps:$4 sm:$0xff]  }
 0x5b2   :  { %10289 = vmatpush1.bf16.msra.mxu0 %v13546_v16  ;;  %v13596_v16 = vld [vmem:[#allocation18 + $0x1d24] ss:$16 sps:$4 sm:$0xff]  }
 0x5b3   :  { %10290 = vmatprep.subr.bf16.mxu0 %v13554_v27  ;;  %v13591_v27 = vld [vmem:[#allocation18 + $0x1f40] ss:$16 sps:$4 sm:$0xff]  }
 0x5b4   :  { %10330 = vmatpush1.bf16.msra.mxu1 %v13549_v29  ;;  %v13599_v29 = vld [vmem:[#allocation18 + $0x1f24] ss:$16 sps:$4 sm:$0xff]  }
 0x5b5   :  { %10331 = vmatprep.subr.bf16.mxu1 %v13557_v62  ;;  %v13594_v62 = vld [vmem:[#allocation18 + $0x1d20] ss:$16 sps:$4 sm:$0xff]  }
 0x5b6   :  { %10291 = vmatpush1.bf16.msra.mxu0 %v13552_v33  ;;  %v13602_v33 = vld [vmem:[#allocation18 + $0x1d04] ss:$16 sps:$4 sm:$0xff]  }
 0x5b7   :  { %10292 = vmatprep.subr.bf16.mxu0 %v13560_v39  ;;  %v13597_v39 = vld [vmem:[#allocation18 + $0x1f20] ss:$16 sps:$4 sm:$0xff]  }
 0x5b8   :  { %10332 = vmatpush1.bf16.msra.mxu1 %v13555_v8  ;;  %v13605_v8 = vld [vmem:[#allocation18 + $0x1f04] ss:$16 sps:$4 sm:$0xff]  }
 0x5b9   :  { %10333 = vmatprep.subr.bf16.mxu1 %v13563_v63  ;;  %v13600_v63 = vld [vmem:[#allocation18 + $0x1d00] ss:$16 sps:$4 sm:$0xff]  }
 0x5ba   :  { %10293 = vmatpush2.bf16.msra.mxu0 %v13558_v20  ;;  %v13608_v20 = vld [vmem:[#allocation18 + $0xec] ss:$16 sps:$4 sm:$0xff]  }
 0x5bb   :  { %10294 = vmatprep.subr.bf16.mxu0 %v13566_v47  ;;  %v13603_v47 = vld [vmem:[#allocation18 + $0x1f00] ss:$16 sps:$4 sm:$0xff]  }
 0x5bc   :  { %10334 = vmatpush2.bf16.msra.mxu1 %v13561_v50  ;;  %v13611_v50 = vld [vmem:[#allocation18 + $0x2ec] ss:$16 sps:$4 sm:$0xff]  }
 0x5bd   :  { %10335 = vmatprep.subr.bf16.mxu1 %v13569_v60  ;;  %v13606_v60 = vld [vmem:[#allocation18 + $0xe8] ss:$16 sps:$4 sm:$0xff]  }
 0x5be   :  { %10295 = vmatpush2.bf16.msra.mxu0 %v13564_v55  ;;  %v15597_v55 = vcombine.low %v15441_v0, %v15441_v0  ;;  %v13612_v0 = vld [vmem:[#allocation18 + $0xc8] ss:$16 sps:$4 sm:$0xff]  }
 0x5bf   :  { %10296 = vmatprep.subr.bf16.mxu0 %v13572_v26  ;;  %v13614_v26 = vld [vmem:[#allocation18 + $0xcc] ss:$16 sps:$4 sm:$0xff]  }
 0x5c0   :  { %10336 = vmatpush2.bf16.msra.mxu1 %v13567_v22  ;;  %v13609_v22 = vld [vmem:[#allocation18 + $0x2e8] ss:$16 sps:$4 sm:$0xff]  }
 0x5c1   :  { %10337 = vmatprep.subr.bf16.mxu1 %v13575_v43  ;;  %v15601_v43 = vcombine.low %v15449_v17, %v15449_v17 }
 0x5c2   :  { %10297 = vmatpush2.bf16.msra.mxu0 %v13570_v24 }
 0x5c3   :  { %10298 = vmatprep.subr.bf16.mxu0 %v13578_v48  ;;  %v13617_v48 = vld [vmem:[#allocation18 + $0x2cc] ss:$16 sps:$4 sm:$0xff]  }
 0x5c4   :  { %10338 = vmatpush2.bf16.msra.mxu1 %v13573_v13 }
 0x5c5   :  { %10339 = vmatprep.subr.bf16.mxu1 %v13581_v6 }
 0x5c6   :  { %10299 = vmatpush2.bf16.msra.mxu0 %v13576_v44 }
 0x5c7   :  { %10300 = vmatprep.subr.bf16.mxu0 %v13584_v54  ;;  %v13620_v54 = vld [vmem:[#allocation18 + $0xac] ss:$16 sps:$4 sm:$0xff]  }
 0x5c8   :  { %10340 = vmatpush2.bf16.msra.mxu1 %v13579_v59 }
 0x5c9   :  { %10341 = vmatprep.subr.bf16.mxu1 %v13587_v25  ;;  %v13615_v25 = vld [vmem:[#allocation18 + $0x2c8] ss:$16 sps:$4 sm:$0xff]  }
 0x5ca   :  { %10301 = vmatpush2.bf16.msra.mxu0 %v13582_v9 }
 0x5cb   :  { %10302 = vmatprep.subr.bf16.mxu0 %v13590_v4  ;;  %v13623_v4 = vld [vmem:[#allocation18 + $0x2ac] ss:$16 sps:$4 sm:$0xff]  }
 0x5cc   :  { %10342 = vmatpush2.bf16.msra.mxu1 %v13585_v1  ;;  %v13618_v1 = vld [vmem:[#allocation18 + $0xa8] ss:$16 sps:$4 sm:$0xff]  }
 0x5cd   :  { %10343 = vmatprep.subr.bf16.mxu1 %v13593_v31 }
 0x5ce   :  { %10303 = vmatpush2.bf16.msra.mxu0 %v13588_v45 }
 0x5cf   :  { %10304 = vmatprep.subr.bf16.mxu0 %v13596_v16  ;;  %v13626_v16 = vld [vmem:[#allocation18 + $0x8c] ss:$16 sps:$4 sm:$0xff]  }
 0x5d0   :  { %10344 = vmatpush2.bf16.msra.mxu1 %v13591_v27 }
 0x5d1   :  { %10345 = vmatprep.subr.bf16.mxu1 %v13599_v29  ;;  %v13629_v29 = vld [vmem:[#allocation18 + $0x28c] ss:$16 sps:$4 sm:$0xff]  }
 0x5d2   :  { %10305 = vmatpush2.bf16.msra.mxu0 %v13594_v62  ;;  %v13632_v62 = vld [vmem:[#allocation18 + $0x6c] ss:$16 sps:$4 sm:$0xff]  }
 0x5d3   :  { %10306 = vmatprep.subr.bf16.mxu0 %v13602_v33  ;;  %v13627_v33 = vld [vmem:[#allocation18 + $0x288] ss:$16 sps:$4 sm:$0xff]  }
 0x5d4   :  { %10346 = vmatpush2.bf16.msra.mxu1 %v13597_v39  ;;  %v13635_v39 = vld [vmem:[#allocation18 + $0x26c] ss:$16 sps:$4 sm:$0xff]  }
 0x5d5   :  { %10347 = vmatprep.subr.bf16.mxu1 %v13605_v8  ;;  %v13630_v8 = vld [vmem:[#allocation18 + $0x68] ss:$16 sps:$4 sm:$0xff]  }
 0x5d6   :  { %10307 = vmatpush2.bf16.msra.mxu0 %v13600_v63  ;;  %v13638_v63 = vld [vmem:[#allocation18 + $0x4c] ss:$16 sps:$4 sm:$0xff]  }
 0x5d7   :  { %10358 = vmatprep.subr.bf16.mxu0 %v13608_v20  ;;  %v13633_v20 = vld [vmem:[#allocation18 + $0x268] ss:$16 sps:$4 sm:$0xff]  }
 0x5d8   :  { %10348 = vmatpush2.bf16.msra.mxu1 %v13603_v47  ;;  %v13641_v47 = vld [vmem:[#allocation18 + $0x24c] ss:$16 sps:$4 sm:$0xff]  }
 0x5d9   :  { %v10064_v24 = vpop.f32.mrf.mxu0  ;;  %10309 = vmatmul.mubr.bf16.vlgmr.msra.gmra.mxu0 %v15597_v55  ;;  %10399 = vmatprep.subr.bf16.mxu1 %v13611_v50  ;;  %v13636_v50 = vld [vmem:[#allocation18 + $0x48] ss:$16 sps:$4 sm:$0xff]  }
 0x5da   :  { %v10065_v13 = vadd.f32 %v10064_v24, %v15590_v56  ;;  %10359 = vmatpush1.bf16.msra.mxu0 %v13606_v60  ;;  %10390 = vmatprep.mubr.bf16.mxu0 %v15375_v36  ;;  %v13644_v60 = vld [vmem:[#allocation18 + $0x2c] ss:$16 sps:$4 sm:$0xff]   ;;  %v13642_v24 = vld [vmem:[#allocation18 + $0x28] ss:$16 sps:$4 sm:$0xff]  }
 0x5db   :  { %v10066_v6 = vpop.f32.mrf.mxu0  ;;  %v10105_v44 = vpop.f32.mrf.mxu1  ;;  %10350 = vmatmul.mubr.bf16.vlgmr.msra.gmra.mxu1 %v15601_v43  ;;  %10360 = vmatprep.subr.bf16.mxu0 %v13614_v26  ;;  %v13639_v26 = vld [vmem:[#allocation18 + $0x248] ss:$16 sps:$4 sm:$0xff]  }
 0x5dc   :  { %v10067_v17 = vadd.f32 %v10066_v6, %v15593_v46  ;;  %v15608_v59 = vadd.f32 %v10105_v44, %v10065_v13  ;;  %10400 = vmatpush1.bf16.msra.mxu1 %v13609_v22  ;;  %10431 = vmatprep.mubr.bf16.mxu1 %v15384_v34  ;;  %v13621_v46 = vld [vmem:[#allocation18 + $0x2a8] ss:$16 sps:$4 sm:$0xff]   ;;  %v13647_v22 = vld [vmem:[#allocation18 + $0x22c] ss:$16 sps:$4 sm:$0xff]  }
 0x5dd   :  { %v10068_v9 = vpop.f32.mrf.mxu0  ;;  %v10107_v56 = vpop.f32.mrf.mxu1  ;;  %10401 = vmatprep.subr.bf16.mxu1 %v13617_v48  ;;  %v13624_v34 = vld [vmem:[#allocation18 + $0x88] ss:$16 sps:$4 sm:$0xff]   ;;  %v13650_v48 = vld [vmem:[#allocation18 + $0xc] ss:$16 sps:$4 sm:$0xff]  }
 0x5de   :  { %v15611_v36 = vadd.f32 %v10107_v56, %v10067_v17  ;;  %10361 = vmatpush1.bf16.msra.mxu0 %v13612_v0  ;;  %v13645_v13 = vld [vmem:[#allocation18 + $0x228] ss:$16 sps:$4 sm:$0xff]   ;;  %v13653_v0 = vld [vmem:[#allocation18 + $0x20c] ss:$16 sps:$4 sm:$0xff]  }
 0x5df   :  { %v10069_v31 = vpop.f32.mrf.mxu0  ;;  %v10109_v45 = vpop.f32.mrf.mxu1  ;;  %10362 = vmatprep.subr.bf16.mxu0 %v13620_v54  ;;  %v13648_v6 = vld [vmem:[#allocation18 + $0x8] ss:$16 sps:$4 sm:$0xff]   ;;  %v13656_v44 = vld [vmem:[#allocation18 + $0x1ec] ss:$16 sps:$4 sm:$0xff]  }
 0x5e0   :  { %10402 = vmatpush1.bf16.msra.mxu1 %v13615_v25  ;;  %v13651_v54 = vld [vmem:[#allocation18 + $0x208] ss:$16 sps:$4 sm:$0xff]   ;;  %v13659_v17 = vld [vmem:[#allocation18 + $0x3ec] ss:$16 sps:$4 sm:$0xff]  }
 0x5e1   :  { %v10110_v27 = vpop.f32.mrf.mxu1  ;;  %10403 = vmatprep.subr.bf16.mxu1 %v13623_v4  ;;  %v13654_v25 = vld [vmem:[#allocation18 + $0x1e8] ss:$16 sps:$4 sm:$0xff]   ;;  %v13662_v9 = vld [vmem:[#allocation18 + $0x1cc] ss:$16 sps:$4 sm:$0xff]  }
 0x5e2   :  { %10363 = vmatpush1.bf16.msra.mxu0 %v13618_v1  ;;  %v13657_v56 = vld [vmem:[#allocation18 + $0x3e8] ss:$16 sps:$4 sm:$0xff]   ;;  %v13665_v4 = vld [vmem:[#allocation18 + $0x3cc] ss:$16 sps:$4 sm:$0xff]  }
 0x5e3   :  { %10364 = vmatprep.subr.bf16.mxu0 %v13626_v16  ;;  %v13660_v1 = vld [vmem:[#allocation18 + $0x1c8] ss:$16 sps:$4 sm:$0xff]   ;;  %v13668_v31 = vld [vmem:[#allocation18 + $0x1ac] ss:$16 sps:$4 sm:$0xff]  }
 0x5e4   :  { %10404 = vmatpush1.bf16.msra.mxu1 %v13621_v46  ;;  %v13663_v45 = vld [vmem:[#allocation18 + $0x3c8] ss:$16 sps:$4 sm:$0xff]   ;;  %v13671_v16 = vld [vmem:[#allocation18 + $0x3ac] ss:$16 sps:$4 sm:$0xff]  }
 0x5e5   :  { %10405 = vmatprep.subr.bf16.mxu1 %v13629_v29  ;;  %v13666_v46 = vld [vmem:[#allocation18 + $0x1a8] ss:$16 sps:$4 sm:$0xff]   ;;  %v13674_v27 = vld [vmem:[#allocation18 + $0x18c] ss:$16 sps:$4 sm:$0xff]  }
 0x5e6   :  { %10365 = vmatpush1.bf16.msra.mxu0 %v13624_v34  ;;  %v13669_v29 = vld [vmem:[#allocation18 + $0x3a8] ss:$16 sps:$4 sm:$0xff]   ;;  %v13677_v34 = vld [vmem:[#allocation18 + $0x38c] ss:$16 sps:$4 sm:$0xff]  }
 0x5e7   :  { %10366 = vmatprep.subr.bf16.mxu0 %v13632_v62  ;;  %v13672_v62 = vld [vmem:[#allocation18 + $0x188] ss:$16 sps:$4 sm:$0xff]  }
 0x5e8   :  { %10406 = vmatpush1.bf16.msra.mxu1 %v13627_v33  ;;  %v13680_v33 = vld [vmem:[#allocation18 + $0x16c] ss:$16 sps:$4 sm:$0xff]  }
 0x5e9   :  { %10407 = vmatprep.subr.bf16.mxu1 %v13635_v39  ;;  %v13675_v39 = vld [vmem:[#allocation18 + $0x388] ss:$16 sps:$4 sm:$0xff]  }
 0x5ea   :  { %10367 = vmatpush1.bf16.msra.mxu0 %v13630_v8  ;;  %v13683_v8 = vld [vmem:[#allocation18 + $0x36c] ss:$16 sps:$4 sm:$0xff]  }
 0x5eb   :  { %10368 = vmatprep.subr.bf16.mxu0 %v13638_v63  ;;  %v13678_v63 = vld [vmem:[#allocation18 + $0x168] ss:$16 sps:$4 sm:$0xff]  }
 0x5ec   :  { %10408 = vmatpush1.bf16.msra.mxu1 %v13633_v20  ;;  %v13686_v20 = vld [vmem:[#allocation18 + $0x14c] ss:$16 sps:$4 sm:$0xff]  }
 0x5ed   :  { %10409 = vmatprep.subr.bf16.mxu1 %v13641_v47  ;;  %v13681_v47 = vld [vmem:[#allocation18 + $0x368] ss:$16 sps:$4 sm:$0xff]  }
 0x5ee   :  { %10369 = vmatpush1.bf16.msra.mxu0 %v13636_v50  ;;  %v13689_v50 = vld [vmem:[#allocation18 + $0x34c] ss:$16 sps:$4 sm:$0xff]  }
 0x5ef   :  { %10370 = vmatprep.subr.bf16.mxu0 %v13644_v60  ;;  %v13684_v60 = vld [vmem:[#allocation18 + $0x148] ss:$16 sps:$4 sm:$0xff]  }
 0x5f0   :  { %10410 = vmatpush1.bf16.msra.mxu1 %v13639_v26  ;;  %v13692_v26 = vld [vmem:[#allocation18 + $0x12c] ss:$16 sps:$4 sm:$0xff]  }
 0x5f1   :  { %10411 = vmatprep.subr.bf16.mxu1 %v13647_v22  ;;  %v13687_v22 = vld [vmem:[#allocation18 + $0x348] ss:$16 sps:$4 sm:$0xff]  }
 0x5f2   :  { %10371 = vmatpush1.bf16.msra.mxu0 %v13642_v24  ;;  %v13695_v24 = vld [vmem:[#allocation18 + $0x32c] ss:$16 sps:$4 sm:$0xff]  }
 0x5f3   :  { %10372 = vmatprep.subr.bf16.mxu0 %v13650_v48  ;;  %v13690_v48 = vld [vmem:[#allocation18 + $0x128] ss:$16 sps:$4 sm:$0xff]  }
 0x5f4   :  { %10412 = vmatpush1.bf16.msra.mxu1 %v13645_v13  ;;  %v13698_v13 = vld [vmem:[#allocation18 + $0x10c] ss:$16 sps:$4 sm:$0xff]  }
 0x5f5   :  { %10413 = vmatprep.subr.bf16.mxu1 %v13653_v0  ;;  %v13693_v0 = vld [vmem:[#allocation18 + $0x328] ss:$16 sps:$4 sm:$0xff]  }
 0x5f6   :  { %10373 = vmatpush1.bf16.msra.mxu0 %v13648_v6  ;;  %v13701_v6 = vld [vmem:[#allocation18 + $0x30c] ss:$16 sps:$4 sm:$0xff]  }
 0x5f7   :  { %10374 = vmatprep.subr.bf16.mxu0 %v13656_v44  ;;  %v13696_v44 = vld [vmem:[#allocation18 + $0x108] ss:$16 sps:$4 sm:$0xff]  }
 0x5f8   :  { %10414 = vmatpush1.bf16.msra.mxu1 %v13651_v54  ;;  %v13704_v54 = vld [vmem:[#allocation18 + $0x4ec] ss:$16 sps:$4 sm:$0xff]  }
 0x5f9   :  { %10415 = vmatprep.subr.bf16.mxu1 %v13659_v17  ;;  %v13699_v17 = vld [vmem:[#allocation18 + $0x308] ss:$16 sps:$4 sm:$0xff]  }
 0x5fa   :  { %10375 = vmatpush2.bf16.msra.mxu0 %v13654_v25  ;;  %v13707_v25 = vld [vmem:[#allocation18 + $0x6ec] ss:$16 sps:$4 sm:$0xff]  }
 0x5fb   :  { %10376 = vmatprep.subr.bf16.mxu0 %v13662_v9  ;;  %v13702_v9 = vld [vmem:[#allocation18 + $0x4e8] ss:$16 sps:$4 sm:$0xff]  }
 0x5fc   :  { %10416 = vmatpush2.bf16.msra.mxu1 %v13657_v56  ;;  %v13710_v56 = vld [vmem:[#allocation18 + $0x4cc] ss:$16 sps:$4 sm:$0xff]  }
 0x5fd   :  { %10417 = vmatprep.subr.bf16.mxu1 %v13665_v4  ;;  %v13705_v4 = vld [vmem:[#allocation18 + $0x6e8] ss:$16 sps:$4 sm:$0xff]  }
 0x5fe   :  { %10377 = vmatpush2.bf16.msra.mxu0 %v13660_v1 }
 0x5ff   :  { %10378 = vmatprep.subr.bf16.mxu0 %v13668_v31  ;;  %v13713_v31 = vld [vmem:[#allocation18 + $0x6cc] ss:$16 sps:$4 sm:$0xff]  }
 0x600   :  { %10418 = vmatpush2.bf16.msra.mxu1 %v13663_v45 }
 0x601   :  { %10419 = vmatprep.subr.bf16.mxu1 %v13671_v16  ;;  %v13708_v16 = vld [vmem:[#allocation18 + $0x4c8] ss:$16 sps:$4 sm:$0xff]  }
 0x602   :  { %10379 = vmatpush2.bf16.msra.mxu0 %v13666_v46 }
 0x603   :  { %10380 = vmatprep.subr.bf16.mxu0 %v13674_v27 }
 0x604   :  { %10420 = vmatpush2.bf16.msra.mxu1 %v13669_v29  ;;  %v13716_v29 = vld [vmem:[#allocation18 + $0x4ac] ss:$16 sps:$4 sm:$0xff]  }
 0x605   :  { %10421 = vmatprep.subr.bf16.mxu1 %v13677_v34 }
 0x606   :  { %10381 = vmatpush2.bf16.msra.mxu0 %v13672_v62 }
 0x607   :  { %10382 = vmatprep.subr.bf16.mxu0 %v13680_v33 }
 0x608   :  { %10422 = vmatpush2.bf16.msra.mxu1 %v13675_v39  ;;  %v13719_v39 = vld [vmem:[#allocation18 + $0x6ac] ss:$16 sps:$4 sm:$0xff]  }
 0x609   :  { %10423 = vmatprep.subr.bf16.mxu1 %v13683_v8  ;;  %v13714_v8 = vld [vmem:[#allocation18 + $0x4a8] ss:$16 sps:$4 sm:$0xff]  }
 0x60a   :  { %10383 = vmatpush2.bf16.msra.mxu0 %v13678_v63 }
 0x60b   :  { %10384 = vmatprep.subr.bf16.mxu0 %v13686_v20  ;;  %v13722_v20 = vld [vmem:[#allocation18 + $0x48c] ss:$16 sps:$4 sm:$0xff]  }
 0x60c   :  { %10424 = vmatpush2.bf16.msra.mxu1 %v13681_v47 }
 0x60d   :  { %10425 = vmatprep.subr.bf16.mxu1 %v13689_v50  ;;  %v13725_v50 = vld [vmem:[#allocation18 + $0x68c] ss:$16 sps:$4 sm:$0xff]  }
 0x60e   :  { %10385 = vmatpush2.bf16.msra.mxu0 %v13684_v60  ;;  %v13728_v60 = vld [vmem:[#allocation18 + $0x46c] ss:$16 sps:$4 sm:$0xff]  }
 0x60f   :  { %10386 = vmatprep.subr.bf16.mxu0 %v13692_v26  ;;  %v13723_v26 = vld [vmem:[#allocation18 + $0x688] ss:$16 sps:$4 sm:$0xff]  }
 0x610   :  { %10426 = vmatpush2.bf16.msra.mxu1 %v13687_v22  ;;  %v13731_v22 = vld [vmem:[#allocation18 + $0x66c] ss:$16 sps:$4 sm:$0xff]  }
 0x611   :  { %10427 = vmatprep.subr.bf16.mxu1 %v13695_v24  ;;  %v13726_v24 = vld [vmem:[#allocation18 + $0x468] ss:$16 sps:$4 sm:$0xff]  }
 0x612   :  { %10387 = vmatpush2.bf16.msra.mxu0 %v13690_v48  ;;  %v13734_v48 = vld [vmem:[#allocation18 + $0x44c] ss:$16 sps:$4 sm:$0xff]  }
 0x613   :  { %10388 = vmatprep.subr.bf16.mxu0 %v13698_v13  ;;  %v13729_v13 = vld [vmem:[#allocation18 + $0x668] ss:$16 sps:$4 sm:$0xff]  }
 0x614   :  { %10428 = vmatpush2.bf16.msra.mxu1 %v13693_v0  ;;  %v13737_v0 = vld [vmem:[#allocation18 + $0x64c] ss:$16 sps:$4 sm:$0xff]  }
 0x615   :  { %10429 = vmatprep.subr.bf16.mxu1 %v13701_v6  ;;  %v13732_v6 = vld [vmem:[#allocation18 + $0x448] ss:$16 sps:$4 sm:$0xff]  }
 0x616   :  { %10389 = vmatpush2.bf16.msra.mxu0 %v13696_v44  ;;  %v13740_v44 = vld [vmem:[#allocation18 + $0x42c] ss:$16 sps:$4 sm:$0xff]  }
 0x617   :  { %10440 = vmatprep.subr.bf16.mxu0 %v13704_v54  ;;  %v13735_v54 = vld [vmem:[#allocation18 + $0x648] ss:$16 sps:$4 sm:$0xff]  }
 0x618   :  { %10430 = vmatpush2.bf16.msra.mxu1 %v13699_v17  ;;  %v13743_v17 = vld [vmem:[#allocation18 + $0x62c] ss:$16 sps:$4 sm:$0xff]  }
 0x619   :  { %v10146_v1 = vpop.f32.mrf.mxu0  ;;  %10391 = vmatmul.mubr.bf16.vlgmr.msra.gmra.mxu0 %v15373_v14  ;;  %10481 = vmatprep.subr.bf16.mxu1 %v13707_v25  ;;  %v13711_v14 = vld [vmem:[#allocation18 + $0x6c8] ss:$16 sps:$4 sm:$0xff]  }
 0x61a   :  { %v10147_v45 = vadd.f32 %v10146_v1, %v15608_v59  ;;  %10441 = vmatpush1.bf16.msra.mxu0 %v13702_v9  ;;  %10472 = vmatprep.mubr.bf16.mxu0 %v15391_v52  ;;  %v13738_v25 = vld [vmem:[#allocation18 + $0x428] ss:$16 sps:$4 sm:$0xff]   ;;  %v13746_v9 = vld [vmem:[#allocation18 + $0x40c] ss:$16 sps:$4 sm:$0xff]  }
 0x61b   :  { %v10148_v46 = vpop.f32.mrf.mxu0  ;;  %v10187_v27 = vpop.f32.mrf.mxu1  ;;  %10432 = vmatmul.mubr.bf16.vlgmr.msra.gmra.mxu1 %v15382_v10  ;;  %10442 = vmatprep.subr.bf16.mxu0 %v13710_v56  ;;  %v13741_v56 = vld [vmem:[#allocation18 + $0x628] ss:$16 sps:$4 sm:$0xff]  }
 0x61c   :  { %v10149_v34 = vadd.f32 %v10148_v46, %v15611_v36  ;;  %v15618_v62 = vadd.f32 %v10187_v27, %v10147_v45  ;;  %10482 = vmatpush1.bf16.msra.mxu1 %v13705_v4  ;;  %10513 = vmatprep.mubr.bf16.mxu1 %v15402_v11  ;;  %v13717_v36 = vld [vmem:[#allocation18 + $0x6a8] ss:$16 sps:$4 sm:$0xff]   ;;  %v13749_v4 = vld [vmem:[#allocation18 + $0x60c] ss:$16 sps:$4 sm:$0xff]  }
 0x61d   :  { %v10150_v33 = vpop.f32.mrf.mxu0  ;;  %v10189_v59 = vpop.f32.mrf.mxu1  ;;  %10483 = vmatprep.subr.bf16.mxu1 %v13713_v31  ;;  %v13720_v11 = vld [vmem:[#allocation18 + $0x488] ss:$16 sps:$4 sm:$0xff]   ;;  %v13752_v31 = vld [vmem:[#allocation18 + $0x5ec] ss:$16 sps:$4 sm:$0xff]  }
 0x61e   :  { %v15621_v52 = vadd.f32 %v10189_v59, %v10149_v34  ;;  %10443 = vmatpush1.bf16.msra.mxu0 %v13708_v16  ;;  %v13744_v1 = vld [vmem:[#allocation18 + $0x408] ss:$16 sps:$4 sm:$0xff]   ;;  %v13755_v16 = vld [vmem:[#allocation18 + $0x7ec] ss:$16 sps:$4 sm:$0xff]  }
 0x61f   :  { %v10151_v63 = vpop.f32.mrf.mxu0  ;;  %v10191_v10 = vpop.f32.mrf.mxu1  ;;  %10444 = vmatprep.subr.bf16.mxu0 %v13716_v29  ;;  %v13747_v45 = vld [vmem:[#allocation18 + $0x608] ss:$16 sps:$4 sm:$0xff]   ;;  %v13758_v27 = vld [vmem:[#allocation18 + $0x5cc] ss:$16 sps:$4 sm:$0xff]  }
 0x620   :  { %10484 = vmatpush1.bf16.msra.mxu1 %v13711_v14  ;;  %v13750_v46 = vld [vmem:[#allocation18 + $0x5e8] ss:$16 sps:$4 sm:$0xff]   ;;  %v13761_v34 = vld [vmem:[#allocation18 + $0x7cc] ss:$16 sps:$4 sm:$0xff]  }
 0x621   :  { %v10192_v47 = vpop.f32.mrf.mxu1  ;;  %10485 = vmatprep.subr.bf16.mxu1 %v13719_v39  ;;  %v13753_v29 = vld [vmem:[#allocation18 + $0x7e8] ss:$16 sps:$4 sm:$0xff]   ;;  %v13764_v33 = vld [vmem:[#allocation18 + $0x5ac] ss:$16 sps:$4 sm:$0xff]  }
 0x622   :  { %10445 = vmatpush1.bf16.msra.mxu0 %v13714_v8  ;;  %v13756_v14 = vld [vmem:[#allocation18 + $0x5c8] ss:$16 sps:$4 sm:$0xff]   ;;  %v13767_v39 = vld [vmem:[#allocation18 + $0x7ac] ss:$16 sps:$4 sm:$0xff]  }
 0x623   :  { %10446 = vmatprep.subr.bf16.mxu0 %v13722_v20  ;;  %v13759_v59 = vld [vmem:[#allocation18 + $0x7c8] ss:$16 sps:$4 sm:$0xff]   ;;  %v13770_v63 = vld [vmem:[#allocation18 + $0x58c] ss:$16 sps:$4 sm:$0xff]  }
 0x624   :  { %10486 = vmatpush1.bf16.msra.mxu1 %v13717_v36  ;;  %v13762_v8 = vld [vmem:[#allocation18 + $0x5a8] ss:$16 sps:$4 sm:$0xff]   ;;  %v13773_v20 = vld [vmem:[#allocation18 + $0x78c] ss:$16 sps:$4 sm:$0xff]  }
 0x625   :  { %10487 = vmatprep.subr.bf16.mxu1 %v13725_v50  ;;  %v13765_v10 = vld [vmem:[#allocation18 + $0x7a8] ss:$16 sps:$4 sm:$0xff]   ;;  %v13776_v47 = vld [vmem:[#allocation18 + $0x56c] ss:$16 sps:$4 sm:$0xff]  }
 0x626   :  { %10447 = vmatpush1.bf16.msra.mxu0 %v13720_v11  ;;  %v13768_v36 = vld [vmem:[#allocation18 + $0x588] ss:$16 sps:$4 sm:$0xff]   ;;  %v13779_v11 = vld [vmem:[#allocation18 + $0x76c] ss:$16 sps:$4 sm:$0xff]  }
 0x627   :  { %10448 = vmatprep.subr.bf16.mxu0 %v13728_v60  ;;  %v13771_v50 = vld [vmem:[#allocation18 + $0x788] ss:$16 sps:$4 sm:$0xff]  }
 0x628   :  { %10488 = vmatpush1.bf16.msra.mxu1 %v13723_v26  ;;  %v13774_v60 = vld [vmem:[#allocation18 + $0x568] ss:$16 sps:$4 sm:$0xff]   ;;  %v13782_v26 = vld [vmem:[#allocation18 + $0x54c] ss:$16 sps:$4 sm:$0xff]  }
 0x629   :  { %10489 = vmatprep.subr.bf16.mxu1 %v13731_v22  ;;  %v13777_v22 = vld [vmem:[#allocation18 + $0x768] ss:$16 sps:$4 sm:$0xff]  }
 0x62a   :  { %10449 = vmatpush1.bf16.msra.mxu0 %v13726_v24  ;;  %v13785_v24 = vld [vmem:[#allocation18 + $0x74c] ss:$16 sps:$4 sm:$0xff]  }
 0x62b   :  { %10450 = vmatprep.subr.bf16.mxu0 %v13734_v48  ;;  %v13780_v48 = vld [vmem:[#allocation18 + $0x548] ss:$16 sps:$4 sm:$0xff]  }
 0x62c   :  { %10490 = vmatpush1.bf16.msra.mxu1 %v13729_v13  ;;  %v13788_v13 = vld [vmem:[#allocation18 + $0x52c] ss:$16 sps:$4 sm:$0xff]  }
 0x62d   :  { %10491 = vmatprep.subr.bf16.mxu1 %v13737_v0  ;;  %v13783_v0 = vld [vmem:[#allocation18 + $0x748] ss:$16 sps:$4 sm:$0xff]  }
 0x62e   :  { %10451 = vmatpush1.bf16.msra.mxu0 %v13732_v6  ;;  %v13791_v6 = vld [vmem:[#allocation18 + $0x72c] ss:$16 sps:$4 sm:$0xff]  }
 0x62f   :  { %10452 = vmatprep.subr.bf16.mxu0 %v13740_v44  ;;  %v13786_v44 = vld [vmem:[#allocation18 + $0x528] ss:$16 sps:$4 sm:$0xff]  }
 0x630   :  { %10492 = vmatpush1.bf16.msra.mxu1 %v13735_v54  ;;  %v13794_v54 = vld [vmem:[#allocation18 + $0x50c] ss:$16 sps:$4 sm:$0xff]  }
 0x631   :  { %10493 = vmatprep.subr.bf16.mxu1 %v13743_v17  ;;  %v13789_v17 = vld [vmem:[#allocation18 + $0x728] ss:$16 sps:$4 sm:$0xff]  }
 0x632   :  { %10453 = vmatpush1.bf16.msra.mxu0 %v13738_v25  ;;  %v13797_v25 = vld [vmem:[#allocation18 + $0x70c] ss:$16 sps:$4 sm:$0xff]  }
 0x633   :  { %10454 = vmatprep.subr.bf16.mxu0 %v13746_v9  ;;  %v13792_v9 = vld [vmem:[#allocation18 + $0x508] ss:$16 sps:$4 sm:$0xff]  }
 0x634   :  { %10494 = vmatpush1.bf16.msra.mxu1 %v13741_v56  ;;  %v13800_v56 = vld [vmem:[#allocation18 + $0x8ec] ss:$16 sps:$4 sm:$0xff]  }
 0x635   :  { %10495 = vmatprep.subr.bf16.mxu1 %v13749_v4  ;;  %v13795_v4 = vld [vmem:[#allocation18 + $0x708] ss:$16 sps:$4 sm:$0xff]  }
 0x636   :  { %10455 = vmatpush1.bf16.msra.mxu0 %v13744_v1  ;;  %v13803_v1 = vld [vmem:[#allocation18 + $0xaec] ss:$16 sps:$4 sm:$0xff]  }
 0x637   :  { %10456 = vmatprep.subr.bf16.mxu0 %v13752_v31  ;;  %v13798_v31 = vld [vmem:[#allocation18 + $0x8e8] ss:$16 sps:$4 sm:$0xff]  }
 0x638   :  { %10496 = vmatpush1.bf16.msra.mxu1 %v13747_v45  ;;  %v13806_v45 = vld [vmem:[#allocation18 + $0x8cc] ss:$16 sps:$4 sm:$0xff]  }
 0x639   :  { %10497 = vmatprep.subr.bf16.mxu1 %v13755_v16  ;;  %v13801_v16 = vld [vmem:[#allocation18 + $0xae8] ss:$16 sps:$4 sm:$0xff]  }
 0x63a   :  { %10457 = vmatpush2.bf16.msra.mxu0 %v13750_v46 }
 0x63b   :  { %10458 = vmatprep.subr.bf16.mxu0 %v13758_v27  ;;  %v13809_v27 = vld [vmem:[#allocation18 + $0xacc] ss:$16 sps:$4 sm:$0xff]  }
 0x63c   :  { %10498 = vmatpush2.bf16.msra.mxu1 %v13753_v29  ;;  %v13804_v29 = vld [vmem:[#allocation18 + $0x8c8] ss:$16 sps:$4 sm:$0xff]  }
 0x63d   :  { %10499 = vmatprep.subr.bf16.mxu1 %v13761_v34 }
 0x63e   :  { %10459 = vmatpush2.bf16.msra.mxu0 %v13756_v14 }
 0x63f   :  { %10460 = vmatprep.subr.bf16.mxu0 %v13764_v33  ;;  %v13812_v33 = vld [vmem:[#allocation18 + $0x8ac] ss:$16 sps:$4 sm:$0xff]  }
 0x640   :  { %10500 = vmatpush2.bf16.msra.mxu1 %v13759_v59  ;;  %v13807_v59 = vld [vmem:[#allocation18 + $0xac8] ss:$16 sps:$4 sm:$0xff]  }
 0x641   :  { %10501 = vmatprep.subr.bf16.mxu1 %v13767_v39 }
 0x642   :  { %10461 = vmatpush2.bf16.msra.mxu0 %v13762_v8  ;;  %v13815_v8 = vld [vmem:[#allocation18 + $0xaac] ss:$16 sps:$4 sm:$0xff]  }
 0x643   :  { %10462 = vmatprep.subr.bf16.mxu0 %v13770_v63 }
 0x644   :  { %10502 = vmatpush2.bf16.msra.mxu1 %v13765_v10 }
 0x645   :  { %10503 = vmatprep.subr.bf16.mxu1 %v13773_v20  ;;  %v13818_v20 = vld [vmem:[#allocation18 + $0x88c] ss:$16 sps:$4 sm:$0xff]  }
 0x646   :  { %10463 = vmatpush2.bf16.msra.mxu0 %v13768_v36  ;;  %v13813_v36 = vld [vmem:[#allocation18 + $0xaa8] ss:$16 sps:$4 sm:$0xff]  }
 0x647   :  { %10464 = vmatprep.subr.bf16.mxu0 %v13776_v47  ;;  %v13821_v47 = vld [vmem:[#allocation18 + $0xa8c] ss:$16 sps:$4 sm:$0xff]  }
 0x648   :  { %10504 = vmatpush2.bf16.msra.mxu1 %v13771_v50  ;;  %v13816_v50 = vld [vmem:[#allocation18 + $0x888] ss:$16 sps:$4 sm:$0xff]  }
 0x649   :  { %10505 = vmatprep.subr.bf16.mxu1 %v13779_v11  ;;  %v13819_v11 = vld [vmem:[#allocation18 + $0xa88] ss:$16 sps:$4 sm:$0xff]  }
 0x64a   :  { %10465 = vmatpush2.bf16.msra.mxu0 %v13774_v60  ;;  %v13827_v60 = vld [vmem:[#allocation18 + $0xa6c] ss:$16 sps:$4 sm:$0xff]  }
 0x64b   :  { %10466 = vmatprep.subr.bf16.mxu0 %v13782_v26  ;;  %v13822_v26 = vld [vmem:[#allocation18 + $0x868] ss:$16 sps:$4 sm:$0xff]  }
 0x64c   :  { %10506 = vmatpush2.bf16.msra.mxu1 %v13777_v22  ;;  %v13830_v22 = vld [vmem:[#allocation18 + $0x84c] ss:$16 sps:$4 sm:$0xff]  }
 0x64d   :  { %10507 = vmatprep.subr.bf16.mxu1 %v13785_v24  ;;  %v13825_v24 = vld [vmem:[#allocation18 + $0xa68] ss:$16 sps:$4 sm:$0xff]  }
 0x64e   :  { %10467 = vmatpush2.bf16.msra.mxu0 %v13780_v48  ;;  %v13833_v48 = vld [vmem:[#allocation18 + $0xa4c] ss:$16 sps:$4 sm:$0xff]  }
 0x64f   :  { %10468 = vmatprep.subr.bf16.mxu0 %v13788_v13  ;;  %v13828_v13 = vld [vmem:[#allocation18 + $0x848] ss:$16 sps:$4 sm:$0xff]  }
 0x650   :  { %10508 = vmatpush2.bf16.msra.mxu1 %v13783_v0  ;;  %v13836_v0 = vld [vmem:[#allocation18 + $0x82c] ss:$16 sps:$4 sm:$0xff]  }
 0x651   :  { %10509 = vmatprep.subr.bf16.mxu1 %v13791_v6  ;;  %v13831_v6 = vld [vmem:[#allocation18 + $0xa48] ss:$16 sps:$4 sm:$0xff]  }
 0x652   :  { %10469 = vmatpush2.bf16.msra.mxu0 %v13786_v44  ;;  %v13839_v44 = vld [vmem:[#allocation18 + $0xa2c] ss:$16 sps:$4 sm:$0xff]  }
 0x653   :  { %10470 = vmatprep.subr.bf16.mxu0 %v13794_v54  ;;  %v13834_v54 = vld [vmem:[#allocation18 + $0x828] ss:$16 sps:$4 sm:$0xff]  }
 0x654   :  { %10510 = vmatpush2.bf16.msra.mxu1 %v13789_v17  ;;  %v13842_v17 = vld [vmem:[#allocation18 + $0x80c] ss:$16 sps:$4 sm:$0xff]  }
 0x655   :  { %10511 = vmatprep.subr.bf16.mxu1 %v13797_v25  ;;  %v13837_v25 = vld [vmem:[#allocation18 + $0xa28] ss:$16 sps:$4 sm:$0xff]  }
 0x656   :  { %10471 = vmatpush2.bf16.msra.mxu0 %v13792_v9  ;;  %v13845_v9 = vld [vmem:[#allocation18 + $0xa0c] ss:$16 sps:$4 sm:$0xff]  }
 0x657   :  { %10522 = vmatprep.subr.bf16.mxu0 %v13800_v56  ;;  %v13840_v56 = vld [vmem:[#allocation18 + $0x808] ss:$16 sps:$4 sm:$0xff]  }
 0x658   :  { %10512 = vmatpush2.bf16.msra.mxu1 %v13795_v4  ;;  %v13848_v4 = vld [vmem:[#allocation18 + $0x9ec] ss:$16 sps:$4 sm:$0xff]  }
 0x659   :  { %v15623_v46 = vpop.f32.mrf.mxu0  ;;  %10473 = vmatmul.mubr.bf16.vlgmr.msra.gmra.mxu0 %v15453_v49  ;;  %10563 = vmatprep.subr.bf16.mxu1 %v13803_v1  ;;  %v13843_v1 = vld [vmem:[#allocation18 + $0xa08] ss:$16 sps:$4 sm:$0xff]  }
 0x65a   :  { %10523 = vmatpush1.bf16.msra.mxu0 %v13798_v31  ;;  %10554 = vmatprep.mubr.bf16.mxu0 %v15457_v5  ;;  %v13810_v5 = vld [vmem:[#allocation18 + $0x8a8] ss:$16 sps:$4 sm:$0xff]   ;;  %v13851_v31 = vld [vmem:[#allocation18 + $0xbec] ss:$16 sps:$4 sm:$0xff]  }
 0x65b   :  { %v15627_v34 = vpop.f32.mrf.mxu0  ;;  %v15629_v14 = vpop.f32.mrf.mxu1  ;;  %10514 = vmatmul.mubr.bf16.vlgmr.msra.gmra.mxu1 %v15462_v37  ;;  %10524 = vmatprep.subr.bf16.mxu0 %v13806_v45  ;;  %v13846_v45 = vld [vmem:[#allocation18 + $0x9e8] ss:$16 sps:$4 sm:$0xff]  }
 0x65c   :  { %10564 = vmatpush1.bf16.msra.mxu1 %v13801_v16  ;;  %10595 = vmatprep.mubr.bf16.mxu1 %v15467_v40  ;;  %v13824_v40 = vld [vmem:[#allocation18 + $0x86c] ss:$16 sps:$4 sm:$0xff]  }
 0x65d   :  { %v10232_v39 = vpop.f32.mrf.mxu0  ;;  %v15633_v49 = vpop.f32.mrf.mxu1  ;;  %10565 = vmatprep.subr.bf16.mxu1 %v13809_v27  ;;  %v13854_v16 = vld [vmem:[#allocation18 + $0x9cc] ss:$16 sps:$4 sm:$0xff]   ;;  %v13849_v27 = vld [vmem:[#allocation18 + $0xbe8] ss:$16 sps:$4 sm:$0xff]  }
 0x65e   :  { %10525 = vmatpush1.bf16.msra.mxu0 %v13804_v29  ;;  %v13857_v29 = vld [vmem:[#allocation18 + $0xbcc] ss:$16 sps:$4 sm:$0xff]   ;;  %v13855_v39 = vld [vmem:[#allocation18 + $0xbc8] ss:$16 sps:$4 sm:$0xff]  }
 0x65f   :  { %v10233_v63 = vpop.f32.mrf.mxu0  ;;  %v10273_v10 = vpop.f32.mrf.mxu1  ;;  %10526 = vmatprep.subr.bf16.mxu0 %v13812_v33  ;;  %v13852_v33 = vld [vmem:[#allocation18 + $0x9c8] ss:$16 sps:$4 sm:$0xff]  }
 0x660   :  { %10566 = vmatpush1.bf16.msra.mxu1 %v13807_v59  ;;  %v13860_v59 = vld [vmem:[#allocation18 + $0x9ac] ss:$16 sps:$4 sm:$0xff]   ;;  %v13861_v10 = vld [vmem:[#allocation18 + $0xba8] ss:$16 sps:$4 sm:$0xff]  }
 0x661   :  { %v10274_v37 = vpop.f32.mrf.mxu1  ;;  %10567 = vmatprep.subr.bf16.mxu1 %v13815_v8  ;;  %v13863_v8 = vld [vmem:[#allocation18 + $0xbac] ss:$16 sps:$4 sm:$0xff]  }
 0x662   :  { %10527 = vmatpush1.bf16.msra.mxu0 %v13810_v5  ;;  %v13858_v5 = vld [vmem:[#allocation18 + $0x9a8] ss:$16 sps:$4 sm:$0xff]   ;;  %v13866_v63 = vld [vmem:[#allocation18 + $0x98c] ss:$16 sps:$4 sm:$0xff]  }
 0x663   :  { %10528 = vmatprep.subr.bf16.mxu0 %v13818_v20  ;;  %v13869_v20 = vld [vmem:[#allocation18 + $0xb8c] ss:$16 sps:$4 sm:$0xff]  }
 0x664   :  { %10568 = vmatpush1.bf16.msra.mxu1 %v13813_v36  ;;  %v13864_v36 = vld [vmem:[#allocation18 + $0x988] ss:$16 sps:$4 sm:$0xff]   ;;  %v13872_v37 = vld [vmem:[#allocation18 + $0x96c] ss:$16 sps:$4 sm:$0xff]  }
 0x665   :  { %10569 = vmatprep.subr.bf16.mxu1 %v13821_v47  ;;  %v13867_v47 = vld [vmem:[#allocation18 + $0xb88] ss:$16 sps:$4 sm:$0xff]  }
 0x666   :  { %10529 = vmatpush1.bf16.msra.mxu0 %v13816_v50  ;;  %v13875_v50 = vld [vmem:[#allocation18 + $0xb6c] ss:$16 sps:$4 sm:$0xff]  }
 0x667   :  { %10530 = vmatprep.subr.bf16.mxu0 %v13824_v40  ;;  %v13870_v40 = vld [vmem:[#allocation18 + $0x968] ss:$16 sps:$4 sm:$0xff]  }
 0x668   :  { %10570 = vmatpush1.bf16.msra.mxu1 %v13819_v11  ;;  %v13878_v11 = vld [vmem:[#allocation18 + $0x94c] ss:$16 sps:$4 sm:$0xff]  }
 0x669   :  { %10571 = vmatprep.subr.bf16.mxu1 %v13827_v60  ;;  %v13873_v60 = vld [vmem:[#allocation18 + $0xb68] ss:$16 sps:$4 sm:$0xff]  }
 0x66a   :  { %10531 = vmatpush1.bf16.msra.mxu0 %v13822_v26  ;;  %v13881_v26 = vld [vmem:[#allocation18 + $0xb4c] ss:$16 sps:$4 sm:$0xff]  }
 0x66b   :  { %10532 = vmatprep.subr.bf16.mxu0 %v13830_v22  ;;  %v13876_v22 = vld [vmem:[#allocation18 + $0x948] ss:$16 sps:$4 sm:$0xff]  }
 0x66c   :  { %10572 = vmatpush1.bf16.msra.mxu1 %v13825_v24  ;;  %v13884_v24 = vld [vmem:[#allocation18 + $0x92c] ss:$16 sps:$4 sm:$0xff]  }
 0x66d   :  { %10573 = vmatprep.subr.bf16.mxu1 %v13833_v48  ;;  %v13879_v48 = vld [vmem:[#allocation18 + $0xb48] ss:$16 sps:$4 sm:$0xff]  }
 0x66e   :  { %10533 = vmatpush1.bf16.msra.mxu0 %v13828_v13  ;;  %v13887_v13 = vld [vmem:[#allocation18 + $0xb2c] ss:$16 sps:$4 sm:$0xff]  }
 0x66f   :  { %10534 = vmatprep.subr.bf16.mxu0 %v13836_v0  ;;  %v13882_v0 = vld [vmem:[#allocation18 + $0x928] ss:$16 sps:$4 sm:$0xff]  }
 0x670   :  { %10574 = vmatpush1.bf16.msra.mxu1 %v13831_v6  ;;  %v13890_v6 = vld [vmem:[#allocation18 + $0x90c] ss:$16 sps:$4 sm:$0xff]  }
 0x671   :  { %10575 = vmatprep.subr.bf16.mxu1 %v13839_v44  ;;  %v13885_v44 = vld [vmem:[#allocation18 + $0xb28] ss:$16 sps:$4 sm:$0xff]  }
 0x672   :  { %10535 = vmatpush1.bf16.msra.mxu0 %v13834_v54  ;;  %v13893_v54 = vld [vmem:[#allocation18 + $0xb0c] ss:$16 sps:$4 sm:$0xff]  }
 0x673   :  { %10536 = vmatprep.subr.bf16.mxu0 %v13842_v17  ;;  %v13888_v17 = vld [vmem:[#allocation18 + $0x908] ss:$16 sps:$4 sm:$0xff]  }
 0x674   :  { %10576 = vmatpush1.bf16.msra.mxu1 %v13837_v25  ;;  %v13896_v25 = vld [vmem:[#allocation18 + $0xcec] ss:$16 sps:$4 sm:$0xff]  }
 0x675   :  { %10577 = vmatprep.subr.bf16.mxu1 %v13845_v9  ;;  %v10229_v9 = vadd.f32 %v15623_v46, %v15618_v62  ;;  %v13905_v62 = vld [vmem:[#allocation18 + $0xecc] ss:$16 sps:$4 sm:$0xff]  }
 0x676   :  { %10537 = vmatpush1.bf16.msra.mxu0 %v13840_v56  ;;  %v13891_v56 = vld [vmem:[#allocation18 + $0xb08] ss:$16 sps:$4 sm:$0xff]  }
 0x677   :  { %10538 = vmatprep.subr.bf16.mxu0 %v13848_v4  ;;  %v13899_v4 = vld [vmem:[#allocation18 + $0xeec] ss:$16 sps:$4 sm:$0xff]  }
 0x678   :  { %10578 = vmatpush1.bf16.msra.mxu1 %v13843_v1  ;;  %v10231_v1 = vadd.f32 %v15627_v34, %v15621_v52  ;;  %v13900_v52 = vld [vmem:[#allocation18 + $0xcc8] ss:$16 sps:$4 sm:$0xff]  }
 0x679   :  { %10579 = vmatprep.subr.bf16.mxu1 %v13851_v31  ;;  %v13894_v31 = vld [vmem:[#allocation18 + $0xce8] ss:$16 sps:$4 sm:$0xff]  }
 0x67a   :  { %10539 = vmatpush2.bf16.msra.mxu0 %v13846_v45  ;;  %v13902_v45 = vld [vmem:[#allocation18 + $0xccc] ss:$16 sps:$4 sm:$0xff]   ;;  %v10272_v46 = vadd.f32 %v15633_v49, %v10231_v1  ;;  %v13936_v1 = vld [vmem:[#allocation18 + $0xc08] ss:$16 sps:$4 sm:$0xff]  }
 0x67b   :  { %10540 = vmatprep.subr.bf16.mxu0 %v13854_v16  ;;  %v10270_v16 = vadd.f32 %v15629_v14, %v10229_v9  ;;  %v13908_v14 = vld [vmem:[#allocation18 + $0xcac] ss:$16 sps:$4 sm:$0xff]  }
 0x67c   :  { %10580 = vmatpush2.bf16.msra.mxu1 %v13849_v27  ;;  %v13897_v27 = vld [vmem:[#allocation18 + $0xee8] ss:$16 sps:$4 sm:$0xff]   ;;  %v13911_v49 = vld [vmem:[#allocation18 + $0xeac] ss:$16 sps:$4 sm:$0xff]  }
 0x67d   :  { %10581 = vmatprep.subr.bf16.mxu1 %v13857_v29  ;;  %v13938_v9 = vld [vmem:[#allocation18 + $0xc0c] ss:$16 sps:$4 sm:$0xff]  }
 0x67e   :  { %10541 = vmatpush2.bf16.msra.mxu0 %v13852_v33 }
 0x67f   :  { %10542 = vmatprep.subr.bf16.mxu0 %v13860_v59 }
 0x680   :  { %10582 = vmatpush2.bf16.msra.mxu1 %v13855_v39 }
 0x681   :  { %10583 = vmatprep.subr.bf16.mxu1 %v13863_v8 }
 0x682   :  { %10543 = vmatpush2.bf16.msra.mxu0 %v13858_v5 }
 0x683   :  { %10544 = vmatprep.subr.bf16.mxu0 %v13866_v63 }
 0x684   :  { %10584 = vmatpush2.bf16.msra.mxu1 %v13861_v10 }
 0x685   :  { %10585 = vmatprep.subr.bf16.mxu1 %v13869_v20 }
 0x686   :  { %10545 = vmatpush2.bf16.msra.mxu0 %v13864_v36 }
 0x687   :  { %10546 = vmatprep.subr.bf16.mxu0 %v13872_v37 }
 0x688   :  { %10586 = vmatpush2.bf16.msra.mxu1 %v13867_v47 }
 0x689   :  { %10587 = vmatprep.subr.bf16.mxu1 %v13875_v50 }
 0x68a   :  { %10547 = vmatpush2.bf16.msra.mxu0 %v13870_v40  ;;  %v13917_v40 = vld [vmem:[#allocation18 + $0xe8c] ss:$16 sps:$4 sm:$0xff]  }
 0x68b   :  { %10548 = vmatprep.subr.bf16.mxu0 %v13878_v11  ;;  %v13912_v11 = vld [vmem:[#allocation18 + $0xc88] ss:$16 sps:$4 sm:$0xff]  }
 0x68c   :  { %10588 = vmatpush2.bf16.msra.mxu1 %v13873_v60  ;;  %v13920_v60 = vld [vmem:[#allocation18 + $0xc6c] ss:$16 sps:$4 sm:$0xff]  }
 0x68d   :  { %10589 = vmatprep.subr.bf16.mxu1 %v13881_v26  ;;  %v13915_v26 = vld [vmem:[#allocation18 + $0xe88] ss:$16 sps:$4 sm:$0xff]  }
 0x68e   :  { %10549 = vmatpush2.bf16.msra.mxu0 %v13876_v22  ;;  %v13923_v22 = vld [vmem:[#allocation18 + $0xe6c] ss:$16 sps:$4 sm:$0xff]  }
 0x68f   :  { %10550 = vmatprep.subr.bf16.mxu0 %v13884_v24  ;;  %v13918_v24 = vld [vmem:[#allocation18 + $0xc68] ss:$16 sps:$4 sm:$0xff]  }
 0x690   :  { %10590 = vmatpush2.bf16.msra.mxu1 %v13879_v48  ;;  %v13926_v48 = vld [vmem:[#allocation18 + $0xc4c] ss:$16 sps:$4 sm:$0xff]  }
 0x691   :  { %10591 = vmatprep.subr.bf16.mxu1 %v13887_v13  ;;  %v13921_v13 = vld [vmem:[#allocation18 + $0xe68] ss:$16 sps:$4 sm:$0xff]  }
 0x692   :  { %10551 = vmatpush2.bf16.msra.mxu0 %v13882_v0  ;;  %v13929_v0 = vld [vmem:[#allocation18 + $0xe4c] ss:$16 sps:$4 sm:$0xff]  }
 0x693   :  { %10552 = vmatprep.subr.bf16.mxu0 %v13890_v6  ;;  %v13924_v6 = vld [vmem:[#allocation18 + $0xc48] ss:$16 sps:$4 sm:$0xff]  }
 0x694   :  { %10592 = vmatpush2.bf16.msra.mxu1 %v13885_v44  ;;  %v13932_v44 = vld [vmem:[#allocation18 + $0xc2c] ss:$16 sps:$4 sm:$0xff]  }
 0x695   :  { %10593 = vmatprep.subr.bf16.mxu1 %v13893_v54  ;;  %v13927_v54 = vld [vmem:[#allocation18 + $0xe48] ss:$16 sps:$4 sm:$0xff]  }
 0x696   :  { %10553 = vmatpush2.bf16.msra.mxu0 %v13888_v17  ;;  %v13935_v17 = vld [vmem:[#allocation18 + $0xe2c] ss:$16 sps:$4 sm:$0xff]  }
 0x697   :  { %10604 = vmatprep.subr.bf16.mxu0 %v13896_v25  ;;  %v13930_v25 = vld [vmem:[#allocation18 + $0xc28] ss:$16 sps:$4 sm:$0xff]  }
 0x698   :  { %10594 = vmatpush2.bf16.msra.mxu1 %v13891_v56  ;;  %v13933_v56 = vld [vmem:[#allocation18 + $0xe28] ss:$16 sps:$4 sm:$0xff]  }
 0x699   :  { %v10310_v29 = vpop.f32.mrf.mxu0  ;;  %10555 = vmatmul.mubr.bf16.vlgmr.msra.gmra.mxu0 %v15473_v2  ;;  %10645 = vmatprep.subr.bf16.mxu1 %v13899_v4  ;;  %v13903_v2 = vld [vmem:[#allocation18 + $0xec8] ss:$16 sps:$4 sm:$0xff]   ;;  %v13941_v4 = vld [vmem:[#allocation18 + $0xe0c] ss:$16 sps:$4 sm:$0xff]  }
 0x69a   :  { %v10311_v33 = vadd.f32 %v10310_v29, %v10270_v16  ;;  %10605 = vmatpush1.bf16.msra.mxu0 %v13894_v31  ;;  %10636 = vmatprep.mubr.bf16.mxu0 %v15477_v38  ;;  %v13906_v38 = vld [vmem:[#allocation18 + $0xca8] ss:$16 sps:$4 sm:$0xff]   ;;  %v13944_v31 = vld [vmem:[#allocation18 + $0xdec] ss:$16 sps:$4 sm:$0xff]  }
 0x69b   :  { %v10312_v34 = vpop.f32.mrf.mxu0  ;;  %v10351_v59 = vpop.f32.mrf.mxu1  ;;  %10596 = vmatmul.mubr.bf16.vlgmr.msra.gmra.mxu1 %v15482_v61  ;;  %10606 = vmatprep.subr.bf16.mxu0 %v13902_v45  ;;  %v13914_v61 = vld [vmem:[#allocation18 + $0xc8c] ss:$16 sps:$4 sm:$0xff]   ;;  %v13939_v45 = vld [vmem:[#allocation18 + $0xe08] ss:$16 sps:$4 sm:$0xff]  }
 0x69c   :  { %v10313_v39 = vadd.f32 %v10312_v34, %v10272_v46  ;;  %v10352_v8 = vadd.f32 %v10351_v59, %v10311_v33  ;;  %10646 = vmatpush1.bf16.msra.mxu1 %v13897_v27  ;;  %10677 = vmatprep.mubr.bf16.mxu1 %v15487_v57  ;;  %v13909_v57 = vld [vmem:[#allocation18 + $0xea8] ss:$16 sps:$4 sm:$0xff]   ;;  %v13947_v16 = vld [vmem:[#allocation18 + $0xfec] ss:$16 sps:$4 sm:$0xff]  }
 0x69d   :  { %v10314_v5 = vpop.f32.mrf.mxu0  ;;  %v10353_v63 = vpop.f32.mrf.mxu1  ;;  %10647 = vmatprep.subr.bf16.mxu1 %v13905_v62  ;;  %v13942_v27 = vld [vmem:[#allocation18 + $0xde8] ss:$16 sps:$4 sm:$0xff]   ;;  %v13950_v29 = vld [vmem:[#allocation18 + $0xdcc] ss:$16 sps:$4 sm:$0xff]  }
 0x69e   :  { %v11014_v10 = vmax.f32 %v10352_v8, 0.0  ;;  %v10354_v20 = vadd.f32 %v10353_v63, %v10313_v39  ;;  %10607 = vmatpush1.bf16.msra.mxu0 %v13900_v52  ;;  %v13945_v62 = vld [vmem:[#allocation18 + $0xfe8] ss:$16 sps:$4 sm:$0xff]   ;;  %v13953_v46 = vld [vmem:[#allocation18 + $0xfcc] ss:$16 sps:$4 sm:$0xff]  }
 0x69f   :  { %v10315_v36 = vpop.f32.mrf.mxu0  ;;  %v10355_v37 = vpop.f32.mrf.mxu1  ;;  %10608 = vmatprep.subr.bf16.mxu0 %v13908_v14  ;;  %v13948_v33 = vld [vmem:[#allocation18 + $0xdc8] ss:$16 sps:$4 sm:$0xff]   ;;  %v13956_v52 = vld [vmem:[#allocation18 + $0xdac] ss:$16 sps:$4 sm:$0xff]  }
 0x6a0   :  { %11018 = vst [vmem:[%s15713_s12] sm:$0xff] %v11014_v10  ;;  %v11015_v47 = vmax.f32 %v10354_v20, 0.0  ;;  %10648 = vmatpush1.bf16.msra.mxu1 %v13903_v2  ;;  %v13951_v34 = vld [vmem:[#allocation18 + $0xfc8] ss:$16 sps:$4 sm:$0xff]   ;;  %v13959_v59 = vld [vmem:[#allocation18 + $0xfac] ss:$16 sps:$4 sm:$0xff]  }
 0x6a1   :  { %v10356_v50 = vpop.f32.mrf.mxu1  ;;  %10649 = vmatprep.subr.bf16.mxu1 %v13911_v49  ;;  %v13954_v14 = vld [vmem:[#allocation18 + $0xda8] ss:$16 sps:$4 sm:$0xff]   ;;  %v13962_v39 = vld [vmem:[#allocation18 + $0xd8c] ss:$16 sps:$4 sm:$0xff]  }
 0x6a2   :  { %11019 = vst [vmem:[%s15713_s12 + $0x8] sm:$0xff] %v11015_v47  ;;  %10609 = vmatpush1.bf16.msra.mxu0 %v13906_v38  ;;  %v13957_v8 = vld [vmem:[#allocation18 + $0xfa8] ss:$16 sps:$4 sm:$0xff]   ;;  %v13965_v2 = vld [vmem:[#allocation18 + $0xf8c] ss:$16 sps:$4 sm:$0xff]  }
 0x6a3   :  { %10610 = vmatprep.subr.bf16.mxu0 %v13914_v61  ;;  %v13960_v5 = vld [vmem:[#allocation18 + $0xd88] ss:$16 sps:$4 sm:$0xff]   ;;  %v13968_v63 = vld [vmem:[#allocation18 + $0xd6c] ss:$16 sps:$4 sm:$0xff]  }
 0x6a4   :  { %10650 = vmatpush1.bf16.msra.mxu1 %v13909_v57  ;;  %v13963_v49 = vld [vmem:[#allocation18 + $0xf88] ss:$16 sps:$4 sm:$0xff]   ;;  %v13971_v10 = vld [vmem:[#allocation18 + $0xf6c] ss:$16 sps:$4 sm:$0xff]  }
 0x6a5   :  { %10651 = vmatprep.subr.bf16.mxu1 %v13917_v40  ;;  %v13966_v20 = vld [vmem:[#allocation18 + $0xd68] ss:$16 sps:$4 sm:$0xff]   ;;  %v13974_v38 = vld [vmem:[#allocation18 + $0xd4c] ss:$16 sps:$4 sm:$0xff]  }
 0x6a6   :  { %10611 = vmatpush1.bf16.msra.mxu0 %v13912_v11  ;;  %v13969_v36 = vld [vmem:[#allocation18 + $0xf68] ss:$16 sps:$4 sm:$0xff]   ;;  %v13977_v37 = vld [vmem:[#allocation18 + $0xf4c] ss:$16 sps:$4 sm:$0xff]  }
 0x6a7   :  { %10612 = vmatprep.subr.bf16.mxu0 %v13920_v60  ;;  %v13972_v61 = vld [vmem:[#allocation18 + $0xd48] ss:$16 sps:$4 sm:$0xff]   ;;  %v13980_v47 = vld [vmem:[#allocation18 + $0xd2c] ss:$16 sps:$4 sm:$0xff]  }
 0x6a8   :  { %10652 = vmatpush1.bf16.msra.mxu1 %v13915_v26  ;;  %v13975_v57 = vld [vmem:[#allocation18 + $0xf48] ss:$16 sps:$4 sm:$0xff]   ;;  %v13983_v50 = vld [vmem:[#allocation18 + $0xf2c] ss:$16 sps:$4 sm:$0xff]  }
 0x6a9   :  { %10653 = vmatprep.subr.bf16.mxu1 %v13923_v22  ;;  %v13978_v40 = vld [vmem:[#allocation18 + $0xd28] ss:$16 sps:$4 sm:$0xff]   ;;  %v13986_v11 = vld [vmem:[#allocation18 + $0xd0c] ss:$16 sps:$4 sm:$0xff]  }
 0x6aa   :  { %10613 = vmatpush1.bf16.msra.mxu0 %v13918_v24  ;;  %v13981_v60 = vld [vmem:[#allocation18 + $0xf28] ss:$16 sps:$4 sm:$0xff]   ;;  %v13989_v26 = vld [vmem:[#allocation18 + $0xf0c] ss:$16 sps:$4 sm:$0xff]   ;;  %v4572_v24 = vsub.s32 2, %v15029_v18 }
 0x6ab   :  { %10614 = vmatprep.subr.bf16.mxu0 %v13926_v48  ;;  %v13984_v22 = vld [vmem:[#allocation18 + $0xd08] ss:$16 sps:$4 sm:$0xff]   ;;  %v13992_v48 = vld [vmem:[#allocation18 + $0x10ec] ss:$16 sps:$4 sm:$0xff]  }
 0x6ac   :  { %10654 = vmatpush1.bf16.msra.mxu1 %v13921_v13  ;;  %v13987_v13 = vld [vmem:[#allocation18 + $0xf08] ss:$16 sps:$4 sm:$0xff]  }
 0x6ad   :  { %10655 = vmatprep.subr.bf16.mxu1 %v13929_v0  ;;  %v4576_v0 = vsub.s32 3, %v15029_v18  ;;  %v13996_v18 = vld [vmem:[#allocation18 + $0x10c8] ss:$16 sps:$4 sm:$0xff]  }
 0x6ae   :  { %10615 = vmatpush1.bf16.msra.mxu0 %v13924_v6  ;;  %v13995_v6 = vld [vmem:[#allocation18 + $0x12ec] ss:$16 sps:$4 sm:$0xff]  }
 0x6af   :  { %10616 = vmatprep.subr.bf16.mxu0 %v13932_v44  ;;  %v14374_v44 = vld [vmem:[#allocation20] sm:$0xf] }
 0x6b0   :  { %10656 = vmatpush1.bf16.msra.mxu1 %v13927_v54  ;;  %v4573_v54 = vrot.slane %v14374_v44, %v4572_v24  ;;  %v14035_v24 = vld [vmem:[#allocation18 + $0x1208] ss:$16 sps:$4 sm:$0xff]  }
 0x6b1   :  { %10657 = vmatprep.subr.bf16.mxu1 %v13935_v17  ;;  %v13990_v17 = vld [vmem:[#allocation18 + $0x10e8] ss:$16 sps:$4 sm:$0xff]  }
 0x6b2   :  { %10617 = vmatpush1.bf16.msra.mxu0 %v13930_v25  ;;  %v13998_v25 = vld [vmem:[#allocation18 + $0x10cc] ss:$16 sps:$4 sm:$0xff]  }
 0x6b3   :  { %10618 = vmatprep.subr.bf16.mxu0 %v13938_v9  ;;  %v4577_v9 = vrot.slane %v14374_v44, %v4576_v0  ;;  %v14046_v0 = vld [vmem:[#allocation18 + $0x11cc] ss:$16 sps:$4 sm:$0xff]  }
 0x6b4   :  { %10658 = vmatpush1.bf16.msra.mxu1 %v13933_v56  ;;  %v13993_v56 = vld [vmem:[#allocation18 + $0x12e8] ss:$16 sps:$4 sm:$0xff]   ;;  %v14049_v44 = vld [vmem:[#allocation18 + $0x13cc] ss:$16 sps:$4 sm:$0xff]  }
 0x6b5   :  { %10659 = vmatprep.subr.bf16.mxu1 %v13941_v4 }
 0x6b6   :  { %10619 = vmatpush1.bf16.msra.mxu0 %v13936_v1  ;;  %v14001_v1 = vld [vmem:[#allocation18 + $0x12cc] ss:$16 sps:$4 sm:$0xff]  }
 0x6b7   :  { %10620 = vmatprep.subr.bf16.mxu0 %v13944_v31 }
 0x6b8   :  { %10660 = vmatpush1.bf16.msra.mxu1 %v13939_v45 }
 0x6b9   :  { %10661 = vmatprep.subr.bf16.mxu1 %v13947_v16 }
 0x6ba   :  { %10621 = vmatpush2.bf16.msra.mxu0 %v13942_v27  ;;  %v14004_v27 = vld [vmem:[#allocation18 + $0x10ac] ss:$16 sps:$4 sm:$0xff]  }
 0x6bb   :  { %10622 = vmatprep.subr.bf16.mxu0 %v13950_v29 }
 0x6bc   :  { %10662 = vmatpush2.bf16.msra.mxu1 %v13945_v62 }
 0x6bd   :  { %10663 = vmatprep.subr.bf16.mxu1 %v13953_v46 }
 0x6be   :  { %10623 = vmatpush2.bf16.msra.mxu0 %v13948_v33 }
 0x6bf   :  { %10624 = vmatprep.subr.bf16.mxu0 %v13956_v52  ;;  %v14007_v52 = vld [vmem:[#allocation18 + $0x12ac] ss:$16 sps:$4 sm:$0xff]  }
 0x6c0   :  { %10664 = vmatpush2.bf16.msra.mxu1 %v13951_v34 }
 0x6c1   :  { %10665 = vmatprep.subr.bf16.mxu1 %v13959_v59 }
 0x6c2   :  { %10625 = vmatpush2.bf16.msra.mxu0 %v13954_v14 }
 0x6c3   :  { %10626 = vmatprep.subr.bf16.mxu0 %v13962_v39  ;;  %v14005_v39 = vld [vmem:[#allocation18 + $0x12a8] ss:$16 sps:$4 sm:$0xff]  }
 0x6c4   :  { %10666 = vmatpush2.bf16.msra.mxu1 %v13957_v8 }
 0x6c5   :  { %10667 = vmatprep.subr.bf16.mxu1 %v13965_v2  ;;  %v14013_v2 = vld [vmem:[#allocation18 + $0x128c] ss:$16 sps:$4 sm:$0xff]  }
 0x6c6   :  { %10627 = vmatpush2.bf16.msra.mxu0 %v13960_v5  ;;  %v14016_v5 = vld [vmem:[#allocation18 + $0x106c] ss:$16 sps:$4 sm:$0xff]  }
 0x6c7   :  { %10628 = vmatprep.subr.bf16.mxu0 %v13968_v63  ;;  %v14011_v63 = vld [vmem:[#allocation18 + $0x1288] ss:$16 sps:$4 sm:$0xff]  }
 0x6c8   :  { %10668 = vmatpush2.bf16.msra.mxu1 %v13963_v49  ;;  %v14019_v49 = vld [vmem:[#allocation18 + $0x126c] ss:$16 sps:$4 sm:$0xff]  }
 0x6c9   :  { %10669 = vmatprep.subr.bf16.mxu1 %v13971_v10  ;;  %v14014_v10 = vld [vmem:[#allocation18 + $0x1068] ss:$16 sps:$4 sm:$0xff]  }
 0x6ca   :  { %10629 = vmatpush2.bf16.msra.mxu0 %v13966_v20  ;;  %v14022_v20 = vld [vmem:[#allocation18 + $0x104c] ss:$16 sps:$4 sm:$0xff]  }
 0x6cb   :  { %10630 = vmatprep.subr.bf16.mxu0 %v13974_v38  ;;  %v14017_v38 = vld [vmem:[#allocation18 + $0x1268] ss:$16 sps:$4 sm:$0xff]  }
 0x6cc   :  { %10670 = vmatpush2.bf16.msra.mxu1 %v13969_v36  ;;  %v14025_v36 = vld [vmem:[#allocation18 + $0x124c] ss:$16 sps:$4 sm:$0xff]  }
 0x6cd   :  { %10671 = vmatprep.subr.bf16.mxu1 %v13977_v37  ;;  %v14020_v37 = vld [vmem:[#allocation18 + $0x1048] ss:$16 sps:$4 sm:$0xff]  }
 0x6ce   :  { %10631 = vmatpush2.bf16.msra.mxu0 %v13972_v61  ;;  %v14028_v61 = vld [vmem:[#allocation18 + $0x102c] ss:$16 sps:$4 sm:$0xff]  }
 0x6cf   :  { %10632 = vmatprep.subr.bf16.mxu0 %v13980_v47  ;;  %v14023_v47 = vld [vmem:[#allocation18 + $0x1248] ss:$16 sps:$4 sm:$0xff]  }
 0x6d0   :  { %10672 = vmatpush2.bf16.msra.mxu1 %v13975_v57  ;;  %v14031_v57 = vld [vmem:[#allocation18 + $0x122c] ss:$16 sps:$4 sm:$0xff]  }
 0x6d1   :  { %10673 = vmatprep.subr.bf16.mxu1 %v13983_v50  ;;  %v14026_v50 = vld [vmem:[#allocation18 + $0x1028] ss:$16 sps:$4 sm:$0xff]  }
 0x6d2   :  { %10633 = vmatpush2.bf16.msra.mxu0 %v13978_v40  ;;  %v14034_v40 = vld [vmem:[#allocation18 + $0x100c] ss:$16 sps:$4 sm:$0xff]  }
 0x6d3   :  { %10634 = vmatprep.subr.bf16.mxu0 %v13986_v11  ;;  %v14029_v11 = vld [vmem:[#allocation18 + $0x1228] ss:$16 sps:$4 sm:$0xff]  }
 0x6d4   :  { %10674 = vmatpush2.bf16.msra.mxu1 %v13981_v60  ;;  %v14037_v60 = vld [vmem:[#allocation18 + $0x120c] ss:$16 sps:$4 sm:$0xff]  }
 0x6d5   :  { %10675 = vmatprep.subr.bf16.mxu1 %v13989_v26  ;;  %v14032_v26 = vld [vmem:[#allocation18 + $0x1008] ss:$16 sps:$4 sm:$0xff]  }
 0x6d6   :  { %10635 = vmatpush2.bf16.msra.mxu0 %v13984_v22  ;;  %v14040_v22 = vld [vmem:[#allocation18 + $0x11ec] ss:$16 sps:$4 sm:$0xff]  }
 0x6d7   :  { %10686 = vmatprep.subr.bf16.mxu0 %v13992_v48  ;;  %v14043_v48 = vld [vmem:[#allocation18 + $0x13ec] ss:$16 sps:$4 sm:$0xff]  }
 0x6d8   :  { %10676 = vmatpush2.bf16.msra.mxu1 %v13987_v13  ;;  %v14038_v13 = vld [vmem:[#allocation18 + $0x11e8] ss:$16 sps:$4 sm:$0xff]  }
 0x6d9   :  { %v10392_v4 = vpop.f32.mrf.mxu0  ;;  %10637 = vmatmul.mubr.bf16.vlgmr.msra.gmra.mxu0 %v15494_v15  ;;  %10727 = vmatprep.subr.bf16.mxu1 %v13995_v6  ;;  %v13999_v15 = vld [vmem:[#allocation18 + $0x12c8] ss:$16 sps:$4 sm:$0xff]  }
 0x6da   :  { %v10393_v31 = vadd.f32 %v10392_v4, %v4573_v54  ;;  %10687 = vmatpush1.bf16.msra.mxu0 %v13990_v17  ;;  %10718 = vmatprep.mubr.bf16.mxu0 %v15498_v28  ;;  %v14002_v28 = vld [vmem:[#allocation18 + $0x10a8] ss:$16 sps:$4 sm:$0xff]   ;;  %v14052_v17 = vld [vmem:[#allocation18 + $0x11ac] ss:$16 sps:$4 sm:$0xff]  }
 0x6db   :  { %v10394_v45 = vpop.f32.mrf.mxu0  ;;  %v10433_v16 = vpop.f32.mrf.mxu1  ;;  %10678 = vmatmul.mubr.bf16.vlgmr.msra.gmra.mxu1 %v15504_v41  ;;  %10688 = vmatprep.subr.bf16.mxu0 %v13998_v25  ;;  %v14010_v41 = vld [vmem:[#allocation18 + $0x108c] ss:$16 sps:$4 sm:$0xff]   ;;  %v14041_v6 = vld [vmem:[#allocation18 + $0x13e8] ss:$16 sps:$4 sm:$0xff]  }
 0x6dc   :  { %v10395_v29 = vadd.f32 %v10394_v45, %v4577_v9  ;;  %v15656_v62 = vadd.f32 %v10433_v16, %v10393_v31  ;;  %10728 = vmatpush1.bf16.msra.mxu1 %v13993_v56  ;;  %10759 = vmatprep.mubr.bf16.mxu1 %v15509_v51  ;;  %v14008_v51 = vld [vmem:[#allocation18 + $0x1088] ss:$16 sps:$4 sm:$0xff]   ;;  %v14055_v9 = vld [vmem:[#allocation18 + $0x13ac] ss:$16 sps:$4 sm:$0xff]  }
 0x6dd   :  { %v10396_v46 = vpop.f32.mrf.mxu0  ;;  %v10435_v33 = vpop.f32.mrf.mxu1  ;;  %10729 = vmatprep.subr.bf16.mxu1 %v14001_v1  ;;  %v14044_v54 = vld [vmem:[#allocation18 + $0x11c8] ss:$16 sps:$4 sm:$0xff]   ;;  %v14058_v4 = vld [vmem:[#allocation18 + $0x118c] ss:$16 sps:$4 sm:$0xff]  }
 0x6de   :  { %v15659_v34 = vadd.f32 %v10435_v33, %v10395_v29  ;;  %10689 = vmatpush1.bf16.msra.mxu0 %v13996_v18  ;;  %v14047_v25 = vld [vmem:[#allocation18 + $0x13c8] ss:$16 sps:$4 sm:$0xff]   ;;  %v14061_v31 = vld [vmem:[#allocation18 + $0x138c] ss:$16 sps:$4 sm:$0xff]  }
 0x6df   :  { %v10397_v59 = vpop.f32.mrf.mxu0  ;;  %v10437_v14 = vpop.f32.mrf.mxu1  ;;  %10690 = vmatprep.subr.bf16.mxu0 %v14004_v27  ;;  %v14050_v56 = vld [vmem:[#allocation18 + $0x11a8] ss:$16 sps:$4 sm:$0xff]   ;;  %v14064_v45 = vld [vmem:[#allocation18 + $0x116c] ss:$16 sps:$4 sm:$0xff]  }
 0x6e0   :  { %10730 = vmatpush1.bf16.msra.mxu1 %v13999_v15  ;;  %v14053_v1 = vld [vmem:[#allocation18 + $0x13a8] ss:$16 sps:$4 sm:$0xff]   ;;  %v14067_v27 = vld [vmem:[#allocation18 + $0x136c] ss:$16 sps:$4 sm:$0xff]  }
 0x6e1   :  { %v10438_v8 = vpop.f32.mrf.mxu1  ;;  %10731 = vmatprep.subr.bf16.mxu1 %v14007_v52  ;;  %v14056_v18 = vld [vmem:[#allocation18 + $0x1188] ss:$16 sps:$4 sm:$0xff]   ;;  %v14070_v15 = vld [vmem:[#allocation18 + $0x114c] ss:$16 sps:$4 sm:$0xff]  }
 0x6e2   :  { %10691 = vmatpush1.bf16.msra.mxu0 %v14002_v28  ;;  %v14059_v16 = vld [vmem:[#allocation18 + $0x1388] ss:$16 sps:$4 sm:$0xff]   ;;  %v14073_v33 = vld [vmem:[#allocation18 + $0x134c] ss:$16 sps:$4 sm:$0xff]  }
 0x6e3   :  { %10692 = vmatprep.subr.bf16.mxu0 %v14010_v41  ;;  %v14062_v29 = vld [vmem:[#allocation18 + $0x1168] ss:$16 sps:$4 sm:$0xff]   ;;  %v14076_v28 = vld [vmem:[#allocation18 + $0x112c] ss:$16 sps:$4 sm:$0xff]  }
 0x6e4   :  { %10732 = vmatpush1.bf16.msra.mxu1 %v14005_v39  ;;  %v14065_v46 = vld [vmem:[#allocation18 + $0x1368] ss:$16 sps:$4 sm:$0xff]   ;;  %v14079_v14 = vld [vmem:[#allocation18 + $0x132c] ss:$16 sps:$4 sm:$0xff]  }
 0x6e5   :  { %10733 = vmatprep.subr.bf16.mxu1 %v14013_v2  ;;  %v14068_v52 = vld [vmem:[#allocation18 + $0x1148] ss:$16 sps:$4 sm:$0xff]   ;;  %v14082_v39 = vld [vmem:[#allocation18 + $0x110c] ss:$16 sps:$4 sm:$0xff]  }
 0x6e6   :  { %10693 = vmatpush1.bf16.msra.mxu0 %v14008_v51  ;;  %v14071_v59 = vld [vmem:[#allocation18 + $0x1348] ss:$16 sps:$4 sm:$0xff]   ;;  %v14085_v2 = vld [vmem:[#allocation18 + $0x130c] ss:$16 sps:$4 sm:$0xff]  }
 0x6e7   :  { %10694 = vmatprep.subr.bf16.mxu0 %v14016_v5  ;;  %v14074_v41 = vld [vmem:[#allocation18 + $0x1128] ss:$16 sps:$4 sm:$0xff]   ;;  %v14088_v5 = vld [vmem:[#allocation18 + $0x14ec] ss:$16 sps:$4 sm:$0xff]  }
 0x6e8   :  { %10734 = vmatpush1.bf16.msra.mxu1 %v14011_v63  ;;  %v14077_v8 = vld [vmem:[#allocation18 + $0x1328] ss:$16 sps:$4 sm:$0xff]  }
 0x6e9   :  { %10735 = vmatprep.subr.bf16.mxu1 %v14019_v49  ;;  %v14080_v51 = vld [vmem:[#allocation18 + $0x1108] ss:$16 sps:$4 sm:$0xff]   ;;  %v14091_v49 = vld [vmem:[#allocation18 + $0x16ec] ss:$16 sps:$4 sm:$0xff]  }
 0x6ea   :  { %10695 = vmatpush1.bf16.msra.mxu0 %v14014_v10  ;;  %v14083_v63 = vld [vmem:[#allocation18 + $0x1308] ss:$16 sps:$4 sm:$0xff]  }
 0x6eb   :  { %10696 = vmatprep.subr.bf16.mxu0 %v14022_v20  ;;  %v14086_v10 = vld [vmem:[#allocation18 + $0x14e8] ss:$16 sps:$4 sm:$0xff]   ;;  %v14094_v20 = vld [vmem:[#allocation18 + $0x14cc] ss:$16 sps:$4 sm:$0xff]  }
 0x6ec   :  { %10736 = vmatpush1.bf16.msra.mxu1 %v14017_v38  ;;  %v14089_v38 = vld [vmem:[#allocation18 + $0x16e8] ss:$16 sps:$4 sm:$0xff]  }
 0x6ed   :  { %10737 = vmatprep.subr.bf16.mxu1 %v14025_v36 }
 0x6ee   :  { %10697 = vmatpush1.bf16.msra.mxu0 %v14020_v37  ;;  %v14097_v37 = vld [vmem:[#allocation18 + $0x16cc] ss:$16 sps:$4 sm:$0xff]  }
 0x6ef   :  { %10698 = vmatprep.subr.bf16.mxu0 %v14028_v61 }
 0x6f0   :  { %10738 = vmatpush1.bf16.msra.mxu1 %v14023_v47  ;;  %v14092_v47 = vld [vmem:[#allocation18 + $0x14c8] ss:$16 sps:$4 sm:$0xff]  }
 0x6f1   :  { %10739 = vmatprep.subr.bf16.mxu1 %v14031_v57 }
 0x6f2   :  { %10699 = vmatpush1.bf16.msra.mxu0 %v14026_v50 }
 0x6f3   :  { %10700 = vmatprep.subr.bf16.mxu0 %v14034_v40  ;;  %v14100_v40 = vld [vmem:[#allocation18 + $0x14ac] ss:$16 sps:$4 sm:$0xff]  }
 0x6f4   :  { %10740 = vmatpush1.bf16.msra.mxu1 %v14029_v11 }
 0x6f5   :  { %10741 = vmatprep.subr.bf16.mxu1 %v14037_v60 }
 0x6f6   :  { %10701 = vmatpush1.bf16.msra.mxu0 %v14032_v26 }
 0x6f7   :  { %10702 = vmatprep.subr.bf16.mxu0 %v14040_v22  ;;  %v14103_v22 = vld [vmem:[#allocation18 + $0x16ac] ss:$16 sps:$4 sm:$0xff]  }
 0x6f8   :  { %10742 = vmatpush1.bf16.msra.mxu1 %v14035_v24  ;;  %v14098_v24 = vld [vmem:[#allocation18 + $0x14a8] ss:$16 sps:$4 sm:$0xff]  }
 0x6f9   :  { %10743 = vmatprep.subr.bf16.mxu1 %v14043_v48 }
 0x6fa   :  { %10703 = vmatpush2.bf16.msra.mxu0 %v14038_v13  ;;  %v14106_v13 = vld [vmem:[#allocation18 + $0x148c] ss:$16 sps:$4 sm:$0xff]  }
 0x6fb   :  { %10704 = vmatprep.subr.bf16.mxu0 %v14046_v0 }
 0x6fc   :  { %10744 = vmatpush2.bf16.msra.mxu1 %v14041_v6  ;;  %v14109_v6 = vld [vmem:[#allocation18 + $0x168c] ss:$16 sps:$4 sm:$0xff]  }
 0x6fd   :  { %10745 = vmatprep.subr.bf16.mxu1 %v14049_v44  ;;  %v14112_v44 = vld [vmem:[#allocation18 + $0x146c] ss:$16 sps:$4 sm:$0xff]  }
 0x6fe   :  { %10705 = vmatpush2.bf16.msra.mxu0 %v14044_v54  ;;  %v14107_v54 = vld [vmem:[#allocation18 + $0x1688] ss:$16 sps:$4 sm:$0xff]  }
 0x6ff   :  { %10706 = vmatprep.subr.bf16.mxu0 %v14052_v17  ;;  %v14115_v17 = vld [vmem:[#allocation18 + $0x166c] ss:$16 sps:$4 sm:$0xff]  }
 0x700   :  { %10746 = vmatpush2.bf16.msra.mxu1 %v14047_v25  ;;  %v14110_v25 = vld [vmem:[#allocation18 + $0x1468] ss:$16 sps:$4 sm:$0xff]  }
 0x701   :  { %10747 = vmatprep.subr.bf16.mxu1 %v14055_v9  ;;  %v14118_v9 = vld [vmem:[#allocation18 + $0x144c] ss:$16 sps:$4 sm:$0xff]  }
 0x702   :  { %10707 = vmatpush2.bf16.msra.mxu0 %v14050_v56  ;;  %v14113_v56 = vld [vmem:[#allocation18 + $0x1668] ss:$16 sps:$4 sm:$0xff]  }
 0x703   :  { %10708 = vmatprep.subr.bf16.mxu0 %v14058_v4  ;;  %v14121_v4 = vld [vmem:[#allocation18 + $0x164c] ss:$16 sps:$4 sm:$0xff]  }
 0x704   :  { %10748 = vmatpush2.bf16.msra.mxu1 %v14053_v1  ;;  %v14116_v1 = vld [vmem:[#allocation18 + $0x1448] ss:$16 sps:$4 sm:$0xff]  }
 0x705   :  { %10749 = vmatprep.subr.bf16.mxu1 %v14061_v31  ;;  %v14124_v31 = vld [vmem:[#allocation18 + $0x142c] ss:$16 sps:$4 sm:$0xff]  }
 0x706   :  { %10709 = vmatpush2.bf16.msra.mxu0 %v14056_v18  ;;  %v14119_v18 = vld [vmem:[#allocation18 + $0x1648] ss:$16 sps:$4 sm:$0xff]  }
 0x707   :  { %10710 = vmatprep.subr.bf16.mxu0 %v14064_v45  ;;  %v14127_v45 = vld [vmem:[#allocation18 + $0x162c] ss:$16 sps:$4 sm:$0xff]  }
 0x708   :  { %10750 = vmatpush2.bf16.msra.mxu1 %v14059_v16  ;;  %v14122_v16 = vld [vmem:[#allocation18 + $0x1428] ss:$16 sps:$4 sm:$0xff]  }
 0x709   :  { %10751 = vmatprep.subr.bf16.mxu1 %v14067_v27  ;;  %v14130_v27 = vld [vmem:[#allocation18 + $0x140c] ss:$16 sps:$4 sm:$0xff]  }
 0x70a   :  { %10711 = vmatpush2.bf16.msra.mxu0 %v14062_v29  ;;  %v14125_v29 = vld [vmem:[#allocation18 + $0x1628] ss:$16 sps:$4 sm:$0xff]  }
 0x70b   :  { %10712 = vmatprep.subr.bf16.mxu0 %v14070_v15  ;;  %v14133_v15 = vld [vmem:[#allocation18 + $0x160c] ss:$16 sps:$4 sm:$0xff]  }
 0x70c   :  { %10752 = vmatpush2.bf16.msra.mxu1 %v14065_v46  ;;  %v14128_v46 = vld [vmem:[#allocation18 + $0x1408] ss:$16 sps:$4 sm:$0xff]  }
 0x70d   :  { %10753 = vmatprep.subr.bf16.mxu1 %v14073_v33  ;;  %v14136_v33 = vld [vmem:[#allocation18 + $0x15ec] ss:$16 sps:$4 sm:$0xff]  }
 0x70e   :  { %10713 = vmatpush2.bf16.msra.mxu0 %v14068_v52  ;;  %v14131_v52 = vld [vmem:[#allocation18 + $0x1608] ss:$16 sps:$4 sm:$0xff]  }
 0x70f   :  { %10714 = vmatprep.subr.bf16.mxu0 %v14076_v28  ;;  %v14139_v28 = vld [vmem:[#allocation18 + $0x17ec] ss:$16 sps:$4 sm:$0xff]  }
 0x710   :  { %10754 = vmatpush2.bf16.msra.mxu1 %v14071_v59  ;;  %v14134_v59 = vld [vmem:[#allocation18 + $0x15e8] ss:$16 sps:$4 sm:$0xff]  }
 0x711   :  { %10755 = vmatprep.subr.bf16.mxu1 %v14079_v14  ;;  %v14142_v14 = vld [vmem:[#allocation18 + $0x15cc] ss:$16 sps:$4 sm:$0xff]  }
 0x712   :  { %10715 = vmatpush2.bf16.msra.mxu0 %v14074_v41  ;;  %v14137_v41 = vld [vmem:[#allocation18 + $0x17e8] ss:$16 sps:$4 sm:$0xff]  }
 0x713   :  { %10716 = vmatprep.subr.bf16.mxu0 %v14082_v39  ;;  %v14145_v39 = vld [vmem:[#allocation18 + $0x17cc] ss:$16 sps:$4 sm:$0xff]  }
 0x714   :  { %10756 = vmatpush2.bf16.msra.mxu1 %v14077_v8  ;;  %v14140_v8 = vld [vmem:[#allocation18 + $0x15c8] ss:$16 sps:$4 sm:$0xff]  }
 0x715   :  { %10757 = vmatprep.subr.bf16.mxu1 %v14085_v2  ;;  %v14148_v2 = vld [vmem:[#allocation18 + $0x15ac] ss:$16 sps:$4 sm:$0xff]  }
 0x716   :  { %10717 = vmatpush2.bf16.msra.mxu0 %v14080_v51  ;;  %v14143_v51 = vld [vmem:[#allocation18 + $0x17c8] ss:$16 sps:$4 sm:$0xff]  }
 0x717   :  { %10768 = vmatprep.subr.bf16.mxu0 %v14088_v5  ;;  %v14151_v5 = vld [vmem:[#allocation18 + $0x17ac] ss:$16 sps:$4 sm:$0xff]  }
 0x718   :  { %10758 = vmatpush2.bf16.msra.mxu1 %v14083_v63  ;;  %v14146_v63 = vld [vmem:[#allocation18 + $0x15a8] ss:$16 sps:$4 sm:$0xff]  }
 0x719   :  { %v10474_v36 = vpop.f32.mrf.mxu0  ;;  %10719 = vmatmul.mubr.bf16.vlgmr.msra.gmra.mxu0 %v15519_v42  ;;  %10809 = vmatprep.subr.bf16.mxu1 %v14091_v49  ;;  %v14095_v42 = vld [vmem:[#allocation18 + $0x16c8] ss:$16 sps:$4 sm:$0xff]   ;;  %v14154_v49 = vld [vmem:[#allocation18 + $0x158c] ss:$16 sps:$4 sm:$0xff]  }
 0x71a   :  { %v10475_v61 = vadd.f32 %v10474_v36, %v15656_v62  ;;  %10769 = vmatpush1.bf16.msra.mxu0 %v14086_v10  ;;  %10800 = vmatprep.mubr.bf16.mxu0 %v15523_v7  ;;  %v14149_v10 = vld [vmem:[#allocation18 + $0x17a8] ss:$16 sps:$4 sm:$0xff]   ;;  %v14160_v36 = vld [vmem:[#allocation18 + $0x156c] ss:$16 sps:$4 sm:$0xff]  }
 0x71b   :  { %v10476_v57 = vpop.f32.mrf.mxu0  ;;  %v10515_v50 = vpop.f32.mrf.mxu1  ;;  %10760 = vmatmul.mubr.bf16.vlgmr.msra.gmra.mxu1 %v15527_v3  ;;  %10770 = vmatprep.subr.bf16.mxu0 %v14094_v20  ;;  %v14157_v20 = vld [vmem:[#allocation18 + $0x178c] ss:$16 sps:$4 sm:$0xff]  }
 0x71c   :  { %v10477_v11 = vadd.f32 %v10476_v57, %v15659_v34  ;;  %v15666_v60 = vadd.f32 %v10515_v50, %v10475_v61  ;;  %10810 = vmatpush1.bf16.msra.mxu1 %v14089_v38  ;;  %10841 = vmatprep.mubr.bf16.mxu1 %v15534_v53  ;;  %v14101_v34 = vld [vmem:[#allocation18 + $0x16a8] ss:$16 sps:$4 sm:$0xff]   ;;  %v14163_v61 = vld [vmem:[#allocation18 + $0x176c] ss:$16 sps:$4 sm:$0xff]  }
 0x71d   :  { %v10478_v26 = vpop.f32.mrf.mxu0  ;;  %v10517_v62 = vpop.f32.mrf.mxu1  ;;  %10811 = vmatprep.subr.bf16.mxu1 %v14097_v37  ;;  %v14104_v53 = vld [vmem:[#allocation18 + $0x1488] ss:$16 sps:$4 sm:$0xff]   ;;  %v14166_v57 = vld [vmem:[#allocation18 + $0x154c] ss:$16 sps:$4 sm:$0xff]  }
 0x71e   :  { %v15669_v7 = vadd.f32 %v10517_v62, %v10477_v11  ;;  %10771 = vmatpush1.bf16.msra.mxu0 %v14092_v47  ;;  %v14152_v38 = vld [vmem:[#allocation18 + $0x1588] ss:$16 sps:$4 sm:$0xff]   ;;  %v14175_v62 = vld [vmem:[#allocation18 + $0x172c] ss:$16 sps:$4 sm:$0xff]  }
 0x71f   :  { %v10479_v48 = vpop.f32.mrf.mxu0  ;;  %v10519_v3 = vpop.f32.mrf.mxu1  ;;  %10772 = vmatprep.subr.bf16.mxu0 %v14100_v40  ;;  %v14155_v37 = vld [vmem:[#allocation18 + $0x1788] ss:$16 sps:$4 sm:$0xff]   ;;  %v14169_v40 = vld [vmem:[#allocation18 + $0x174c] ss:$16 sps:$4 sm:$0xff]  }
 0x720   :  { %10812 = vmatpush1.bf16.msra.mxu1 %v14095_v42  ;;  %v14158_v47 = vld [vmem:[#allocation18 + $0x1568] ss:$16 sps:$4 sm:$0xff]   ;;  %v14172_v42 = vld [vmem:[#allocation18 + $0x152c] ss:$16 sps:$4 sm:$0xff]  }
 0x721   :  { %v10520_v0 = vpop.f32.mrf.mxu1  ;;  %10813 = vmatprep.subr.bf16.mxu1 %v14103_v22  ;;  %v14161_v50 = vld [vmem:[#allocation18 + $0x1768] ss:$16 sps:$4 sm:$0xff]   ;;  %v14181_v3 = vld [vmem:[#allocation18 + $0x170c] ss:$16 sps:$4 sm:$0xff]  }
 0x722   :  { %10773 = vmatpush1.bf16.msra.mxu0 %v14098_v24  ;;  %v14164_v11 = vld [vmem:[#allocation18 + $0x1548] ss:$16 sps:$4 sm:$0xff]   ;;  %v14178_v24 = vld [vmem:[#allocation18 + $0x150c] ss:$16 sps:$4 sm:$0xff]  }
 0x723   :  { %10774 = vmatprep.subr.bf16.mxu0 %v14106_v13  ;;  %v14167_v26 = vld [vmem:[#allocation18 + $0x1748] ss:$16 sps:$4 sm:$0xff]  }
 0x724   :  { %10814 = vmatpush1.bf16.msra.mxu1 %v14101_v34  ;;  %v14170_v22 = vld [vmem:[#allocation18 + $0x1528] ss:$16 sps:$4 sm:$0xff]   ;;  %v14184_v34 = vld [vmem:[#allocation18 + $0x18ec] ss:$16 sps:$4 sm:$0xff]  }
 0x725   :  { %10815 = vmatprep.subr.bf16.mxu1 %v14109_v6  ;;  %v14173_v48 = vld [vmem:[#allocation18 + $0x1728] ss:$16 sps:$4 sm:$0xff]   ;;  %v14187_v6 = vld [vmem:[#allocation18 + $0x1aec] ss:$16 sps:$4 sm:$0xff]  }
 0x726   :  { %10775 = vmatpush1.bf16.msra.mxu0 %v14104_v53  ;;  %v14176_v13 = vld [vmem:[#allocation18 + $0x1508] ss:$16 sps:$4 sm:$0xff]  }
 0x727   :  { %10776 = vmatprep.subr.bf16.mxu0 %v14112_v44  ;;  %v14179_v0 = vld [vmem:[#allocation18 + $0x1708] ss:$16 sps:$4 sm:$0xff]   ;;  %v14190_v44 = vld [vmem:[#allocation18 + $0x18cc] ss:$16 sps:$4 sm:$0xff]  }
 0x728   :  { %10816 = vmatpush1.bf16.msra.mxu1 %v14107_v54  ;;  %v14182_v53 = vld [vmem:[#allocation18 + $0x18e8] ss:$16 sps:$4 sm:$0xff]  }
 0x729   :  { %10817 = vmatprep.subr.bf16.mxu1 %v14115_v17  ;;  %v14185_v54 = vld [vmem:[#allocation18 + $0x1ae8] ss:$16 sps:$4 sm:$0xff]  }
 0x72a   :  { %10777 = vmatpush1.bf16.msra.mxu0 %v14110_v25  ;;  %v14193_v25 = vld [vmem:[#allocation18 + $0x1acc] ss:$16 sps:$4 sm:$0xff]  }
 0x72b   :  { %10778 = vmatprep.subr.bf16.mxu0 %v14118_v9 }
 0x72c   :  { %10818 = vmatpush1.bf16.msra.mxu1 %v14113_v56  ;;  %v14188_v56 = vld [vmem:[#allocation18 + $0x18c8] ss:$16 sps:$4 sm:$0xff]  }
 0x72d   :  { %10819 = vmatprep.subr.bf16.mxu1 %v14121_v4 }
 0x72e   :  { %10779 = vmatpush1.bf16.msra.mxu0 %v14116_v1 }
 0x72f   :  { %10780 = vmatprep.subr.bf16.mxu0 %v14124_v31  ;;  %v14196_v31 = vld [vmem:[#allocation18 + $0x18ac] ss:$16 sps:$4 sm:$0xff]  }
 0x730   :  { %10820 = vmatpush1.bf16.msra.mxu1 %v14119_v18 }
 0x731   :  { %10821 = vmatprep.subr.bf16.mxu1 %v14127_v45 }
 0x732   :  { %10781 = vmatpush1.bf16.msra.mxu0 %v14122_v16 }
 0x733   :  { %10782 = vmatprep.subr.bf16.mxu0 %v14130_v27  ;;  %v14199_v27 = vld [vmem:[#allocation18 + $0x1aac] ss:$16 sps:$4 sm:$0xff]  }
 0x734   :  { %10822 = vmatpush1.bf16.msra.mxu1 %v14125_v29  ;;  %v14194_v29 = vld [vmem:[#allocation18 + $0x18a8] ss:$16 sps:$4 sm:$0xff]  }
 0x735   :  { %10823 = vmatprep.subr.bf16.mxu1 %v14133_v15 }
 0x736   :  { %10783 = vmatpush1.bf16.msra.mxu0 %v14128_v46  ;;  %v14202_v46 = vld [vmem:[#allocation18 + $0x188c] ss:$16 sps:$4 sm:$0xff]  }
 0x737   :  { %10784 = vmatprep.subr.bf16.mxu0 %v14136_v33 }
 0x738   :  { %10824 = vmatpush1.bf16.msra.mxu1 %v14131_v52  ;;  %v14205_v52 = vld [vmem:[#allocation18 + $0x1a8c] ss:$16 sps:$4 sm:$0xff]  }
 0x739   :  { %10825 = vmatprep.subr.bf16.mxu1 %v14139_v28  ;;  %v14208_v28 = vld [vmem:[#allocation18 + $0x186c] ss:$16 sps:$4 sm:$0xff]  }
 0x73a   :  { %10785 = vmatpush2.bf16.msra.mxu0 %v14134_v59  ;;  %v14203_v59 = vld [vmem:[#allocation18 + $0x1a88] ss:$16 sps:$4 sm:$0xff]  }
 0x73b   :  { %10786 = vmatprep.subr.bf16.mxu0 %v14142_v14  ;;  %v14211_v14 = vld [vmem:[#allocation18 + $0x1a6c] ss:$16 sps:$4 sm:$0xff]  }
 0x73c   :  { %10826 = vmatpush2.bf16.msra.mxu1 %v14137_v41  ;;  %v14206_v41 = vld [vmem:[#allocation18 + $0x1868] ss:$16 sps:$4 sm:$0xff]  }
 0x73d   :  { %10827 = vmatprep.subr.bf16.mxu1 %v14145_v39  ;;  %v14214_v39 = vld [vmem:[#allocation18 + $0x184c] ss:$16 sps:$4 sm:$0xff]  }
 0x73e   :  { %10787 = vmatpush2.bf16.msra.mxu0 %v14140_v8  ;;  %v14209_v8 = vld [vmem:[#allocation18 + $0x1a68] ss:$16 sps:$4 sm:$0xff]  }
 0x73f   :  { %10788 = vmatprep.subr.bf16.mxu0 %v14148_v2  ;;  %v14217_v2 = vld [vmem:[#allocation18 + $0x1a4c] ss:$16 sps:$4 sm:$0xff]  }
 0x740   :  { %10828 = vmatpush2.bf16.msra.mxu1 %v14143_v51  ;;  %v14212_v51 = vld [vmem:[#allocation18 + $0x1848] ss:$16 sps:$4 sm:$0xff]  }
 0x741   :  { %10829 = vmatprep.subr.bf16.mxu1 %v14151_v5  ;;  %v14220_v5 = vld [vmem:[#allocation18 + $0x182c] ss:$16 sps:$4 sm:$0xff]  }
 0x742   :  { %10789 = vmatpush2.bf16.msra.mxu0 %v14146_v63  ;;  %v14215_v63 = vld [vmem:[#allocation18 + $0x1a48] ss:$16 sps:$4 sm:$0xff]  }
 0x743   :  { %10790 = vmatprep.subr.bf16.mxu0 %v14154_v49  ;;  %v14223_v49 = vld [vmem:[#allocation18 + $0x1a2c] ss:$16 sps:$4 sm:$0xff]  }
 0x744   :  { %10830 = vmatpush2.bf16.msra.mxu1 %v14149_v10  ;;  %v14218_v10 = vld [vmem:[#allocation18 + $0x1828] ss:$16 sps:$4 sm:$0xff]  }
 0x745   :  { %10831 = vmatprep.subr.bf16.mxu1 %v14157_v20  ;;  %v14226_v20 = vld [vmem:[#allocation18 + $0x180c] ss:$16 sps:$4 sm:$0xff]  }
 0x746   :  { %10791 = vmatpush2.bf16.msra.mxu0 %v14152_v38  ;;  %v14221_v38 = vld [vmem:[#allocation18 + $0x1a28] ss:$16 sps:$4 sm:$0xff]  }
 0x747   :  { %10792 = vmatprep.subr.bf16.mxu0 %v14160_v36  ;;  %v14229_v36 = vld [vmem:[#allocation18 + $0x1a0c] ss:$16 sps:$4 sm:$0xff]  }
 0x748   :  { %10832 = vmatpush2.bf16.msra.mxu1 %v14155_v37  ;;  %v14224_v37 = vld [vmem:[#allocation18 + $0x1808] ss:$16 sps:$4 sm:$0xff]  }
 0x749   :  { %10833 = vmatprep.subr.bf16.mxu1 %v14163_v61  ;;  %v14232_v61 = vld [vmem:[#allocation18 + $0x19ec] ss:$16 sps:$4 sm:$0xff]  }
 0x74a   :  { %10793 = vmatpush2.bf16.msra.mxu0 %v14158_v47  ;;  %v14227_v47 = vld [vmem:[#allocation18 + $0x1a08] ss:$16 sps:$4 sm:$0xff]  }
 0x74b   :  { %10794 = vmatprep.subr.bf16.mxu0 %v14166_v57  ;;  %v14235_v57 = vld [vmem:[#allocation18 + $0x1bec] ss:$16 sps:$4 sm:$0xff]  }
 0x74c   :  { %10834 = vmatpush2.bf16.msra.mxu1 %v14161_v50  ;;  %v14230_v50 = vld [vmem:[#allocation18 + $0x19e8] ss:$16 sps:$4 sm:$0xff]  }
 0x74d   :  { %10835 = vmatprep.subr.bf16.mxu1 %v14169_v40  ;;  %v14238_v40 = vld [vmem:[#allocation18 + $0x19cc] ss:$16 sps:$4 sm:$0xff]  }
 0x74e   :  { %10795 = vmatpush2.bf16.msra.mxu0 %v14164_v11  ;;  %v14233_v11 = vld [vmem:[#allocation18 + $0x1be8] ss:$16 sps:$4 sm:$0xff]  }
 0x74f   :  { %10796 = vmatprep.subr.bf16.mxu0 %v14172_v42  ;;  %v14241_v42 = vld [vmem:[#allocation18 + $0x1bcc] ss:$16 sps:$4 sm:$0xff]  }
 0x750   :  { %10836 = vmatpush2.bf16.msra.mxu1 %v14167_v26  ;;  %v14236_v26 = vld [vmem:[#allocation18 + $0x19c8] ss:$16 sps:$4 sm:$0xff]  }
 0x751   :  { %10837 = vmatprep.subr.bf16.mxu1 %v14175_v62  ;;  %v14244_v62 = vld [vmem:[#allocation18 + $0x19ac] ss:$16 sps:$4 sm:$0xff]  }
 0x752   :  { %10797 = vmatpush2.bf16.msra.mxu0 %v14170_v22  ;;  %v14239_v22 = vld [vmem:[#allocation18 + $0x1bc8] ss:$16 sps:$4 sm:$0xff]  }
 0x753   :  { %10798 = vmatprep.subr.bf16.mxu0 %v14178_v24  ;;  %v14247_v24 = vld [vmem:[#allocation18 + $0x1bac] ss:$16 sps:$4 sm:$0xff]  }
 0x754   :  { %10838 = vmatpush2.bf16.msra.mxu1 %v14173_v48  ;;  %v14242_v48 = vld [vmem:[#allocation18 + $0x19a8] ss:$16 sps:$4 sm:$0xff]  }
 0x755   :  { %10839 = vmatprep.subr.bf16.mxu1 %v14181_v3  ;;  %v14250_v3 = vld [vmem:[#allocation18 + $0x198c] ss:$16 sps:$4 sm:$0xff]  }
 0x756   :  { %10799 = vmatpush2.bf16.msra.mxu0 %v14176_v13  ;;  %v14245_v13 = vld [vmem:[#allocation18 + $0x1ba8] ss:$16 sps:$4 sm:$0xff]  }
 0x757   :  { %10850 = vmatprep.subr.bf16.mxu0 %v14184_v34  ;;  %v14253_v34 = vld [vmem:[#allocation18 + $0x1b8c] ss:$16 sps:$4 sm:$0xff]  }
 0x758   :  { %10840 = vmatpush2.bf16.msra.mxu1 %v14179_v0  ;;  %v14248_v0 = vld [vmem:[#allocation18 + $0x1988] ss:$16 sps:$4 sm:$0xff]  }
 0x759   :  { %v10556_v17 = vpop.f32.mrf.mxu0  ;;  %10801 = vmatmul.mubr.bf16.vlgmr.msra.gmra.mxu0 %v15545_v58  ;;  %10891 = vmatprep.subr.bf16.mxu1 %v14187_v6  ;;  %v14191_v58 = vld [vmem:[#allocation18 + $0x1ac8] ss:$16 sps:$4 sm:$0xff]   ;;  %v14256_v6 = vld [vmem:[#allocation18 + $0x196c] ss:$16 sps:$4 sm:$0xff]  }
 0x75a   :  { %v10557_v9 = vadd.f32 %v10556_v17, %v15666_v60  ;;  %10851 = vmatpush1.bf16.msra.mxu0 %v14182_v53  ;;  %10882 = vmatprep.mubr.bf16.mxu0 %v15549_v35  ;;  %v14251_v53 = vld [vmem:[#allocation18 + $0x1b88] ss:$16 sps:$4 sm:$0xff]   ;;  %v14262_v17 = vld [vmem:[#allocation18 + $0x194c] ss:$16 sps:$4 sm:$0xff]  }
 0x75b   :  { %v10558_v4 = vpop.f32.mrf.mxu0  ;;  %v10597_v1 = vpop.f32.mrf.mxu1  ;;  %10842 = vmatmul.mubr.bf16.vlgmr.msra.gmra.mxu1 %v15553_v12  ;;  %10852 = vmatprep.subr.bf16.mxu0 %v14190_v44  ;;  %v14259_v44 = vld [vmem:[#allocation18 + $0x1b6c] ss:$16 sps:$4 sm:$0xff]  }
 0x75c   :  { %v10559_v18 = vadd.f32 %v10558_v4, %v15669_v7  ;;  %v15676_v45 = vadd.f32 %v10597_v1, %v10557_v9  ;;  %10892 = vmatpush1.bf16.msra.mxu1 %v14185_v54  ;;  %10923 = vmatprep.mubr.bf16.mxu1 %v15560_v19  ;;  %v14197_v7 = vld [vmem:[#allocation18 + $0x1aa8] ss:$16 sps:$4 sm:$0xff]   ;;  %v14265_v9 = vld [vmem:[#allocation18 + $0x1b4c] ss:$16 sps:$4 sm:$0xff]  }
 0x75d   :  { %v10560_v16 = vpop.f32.mrf.mxu0  ;;  %v10599_v60 = vpop.f32.mrf.mxu1  ;;  %10893 = vmatprep.subr.bf16.mxu1 %v14193_v25  ;;  %v14200_v19 = vld [vmem:[#allocation18 + $0x1888] ss:$16 sps:$4 sm:$0xff]   ;;  %v14268_v4 = vld [vmem:[#allocation18 + $0x192c] ss:$16 sps:$4 sm:$0xff]  }
 0x75e   :  { %v15679_v35 = vadd.f32 %v10599_v60, %v10559_v18  ;;  %10853 = vmatpush1.bf16.msra.mxu0 %v14188_v56  ;;  %v14254_v54 = vld [vmem:[#allocation18 + $0x1968] ss:$16 sps:$4 sm:$0xff]   ;;  %v14277_v60 = vld [vmem:[#allocation18 + $0x1b0c] ss:$16 sps:$4 sm:$0xff]  }
 0x75f   :  { %v10561_v15 = vpop.f32.mrf.mxu0  ;;  %v10601_v12 = vpop.f32.mrf.mxu1  ;;  %10854 = vmatprep.subr.bf16.mxu0 %v14196_v31  ;;  %v14257_v25 = vld [vmem:[#allocation18 + $0x1b68] ss:$16 sps:$4 sm:$0xff]   ;;  %v14271_v31 = vld [vmem:[#allocation18 + $0x1b2c] ss:$16 sps:$4 sm:$0xff]  }
 0x760   :  { %10894 = vmatpush1.bf16.msra.mxu1 %v14191_v58  ;;  %v14260_v56 = vld [vmem:[#allocation18 + $0x1948] ss:$16 sps:$4 sm:$0xff]   ;;  %v14274_v58 = vld [vmem:[#allocation18 + $0x190c] ss:$16 sps:$4 sm:$0xff]  }
 0x761   :  { %v10602_v33 = vpop.f32.mrf.mxu1  ;;  %10895 = vmatprep.subr.bf16.mxu1 %v14199_v27  ;;  %v14263_v1 = vld [vmem:[#allocation18 + $0x1b48] ss:$16 sps:$4 sm:$0xff]   ;;  %v14283_v12 = vld [vmem:[#allocation18 + $0x1eec] ss:$16 sps:$4 sm:$0xff]  }
 0x762   :  { %10855 = vmatpush1.bf16.msra.mxu0 %v14194_v29  ;;  %v14266_v18 = vld [vmem:[#allocation18 + $0x1928] ss:$16 sps:$4 sm:$0xff]   ;;  %v14280_v29 = vld [vmem:[#allocation18 + $0x1cec] ss:$16 sps:$4 sm:$0xff]  }
 0x763   :  { %10856 = vmatprep.subr.bf16.mxu0 %v14202_v46  ;;  %v14269_v16 = vld [vmem:[#allocation18 + $0x1b28] ss:$16 sps:$4 sm:$0xff]  }
 0x764   :  { %10896 = vmatpush1.bf16.msra.mxu1 %v14197_v7  ;;  %v14272_v27 = vld [vmem:[#allocation18 + $0x1908] ss:$16 sps:$4 sm:$0xff]   ;;  %v14286_v7 = vld [vmem:[#allocation18 + $0x1ccc] ss:$16 sps:$4 sm:$0xff]  }
 0x765   :  { %10897 = vmatprep.subr.bf16.mxu1 %v14205_v52  ;;  %v14275_v15 = vld [vmem:[#allocation18 + $0x1b08] ss:$16 sps:$4 sm:$0xff]  }
 0x766   :  { %10857 = vmatpush1.bf16.msra.mxu0 %v14200_v19  ;;  %v14278_v46 = vld [vmem:[#allocation18 + $0x1ce8] ss:$16 sps:$4 sm:$0xff]   ;;  %v14289_v19 = vld [vmem:[#allocation18 + $0x1ecc] ss:$16 sps:$4 sm:$0xff]  }
 0x767   :  { %10858 = vmatprep.subr.bf16.mxu0 %v14208_v28  ;;  %v14281_v33 = vld [vmem:[#allocation18 + $0x1ee8] ss:$16 sps:$4 sm:$0xff]  }
 0x768   :  { %10898 = vmatpush1.bf16.msra.mxu1 %v14203_v59  ;;  %v14284_v59 = vld [vmem:[#allocation18 + $0x1cc8] ss:$16 sps:$4 sm:$0xff]  }
 0x769   :  { %10899 = vmatprep.subr.bf16.mxu1 %v14211_v14 }
 0x76a   :  { %10859 = vmatpush1.bf16.msra.mxu0 %v14206_v41 }
 0x76b   :  { %10860 = vmatprep.subr.bf16.mxu0 %v14214_v39  ;;  %v14292_v39 = vld [vmem:[#allocation18 + $0x1cac] ss:$16 sps:$4 sm:$0xff]  }
 0x76c   :  { %10900 = vmatpush1.bf16.msra.mxu1 %v14209_v8 }
 0x76d   :  { %10901 = vmatprep.subr.bf16.mxu1 %v14217_v2 }
 0x76e   :  { %10861 = vmatpush1.bf16.msra.mxu0 %v14212_v51 }
 0x76f   :  { %10862 = vmatprep.subr.bf16.mxu0 %v14220_v5  ;;  %v14295_v5 = vld [vmem:[#allocation18 + $0x1eac] ss:$16 sps:$4 sm:$0xff]  }
 0x770   :  { %10902 = vmatpush1.bf16.msra.mxu1 %v14215_v63  ;;  %v14290_v63 = vld [vmem:[#allocation18 + $0x1ca8] ss:$16 sps:$4 sm:$0xff]  }
 0x771   :  { %10903 = vmatprep.subr.bf16.mxu1 %v14223_v49 }
 0x772   :  { %10863 = vmatpush1.bf16.msra.mxu0 %v14218_v10  ;;  %v14298_v10 = vld [vmem:[#allocation18 + $0x1c8c] ss:$16 sps:$4 sm:$0xff]  }
 0x773   :  { %10864 = vmatprep.subr.bf16.mxu0 %v14226_v20 }
 0x774   :  { %10904 = vmatpush1.bf16.msra.mxu1 %v14221_v38  ;;  %v14301_v38 = vld [vmem:[#allocation18 + $0x1e8c] ss:$16 sps:$4 sm:$0xff]  }
 0x775   :  { %10905 = vmatprep.subr.bf16.mxu1 %v14229_v36  ;;  %v14304_v36 = vld [vmem:[#allocation18 + $0x1c6c] ss:$16 sps:$4 sm:$0xff]  }
 0x776   :  { %10865 = vmatpush1.bf16.msra.mxu0 %v14224_v37  ;;  %v14299_v37 = vld [vmem:[#allocation18 + $0x1e88] ss:$16 sps:$4 sm:$0xff]  }
 0x777   :  { %10866 = vmatprep.subr.bf16.mxu0 %v14232_v61  ;;  %v14307_v61 = vld [vmem:[#allocation18 + $0x1e6c] ss:$16 sps:$4 sm:$0xff]  }
 0x778   :  { %10906 = vmatpush1.bf16.msra.mxu1 %v14227_v47  ;;  %v14302_v47 = vld [vmem:[#allocation18 + $0x1c68] ss:$16 sps:$4 sm:$0xff]  }
 0x779   :  { %10907 = vmatprep.subr.bf16.mxu1 %v14235_v57  ;;  %v14310_v57 = vld [vmem:[#allocation18 + $0x1c4c] ss:$16 sps:$4 sm:$0xff]  }
 0x77a   :  { %10867 = vmatpush2.bf16.msra.mxu0 %v14230_v50  ;;  %v14305_v50 = vld [vmem:[#allocation18 + $0x1e68] ss:$16 sps:$4 sm:$0xff]  }
 0x77b   :  { %10868 = vmatprep.subr.bf16.mxu0 %v14238_v40  ;;  %v14313_v40 = vld [vmem:[#allocation18 + $0x1e4c] ss:$16 sps:$4 sm:$0xff]  }
 0x77c   :  { %10908 = vmatpush2.bf16.msra.mxu1 %v14233_v11  ;;  %v14308_v11 = vld [vmem:[#allocation18 + $0x1c48] ss:$16 sps:$4 sm:$0xff]  }
 0x77d   :  { %10909 = vmatprep.subr.bf16.mxu1 %v14241_v42  ;;  %v14316_v42 = vld [vmem:[#allocation18 + $0x1c2c] ss:$16 sps:$4 sm:$0xff]  }
 0x77e   :  { %10869 = vmatpush2.bf16.msra.mxu0 %v14236_v26  ;;  %v14311_v26 = vld [vmem:[#allocation18 + $0x1e48] ss:$16 sps:$4 sm:$0xff]  }
 0x77f   :  { %10870 = vmatprep.subr.bf16.mxu0 %v14244_v62  ;;  %v14319_v62 = vld [vmem:[#allocation18 + $0x1e2c] ss:$16 sps:$4 sm:$0xff]  }
 0x780   :  { %10910 = vmatpush2.bf16.msra.mxu1 %v14239_v22  ;;  %v14314_v22 = vld [vmem:[#allocation18 + $0x1c28] ss:$16 sps:$4 sm:$0xff]  }
 0x781   :  { %10911 = vmatprep.subr.bf16.mxu1 %v14247_v24  ;;  %v14322_v24 = vld [vmem:[#allocation18 + $0x1c0c] ss:$16 sps:$4 sm:$0xff]  }
 0x782   :  { %10871 = vmatpush2.bf16.msra.mxu0 %v14242_v48  ;;  %v14317_v48 = vld [vmem:[#allocation18 + $0x1e28] ss:$16 sps:$4 sm:$0xff]  }
 0x783   :  { %10872 = vmatprep.subr.bf16.mxu0 %v14250_v3  ;;  %v14325_v3 = vld [vmem:[#allocation18 + $0x1e0c] ss:$16 sps:$4 sm:$0xff]  }
 0x784   :  { %10912 = vmatpush2.bf16.msra.mxu1 %v14245_v13  ;;  %v14320_v13 = vld [vmem:[#allocation18 + $0x1c08] ss:$16 sps:$4 sm:$0xff]  }
 0x785   :  { %10913 = vmatprep.subr.bf16.mxu1 %v14253_v34  ;;  %v14328_v34 = vld [vmem:[#allocation18 + $0x1dec] ss:$16 sps:$4 sm:$0xff]  }
 0x786   :  { %10873 = vmatpush2.bf16.msra.mxu0 %v14248_v0  ;;  %v14323_v0 = vld [vmem:[#allocation18 + $0x1e08] ss:$16 sps:$4 sm:$0xff]  }
 0x787   :  { %10874 = vmatprep.subr.bf16.mxu0 %v14256_v6  ;;  %v14331_v6 = vld [vmem:[#allocation18 + $0x1fec] ss:$16 sps:$4 sm:$0xff]  }
 0x788   :  { %10914 = vmatpush2.bf16.msra.mxu1 %v14251_v53  ;;  %v14326_v53 = vld [vmem:[#allocation18 + $0x1de8] ss:$16 sps:$4 sm:$0xff]  }
 0x789   :  { %10915 = vmatprep.subr.bf16.mxu1 %v14259_v44  ;;  %v14334_v44 = vld [vmem:[#allocation18 + $0x1dcc] ss:$16 sps:$4 sm:$0xff]  }
 0x78a   :  { %10875 = vmatpush2.bf16.msra.mxu0 %v14254_v54  ;;  %v14329_v54 = vld [vmem:[#allocation18 + $0x1fe8] ss:$16 sps:$4 sm:$0xff]  }
 0x78b   :  { %10876 = vmatprep.subr.bf16.mxu0 %v14262_v17  ;;  %v14337_v17 = vld [vmem:[#allocation18 + $0x1fcc] ss:$16 sps:$4 sm:$0xff]  }
 0x78c   :  { %10916 = vmatpush2.bf16.msra.mxu1 %v14257_v25  ;;  %v14332_v25 = vld [vmem:[#allocation18 + $0x1dc8] ss:$16 sps:$4 sm:$0xff]  }
 0x78d   :  { %10917 = vmatprep.subr.bf16.mxu1 %v14265_v9  ;;  %v14340_v9 = vld [vmem:[#allocation18 + $0x1dac] ss:$16 sps:$4 sm:$0xff]  }
 0x78e   :  { %10877 = vmatpush2.bf16.msra.mxu0 %v14260_v56  ;;  %v14335_v56 = vld [vmem:[#allocation18 + $0x1fc8] ss:$16 sps:$4 sm:$0xff]  }
 0x78f   :  { %10878 = vmatprep.subr.bf16.mxu0 %v14268_v4  ;;  %v14343_v4 = vld [vmem:[#allocation18 + $0x1fac] ss:$16 sps:$4 sm:$0xff]  }
 0x790   :  { %10918 = vmatpush2.bf16.msra.mxu1 %v14263_v1  ;;  %v14338_v1 = vld [vmem:[#allocation18 + $0x1da8] ss:$16 sps:$4 sm:$0xff]  }
 0x791   :  { %10919 = vmatprep.subr.bf16.mxu1 %v14271_v31  ;;  %v14346_v31 = vld [vmem:[#allocation18 + $0x1d8c] ss:$16 sps:$4 sm:$0xff]  }
 0x792   :  { %10879 = vmatpush2.bf16.msra.mxu0 %v14266_v18  ;;  %v14341_v18 = vld [vmem:[#allocation18 + $0x1fa8] ss:$16 sps:$4 sm:$0xff]  }
 0x793   :  { %10880 = vmatprep.subr.bf16.mxu0 %v14274_v58  ;;  %v14349_v58 = vld [vmem:[#allocation18 + $0x1f8c] ss:$16 sps:$4 sm:$0xff]  }
 0x794   :  { %10920 = vmatpush2.bf16.msra.mxu1 %v14269_v16  ;;  %v14344_v16 = vld [vmem:[#allocation18 + $0x1d88] ss:$16 sps:$4 sm:$0xff]  }
 0x795   :  { %10921 = vmatprep.subr.bf16.mxu1 %v14277_v60  ;;  %v14352_v60 = vld [vmem:[#allocation18 + $0x1d6c] ss:$16 sps:$4 sm:$0xff]  }
 0x796   :  { %10881 = vmatpush2.bf16.msra.mxu0 %v14272_v27  ;;  %v14347_v27 = vld [vmem:[#allocation18 + $0x1f88] ss:$16 sps:$4 sm:$0xff]  }
 0x797   :  { %10932 = vmatprep.subr.bf16.mxu0 %v14280_v29  ;;  %v14355_v29 = vld [vmem:[#allocation18 + $0x1f6c] ss:$16 sps:$4 sm:$0xff]  }
 0x798   :  { %10922 = vmatpush2.bf16.msra.mxu1 %v14275_v15  ;;  %v14350_v15 = vld [vmem:[#allocation18 + $0x1d68] ss:$16 sps:$4 sm:$0xff]  }
 0x799   :  { %v10638_v52 = vpop.f32.mrf.mxu0  ;;  %10883 = vmatmul.mubr.bf16.vlgmr.msra.gmra.mxu0 %v15571_v21  ;;  %10973 = vmatprep.subr.bf16.mxu1 %v14283_v12  ;;  %v14287_v21 = vld [vmem:[#allocation18 + $0x1ec8] ss:$16 sps:$4 sm:$0xff]   ;;  %v14358_v12 = vld [vmem:[#allocation18 + $0x1d4c] ss:$16 sps:$4 sm:$0xff]  }
 0x79a   :  { %v10639_v28 = vadd.f32 %v10638_v52, %v15676_v45  ;;  %10933 = vmatpush1.bf16.msra.mxu0 %v14278_v46  ;;  %10964 = vmatprep.mubr.bf16.mxu0 %v15575_v32  ;;  %v14353_v46 = vld [vmem:[#allocation18 + $0x1f68] ss:$16 sps:$4 sm:$0xff]   ;;  %v14364_v52 = vld [vmem:[#allocation18 + $0x1d2c] ss:$16 sps:$4 sm:$0xff]  }
 0x79b   :  { %v10640_v14 = vpop.f32.mrf.mxu0  ;;  %v10679_v41 = vpop.f32.mrf.mxu1  ;;  %10924 = vmatmul.mubr.bf16.vlgmr.msra.gmra.mxu1 %v15579_v30  ;;  %10934 = vmatprep.subr.bf16.mxu0 %v14286_v7  ;;  %v14361_v7 = vld [vmem:[#allocation18 + $0x1f4c] ss:$16 sps:$4 sm:$0xff]  }
 0x79c   :  { %v10641_v8 = vadd.f32 %v10640_v14, %v15679_v35  ;;  %v15686_v2 = vadd.f32 %v10679_v41, %v10639_v28  ;;  %10974 = vmatpush1.bf16.msra.mxu1 %v14281_v33  ;;  %11005 = vmatprep.mubr.bf16.mxu1 %v15586_v23  ;;  %v14293_v35 = vld [vmem:[#allocation18 + $0x1ea8] ss:$16 sps:$4 sm:$0xff]   ;;  %v14367_v28 = vld [vmem:[#allocation18 + $0x1f2c] ss:$16 sps:$4 sm:$0xff]  }
 0x79d   :  { %v10642_v51 = vpop.f32.mrf.mxu0  ;;  %v10681_v45 = vpop.f32.mrf.mxu1  ;;  %10975 = vmatprep.subr.bf16.mxu1 %v14289_v19  ;;  %v14296_v23 = vld [vmem:[#allocation18 + $0x1c88] ss:$16 sps:$4 sm:$0xff]   ;;  %v14370_v14 = vld [vmem:[#allocation18 + $0x1d0c] ss:$16 sps:$4 sm:$0xff]  }
 0x79e   :  { %v15689_v32 = vadd.f32 %v10681_v45, %v10641_v8  ;;  %10935 = vmatpush1.bf16.msra.mxu0 %v14284_v59  ;;  %v14356_v33 = vld [vmem:[#allocation18 + $0x1d48] ss:$16 sps:$4 sm:$0xff]  }
 0x79f   :  { %v10643_v49 = vpop.f32.mrf.mxu0  ;;  %v10683_v30 = vpop.f32.mrf.mxu1  ;;  %10936 = vmatprep.subr.bf16.mxu0 %v14292_v39  ;;  %v14359_v19 = vld [vmem:[#allocation18 + $0x1f48] ss:$16 sps:$4 sm:$0xff]   ;;  %v14373_v39 = vld [vmem:[#allocation18 + $0x1f0c] ss:$16 sps:$4 sm:$0xff]  }
 0x7a0   :  { %10976 = vmatpush1.bf16.msra.mxu1 %v14287_v21  ;;  %v14362_v59 = vld [vmem:[#allocation18 + $0x1d28] ss:$16 sps:$4 sm:$0xff]  }
 0x7a1   :  { %v10684_v20 = vpop.f32.mrf.mxu1  ;;  %10977 = vmatprep.subr.bf16.mxu1 %v14295_v5  ;;  %v14365_v41 = vld [vmem:[#allocation18 + $0x1f28] ss:$16 sps:$4 sm:$0xff]  }
 0x7a2   :  { %10937 = vmatpush1.bf16.msra.mxu0 %v14290_v63  ;;  %v14368_v8 = vld [vmem:[#allocation18 + $0x1d08] ss:$16 sps:$4 sm:$0xff]  }
 0x7a3   :  { %10938 = vmatprep.subr.bf16.mxu0 %v14298_v10  ;;  %v14371_v21 = vld [vmem:[#allocation18 + $0x1f08] ss:$16 sps:$4 sm:$0xff]  }
 0x7a4   :  { %10978 = vmatpush1.bf16.msra.mxu1 %v14293_v35 }
 0x7a5   :  { %10979 = vmatprep.subr.bf16.mxu1 %v14301_v38 }
 0x7a6   :  { %10939 = vmatpush1.bf16.msra.mxu0 %v14296_v23 }
 0x7a7   :  { %10940 = vmatprep.subr.bf16.mxu0 %v14304_v36 }
 0x7a8   :  { %10980 = vmatpush1.bf16.msra.mxu1 %v14299_v37 }
 0x7a9   :  { %10981 = vmatprep.subr.bf16.mxu1 %v14307_v61 }
 0x7aa   :  { %10941 = vmatpush1.bf16.msra.mxu0 %v14302_v47 }
 0x7ab   :  { %10942 = vmatprep.subr.bf16.mxu0 %v14310_v57 }
 0x7ac   :  { %10982 = vmatpush1.bf16.msra.mxu1 %v14305_v50 }
 0x7ad   :  { %10983 = vmatprep.subr.bf16.mxu1 %v14313_v40 }
 0x7ae   :  { %10943 = vmatpush1.bf16.msra.mxu0 %v14308_v11 }
 0x7af   :  { %10944 = vmatprep.subr.bf16.mxu0 %v14316_v42 }
 0x7b0   :  { %10984 = vmatpush1.bf16.msra.mxu1 %v14311_v26 }
 0x7b1   :  { %10985 = vmatprep.subr.bf16.mxu1 %v14319_v62 }
 0x7b2   :  { %10945 = vmatpush1.bf16.msra.mxu0 %v14314_v22 }
 0x7b3   :  { %10946 = vmatprep.subr.bf16.mxu0 %v14322_v24 }
 0x7b4   :  { %10986 = vmatpush1.bf16.msra.mxu1 %v14317_v48 }
 0x7b5   :  { %10987 = vmatprep.subr.bf16.mxu1 %v14325_v3 }
 0x7b6   :  { %10947 = vmatpush1.bf16.msra.mxu0 %v14320_v13 }
 0x7b7   :  { %10948 = vmatprep.subr.bf16.mxu0 %v14328_v34 }
 0x7b8   :  { %10988 = vmatpush1.bf16.msra.mxu1 %v14323_v0 }
 0x7b9   :  { %10989 = vmatprep.subr.bf16.mxu1 %v14331_v6 }
 0x7ba   :  { %10949 = vmatpush2.bf16.msra.mxu0 %v14326_v53 }
 0x7bb   :  { %10950 = vmatprep.subr.bf16.mxu0 %v14334_v44 }
 0x7bc   :  { %10990 = vmatpush2.bf16.msra.mxu1 %v14329_v54 }
 0x7bd   :  { %10991 = vmatprep.subr.bf16.mxu1 %v14337_v17 }
 0x7be   :  { %10951 = vmatpush2.bf16.msra.mxu0 %v14332_v25 }
 0x7bf   :  { %10952 = vmatprep.subr.bf16.mxu0 %v14340_v9 }
 0x7c0   :  { %10992 = vmatpush2.bf16.msra.mxu1 %v14335_v56 }
 0x7c1   :  { %10993 = vmatprep.subr.bf16.mxu1 %v14343_v4 }
 0x7c2   :  { %10953 = vmatpush2.bf16.msra.mxu0 %v14338_v1 }
 0x7c3   :  { %10954 = vmatprep.subr.bf16.mxu0 %v14346_v31 }
 0x7c4   :  { %10994 = vmatpush2.bf16.msra.mxu1 %v14341_v18 }
 0x7c5   :  { %10995 = vmatprep.subr.bf16.mxu1 %v14349_v58 }
 0x7c6   :  { %10955 = vmatpush2.bf16.msra.mxu0 %v14344_v16 }
 0x7c7   :  { %10956 = vmatprep.subr.bf16.mxu0 %v14352_v60 }
 0x7c8   :  { %10996 = vmatpush2.bf16.msra.mxu1 %v14347_v27 }
 0x7c9   :  { %10997 = vmatprep.subr.bf16.mxu1 %v14355_v29 }
 0x7ca   :  { %10957 = vmatpush2.bf16.msra.mxu0 %v14350_v15 }
 0x7cb   :  { %10958 = vmatprep.subr.bf16.mxu0 %v14358_v12 }
 0x7cc   :  { %10998 = vmatpush2.bf16.msra.mxu1 %v14353_v46 }
 0x7cd   :  { %10999 = vmatprep.subr.bf16.mxu1 %v14361_v7 }
 0x7ce   :  { %10959 = vmatpush2.bf16.msra.mxu0 %v14356_v33 }
 0x7cf   :  { %10960 = vmatprep.subr.bf16.mxu0 %v14364_v52 }
 0x7d0   :  { %11000 = vmatpush2.bf16.msra.mxu1 %v14359_v19 }
 0x7d1   :  { %11001 = vmatprep.subr.bf16.mxu1 %v14367_v28 }
 0x7d2   :  { %10961 = vmatpush2.bf16.msra.mxu0 %v14362_v59 }
 0x7d3   :  { %10962 = vmatprep.subr.bf16.mxu0 %v14370_v14 }
 0x7d4   :  { %11002 = vmatpush2.bf16.msra.mxu1 %v14365_v41 }
 0x7d5   :  { %11003 = vmatprep.subr.bf16.mxu1 %v14373_v39 }
 0x7d6   :  { %10963 = vmatpush2.bf16.msra.mxu0 %v14368_v8 }
 0x7d8   :  { %11004 = vmatpush2.bf16.msra.mxu1 %v14371_v21 }
 0x7d9   :  { %v10720_v51 = vpop.f32.mrf.mxu0  ;;  %10965 = vmatmul.mubr.bf16.vlgmr.msra.gmra.mxu0 %v15597_v55 }
 0x7da   :  { %v10721_v45 = vadd.f32 %v10720_v51, %v15686_v2 }
 0x7db   :  { %v10722_v5 = vpop.f32.mrf.mxu0  ;;  %v10761_v63 = vpop.f32.mrf.mxu1  ;;  %11006 = vmatmul.mubr.bf16.vlgmr.msra.gmra.mxu1 %v15601_v43 }
 0x7dc   :  { %v10723_v49 = vadd.f32 %v10722_v5, %v15689_v32  ;;  %v10762_v30 = vadd.f32 %v10761_v63, %v10721_v45 }
 0x7dd   :  { %v10724_v10 = vpop.f32.mrf.mxu0  ;;  %v10763_v35 = vpop.f32.mrf.mxu1 }
 0x7de   :  { %v10764_v20 = vadd.f32 %v10763_v35, %v10723_v49 }
 0x7df   :  { %v10725_v38 = vpop.f32.mrf.mxu0  ;;  %v10765_v23 = vpop.f32.mrf.mxu1 }
 0x7e1   :  { %v10766_v36 = vpop.f32.mrf.mxu1 }
 0x819   :  { %v10802_v37 = vpop.f32.mrf.mxu0 }
 0x81a   :  { %v10803_v61 = vadd.f32 %v10802_v37, %v10762_v30 }
 0x81b   :  { %v10804_v47 = vpop.f32.mrf.mxu0  ;;  %v10843_v57 = vpop.f32.mrf.mxu1 }
 0x81c   :  { %v10805_v55 = vadd.f32 %v10804_v47, %v10764_v20  ;;  %v10844_v50 = vadd.f32 %v10843_v57, %v10803_v61 }
 0x81d   :  { %v10806_v2 = vpop.f32.mrf.mxu0  ;;  %v10845_v40 = vpop.f32.mrf.mxu1 }
 0x81e   :  { %v10846_v11 = vadd.f32 %v10845_v40, %v10805_v55 }
 0x81f   :  { %v10807_v42 = vpop.f32.mrf.mxu0  ;;  %v10847_v43 = vpop.f32.mrf.mxu1 }
 0x821   :  { %v10848_v26 = vpop.f32.mrf.mxu1 }
 0x859   :  { %v10884_v32 = vpop.f32.mrf.mxu0 }
 0x85a   :  { %v10885_v0 = vadd.f32 %v10884_v32, %v10844_v50 }
 0x85b   :  { %v10886_v62 = vpop.f32.mrf.mxu0  ;;  %v10925_v22 = vpop.f32.mrf.mxu1 }
 0x85c   :  { %v10887_v6 = vadd.f32 %v10886_v62, %v10846_v11  ;;  %v10926_v53 = vadd.f32 %v10925_v22, %v10885_v0 }
 0x85d   :  { %v10888_v24 = vpop.f32.mrf.mxu0  ;;  %v10927_v48 = vpop.f32.mrf.mxu1 }
 0x85e   :  { %v10928_v54 = vadd.f32 %v10927_v48, %v10887_v6 }
 0x85f   :  { %v10889_v3 = vpop.f32.mrf.mxu0  ;;  %v10929_v13 = vpop.f32.mrf.mxu1 }
 0x861   :  { %v10930_v34 = vpop.f32.mrf.mxu1 }
 0x899   :  { %v10966_v44 = vpop.f32.mrf.mxu0 }
 0x89a   :  { %v10967_v17 = vadd.f32 %v10966_v44, %v10926_v53 }
 0x89b   :  { %v10968_v25 = vpop.f32.mrf.mxu0  ;;  %v11007_v9 = vpop.f32.mrf.mxu1 }
 0x89c   :  { %v10969_v56 = vadd.f32 %v10968_v25, %v10928_v54  ;;  %v11008_v4 = vadd.f32 %v11007_v9, %v10967_v17 }
 0x89d   :  { %v10970_v1 = vpop.f32.mrf.mxu0  ;;  %v11009_v31 = vpop.f32.mrf.mxu1 }
 0x89e   :  { %v11016_v18 = vmax.f32 %v11008_v4, 0.0  ;;  %v11010_v58 = vadd.f32 %v11009_v31, %v10969_v56 }
 0x89f   :  { %v10971_v16 = vpop.f32.mrf.mxu0  ;;  %v11011_v60 = vpop.f32.mrf.mxu1 }
 0x8a0   :  { %11020 = vst [vmem:[%s15713_s12 + $0x10] sm:$0xff] %v11016_v18  ;;  %v11017_v27 = vmax.f32 %v11010_v58, 0.0 }
 0x8a1   :  { %v11012_v29 = vpop.f32.mrf.mxu1 }
 0x8a2   :  { %11021 = vst [vmem:[%s15713_s12 + $0x18] sm:$0xff] %v11017_v27 }
 0x8a3   :  { %11026 = vsyncpa [#allocation5], 1 }
 0x8a4   :  { %11027 = vsyncpa [#allocation7], 1 }
 0x8a5   :  { %11028 = vsyncpa [#allocation10], 1 }
 0x8a6   :  { %11029 = vsyncpa [#allocation13], 1 }
 0x8a7   :  { %11030 = vsyncpa [#allocation16], 1 }
 0x8a8   :  { %11031 = vsyncpa [#allocation19], 1 }

</bundles_post_ra>
